<compile_context>
chip_gen: v7x
topology: tpu7x:2x2x1
jax: 0.10.0
libtpu: 0.0.40
codegen_flags: <defaults>
</compile_context>

<pallas_src>
import functools
import math

import numpy as np
import jax
import jax.numpy as jnp
from jax.experimental import pallas as pl
from jax.experimental.pallas import tpu as pltpu


# ---------------------------------------------------------------------------
# Fused kernel: pooling + combine + conv_hw + SwitchNorm2d + MetaAconC
#               + conv_h / conv_w + sigmoid + final gating.
# ---------------------------------------------------------------------------
def make_fused_kernel(n, c, h, w, mip, k_size, eps=1e-5):
    assert h == w, "cat([x_w, x_h], dim=2) requires square spatial dims"
    tw = 2 * w                       # per-sample lane segment: [x_w | x_h]
    pad = (k_size - 1) // 2

    def kernel(x_ref, dcth_ref, dctw_ref,
               wavgh_ref, wmaxh_ref, wavgw_ref, wmaxw_ref,
               whw_ref, bhw_ref, snw_ref, snb_ref,
               mw_ref, vw_ref,
               p1_ref, p2_ref, fc1w_ref, fc1b_ref, fc2w_ref, fc2b_ref,
               chw_ref, chb_ref, cww_ref, cwb_ref,
               out_ref, ybuf_ref):
        f32 = jnp.float32

        # ------------------------------------------------------------------
        # Phase 1: per-sample DCT / max pooling + learned avg/max combine.
        # The (1,k) conv's im2col is built in-VMEM: per-tap shifted copies of
        # [x_w | x_h] go into the zero-initialised scratch ybuf (k, c, n*2w);
        # unwritten lanes stay zero == the conv's zero padding.
        # ------------------------------------------------------------------
        ybuf_ref[...] = jnp.zeros((k_size, c, n * tw), f32)

        dcth = dcth_ref[...]                               # (c, h)
        dctw = dctw_ref[...]                               # (c, w)
        for i in range(n):
            x3 = x_ref[i]                                  # (c, h, w)
            maxh = jnp.max(x3, axis=2)                     # (c, h)  max over W
            maxw = jnp.max(x3, axis=1)                     # (c, w)  max over H
            avgh = jnp.sum(x3 * dctw[:, None, :], axis=2)  # (c, h)  DCT pool over W
            avgw = jnp.sum(x3 * dcth[:, :, None], axis=1)  # (c, w)  DCT pool over H
            xh = wavgh_ref[...] * avgh + wmaxh_ref[...] * maxh   # (c, h)
            xw = wavgw_ref[...] * avgw + wmaxw_ref[...] * maxw   # (c, w)

            s0 = i * tw
            for dk in range(k_size):
                off = pad - dk                 # dest position = src position + off
                if off >= 0:
                    ybuf_ref[dk, :, s0 + off: s0 + w] = xw[:, :w - off]
                    ybuf_ref[dk, :, s0 + w + off: s0 + tw] = xh[:, :w - off]
                else:
                    o = -off
                    ybuf_ref[dk, :, s0: s0 + w - o] = xw[:, o:]
                    ybuf_ref[dk, :, s0 + w: s0 + tw - o] = xh[:, o:]

        # ------------------------------------------------------------------
        # Phase 2: conv_hw as k tap-matmuls, batched over the whole batch.
        #   z[m, i*2w+p] = b[m] + sum_dk sum_c W[m,c,dk] * ypad[c, p+dk]
        # ------------------------------------------------------------------
        z = jnp.dot(whw_ref[0], ybuf_ref[0], preferred_element_type=f32)
        for dk in range(1, k_size):
            z = z + jnp.dot(whw_ref[dk], ybuf_ref[dk], preferred_element_type=f32)
        z = z + bhw_ref[...]                               # (mip, n*2w)

        # ------------------------------------------------------------------
        # Phase 3: SwitchNorm2d statistics (IN / LN / BN mixture).
        # ------------------------------------------------------------------
        m_in, v_in = [], []
        for i in range(n):
            zi = z[:, i * tw:(i + 1) * tw]                 # (mip, 2w)
            m = jnp.mean(zi, axis=1, keepdims=True)        # (mip, 1)
            v = jnp.mean(zi * zi, axis=1, keepdims=True) - m * m
            m_in.append(m)
            v_in.append(v)
        temp = [v + m * m for m, v in zip(m_in, v_in)]
        mean_bn = functools.reduce(lambda a, b: a + b, m_in) / n          # (mip, 1)
        var_bn = functools.reduce(lambda a, b: a + b, temp) / n - mean_bn * mean_bn

        mw0, mw1, mw2 = mw_ref[0], mw_ref[1], mw_ref[2]    # SMEM scalars
        vw0, vw1, vw2 = vw_ref[0], vw_ref[1], vw_ref[2]
        snw, snb = snw_ref[...], snb_ref[...]              # (mip, 1)
        p1, p2 = p1_ref[...], p2_ref[...]                  # (mip, 1)

        # ------------------------------------------------------------------
        # Phase 4: per-sample normalize + MetaAconC + conv_h / conv_w + sigmoid
        #          + final gating  out = x * sig_w * sig_h   (channel-major).
        # ------------------------------------------------------------------
        for i in range(n):
            zi = z[:, i * tw:(i + 1) * tw]                               # (mip, 2w)
            mean_ln = jnp.mean(m_in[i], axis=0, keepdims=True)           # (1, 1)
            var_ln = jnp.mean(temp[i], axis=0, keepdims=True) - mean_ln * mean_ln
            mean_mix = mw0 * m_in[i] + mw1 * mean_ln + mw2 * mean_bn
            var_mix = vw0 * v_in[i] + vw1 * var_ln + vw2 * var_bn
            var_mix = jnp.maximum(var_mix, 0.0)     # guard E[x^2]-E[x]^2 cancellation
            zn = (zi - mean_mix) * jax.lax.rsqrt(var_mix + eps)
            zn = zn * snw + snb

            # MetaAconC; fc1/fc2 are linear, so fc2(fc1(mean(x))) == mean(fc2(fc1(x)))
            h1 = jnp.dot(fc1w_ref[...], zn, preferred_element_type=f32) + fc1b_ref[...]
            b2 = jnp.dot(fc2w_ref[...], h1, preferred_element_type=f32)
            beta = jax.nn.sigmoid(jnp.mean(b2, axis=1, keepdims=True) + fc2b_ref[...])
            d = (p1 - p2) * zn
            za = d * jax.nn.sigmoid(beta * d) + p2 * zn                  # (mip, 2w)

            # split: first w lanes = x_w branch, next w lanes = x_h branch
            zw = za[:, :w]
            zh = za[:, w:]
            sw_g = jax.nn.sigmoid(
                jnp.dot(cww_ref[...], zw, preferred_element_type=f32) + cwb_ref[...])  # (out_c, w)
            sh_g = jax.nn.sigmoid(
                jnp.dot(chw_ref[...], zh, preferred_element_type=f32) + chb_ref[...])  # (out_c, h)

            x3 = x_ref[i]                                                # (c, h, w)
            out_ref[i] = (x3 * sh_g[:, :, None] * sw_g[:, None, :]).astype(out_ref.dtype)

    return kernel


# ---------------------------------------------------------------------------
# Wrapper: one fused pallas_call, whole working set VMEM-resident.
# ---------------------------------------------------------------------------
def spatial_att_forward(x, params):
    n, c, h, w = x.shape
    assert h == w, "cat([x_w, x_h], dim=2) requires square spatial dims"
    mip = params["mip"]
    out_c = params["out_c"]
    k_size = params["k_size"]
    assert out_c == c, "final gate x * sig_w * sig_h requires out_channels == in_channels"

    arg_order = ("dcth", "dctw", "wavgh", "wmaxh", "wavgw", "wmaxw",
                 "whw", "bhw", "snw", "snb", "mw", "vw",
                 "p1", "p2", "fc1w", "fc1b", "fc2w", "fc2b",
                 "chw", "chb", "cww", "cwb")
    args = [params[k] for k in arg_order]

    # Advisory cost hint for XLA scheduling around the custom call.
    hid = params["fc1w"].shape[0]
    n2w = n * 2 * w
    flops = int(8 * n * c * h * w
                + 2 * k_size * mip * c * n2w
                + 2 * n * 2 * w * (hid * mip + mip * hid)
                + 2 * n * 2 * out_c * mip * w
                + 30 * mip * n2w)
    transcendentals = int(n * (3 * mip * 2 * w + 2 * out_c * w + mip))
    bytes_accessed = int(4 * (2 * int(np.prod(x.shape)) + sum(int(a.size) for a in args)))

    vmem = pl.BlockSpec(memory_space=pltpu.MemorySpace.VMEM)
    smem = pl.BlockSpec(memory_space=pltpu.MemorySpace.SMEM)
    in_specs = [vmem] * 11 + [smem, smem] + [vmem] * 10   # mw / vw live in SMEM

    fused = pl.pallas_call(
        make_fused_kernel(n, c, h, w, mip, k_size),
        out_shape=jax.ShapeDtypeStruct((n, c, h, w), x.dtype),
        in_specs=in_specs,
        out_specs=vmem,
        scratch_shapes=[pltpu.VMEM((k_size, c, n2w), jnp.float32)],
        compiler_params=pltpu.CompilerParams(vmem_limit_bytes=32 * 1024 * 1024),
        cost_estimate=pl.CostEstimate(flops=flops,
                                      transcendentals=transcendentals,
                                      bytes_accessed=bytes_accessed),
    )
    return fused(x, *args)


# ---------------------------------------------------------------------------
# Deterministic parameter initialization (synthetic, no checkpoint load)
# ---------------------------------------------------------------------------
def init_params(key, c, out_c, h, w, k_size=3, reduction=32, bnumfre=4):
    mip = max(8, c // reduction)
    hid = max(16, mip // 16)                      # MetaAconC hidden width (r=16)

    def uinit(k, shape, fan_in):
        bound = 1.0 / math.sqrt(fan_in)
        return jax.random.uniform(k, shape, jnp.float32, -bound, bound)

    def dct_basis(C, L):
        # FcaNet-style 1-D DCT basis; channel group g uses frequency g.
        basis = np.zeros((C, L), dtype=np.float32)
        group = max(1, C // bnumfre)
        for ci in range(C):
            u = min(ci // group, bnumfre - 1)
            for t in range(L):
                v = math.cos(math.pi * u * (t + 0.5) / L) / math.sqrt(L)
                if u != 0:
                    v *= math.sqrt(2.0)
                basis[ci, t] = v
        return jnp.asarray(basis)

    keys = jax.random.split(key, 12)

    conv_hw_w = uinit(keys[0], (mip, c, k_size), c * k_size)   # (mip, c, k)
    conv_hw_b = uinit(keys[1], (mip,), c * k_size)

    params = dict(
        mip=mip, out_c=out_c, k_size=k_size,
        # DctSFea bases
        dcth=dct_basis(c, h), dctw=dct_basis(c, w),
        # learned avg/max mix weights (init 0.5, as in the module)
        wavgh=jnp.full((c, h), 0.5, jnp.float32),
        wmaxh=jnp.full((c, h), 0.5, jnp.float32),
        wavgw=jnp.full((c, w), 0.5, jnp.float32),
        wmaxw=jnp.full((c, w), 0.5, jnp.float32),
        # conv_hw: per-tap transposed weights (k, mip, c) + column bias
        whw=jnp.transpose(conv_hw_w, (2, 0, 1)),
        bhw=conv_hw_b.reshape(mip, 1),
        # SwitchNorm2d: weight=1, bias=0, mean/var weights softmax(ones(3))
        snw=jnp.ones((mip, 1), jnp.float32),
        snb=jnp.zeros((mip, 1), jnp.float32),
        mw=jax.nn.softmax(jnp.ones((3,), jnp.float32)),
        vw=jax.nn.softmax(jnp.ones((3,), jnp.float32)),
        # MetaAconC
        p1=jax.random.normal(keys[2], (mip, 1), jnp.float32),
        p2=jax.random.normal(keys[3], (mip, 1), jnp.float32),
        fc1w=uinit(keys[4], (hid, mip), mip),
        fc1b=uinit(keys[5], (hid, 1), mip),
        fc2w=uinit(keys[6], (mip, hid), hid),
        fc2b=uinit(keys[7], (mip, 1), hid),
        # conv_h / conv_w (1x1), channel-major (out_c, mip)
        chw=uinit(keys[8], (out_c, mip), mip),
        chb=uinit(keys[9], (out_c, 1), mip),
        cww=uinit(keys[10], (out_c, mip), mip),
        cwb=uinit(keys[11], (out_c, 1), mip),
    )
    return params


if __name__ == "__main__":
    key = jax.random.PRNGKey(0)
    n, c, hh, ww = 2, 32, 16, 16           # in_channels = out_channels = 32
    x = jax.random.normal(jax.random.fold_in(key, 1), (n, c, hh, ww), jnp.float32)
    params = init_params(key, c, c, hh, ww)

    out = spatial_att_forward(x, params)
    jax.block_until_ready(out)
    assert out.shape == (n, c, hh, ww) and out.dtype == jnp.float32
    assert bool(jnp.all(jnp.isfinite(out)))
    print("KERNEL_OK")
</pallas_src>

<mosaic_0001>
module attributes {stable_mosaic.version = 11 : i64} {
  func.func @kernel(%arg0: memref<2x32x16x16xf32, #tpu.memory_space<vmem>>, %arg1: memref<32x16xf32, #tpu.memory_space<vmem>>, %arg2: memref<32x16xf32, #tpu.memory_space<vmem>>, %arg3: memref<32x16xf32, #tpu.memory_space<vmem>>, %arg4: memref<32x16xf32, #tpu.memory_space<vmem>>, %arg5: memref<32x16xf32, #tpu.memory_space<vmem>>, %arg6: memref<32x16xf32, #tpu.memory_space<vmem>>, %arg7: memref<3x8x32xf32, #tpu.memory_space<vmem>>, %arg8: memref<8x1xf32, #tpu.memory_space<vmem>>, %arg9: memref<8x1xf32, #tpu.memory_space<vmem>>, %arg10: memref<8x1xf32, #tpu.memory_space<vmem>>, %arg11: memref<3xf32, #tpu.memory_space<smem>>, %arg12: memref<3xf32, #tpu.memory_space<smem>>, %arg13: memref<8x1xf32, #tpu.memory_space<vmem>>, %arg14: memref<8x1xf32, #tpu.memory_space<vmem>>, %arg15: memref<16x8xf32, #tpu.memory_space<vmem>>, %arg16: memref<16x1xf32, #tpu.memory_space<vmem>>, %arg17: memref<8x16xf32, #tpu.memory_space<vmem>>, %arg18: memref<8x1xf32, #tpu.memory_space<vmem>>, %arg19: memref<32x8xf32, #tpu.memory_space<vmem>>, %arg20: memref<32x1xf32, #tpu.memory_space<vmem>>, %arg21: memref<32x8xf32, #tpu.memory_space<vmem>>, %arg22: memref<32x1xf32, #tpu.memory_space<vmem>>, %arg23: memref<2x32x16x16xf32, #tpu.memory_space<vmem>>, %arg24: memref<3x32x64xf32, #tpu.memory_space<vmem>>) attributes {dimension_semantics = [], scalar_prefetch = 0 : i64, scratch_operands = 1 : i64, tpu.core_type = #tpu.core_type<tc>} {
    %cst = arith.constant 0.000000e+00 : f32
    %0 = vector.broadcast %cst : f32 to vector<3x32x64xf32>
    %c0 = arith.constant 0 : index
    %c0_0 = arith.constant 0 : index
    %c0_1 = arith.constant 0 : index
    %1 = vector.load %arg24[%c0, %c0_0, %c0_1] : memref<3x32x64xf32, #tpu.memory_space<vmem>>, vector<3x32x64xf32>
    tpu.vector_store %arg24[%c0, %c0_0, %c0_1], %0 {strides = array<i32>} : memref<3x32x64xf32, #tpu.memory_space<vmem>>, vector<3x32x64xf32>,
    %c0_2 = arith.constant 0 : index
    %c0_3 = arith.constant 0 : index
    %2 = vector.load %arg1[%c0_2, %c0_3] : memref<32x16xf32, #tpu.memory_space<vmem>>, vector<32x16xf32>
    %c0_4 = arith.constant 0 : index
    %c0_5 = arith.constant 0 : index
    %3 = vector.load %arg2[%c0_4, %c0_5] : memref<32x16xf32, #tpu.memory_space<vmem>>, vector<32x16xf32>
    %c0_6 = arith.constant 0 : index
    %c0_7 = arith.constant 0 : index
    %c0_8 = arith.constant 0 : index
    %c0_9 = arith.constant 0 : index
    %4 = vector.load %arg0[%c0_6, %c0_7, %c0_8, %c0_9] : memref<2x32x16x16xf32, #tpu.memory_space<vmem>>, vector<1x32x16x16xf32>
    %5 = vector.shape_cast %4 : vector<1x32x16x16xf32> to vector<32x16x16xf32>
    %cst_10 = arith.constant dense<0xFF800000> : vector<32x16xf32>
    %6 = vector.multi_reduction <maximumf>, %5, %cst_10 [2] : vector<32x16x16xf32> to vector<32x16xf32>
    %cst_11 = arith.constant dense<0xFF800000> : vector<32x16xf32>
    %7 = vector.multi_reduction <maximumf>, %5, %cst_11 [1] : vector<32x16x16xf32> to vector<32x16xf32>
    %8 = vector.shape_cast %3 : vector<32x16xf32> to vector<32x1x16xf32>
    %9 = vector.broadcast %8 : vector<32x1x16xf32> to vector<32x16x16xf32>
    %10 = arith.mulf %5, %9 : vector<32x16x16xf32>
    %cst_12 = arith.constant dense<0.000000e+00> : vector<32x16xf32>
    %11 = vector.multi_reduction <add>, %10, %cst_12 [2] : vector<32x16x16xf32> to vector<32x16xf32>
    %12 = vector.shape_cast %2 : vector<32x16xf32> to vector<32x16x1xf32>
    %13 = vector.broadcast %12 : vector<32x16x1xf32> to vector<32x16x16xf32>
    %14 = arith.mulf %5, %13 : vector<32x16x16xf32>
    %cst_13 = arith.constant dense<0.000000e+00> : vector<32x16xf32>
    %15 = vector.multi_reduction <add>, %14, %cst_13 [1] : vector<32x16x16xf32> to vector<32x16xf32>
    %c0_14 = arith.constant 0 : index
    %c0_15 = arith.constant 0 : index
    %16 = vector.load %arg3[%c0_14, %c0_15] : memref<32x16xf32, #tpu.memory_space<vmem>>, vector<32x16xf32>
    %17 = arith.mulf %16, %11 : vector<32x16xf32>
    %c0_16 = arith.constant 0 : index
    %c0_17 = arith.constant 0 : index
    %18 = vector.load %arg4[%c0_16, %c0_17] : memref<32x16xf32, #tpu.memory_space<vmem>>, vector<32x16xf32>
    %19 = arith.mulf %18, %6 : vector<32x16xf32>
    %20 = arith.addf %17, %19 : vector<32x16xf32>
    %c0_18 = arith.constant 0 : index
    %c0_19 = arith.constant 0 : index
    %21 = vector.load %arg5[%c0_18, %c0_19] : memref<32x16xf32, #tpu.memory_space<vmem>>, vector<32x16xf32>
    %22 = arith.mulf %21, %15 : vector<32x16xf32>
    %c0_20 = arith.constant 0 : index
    %c0_21 = arith.constant 0 : index
    %23 = vector.load %arg6[%c0_20, %c0_21] : memref<32x16xf32, #tpu.memory_space<vmem>>, vector<32x16xf32>
    %24 = arith.mulf %23, %7 : vector<32x16xf32>
    %25 = arith.addf %22, %24 : vector<32x16xf32>
    %26 = vector.extract_strided_slice %25 {offsets = [0, 0], sizes = [32, 15], strides = [1, 1]} : vector<32x16xf32> to vector<32x15xf32>
    %c0_22 = arith.constant 0 : index
    %c0_23 = arith.constant 0 : index
    %c1 = arith.constant 1 : index
    %27 = vector.load %arg24[%c0_22, %c0_23, %c1] : memref<3x32x64xf32, #tpu.memory_space<vmem>>, vector<1x32x15xf32>
    %28 = vector.shape_cast %27 : vector<1x32x15xf32> to vector<32x15xf32>
    %29 = vector.shape_cast %26 : vector<32x15xf32> to vector<1x32x15xf32>
    tpu.vector_store %arg24[%c0_22, %c0_23, %c1], %29 {strides = array<i32>} : memref<3x32x64xf32, #tpu.memory_space<vmem>>, vector<1x32x15xf32>,
    %30 = vector.extract_strided_slice %20 {offsets = [0, 0], sizes = [32, 15], strides = [1, 1]} : vector<32x16xf32> to vector<32x15xf32>
    %c0_24 = arith.constant 0 : index
    %c0_25 = arith.constant 0 : index
    %c17 = arith.constant 17 : index
    %31 = vector.load %arg24[%c0_24, %c0_25, %c17] : memref<3x32x64xf32, #tpu.memory_space<vmem>>, vector<1x32x15xf32>
    %32 = vector.shape_cast %31 : vector<1x32x15xf32> to vector<32x15xf32>
    %33 = vector.shape_cast %30 : vector<32x15xf32> to vector<1x32x15xf32>
    tpu.vector_store %arg24[%c0_24, %c0_25, %c17], %33 {strides = array<i32>} : memref<3x32x64xf32, #tpu.memory_space<vmem>>, vector<1x32x15xf32>,
    %c1_26 = arith.constant 1 : index
    %c0_27 = arith.constant 0 : index
    %c0_28 = arith.constant 0 : index
    %34 = vector.load %arg24[%c1_26, %c0_27, %c0_28] : memref<3x32x64xf32, #tpu.memory_space<vmem>>, vector<1x32x16xf32>
    %35 = vector.shape_cast %34 : vector<1x32x16xf32> to vector<32x16xf32>
    %36 = vector.shape_cast %25 : vector<32x16xf32> to vector<1x32x16xf32>
    tpu.vector_store %arg24[%c1_26, %c0_27, %c0_28], %36 {strides = array<i32>} : memref<3x32x64xf32, #tpu.memory_space<vmem>>, vector<1x32x16xf32>,
    %c1_29 = arith.constant 1 : index
    %c0_30 = arith.constant 0 : index
    %c16 = arith.constant 16 : index
    %37 = vector.load %arg24[%c1_29, %c0_30, %c16] : memref<3x32x64xf32, #tpu.memory_space<vmem>>, vector<1x32x16xf32>
    %38 = vector.shape_cast %37 : vector<1x32x16xf32> to vector<32x16xf32>
    %39 = vector.shape_cast %20 : vector<32x16xf32> to vector<1x32x16xf32>
    tpu.vector_store %arg24[%c1_29, %c0_30, %c16], %39 {strides = array<i32>} : memref<3x32x64xf32, #tpu.memory_space<vmem>>, vector<1x32x16xf32>,
    %40 = vector.extract_strided_slice %25 {offsets = [0, 1], sizes = [32, 15], strides = [1, 1]} : vector<32x16xf32> to vector<32x15xf32>
    %c2 = arith.constant 2 : index
    %c0_31 = arith.constant 0 : index
    %c0_32 = arith.constant 0 : index
    %41 = vector.load %arg24[%c2, %c0_31, %c0_32] : memref<3x32x64xf32, #tpu.memory_space<vmem>>, vector<1x32x15xf32>
    %42 = vector.shape_cast %41 : vector<1x32x15xf32> to vector<32x15xf32>
    %43 = vector.shape_cast %40 : vector<32x15xf32> to vector<1x32x15xf32>
    tpu.vector_store %arg24[%c2, %c0_31, %c0_32], %43 {strides = array<i32>} : memref<3x32x64xf32, #tpu.memory_space<vmem>>, vector<1x32x15xf32>,
    %44 = vector.extract_strided_slice %20 {offsets = [0, 1], sizes = [32, 15], strides = [1, 1]} : vector<32x16xf32> to vector<32x15xf32>
    %c2_33 = arith.constant 2 : index
    %c0_34 = arith.constant 0 : index
    %c16_35 = arith.constant 16 : index
    %45 = vector.load %arg24[%c2_33, %c0_34, %c16_35] : memref<3x32x64xf32, #tpu.memory_space<vmem>>, vector<1x32x15xf32>
    %46 = vector.shape_cast %45 : vector<1x32x15xf32> to vector<32x15xf32>
    %47 = vector.shape_cast %44 : vector<32x15xf32> to vector<1x32x15xf32>
    tpu.vector_store %arg24[%c2_33, %c0_34, %c16_35], %47 {strides = array<i32>} : memref<3x32x64xf32, #tpu.memory_space<vmem>>, vector<1x32x15xf32>,
    %c1_36 = arith.constant 1 : index
    %c0_37 = arith.constant 0 : index
    %c0_38 = arith.constant 0 : index
    %c0_39 = arith.constant 0 : index
    %48 = vector.load %arg0[%c1_36, %c0_37, %c0_38, %c0_39] : memref<2x32x16x16xf32, #tpu.memory_space<vmem>>, vector<1x32x16x16xf32>
    %49 = vector.shape_cast %48 : vector<1x32x16x16xf32> to vector<32x16x16xf32>
    %cst_40 = arith.constant dense<0xFF800000> : vector<32x16xf32>
    %50 = vector.multi_reduction <maximumf>, %49, %cst_40 [2] : vector<32x16x16xf32> to vector<32x16xf32>
    %cst_41 = arith.constant dense<0xFF800000> : vector<32x16xf32>
    %51 = vector.multi_reduction <maximumf>, %49, %cst_41 [1] : vector<32x16x16xf32> to vector<32x16xf32>
    %52 = vector.shape_cast %3 : vector<32x16xf32> to vector<32x1x16xf32>
    %53 = vector.broadcast %52 : vector<32x1x16xf32> to vector<32x16x16xf32>
    %54 = arith.mulf %49, %53 : vector<32x16x16xf32>
    %cst_42 = arith.constant dense<0.000000e+00> : vector<32x16xf32>
    %55 = vector.multi_reduction <add>, %54, %cst_42 [2] : vector<32x16x16xf32> to vector<32x16xf32>
    %56 = vector.shape_cast %2 : vector<32x16xf32> to vector<32x16x1xf32>
    %57 = vector.broadcast %56 : vector<32x16x1xf32> to vector<32x16x16xf32>
    %58 = arith.mulf %49, %57 : vector<32x16x16xf32>
    %cst_43 = arith.constant dense<0.000000e+00> : vector<32x16xf32>
    %59 = vector.multi_reduction <add>, %58, %cst_43 [1] : vector<32x16x16xf32> to vector<32x16xf32>
    %c0_44 = arith.constant 0 : index
    %c0_45 = arith.constant 0 : index
    %60 = vector.load %arg3[%c0_44, %c0_45] : memref<32x16xf32, #tpu.memory_space<vmem>>, vector<32x16xf32>
    %61 = arith.mulf %60, %55 : vector<32x16xf32>
    %c0_46 = arith.constant 0 : index
    %c0_47 = arith.constant 0 : index
    %62 = vector.load %arg4[%c0_46, %c0_47] : memref<32x16xf32, #tpu.memory_space<vmem>>, vector<32x16xf32>
    %63 = arith.mulf %62, %50 : vector<32x16xf32>
    %64 = arith.addf %61, %63 : vector<32x16xf32>
    %c0_48 = arith.constant 0 : index
    %c0_49 = arith.constant 0 : index
    %65 = vector.load %arg5[%c0_48, %c0_49] : memref<32x16xf32, #tpu.memory_space<vmem>>, vector<32x16xf32>
    %66 = arith.mulf %65, %59 : vector<32x16xf32>
    %c0_50 = arith.constant 0 : index
    %c0_51 = arith.constant 0 : index
    %67 = vector.load %arg6[%c0_50, %c0_51] : memref<32x16xf32, #tpu.memory_space<vmem>>, vector<32x16xf32>
    %68 = arith.mulf %67, %51 : vector<32x16xf32>
    %69 = arith.addf %66, %68 : vector<32x16xf32>
    %70 = vector.extract_strided_slice %69 {offsets = [0, 0], sizes = [32, 15], strides = [1, 1]} : vector<32x16xf32> to vector<32x15xf32>
    %c0_52 = arith.constant 0 : index
    %c0_53 = arith.constant 0 : index
    %c33 = arith.constant 33 : index
    %71 = vector.load %arg24[%c0_52, %c0_53, %c33] : memref<3x32x64xf32, #tpu.memory_space<vmem>>, vector<1x32x15xf32>
    %72 = vector.shape_cast %71 : vector<1x32x15xf32> to vector<32x15xf32>
    %73 = vector.shape_cast %70 : vector<32x15xf32> to vector<1x32x15xf32>
    tpu.vector_store %arg24[%c0_52, %c0_53, %c33], %73 {strides = array<i32>} : memref<3x32x64xf32, #tpu.memory_space<vmem>>, vector<1x32x15xf32>,
    %74 = vector.extract_strided_slice %64 {offsets = [0, 0], sizes = [32, 15], strides = [1, 1]} : vector<32x16xf32> to vector<32x15xf32>
    %c0_54 = arith.constant 0 : index
    %c0_55 = arith.constant 0 : index
    %c49 = arith.constant 49 : index
    %75 = vector.load %arg24[%c0_54, %c0_55, %c49] : memref<3x32x64xf32, #tpu.memory_space<vmem>>, vector<1x32x15xf32>
    %76 = vector.shape_cast %75 : vector<1x32x15xf32> to vector<32x15xf32>
    %77 = vector.shape_cast %74 : vector<32x15xf32> to vector<1x32x15xf32>
    tpu.vector_store %arg24[%c0_54, %c0_55, %c49], %77 {strides = array<i32>} : memref<3x32x64xf32, #tpu.memory_space<vmem>>, vector<1x32x15xf32>,
    %c1_56 = arith.constant 1 : index
    %c0_57 = arith.constant 0 : index
    %c32 = arith.constant 32 : index
    %78 = vector.load %arg24[%c1_56, %c0_57, %c32] : memref<3x32x64xf32, #tpu.memory_space<vmem>>, vector<1x32x16xf32>
    %79 = vector.shape_cast %78 : vector<1x32x16xf32> to vector<32x16xf32>
    %80 = vector.shape_cast %69 : vector<32x16xf32> to vector<1x32x16xf32>
    tpu.vector_store %arg24[%c1_56, %c0_57, %c32], %80 {strides = array<i32>} : memref<3x32x64xf32, #tpu.memory_space<vmem>>, vector<1x32x16xf32>,
    %c1_58 = arith.constant 1 : index
    %c0_59 = arith.constant 0 : index
    %c48 = arith.constant 48 : index
    %81 = vector.load %arg24[%c1_58, %c0_59, %c48] : memref<3x32x64xf32, #tpu.memory_space<vmem>>, vector<1x32x16xf32>
    %82 = vector.shape_cast %81 : vector<1x32x16xf32> to vector<32x16xf32>
    %83 = vector.shape_cast %64 : vector<32x16xf32> to vector<1x32x16xf32>
    tpu.vector_store %arg24[%c1_58, %c0_59, %c48], %83 {strides = array<i32>} : memref<3x32x64xf32, #tpu.memory_space<vmem>>, vector<1x32x16xf32>,
    %84 = vector.extract_strided_slice %69 {offsets = [0, 1], sizes = [32, 15], strides = [1, 1]} : vector<32x16xf32> to vector<32x15xf32>
    %c2_60 = arith.constant 2 : index
    %c0_61 = arith.constant 0 : index
    %c32_62 = arith.constant 32 : index
    %85 = vector.load %arg24[%c2_60, %c0_61, %c32_62] : memref<3x32x64xf32, #tpu.memory_space<vmem>>, vector<1x32x15xf32>
    %86 = vector.shape_cast %85 : vector<1x32x15xf32> to vector<32x15xf32>
    %87 = vector.shape_cast %84 : vector<32x15xf32> to vector<1x32x15xf32>
    tpu.vector_store %arg24[%c2_60, %c0_61, %c32_62], %87 {strides = array<i32>} : memref<3x32x64xf32, #tpu.memory_space<vmem>>, vector<1x32x15xf32>,
    %88 = vector.extract_strided_slice %64 {offsets = [0, 1], sizes = [32, 15], strides = [1, 1]} : vector<32x16xf32> to vector<32x15xf32>
    %c2_63 = arith.constant 2 : index
    %c0_64 = arith.constant 0 : index
    %c48_65 = arith.constant 48 : index
    %89 = vector.load %arg24[%c2_63, %c0_64, %c48_65] : memref<3x32x64xf32, #tpu.memory_space<vmem>>, vector<1x32x15xf32>
    %90 = vector.shape_cast %89 : vector<1x32x15xf32> to vector<32x15xf32>
    %91 = vector.shape_cast %88 : vector<32x15xf32> to vector<1x32x15xf32>
    tpu.vector_store %arg24[%c2_63, %c0_64, %c48_65], %91 {strides = array<i32>} : memref<3x32x64xf32, #tpu.memory_space<vmem>>, vector<1x32x15xf32>,
    %c0_66 = arith.constant 0 : index
    %c0_67 = arith.constant 0 : index
    %c0_68 = arith.constant 0 : index
    %92 = vector.load %arg7[%c0_66, %c0_67, %c0_68] : memref<3x8x32xf32, #tpu.memory_space<vmem>>, vector<1x8x32xf32>
    %93 = vector.shape_cast %92 : vector<1x8x32xf32> to vector<8x32xf32>
    %c0_69 = arith.constant 0 : index
    %c0_70 = arith.constant 0 : index
    %c0_71 = arith.constant 0 : index
    %94 = vector.load %arg24[%c0_69, %c0_70, %c0_71] : memref<3x32x64xf32, #tpu.memory_space<vmem>>, vector<1x32x64xf32>
    %95 = vector.shape_cast %94 : vector<1x32x64xf32> to vector<32x64xf32>
    %cst_72 = arith.constant dense<0.000000e+00> : vector<8x64xf32>
    %96 = tpu.matmul %93, %95, %cst_72 {dimension_numbers = #tpu.dot_dimension_numbers<[1], [0], [0], [1], [0, 0, 1, 1], [], []>} : vector<8x32xf32>, vector<32x64xf32>, vector<8x64xf32> -> vector<8x64xf32>
    %c1_73 = arith.constant 1 : index
    %c0_74 = arith.constant 0 : index
    %c0_75 = arith.constant 0 : index
    %97 = vector.load %arg7[%c1_73, %c0_74, %c0_75] : memref<3x8x32xf32, #tpu.memory_space<vmem>>, vector<1x8x32xf32>
    %98 = vector.shape_cast %97 : vector<1x8x32xf32> to vector<8x32xf32>
    %c1_76 = arith.constant 1 : index
    %c0_77 = arith.constant 0 : index
    %c0_78 = arith.constant 0 : index
    %99 = vector.load %arg24[%c1_76, %c0_77, %c0_78] : memref<3x32x64xf32, #tpu.memory_space<vmem>>, vector<1x32x64xf32>
    %100 = vector.shape_cast %99 : vector<1x32x64xf32> to vector<32x64xf32>
    %cst_79 = arith.constant dense<0.000000e+00> : vector<8x64xf32>
    %101 = tpu.matmul %98, %100, %cst_79 {dimension_numbers = #tpu.dot_dimension_numbers<[1], [0], [0], [1], [0, 0, 1, 1], [], []>} : vector<8x32xf32>, vector<32x64xf32>, vector<8x64xf32> -> vector<8x64xf32>
    %102 = arith.addf %96, %101 : vector<8x64xf32>
    %c2_80 = arith.constant 2 : index
    %c0_81 = arith.constant 0 : index
    %c0_82 = arith.constant 0 : index
    %103 = vector.load %arg7[%c2_80, %c0_81, %c0_82] : memref<3x8x32xf32, #tpu.memory_space<vmem>>, vector<1x8x32xf32>
    %104 = vector.shape_cast %103 : vector<1x8x32xf32> to vector<8x32xf32>
    %c2_83 = arith.constant 2 : index
    %c0_84 = arith.constant 0 : index
    %c0_85 = arith.constant 0 : index
    %105 = vector.load %arg24[%c2_83, %c0_84, %c0_85] : memref<3x32x64xf32, #tpu.memory_space<vmem>>, vector<1x32x64xf32>
    %106 = vector.shape_cast %105 : vector<1x32x64xf32> to vector<32x64xf32>
    %cst_86 = arith.constant dense<0.000000e+00> : vector<8x64xf32>
    %107 = tpu.matmul %104, %106, %cst_86 {dimension_numbers = #tpu.dot_dimension_numbers<[1], [0], [0], [1], [0, 0, 1, 1], [], []>} : vector<8x32xf32>, vector<32x64xf32>, vector<8x64xf32> -> vector<8x64xf32>
    %108 = arith.addf %102, %107 : vector<8x64xf32>
    %c0_87 = arith.constant 0 : index
    %c0_88 = arith.constant 0 : index
    %109 = vector.load %arg8[%c0_87, %c0_88] : memref<8x1xf32, #tpu.memory_space<vmem>>, vector<8x1xf32>
    %110 = vector.broadcast %109 : vector<8x1xf32> to vector<8x64xf32>
    %111 = arith.addf %108, %110 : vector<8x64xf32>
    %112 = vector.extract_strided_slice %111 {offsets = [0, 0], sizes = [8, 32], strides = [1, 1]} : vector<8x64xf32> to vector<8x32xf32>
    %cst_89 = arith.constant dense<0.000000e+00> : vector<8xf32>
    %113 = vector.multi_reduction <add>, %112, %cst_89 [1] : vector<8x32xf32> to vector<8xf32>
    %114 = vector.shape_cast %113 : vector<8xf32> to vector<8x1xf32>
    %cst_90 = arith.constant 3.200000e+01 : f32
    %115 = vector.broadcast %cst_90 : f32 to vector<8x1xf32>
    %116 = arith.divf %114, %115 : vector<8x1xf32>
    %117 = arith.mulf %112, %112 : vector<8x32xf32>
    %cst_91 = arith.constant dense<0.000000e+00> : vector<8xf32>
    %118 = vector.multi_reduction <add>, %117, %cst_91 [1] : vector<8x32xf32> to vector<8xf32>
    %119 = vector.shape_cast %118 : vector<8xf32> to vector<8x1xf32>
    %cst_92 = arith.constant 3.200000e+01 : f32
    %120 = vector.broadcast %cst_92 : f32 to vector<8x1xf32>
    %121 = arith.divf %119, %120 : vector<8x1xf32>
    %122 = arith.mulf %116, %116 : vector<8x1xf32>
    %123 = arith.subf %121, %122 : vector<8x1xf32>
    %124 = vector.extract_strided_slice %111 {offsets = [0, 32], sizes = [8, 32], strides = [1, 1]} : vector<8x64xf32> to vector<8x32xf32>
    %cst_93 = arith.constant dense<0.000000e+00> : vector<8xf32>
    %125 = vector.multi_reduction <add>, %124, %cst_93 [1] : vector<8x32xf32> to vector<8xf32>
    %126 = vector.shape_cast %125 : vector<8xf32> to vector<8x1xf32>
    %cst_94 = arith.constant 3.200000e+01 : f32
    %127 = vector.broadcast %cst_94 : f32 to vector<8x1xf32>
    %128 = arith.divf %126, %127 : vector<8x1xf32>
    %129 = arith.mulf %124, %124 : vector<8x32xf32>
    %cst_95 = arith.constant dense<0.000000e+00> : vector<8xf32>
    %130 = vector.multi_reduction <add>, %129, %cst_95 [1] : vector<8x32xf32> to vector<8xf32>
    %131 = vector.shape_cast %130 : vector<8xf32> to vector<8x1xf32>
    %cst_96 = arith.constant 3.200000e+01 : f32
    %132 = vector.broadcast %cst_96 : f32 to vector<8x1xf32>
    %133 = arith.divf %131, %132 : vector<8x1xf32>
    %134 = arith.mulf %128, %128 : vector<8x1xf32>
    %135 = arith.subf %133, %134 : vector<8x1xf32>
    %136 = arith.mulf %116, %116 : vector<8x1xf32>
    %137 = arith.addf %123, %136 : vector<8x1xf32>
    %138 = arith.mulf %128, %128 : vector<8x1xf32>
    %139 = arith.addf %135, %138 : vector<8x1xf32>
    %140 = arith.addf %116, %128 : vector<8x1xf32>
    %cst_97 = arith.constant 2.000000e+00 : f32
    %141 = vector.broadcast %cst_97 : f32 to vector<8x1xf32>
    %142 = arith.divf %140, %141 : vector<8x1xf32>
    %143 = arith.addf %137, %139 : vector<8x1xf32>
    %cst_98 = arith.constant 2.000000e+00 : f32
    %144 = vector.broadcast %cst_98 : f32 to vector<8x1xf32>
    %145 = arith.divf %143, %144 : vector<8x1xf32>
    %146 = arith.mulf %142, %142 : vector<8x1xf32>
    %147 = arith.subf %145, %146 : vector<8x1xf32>
    %c0_99 = arith.constant 0 : index
    %148 = memref.load %arg11[%c0_99] : memref<3xf32, #tpu.memory_space<smem>>
    %c1_100 = arith.constant 1 : index
    %149 = memref.load %arg11[%c1_100] : memref<3xf32, #tpu.memory_space<smem>>
    %c2_101 = arith.constant 2 : index
    %150 = memref.load %arg11[%c2_101] : memref<3xf32, #tpu.memory_space<smem>>
    %c0_102 = arith.constant 0 : index
    %151 = memref.load %arg12[%c0_102] : memref<3xf32, #tpu.memory_space<smem>>
    %c1_103 = arith.constant 1 : index
    %152 = memref.load %arg12[%c1_103] : memref<3xf32, #tpu.memory_space<smem>>
    %c2_104 = arith.constant 2 : index
    %153 = memref.load %arg12[%c2_104] : memref<3xf32, #tpu.memory_space<smem>>
    %c0_105 = arith.constant 0 : index
    %c0_106 = arith.constant 0 : index
    %154 = vector.load %arg9[%c0_105, %c0_106] : memref<8x1xf32, #tpu.memory_space<vmem>>, vector<8x1xf32>
    %c0_107 = arith.constant 0 : index
    %c0_108 = arith.constant 0 : index
    %155 = vector.load %arg10[%c0_107, %c0_108] : memref<8x1xf32, #tpu.memory_space<vmem>>, vector<8x1xf32>
    %c0_109 = arith.constant 0 : index
    %c0_110 = arith.constant 0 : index
    %156 = vector.load %arg13[%c0_109, %c0_110] : memref<8x1xf32, #tpu.memory_space<vmem>>, vector<8x1xf32>
    %c0_111 = arith.constant 0 : index
    %c0_112 = arith.constant 0 : index
    %157 = vector.load %arg14[%c0_111, %c0_112] : memref<8x1xf32, #tpu.memory_space<vmem>>, vector<8x1xf32>
    %158 = vector.extract_strided_slice %111 {offsets = [0, 0], sizes = [8, 32], strides = [1, 1]} : vector<8x64xf32> to vector<8x32xf32>
    %cst_113 = arith.constant dense<0.000000e+00> : vector<1xf32>
    %159 = vector.multi_reduction <add>, %116, %cst_113 [0] : vector<8x1xf32> to vector<1xf32>
    %160 = vector.shape_cast %159 : vector<1xf32> to vector<1x1xf32>
    %cst_114 = arith.constant 8.000000e+00 : f32
    %161 = vector.broadcast %cst_114 : f32 to vector<1x1xf32>
    %162 = arith.divf %160, %161 : vector<1x1xf32>
    %cst_115 = arith.constant dense<0.000000e+00> : vector<1xf32>
    %163 = vector.multi_reduction <add>, %137, %cst_115 [0] : vector<8x1xf32> to vector<1xf32>
    %164 = vector.shape_cast %163 : vector<1xf32> to vector<1x1xf32>
    %cst_116 = arith.constant 8.000000e+00 : f32
    %165 = vector.broadcast %cst_116 : f32 to vector<1x1xf32>
    %166 = arith.divf %164, %165 : vector<1x1xf32>
    %167 = arith.mulf %162, %162 : vector<1x1xf32>
    %168 = arith.subf %166, %167 : vector<1x1xf32>
    %169 = vector.broadcast %148 : f32 to vector<8x1xf32>
    %170 = arith.mulf %169, %116 : vector<8x1xf32>
    %171 = vector.broadcast %149 : f32 to vector<1x1xf32>
    %172 = arith.mulf %171, %162 : vector<1x1xf32>
    %173 = vector.broadcast %172 : vector<1x1xf32> to vector<8x1xf32>
    %174 = arith.addf %170, %173 : vector<8x1xf32>
    %175 = vector.broadcast %150 : f32 to vector<8x1xf32>
    %176 = arith.mulf %175, %142 : vector<8x1xf32>
    %177 = arith.addf %174, %176 : vector<8x1xf32>
    %178 = vector.broadcast %151 : f32 to vector<8x1xf32>
    %179 = arith.mulf %178, %123 : vector<8x1xf32>
    %180 = vector.broadcast %152 : f32 to vector<1x1xf32>
    %181 = arith.mulf %180, %168 : vector<1x1xf32>
    %182 = vector.broadcast %181 : vector<1x1xf32> to vector<8x1xf32>
    %183 = arith.addf %179, %182 : vector<8x1xf32>
    %184 = vector.broadcast %153 : f32 to vector<8x1xf32>
    %185 = arith.mulf %184, %147 : vector<8x1xf32>
    %186 = arith.addf %183, %185 : vector<8x1xf32>
    %cst_117 = arith.constant 0.000000e+00 : f32
    %187 = vector.broadcast %cst_117 : f32 to vector<8x1xf32>
    %188 = arith.maximumf %186, %187 : vector<8x1xf32>
    %189 = vector.broadcast %177 : vector<8x1xf32> to vector<8x32xf32>
    %190 = arith.subf %158, %189 : vector<8x32xf32>
    %cst_118 = arith.constant 9.99999974E-6 : f32
    %191 = vector.broadcast %cst_118 : f32 to vector<8x1xf32>
    %192 = arith.addf %188, %191 : vector<8x1xf32>
    %193 = math.rsqrt %192 : vector<8x1xf32>
    %194 = vector.broadcast %193 : vector<8x1xf32> to vector<8x32xf32>
    %195 = arith.mulf %190, %194 : vector<8x32xf32>
    %196 = vector.broadcast %154 : vector<8x1xf32> to vector<8x32xf32>
    %197 = arith.mulf %195, %196 : vector<8x32xf32>
    %198 = vector.broadcast %155 : vector<8x1xf32> to vector<8x32xf32>
    %199 = arith.addf %197, %198 : vector<8x32xf32>
    %c0_119 = arith.constant 0 : index
    %c0_120 = arith.constant 0 : index
    %200 = vector.load %arg15[%c0_119, %c0_120] : memref<16x8xf32, #tpu.memory_space<vmem>>, vector<16x8xf32>
    %cst_121 = arith.constant dense<0.000000e+00> : vector<16x32xf32>
    %201 = tpu.matmul %200, %199, %cst_121 {dimension_numbers = #tpu.dot_dimension_numbers<[1], [0], [0], [1], [0, 0, 1, 1], [], []>} : vector<16x8xf32>, vector<8x32xf32>, vector<16x32xf32> -> vector<16x32xf32>
    %c0_122 = arith.constant 0 : index
    %c0_123 = arith.constant 0 : index
    %202 = vector.load %arg16[%c0_122, %c0_123] : memref<16x1xf32, #tpu.memory_space<vmem>>, vector<16x1xf32>
    %203 = vector.broadcast %202 : vector<16x1xf32> to vector<16x32xf32>
    %204 = arith.addf %201, %203 : vector<16x32xf32>
    %c0_124 = arith.constant 0 : index
    %c0_125 = arith.constant 0 : index
    %205 = vector.load %arg17[%c0_124, %c0_125] : memref<8x16xf32, #tpu.memory_space<vmem>>, vector<8x16xf32>
    %cst_126 = arith.constant dense<0.000000e+00> : vector<8x32xf32>
    %206 = tpu.matmul %205, %204, %cst_126 {dimension_numbers = #tpu.dot_dimension_numbers<[1], [0], [0], [1], [0, 0, 1, 1], [], []>} : vector<8x16xf32>, vector<16x32xf32>, vector<8x32xf32> -> vector<8x32xf32>
    %cst_127 = arith.constant dense<0.000000e+00> : vector<8xf32>
    %207 = vector.multi_reduction <add>, %206, %cst_127 [1] : vector<8x32xf32> to vector<8xf32>
    %208 = vector.shape_cast %207 : vector<8xf32> to vector<8x1xf32>
    %cst_128 = arith.constant 3.200000e+01 : f32
    %209 = vector.broadcast %cst_128 : f32 to vector<8x1xf32>
    %210 = arith.divf %208, %209 : vector<8x1xf32>
    %c0_129 = arith.constant 0 : index
    %c0_130 = arith.constant 0 : index
    %211 = vector.load %arg18[%c0_129, %c0_130] : memref<8x1xf32, #tpu.memory_space<vmem>>, vector<8x1xf32>
    %212 = arith.addf %210, %211 : vector<8x1xf32>
    %213 = arith.negf %212 : vector<8x1xf32>
    %214 = math.exp %213 : vector<8x1xf32>
    %cst_131 = arith.constant 1.000000e+00 : f32
    %215 = vector.broadcast %cst_131 : f32 to vector<8x1xf32>
    %216 = arith.addf %215, %214 : vector<8x1xf32>
    %217 = arith.divf %215, %216 : vector<8x1xf32>
    %218 = arith.subf %156, %157 : vector<8x1xf32>
    %219 = vector.broadcast %218 : vector<8x1xf32> to vector<8x32xf32>
    %220 = arith.mulf %219, %199 : vector<8x32xf32>
    %221 = vector.broadcast %217 : vector<8x1xf32> to vector<8x32xf32>
    %222 = arith.mulf %221, %220 : vector<8x32xf32>
    %223 = arith.negf %222 : vector<8x32xf32>
    %224 = math.exp %223 : vector<8x32xf32>
    %cst_132 = arith.constant 1.000000e+00 : f32
    %225 = vector.broadcast %cst_132 : f32 to vector<8x32xf32>
    %226 = arith.addf %225, %224 : vector<8x32xf32>
    %227 = arith.divf %225, %226 : vector<8x32xf32>
    %228 = arith.mulf %220, %227 : vector<8x32xf32>
    %229 = vector.broadcast %157 : vector<8x1xf32> to vector<8x32xf32>
    %230 = arith.mulf %229, %199 : vector<8x32xf32>
    %231 = arith.addf %228, %230 : vector<8x32xf32>
    %232 = vector.extract_strided_slice %231 {offsets = [0, 0], sizes = [8, 16], strides = [1, 1]} : vector<8x32xf32> to vector<8x16xf32>
    %233 = vector.extract_strided_slice %231 {offsets = [0, 16], sizes = [8, 16], strides = [1, 1]} : vector<8x32xf32> to vector<8x16xf32>
    %c0_133 = arith.constant 0 : index
    %c0_134 = arith.constant 0 : index
    %234 = vector.load %arg21[%c0_133, %c0_134] : memref<32x8xf32, #tpu.memory_space<vmem>>, vector<32x8xf32>
    %cst_135 = arith.constant dense<0.000000e+00> : vector<32x16xf32>
    %235 = tpu.matmul %234, %232, %cst_135 {dimension_numbers = #tpu.dot_dimension_numbers<[1], [0], [0], [1], [0, 0, 1, 1], [], []>} : vector<32x8xf32>, vector<8x16xf32>, vector<32x16xf32> -> vector<32x16xf32>
    %c0_136 = arith.constant 0 : index
    %c0_137 = arith.constant 0 : index
    %236 = vector.load %arg22[%c0_136, %c0_137] : memref<32x1xf32, #tpu.memory_space<vmem>>, vector<32x1xf32>
    %237 = vector.broadcast %236 : vector<32x1xf32> to vector<32x16xf32>
    %238 = arith.addf %235, %237 : vector<32x16xf32>
    %239 = arith.negf %238 : vector<32x16xf32>
    %240 = math.exp %239 : vector<32x16xf32>
    %cst_138 = arith.constant 1.000000e+00 : f32
    %241 = vector.broadcast %cst_138 : f32 to vector<32x16xf32>
    %242 = arith.addf %241, %240 : vector<32x16xf32>
    %243 = arith.divf %241, %242 : vector<32x16xf32>
    %c0_139 = arith.constant 0 : index
    %c0_140 = arith.constant 0 : index
    %244 = vector.load %arg19[%c0_139, %c0_140] : memref<32x8xf32, #tpu.memory_space<vmem>>, vector<32x8xf32>
    %cst_141 = arith.constant dense<0.000000e+00> : vector<32x16xf32>
    %245 = tpu.matmul %244, %233, %cst_141 {dimension_numbers = #tpu.dot_dimension_numbers<[1], [0], [0], [1], [0, 0, 1, 1], [], []>} : vector<32x8xf32>, vector<8x16xf32>, vector<32x16xf32> -> vector<32x16xf32>
    %c0_142 = arith.constant 0 : index
    %c0_143 = arith.constant 0 : index
    %246 = vector.load %arg20[%c0_142, %c0_143] : memref<32x1xf32, #tpu.memory_space<vmem>>, vector<32x1xf32>
    %247 = vector.broadcast %246 : vector<32x1xf32> to vector<32x16xf32>
    %248 = arith.addf %245, %247 : vector<32x16xf32>
    %249 = arith.negf %248 : vector<32x16xf32>
    %250 = math.exp %249 : vector<32x16xf32>
    %cst_144 = arith.constant 1.000000e+00 : f32
    %251 = vector.broadcast %cst_144 : f32 to vector<32x16xf32>
    %252 = arith.addf %251, %250 : vector<32x16xf32>
    %253 = arith.divf %251, %252 : vector<32x16xf32>
    %c0_145 = arith.constant 0 : index
    %c0_146 = arith.constant 0 : index
    %c0_147 = arith.constant 0 : index
    %c0_148 = arith.constant 0 : index
    %254 = vector.load %arg0[%c0_145, %c0_146, %c0_147, %c0_148] : memref<2x32x16x16xf32, #tpu.memory_space<vmem>>, vector<1x32x16x16xf32>
    %255 = vector.shape_cast %254 : vector<1x32x16x16xf32> to vector<32x16x16xf32>
    %256 = vector.shape_cast %253 : vector<32x16xf32> to vector<32x16x1xf32>
    %257 = vector.broadcast %256 : vector<32x16x1xf32> to vector<32x16x16xf32>
    %258 = arith.mulf %255, %257 : vector<32x16x16xf32>
    %259 = vector.shape_cast %243 : vector<32x16xf32> to vector<32x1x16xf32>
    %260 = vector.broadcast %259 : vector<32x1x16xf32> to vector<32x16x16xf32>
    %261 = arith.mulf %258, %260 : vector<32x16x16xf32>
    %c0_149 = arith.constant 0 : index
    %c0_150 = arith.constant 0 : index
    %c0_151 = arith.constant 0 : index
    %c0_152 = arith.constant 0 : index
    %262 = vector.load %arg23[%c0_149, %c0_150, %c0_151, %c0_152] : memref<2x32x16x16xf32, #tpu.memory_space<vmem>>, vector<1x32x16x16xf32>
    %263 = vector.shape_cast %262 : vector<1x32x16x16xf32> to vector<32x16x16xf32>
    %264 = vector.shape_cast %261 : vector<32x16x16xf32> to vector<1x32x16x16xf32>
    tpu.vector_store %arg23[%c0_149, %c0_150, %c0_151, %c0_152], %264 {strides = array<i32>} : memref<2x32x16x16xf32, #tpu.memory_space<vmem>>, vector<1x32x16x16xf32>,
    %265 = vector.extract_strided_slice %111 {offsets = [0, 32], sizes = [8, 32], strides = [1, 1]} : vector<8x64xf32> to vector<8x32xf32>
    %cst_153 = arith.constant dense<0.000000e+00> : vector<1xf32>
    %266 = vector.multi_reduction <add>, %128, %cst_153 [0] : vector<8x1xf32> to vector<1xf32>
    %267 = vector.shape_cast %266 : vector<1xf32> to vector<1x1xf32>
    %cst_154 = arith.constant 8.000000e+00 : f32
    %268 = vector.broadcast %cst_154 : f32 to vector<1x1xf32>
    %269 = arith.divf %267, %268 : vector<1x1xf32>
    %cst_155 = arith.constant dense<0.000000e+00> : vector<1xf32>
    %270 = vector.multi_reduction <add>, %139, %cst_155 [0] : vector<8x1xf32> to vector<1xf32>
    %271 = vector.shape_cast %270 : vector<1xf32> to vector<1x1xf32>
    %cst_156 = arith.constant 8.000000e+00 : f32
    %272 = vector.broadcast %cst_156 : f32 to vector<1x1xf32>
    %273 = arith.divf %271, %272 : vector<1x1xf32>
    %274 = arith.mulf %269, %269 : vector<1x1xf32>
    %275 = arith.subf %273, %274 : vector<1x1xf32>
    %276 = vector.broadcast %148 : f32 to vector<8x1xf32>
    %277 = arith.mulf %276, %128 : vector<8x1xf32>
    %278 = vector.broadcast %149 : f32 to vector<1x1xf32>
    %279 = arith.mulf %278, %269 : vector<1x1xf32>
    %280 = vector.broadcast %279 : vector<1x1xf32> to vector<8x1xf32>
    %281 = arith.addf %277, %280 : vector<8x1xf32>
    %282 = vector.broadcast %150 : f32 to vector<8x1xf32>
    %283 = arith.mulf %282, %142 : vector<8x1xf32>
    %284 = arith.addf %281, %283 : vector<8x1xf32>
    %285 = vector.broadcast %151 : f32 to vector<8x1xf32>
    %286 = arith.mulf %285, %135 : vector<8x1xf32>
    %287 = vector.broadcast %152 : f32 to vector<1x1xf32>
    %288 = arith.mulf %287, %275 : vector<1x1xf32>
    %289 = vector.broadcast %288 : vector<1x1xf32> to vector<8x1xf32>
    %290 = arith.addf %286, %289 : vector<8x1xf32>
    %291 = vector.broadcast %153 : f32 to vector<8x1xf32>
    %292 = arith.mulf %291, %147 : vector<8x1xf32>
    %293 = arith.addf %290, %292 : vector<8x1xf32>
    %cst_157 = arith.constant 0.000000e+00 : f32
    %294 = vector.broadcast %cst_157 : f32 to vector<8x1xf32>
    %295 = arith.maximumf %293, %294 : vector<8x1xf32>
    %296 = vector.broadcast %284 : vector<8x1xf32> to vector<8x32xf32>
    %297 = arith.subf %265, %296 : vector<8x32xf32>
    %cst_158 = arith.constant 9.99999974E-6 : f32
    %298 = vector.broadcast %cst_158 : f32 to vector<8x1xf32>
    %299 = arith.addf %295, %298 : vector<8x1xf32>
    %300 = math.rsqrt %299 : vector<8x1xf32>
    %301 = vector.broadcast %300 : vector<8x1xf32> to vector<8x32xf32>
    %302 = arith.mulf %297, %301 : vector<8x32xf32>
    %303 = vector.broadcast %154 : vector<8x1xf32> to vector<8x32xf32>
    %304 = arith.mulf %302, %303 : vector<8x32xf32>
    %305 = vector.broadcast %155 : vector<8x1xf32> to vector<8x32xf32>
    %306 = arith.addf %304, %305 : vector<8x32xf32>
    %c0_159 = arith.constant 0 : index
    %c0_160 = arith.constant 0 : index
    %307 = vector.load %arg15[%c0_159, %c0_160] : memref<16x8xf32, #tpu.memory_space<vmem>>, vector<16x8xf32>
    %cst_161 = arith.constant dense<0.000000e+00> : vector<16x32xf32>
    %308 = tpu.matmul %307, %306, %cst_161 {dimension_numbers = #tpu.dot_dimension_numbers<[1], [0], [0], [1], [0, 0, 1, 1], [], []>} : vector<16x8xf32>, vector<8x32xf32>, vector<16x32xf32> -> vector<16x32xf32>
    %c0_162 = arith.constant 0 : index
    %c0_163 = arith.constant 0 : index
    %309 = vector.load %arg16[%c0_162, %c0_163] : memref<16x1xf32, #tpu.memory_space<vmem>>, vector<16x1xf32>
    %310 = vector.broadcast %309 : vector<16x1xf32> to vector<16x32xf32>
    %311 = arith.addf %308, %310 : vector<16x32xf32>
    %c0_164 = arith.constant 0 : index
    %c0_165 = arith.constant 0 : index
    %312 = vector.load %arg17[%c0_164, %c0_165] : memref<8x16xf32, #tpu.memory_space<vmem>>, vector<8x16xf32>
    %cst_166 = arith.constant dense<0.000000e+00> : vector<8x32xf32>
    %313 = tpu.matmul %312, %311, %cst_166 {dimension_numbers = #tpu.dot_dimension_numbers<[1], [0], [0], [1], [0, 0, 1, 1], [], []>} : vector<8x16xf32>, vector<16x32xf32>, vector<8x32xf32> -> vector<8x32xf32>
    %cst_167 = arith.constant dense<0.000000e+00> : vector<8xf32>
    %314 = vector.multi_reduction <add>, %313, %cst_167 [1] : vector<8x32xf32> to vector<8xf32>
    %315 = vector.shape_cast %314 : vector<8xf32> to vector<8x1xf32>
    %cst_168 = arith.constant 3.200000e+01 : f32
    %316 = vector.broadcast %cst_168 : f32 to vector<8x1xf32>
    %317 = arith.divf %315, %316 : vector<8x1xf32>
    %c0_169 = arith.constant 0 : index
    %c0_170 = arith.constant 0 : index
    %318 = vector.load %arg18[%c0_169, %c0_170] : memref<8x1xf32, #tpu.memory_space<vmem>>, vector<8x1xf32>
    %319 = arith.addf %317, %318 : vector<8x1xf32>
    %320 = arith.negf %319 : vector<8x1xf32>
    %321 = math.exp %320 : vector<8x1xf32>
    %cst_171 = arith.constant 1.000000e+00 : f32
    %322 = vector.broadcast %cst_171 : f32 to vector<8x1xf32>
    %323 = arith.addf %322, %321 : vector<8x1xf32>
    %324 = arith.divf %322, %323 : vector<8x1xf32>
    %325 = arith.subf %156, %157 : vector<8x1xf32>
    %326 = vector.broadcast %325 : vector<8x1xf32> to vector<8x32xf32>
    %327 = arith.mulf %326, %306 : vector<8x32xf32>
    %328 = vector.broadcast %324 : vector<8x1xf32> to vector<8x32xf32>
    %329 = arith.mulf %328, %327 : vector<8x32xf32>
    %330 = arith.negf %329 : vector<8x32xf32>
    %331 = math.exp %330 : vector<8x32xf32>
    %cst_172 = arith.constant 1.000000e+00 : f32
    %332 = vector.broadcast %cst_172 : f32 to vector<8x32xf32>
    %333 = arith.addf %332, %331 : vector<8x32xf32>
    %334 = arith.divf %332, %333 : vector<8x32xf32>
    %335 = arith.mulf %327, %334 : vector<8x32xf32>
    %336 = vector.broadcast %157 : vector<8x1xf32> to vector<8x32xf32>
    %337 = arith.mulf %336, %306 : vector<8x32xf32>
    %338 = arith.addf %335, %337 : vector<8x32xf32>
    %339 = vector.extract_strided_slice %338 {offsets = [0, 0], sizes = [8, 16], strides = [1, 1]} : vector<8x32xf32> to vector<8x16xf32>
    %340 = vector.extract_strided_slice %338 {offsets = [0, 16], sizes = [8, 16], strides = [1, 1]} : vector<8x32xf32> to vector<8x16xf32>
    %c0_173 = arith.constant 0 : index
    %c0_174 = arith.constant 0 : index
    %341 = vector.load %arg21[%c0_173, %c0_174] : memref<32x8xf32, #tpu.memory_space<vmem>>, vector<32x8xf32>
    %cst_175 = arith.constant dense<0.000000e+00> : vector<32x16xf32>
    %342 = tpu.matmul %341, %339, %cst_175 {dimension_numbers = #tpu.dot_dimension_numbers<[1], [0], [0], [1], [0, 0, 1, 1], [], []>} : vector<32x8xf32>, vector<8x16xf32>, vector<32x16xf32> -> vector<32x16xf32>
    %c0_176 = arith.constant 0 : index
    %c0_177 = arith.constant 0 : index
    %343 = vector.load %arg22[%c0_176, %c0_177] : memref<32x1xf32, #tpu.memory_space<vmem>>, vector<32x1xf32>
    %344 = vector.broadcast %343 : vector<32x1xf32> to vector<32x16xf32>
    %345 = arith.addf %342, %344 : vector<32x16xf32>
    %346 = arith.negf %345 : vector<32x16xf32>
    %347 = math.exp %346 : vector<32x16xf32>
    %cst_178 = arith.constant 1.000000e+00 : f32
    %348 = vector.broadcast %cst_178 : f32 to vector<32x16xf32>
    %349 = arith.addf %348, %347 : vector<32x16xf32>
    %350 = arith.divf %348, %349 : vector<32x16xf32>
    %c0_179 = arith.constant 0 : index
    %c0_180 = arith.constant 0 : index
    %351 = vector.load %arg19[%c0_179, %c0_180] : memref<32x8xf32, #tpu.memory_space<vmem>>, vector<32x8xf32>
    %cst_181 = arith.constant dense<0.000000e+00> : vector<32x16xf32>
    %352 = tpu.matmul %351, %340, %cst_181 {dimension_numbers = #tpu.dot_dimension_numbers<[1], [0], [0], [1], [0, 0, 1, 1], [], []>} : vector<32x8xf32>, vector<8x16xf32>, vector<32x16xf32> -> vector<32x16xf32>
    %c0_182 = arith.constant 0 : index
    %c0_183 = arith.constant 0 : index
    %353 = vector.load %arg20[%c0_182, %c0_183] : memref<32x1xf32, #tpu.memory_space<vmem>>, vector<32x1xf32>
    %354 = vector.broadcast %353 : vector<32x1xf32> to vector<32x16xf32>
    %355 = arith.addf %352, %354 : vector<32x16xf32>
    %356 = arith.negf %355 : vector<32x16xf32>
    %357 = math.exp %356 : vector<32x16xf32>
    %cst_184 = arith.constant 1.000000e+00 : f32
    %358 = vector.broadcast %cst_184 : f32 to vector<32x16xf32>
    %359 = arith.addf %358, %357 : vector<32x16xf32>
    %360 = arith.divf %358, %359 : vector<32x16xf32>
    %c1_185 = arith.constant 1 : index
    %c0_186 = arith.constant 0 : index
    %c0_187 = arith.constant 0 : index
    %c0_188 = arith.constant 0 : index
    %361 = vector.load %arg0[%c1_185, %c0_186, %c0_187, %c0_188] : memref<2x32x16x16xf32, #tpu.memory_space<vmem>>, vector<1x32x16x16xf32>
    %362 = vector.shape_cast %361 : vector<1x32x16x16xf32> to vector<32x16x16xf32>
    %363 = vector.shape_cast %360 : vector<32x16xf32> to vector<32x16x1xf32>
    %364 = vector.broadcast %363 : vector<32x16x1xf32> to vector<32x16x16xf32>
    %365 = arith.mulf %362, %364 : vector<32x16x16xf32>
    %366 = vector.shape_cast %350 : vector<32x16xf32> to vector<32x1x16xf32>
    %367 = vector.broadcast %366 : vector<32x1x16xf32> to vector<32x16x16xf32>
    %368 = arith.mulf %365, %367 : vector<32x16x16xf32>
    %c1_189 = arith.constant 1 : index
    %c0_190 = arith.constant 0 : index
    %c0_191 = arith.constant 0 : index
    %c0_192 = arith.constant 0 : index
    %369 = vector.load %arg23[%c1_189, %c0_190, %c0_191, %c0_192] : memref<2x32x16x16xf32, #tpu.memory_space<vmem>>, vector<1x32x16x16xf32>
    %370 = vector.shape_cast %369 : vector<1x32x16x16xf32> to vector<32x16x16xf32>
    %371 = vector.shape_cast %368 : vector<32x16x16xf32> to vector<1x32x16x16xf32>
    tpu.vector_store %arg23[%c1_189, %c0_190, %c0_191, %c0_192], %371 {strides = array<i32>} : memref<2x32x16x16xf32, #tpu.memory_space<vmem>>, vector<1x32x16x16xf32>,
    return
  }
}

</mosaic_0001>

<bundles_post_ra>
// kernel: tpu_custom_call.1
= control target key start
LH: loop header
LB: loop body
LE: loop exit
PB: predicated region body
PF: predicated region fallthrough
CT: control target
= control target key end

     0   :  { %s15303_s0 = inlined_call_operand.vmem [shape: f32[2,32,16,16], index: 0, kind: input, shape index: {}]   ;;  %s15304_s1 = inlined_call_operand.vmem [shape: f32[32,16], index: 1, kind: input, shape index: {}]   ;;  %s15305_s2 = inlined_call_operand.vmem [shape: f32[32,16], index: 2, kind: input, shape index: {}]   ;;  %s15306_s3 = inlined_call_operand.vmem [shape: f32[32,16], index: 3, kind: input, shape index: {}]   ;;  %s15307_s4 = inlined_call_operand.vmem [shape: f32[32,16], index: 4, kind: input, shape index: {}]   ;;  %s15308_s5 = inlined_call_operand.vmem [shape: f32[32,16], index: 5, kind: input, shape index: {}]   ;;  %s15309_s6 = inlined_call_operand.vmem [shape: f32[32,16], index: 6, kind: input, shape index: {}]   ;;  %s15310_s7 = inlined_call_operand.vmem [shape: f32[3,8,32], index: 7, kind: input, shape index: {}]   ;;  %s15311_s8 = inlined_call_operand.vmem [shape: f32[8,1], index: 8, kind: input, shape index: {}]   ;;  %s15312_s9 = inlined_call_operand.vmem [shape: f32[8,1], index: 9, kind: input, shape index: {}]   ;;  %s15313_s10 = inlined_call_operand.vmem [shape: f32[8,1], index: 10, kind: input, shape index: {}]   ;;  %s15314_s11 = inlined_call_operand.vmem [shape: f32[3], index: 11, kind: input, shape index: {}]   ;;  %s15315_s12 = inlined_call_operand.vmem [shape: f32[3], index: 12, kind: input, shape index: {}]   ;;  %s15316_s13 = inlined_call_operand.vmem [shape: f32[8,1], index: 13, kind: input, shape index: {}]   ;;  %s15317_s14 = inlined_call_operand.vmem [shape: f32[8,1], index: 14, kind: input, shape index: {}]   ;;  %s15318_s15 = inlined_call_operand.vmem [shape: f32[16,8], index: 15, kind: input, shape index: {}]   ;;  %s15319_s16 = inlined_call_operand.vmem [shape: f32[16,1], index: 16, kind: input, shape index: {}]   ;;  %s15320_s17 = inlined_call_operand.vmem [shape: f32[8,16], index: 17, kind: input, shape index: {}]   ;;  %s15321_s18 = inlined_call_operand.vmem [shape: f32[8,1], index: 18, kind: input, shape index: {}]   ;;  %s15322_s19 = inlined_call_operand.vmem [shape: f32[32,8], index: 19, kind: input, shape index: {}]   ;;  %s15323_s20 = inlined_call_operand.vmem [shape: f32[32,1], index: 20, kind: input, shape index: {}]   ;;  %s15324_s21 = inlined_call_operand.vmem [shape: f32[32,8], index: 21, kind: input, shape index: {}]   ;;  %s15325_s22 = inlined_call_operand.vmem [shape: f32[32,1], index: 22, kind: input, shape index: {}]   ;;  %s15326_s23 = inlined_call_operand.vmem [shape: f32[2,32,16,16], index: 23, kind: output, shape index: {}]  }
   0x1   :  { %15544 = sst [smem:[#allocation253_spill]] %s15303_s0 }
   0x2   :  { %15545 = sst [smem:[#allocation254_spill]] %s15304_s1 }
   0x3   :  { %15546 = sst [smem:[#allocation255_spill]] %s15305_s2 }
   0x4   :  { %15547 = sst [smem:[#allocation256_spill]] %s15306_s3 }
   0x5   :  { %15548 = sst [smem:[#allocation257_spill]] %s15307_s4 }
   0x6   :  { %15549 = sst [smem:[#allocation258_spill]] %s15308_s5 }
   0x7   :  { %15550 = sst [smem:[#allocation259_spill]] %s15309_s6 }
   0x8   :  { %15551 = sst [smem:[#allocation260_spill]] %s15310_s7 }
   0x9   :  { %28 = vsyncpa [#allocation4], 0  ;;  %s58_s24 = sshll.u32 %s15314_s11, 4  ;;  %s59_s24 = int_to_ptr.vmem [resolvable:$true] %s58_s24 }
   0xa   :  { %29 = vsyncpa [#allocation6], 0  ;;  %s68_s1 = sshll.u32 %s15315_s12, 4  ;;  %s9069_s26 = scalar_lea.vmem %s59_s24, 16  ;;  %s69_s1 = int_to_ptr.vmem [resolvable:$true] %s68_s1 }
   0xb   :  { %p9070_p0 = scmp.ne.s32.totalorder %s59_s24, %s9069_s26  ;;  %p9074_p1 = scmp.lt.s32.totalorder %s59_s24, %s59_s24 }
   0xc   :  { %p9075_p2 = scmp.lt.s32.totalorder %s9069_s26, %s9069_s26 }
   0xe   :  { %p9076_p3 = por %p9075_p2, %p9074_p1 }
  0x10   :  { %p9077_p4 = pnand %p9076_p3, %p9070_p0 }
  0x12   :  { %9080 = shalt.err (!%p9077_p4)
}
  0x13   :  { %s9097_s2 = smov [#allocation3]   ;;  %s9081_s6 = scalar_lea.vmem %s69_s1, 16 }
  0x14   :  { %61 = dma.vmem_to_smem %s59_s24, 16, %s9097_s2, [#allocation4]  }
  0x15   :  { %p9082_p5 = scmp.ne.s32.totalorder %s69_s1, %s9081_s6  ;;  %p9086_p6 = scmp.lt.s32.totalorder %s69_s1, %s69_s1 }
  0x16   :  { %p9087_p7 = scmp.lt.s32.totalorder %s9081_s6, %s9081_s6 }
  0x18   :  { %p9088_p8 = por %p9087_p7, %p9086_p6 }
  0x1a   :  { %p9089_p9 = pnand %p9088_p8, %p9082_p5 }
  0x1c   :  { %9092 = shalt.err (!%p9089_p9)
}
  0x1d   :  { %s9098_s11 = smov [#allocation5]  }
  0x1e   :  { %71 = dma.vmem_to_smem %s69_s1, 16, %s9098_s11, [#allocation6]  }
  0x1f   :  { %9093 = dma.done.wait [#allocation4], 16  }
  0x20   :  { %9094 = vsyncadd [#allocation4], 4294967280 }
  0x21   :  { %9095 = dma.done.wait [#allocation6], 16  }
  0x22   :  { %9096 = vsyncadd [#allocation6], 4294967280 }
  0x23   :  { %98 = sfence }
  0x24   :  { %s15552_s7 = sld [smem:[#allocation253_spill]]  ;;  %vm184_vm0 = vcmask 130048   ;;  %v15335_v9 = vlaneseq  ;;  %v9099_v24 = vmov 1966171168   ;;  %s15554_s4 = sld [smem:[#allocation255_spill]]  ;;  %vm2281_vm1 = vcmask 1041409  }
  0x25   :  { %v607_v25 = vunpack.c.l.s4 %v9099_v24  ;;  %vm2283_vm2 = vcmask 1042434   ;;  %s15559_s11 = sld [smem:[#allocation254_spill]]  ;;  %vm2285_vm3 = vcmask 1043459   ;;  %vm2287_vm4 = vcmask 1044484   ;;  %s15897_s0 = sld [smem:[#allocation259_spill]] }
  0x26   :  { %v9301_v26 = vshrl.u32 %v15335_v9, 7  ;;  %vm2289_vm5 = vcmask 1045509   ;;  %vm99_vm6 = vcmask 523264   ;;  %vm2291_vm7 = vcmask 1046534   ;;  %s15899_s25 = sld [smem:[#allocation258_spill]]  ;;  %s16174_s27 = sld [smem:[#allocation257_spill]] }
  0x27   :  { %v608_v33 = vunpack.c.0.s8 %v607_v25  ;;  %vm2293_vm8 = vcmask 1047559   ;;  %vm2000_vm9 = vcmask 130112   ;;  %s16179_s24 = sld [smem:[#allocation256_spill]]  ;;  %s9101_s5 = smov 16   ;;  %vm2927_vm10 = vcmask 261248  }
  0x28   :  { %15553 = vst [vmem:[#allocation9_spill] sm:$0xff] %v9301_v26  ;;  %v9337_v46 = vsub.s32 0, %v9301_v26  ;;  %s9102_s2 = smov 32   ;;  %s9103_s30 = smov 48   ;;  %vm5046_vm11 = vcmask 392448   ;;  %vm5063_vm12 = vcmask 523648  }
  0x29   :  { %v9332_v42 = vsub.s32 %v608_v33, %v9301_v26  ;;  %s9104_s29 = smov 1   ;;  %vm2884_vm13 = vcmask 130056   ;;  %s9110_s28 = smov 49   ;;  %vm9113_vm14 = vmmov 0   ;;  %vm2905_vm15 = vcmask 261256  }
  0x2a   :  { %v9247_v0 = vld [vmem:[%s15552_s7 + $0x10] sm:$0xff]  ;;  %v9252_v1 = vld [vmem:[%s15552_s7] sm:$0xff]  ;;  %v9257_v2 = vld [vmem:[%s15552_s7 + $0x18] sm:$0xff]  ;;  %15556 = vst [vmem:[#allocation11_spill] sm:$0xff] %v9337_v46  ;;  %s16366_s1 = sld [smem:[#allocation260_spill]]  ;;  %s9115_s12 = smov 96  }
  0x2b   :  { %v191_v3 = vsel %vm184_vm0, %v9247_v0, -inf  ;;  %v185_v4 = vsel %vm184_vm0, %v9252_v1, -inf  ;;  %v194_v5 = vsel %vm184_vm0, %v9257_v2, -inf  ;;  %v9268_v6 = vld [vmem:[%s15552_s7 + $0x8] sm:$0xff]  ;;  %v9278_v8 = vld [vmem:[%s15552_s7 + $0x80] sm:$0xff]  ;;  %v9289_v14 = vld [vmem:[%s15552_s7 + $0x98] sm:$0xff] }
  0x2c   :  { %v9273_v7 = vld [vmem:[%s15552_s7 + $0x88] sm:$0xff]  ;;  %192 = vmax.xlane.f32.xlu1 %v191_v3  ;;  %186 = vmax.xlane.f32.xlu0 %v185_v4  ;;  %v384_v10 = vmax.f32 %v191_v3, %v194_v5  ;;  %v188_v11 = vsel %vm184_vm0, %v9268_v6, -inf  ;;  %v233_v13 = vsel %vm184_vm0, %v9278_v8, -inf  ;;  %v9294_v15 = vld [vmem:[%s15552_s7 + $0x90] sm:$0xff]  ;;  %v242_v18 = vsel %vm184_vm0, %v9289_v14, -inf  ;;  %v9311_v28 = vld [vmem:[%s15552_s7 + $0x20] sm:$0xff] }
  0x2d   :  { %v236_v12 = vsel %vm184_vm0, %v9273_v7, -inf  ;;  %v377_v16 = vmax.f32 %v185_v4, %v188_v11  ;;  %v239_v19 = vsel %vm184_vm0, %v9294_v15, -inf  ;;  %v9306_v27 = vld [vmem:[%s15552_s7 + $0x28] sm:$0xff]  ;;  %v9316_v36 = vld [vmem:[%s15554_s4] sm:$0xff]  ;;  %v9329_v39 = vsel %vm184_vm0, %v9311_v28, -inf  ;;  %15555 = vst [vmem:[#allocation10_spill] sm:$0xff] %v9332_v42 }
  0x2e   :  { %v433_v17 = vmax.f32 %v233_v13, %v236_v12  ;;  %v385_v20 = vrot.slane %v384_v10, 4  ;;  %v440_v21 = vmax.f32 %v239_v19, %v242_v18  ;;  %v9321_v37 = vld [vmem:[%s15554_s4 + $0x8] sm:$0xff]  ;;  %v9325_v38 = vsel %vm184_vm0, %v9306_v27, -inf  ;;  %s13876_s26 = sld [smem:[#allocation3]]  ;;  %s13878_s6 = sld [smem:[#allocation3 + $0x1]] }
  0x2f   :  { %v378_v22 = vrot.slane %v377_v16, 4  ;;  %v391_v43 = vmax.f32 %v9329_v39, %v9325_v38  ;;  %v612_v49 = vrot.slane %v9316_v36, %v9332_v42  ;;  %v661_v50 = vrot.slane %v9321_v37, %v9332_v42 }
  0x30   :  { %v434_v23 = vrot.slane %v433_v17, 4  ;;  %195 = vmax.xlane.f32.xlu1 %v194_v5  ;;  %v386_v29 = vmax.f32 %v384_v10, %v385_v20  ;;  %189 = vmax.xlane.f32.xlu0 %v188_v11  ;;  %v441_v30 = vrot.slane %v440_v21, 4  ;;  %v141_v5 = vld [vmem:[%s15552_s7 + $0xa8] sm:$0xff]  ;;  %v140_v20 = vld [vmem:[%s15552_s7 + $0xa0] sm:$0xff] }
  0x31   :  { %v379_v31 = vmax.f32 %v377_v16, %v378_v22  ;;  %v392_v53 = vrot.slane %v391_v43, 4  ;;  %v9344_v56 = vrot.slane %v612_v49, %v9332_v42  ;;  %v620_v57 = vcombine.high %v612_v49, %v612_v49 }
  0x32   :  { %v435_v32 = vmax.f32 %v433_v17, %v434_v23  ;;  %v387_v34 = vrot.slane %v386_v29, 2  ;;  %v442_v35 = vmax.f32 %v440_v21, %v441_v30  ;;  %v9347_v60 = vrot.slane %v661_v50, %v9332_v42 }
  0x33   :  { %v380_v40 = vrot.slane %v379_v31, 2  ;;  %v669_v61 = vcombine.high %v661_v50, %v661_v50  ;;  %v9351_v3 = vrot.slane %v9344_v56, %v9337_v46  ;;  %v9354_v4 = vrot.slane %v620_v57, %v9332_v42 }
  0x34   :  { %v436_v41 = vrot.slane %v435_v32, 2  ;;  %v388_v44 = vmax.f32 %v386_v29, %v387_v34  ;;  %237 = vmax.xlane.f32.xlu1 %v236_v12  ;;  %234 = vmax.xlane.f32.xlu0 %v233_v13  ;;  %v443_v45 = vrot.slane %v442_v35, 2  ;;  %v9361_v11 = vrot.slane %v9347_v60, %v9337_v46 }
  0x35   :  { %v381_v47 = vmax.f32 %v379_v31, %v380_v40  ;;  %v9364_v12 = vrot.slane %v669_v61, %v9332_v42  ;;  %v393_v13 = vmax.f32 %v391_v43, %v392_v53  ;;  %v962_v17 = vmul.f32 %v9351_v3, %v9268_v6 }
  0x36   :  { %v437_v48 = vmax.f32 %v435_v32, %v436_v41  ;;  %v389_v51 = vrot.slane %v388_v44, 1  ;;  %v444_v52 = vmax.f32 %v442_v35, %v443_v45  ;;  %v248_v22 = vsel %vm184_vm0, %v141_v5, -inf }
  0x37   :  { %v382_v54 = vrot.slane %v381_v47, 1  ;;  %v1028_v23 = vsel %vm184_vm0, %v962_v17, 0.0  ;;  %v978_v25 = vmul.f32 %v9361_v11, %v9273_v7  ;;  %v977_v29 = vmul.f32 %v9361_v11, %v9278_v8  ;;  %v126_v17 = vld [vmem:[%s15552_s7 + $0x30] sm:$0xff] }
  0x38   :  { %v438_v55 = vrot.slane %v437_v48, 1  ;;  %v390_v58 = vmax.f32 %v388_v44, %v389_v51  ;;  %243 = vmax.xlane.f32.xlu1 %v242_v18  ;;  %v445_v59 = vrot.slane %v444_v52, 1  ;;  %240 = vmax.xlane.f32.xlu0 %v239_v19  ;;  %v961_v18 = vmul.f32 %v9351_v3, %v9252_v1 }
  0x39   :  { %v383_v62 = vmax.f32 %v381_v47, %v382_v54  ;;  %v9373_v19 = vrot.slane %v9354_v4, %v9337_v46  ;;  %v9392_v30 = vrot.slane %v9364_v12, %v9337_v46  ;;  %v245_v31 = vsel %vm184_vm0, %v140_v20, -inf }
  0x3a   :  { %v439_v63 = vmax.f32 %v437_v48, %v438_v55  ;;  %v446_v10 = vmax.f32 %v444_v52, %v445_v59  ;;  %v1025_v24 = vsel %vm184_vm0, %v961_v18, 0.0  ;;  %v394_v33 = vrot.slane %v393_v13, 2 }
  0x3b   :  { %v2828_v16 = vsel %vm2281_vm1, %v390_v58, %v383_v62  ;;  %v964_v6 = vmul.f32 %v9373_v19, %v9257_v2  ;;  %v963_v1 = vmul.f32 %v9373_v19, %v9247_v0  ;;  %v447_v0 = vmax.f32 %v245_v31, %v248_v22 }
  0x3c   :  { %v2835_v21 = vsel %vm2281_vm1, %v446_v10, %v439_v63  ;;  %1029 = vadd.xlane.f32.xlu1 %v1028_v23  ;;  %1026 = vadd.xlane.f32.xlu0 %v1025_v24  ;;  %v395_v34 = vmax.f32 %v393_v13, %v394_v33  ;;  %v1076_v7 = vsel %vm184_vm0, %v978_v25, 0.0  ;;  %v980_v8 = vmul.f32 %v9392_v30, %v9289_v14  ;;  %v9448_v10 = vld [vmem:[%s15559_s11 + $0x8] sm:$0xff]  ;;  %v127_v23 = vld [vmem:[%s15552_s7 + $0x38] sm:$0xff] }
  0x3d   :  { %v1034_v32 = vsel %vm184_vm0, %v964_v6, 0.0  ;;  %v1031_v2 = vsel %vm184_vm0, %v963_v1, 0.0  ;;  %v448_v35 = vrot.slane %v447_v0, 4  ;;  %v1073_v40 = vsel %vm184_vm0, %v977_v29, 0.0 }
  0x3e   :  { %v979_v41 = vmul.f32 %v9392_v30, %v9294_v15  ;;  %v396_v43 = vrot.slane %v395_v34, 1  ;;  %v1082_v48 = vsel %vm184_vm0, %v980_v8, 0.0  ;;  %v650_v51 = vcombine.high %v9344_v56, %v9344_v56 }
  0x3f   :  { %v449_v44 = vmax.f32 %v447_v0, %v448_v35  ;;  %v699_v54 = vcombine.high %v9347_v60, %v9347_v60  ;;  %v9441_v63 = vsub.s32 1, %v9301_v26  ;;  %v1308_v13 = vrot.slane %v9448_v10, %v9337_v46 }
  0x40   :  { %1035 = vadd.xlane.f32.xlu1 %v1034_v32  ;;  %1032 = vadd.xlane.f32.xlu0 %v1031_v2  ;;  %v397_v45 = vmax.f32 %v395_v34, %v396_v43  ;;  %v1079_v49 = vsel %vm184_vm0, %v979_v41, 0.0  ;;  %v9411_v53 = vrot.slane %v650_v51, %v9337_v46  ;;  %v9458_v18 = vsel %vm184_vm0, %v126_v17, -inf  ;;  %v8437_v41 = vld [vmem:[%s15552_s7 + $0x200] sm:$0xff]  ;;  %v8454_v51 = vld [vmem:[%s15552_s7 + $0x288] sm:$0xff] }
  0x41   :  { %v450_v47 = vrot.slane %v449_v44, 2  ;;  %v9425_v58 = vrot.slane %v699_v54, %v9337_v46  ;;  %15560 = vst [vmem:[#allocation14_spill] sm:$0xff] %v9441_v63  ;;  %v701_v6 = vcombine.high %v9364_v12, %v9364_v12  ;;  %v9482_v1 = vsel %vm184_vm0, %v127_v23, -inf }
  0x42   :  { %v9406_v50 = vsel %vm2283_vm2, %v397_v45, %v2828_v16  ;;  %v966_v56 = vmul.f32 %v9411_v53, %v9306_v27  ;;  %v965_v57 = vmul.f32 %v9411_v53, %v9311_v28  ;;  %v9436_v28 = vld [vmem:[%s15559_s11] sm:$0xff]  ;;  %v1319_v16 = vrot.slane %v9448_v10, %v9441_v63 }
  0x43   :  { %15557 = vst [vmem:[#allocation12_spill] sm:$0xff] %v9406_v50  ;;  %v451_v14 = vmax.f32 %v449_v44, %v450_v47  ;;  %v982_v61 = vmul.f32 %v9425_v58, %v141_v5  ;;  %v1220_v62 = vrot.slane %v9436_v28, %v9337_v46  ;;  %v1231_v5 = vrot.slane %v9436_v28, %v9441_v63  ;;  %v8439_v44 = vld [vmem:[%s15552_s7 + $0x210] sm:$0xff]  ;;  %v8438_v47 = vld [vmem:[%s15552_s7 + $0x208] sm:$0xff] }
  0x44   :  { %1077 = vadd.xlane.f32.xlu1 %v1076_v7  ;;  %1074 = vadd.xlane.f32.xlu0 %v1073_v40  ;;  %v1040_v59 = vsel %vm184_vm0, %v966_v56, 0.0  ;;  %v1037_v60 = vsel %vm184_vm0, %v965_v57, 0.0  ;;  %v9490_v32 = vrot.slane %v701_v6, %v9337_v46  ;;  %v9501_v7 = vsub.s32 2, %v9301_v26  ;;  %v8456_v56 = vld [vmem:[%s15552_s7 + $0x298] sm:$0xff]  ;;  %v8455_v57 = vld [vmem:[%s15552_s7 + $0x290] sm:$0xff] }
  0x45   :  { %v452_v52 = vrot.slane %v451_v14, 1  ;;  %v1088_v27 = vsel %vm184_vm0, %v982_v61, 0.0  ;;  %v9511_v43 = vsel %vm184_vm0, %v8437_v41, -inf  ;;  %v9518_v45 = vsel %vm184_vm0, %v8439_v44, -inf }
  0x46   :  { %15561 = vst [vmem:[#allocation15_spill] sm:$0xff] %v9501_v7  ;;  %v1242_v8 = vrot.slane %v9436_v28, %v9501_v7  ;;  %v1330_v40 = vrot.slane %v9448_v10, %v9501_v7  ;;  %v9560_v61 = vsel %vm184_vm0, %v8455_v57, -inf  ;;  %v654_v6 = vcombine.high %v9321_v37, %v9321_v37  ;;  %v129_v37 = vld [vmem:[%s15552_s7 + $0x48] sm:$0xff] }
  0x47   :  { %v453_v15 = vmax.f32 %v451_v14, %v452_v52  ;;  %v8453_v52 = vld [vmem:[%s15552_s7 + $0x280] sm:$0xff] }
  0x48   :  { %1083 = vadd.xlane.f32.xlu1 %v1082_v48  ;;  %1080 = vadd.xlane.f32.xlu0 %v1079_v49  ;;  %v8440_v48 = vld [vmem:[%s15552_s7 + $0x218] sm:$0xff]  ;;  %v9528_v49 = vsel %vm184_vm0, %v8438_v47, -inf  ;;  %v9545_v54 = vsel %vm184_vm0, %v8453_v52, -inf }
  0x49   :  { %v9416_v55 = vsel %vm2283_vm2, %v453_v15, %v2835_v21  ;;  %v142_v21 = vld [vmem:[%s15552_s7 + $0xb0] sm:$0xff]  ;;  %v9531_v14 = vsel %vm184_vm0, %v8440_v48, -inf  ;;  %v9542_v15 = vsel %vm184_vm0, %v8454_v51, -inf }
  0x4a   :  { %15558 = vst [vmem:[#allocation13_spill] sm:$0xff] %v9416_v55  ;;  %v983_v0 = vmul.f32 %v9490_v32, %v142_v21 }
  0x4c   :  { %201 = vmax.xlane.f32.xlu1 %v9325_v38  ;;  %198 = vmax.xlane.f32.xlu0 %v9329_v39  ;;  %v981_v38 = vmul.f32 %v9425_v58, %v140_v20  ;;  %v652_v20 = vcombine.high %v9354_v4, %v9354_v4  ;;  %v143_v4 = vld [vmem:[%s15552_s7 + $0xb8] sm:$0xff]  ;;  %v1091_v35 = vsel %vm184_vm0, %v983_v0, 0.0 }
  0x4d   :  { %v9485_v25 = vsel %vm184_vm0, %v143_v4, -inf  ;;  %v984_v33 = vmul.f32 %v9490_v32, %v143_v4 }
  0x4e   :  { %v1085_v39 = vsel %vm184_vm0, %v981_v38, 0.0  ;;  %v9473_v24 = vrot.slane %v652_v20, %v9337_v46  ;;  %v3448_v38 = vmul.f32 %v8437_v41, %v9351_v3  ;;  %v3464_v20 = vmul.f32 %v8453_v52, %v9361_v11 }
  0x4f   :  { %v1094_v34 = vsel %vm184_vm0, %v984_v33, 0.0 }
  0x50   :  { %249 = vmax.xlane.f32.xlu1 %v248_v22  ;;  %246 = vmax.xlane.f32.xlu0 %v245_v31  ;;  %v9467_v22 = vsel %vm184_vm0, %v142_v21, -inf  ;;  %v968_v29 = vmul.f32 %v9473_v24, %v127_v23  ;;  %v967_v31 = vmul.f32 %v9473_v24, %v126_v17  ;;  %v3467_v23 = vmul.f32 %v8456_v56, %v9392_v30 }
  0x51   :  { %v3560_v4 = vsel %vm184_vm0, %v3464_v20, 0.0 }
  0x52   :  { %v1046_v12 = vsel %vm184_vm0, %v968_v29, 0.0  ;;  %v1043_v2 = vsel %vm184_vm0, %v967_v31, 0.0  ;;  %v9590_v31 = vrot.slane %v654_v6, %v9332_v42 }
  0x54   :  { %1041 = vadd.xlane.f32.xlu1 %v1040_v59  ;;  %1038 = vadd.xlane.f32.xlu0 %v1037_v60  ;;  %v9556_v59 = vsel %vm184_vm0, %v8456_v56, -inf  ;;  %v3449_v60 = vmul.f32 %v8438_v47, %v9351_v3  ;;  %v605_v3 = vcombine.high %v9316_v36, %v9316_v36  ;;  %v3466_v36 = vmul.f32 %v8455_v57, %v9392_v30  ;;  %v128_v30 = vld [vmem:[%s15552_s7 + $0x40] sm:$0xff] }
  0x55   :  { %v9608_v0 = vrot.slane %v9590_v31, %v9332_v42 }
  0x58   :  { %1089 = vadd.xlane.f32.xlu1 %v1088_v27  ;;  %1086 = vadd.xlane.f32.xlu0 %v1085_v39  ;;  %v3515_v27 = vsel %vm184_vm0, %v3449_v60, 0.0  ;;  %v3451_v39 = vmul.f32 %v8440_v48, %v9373_v19 }
  0x69   :  { %1226 = vbcast.lane.b32.xlu1 %v1220_v62, 264 }
  0x6d   :  { %1233 = vbcast.lane.b32.xlu1 %v1231_v5, 256 }
  0x6e   :  { %1222 = vbcast.lane.b32.xlu0 %v1220_v62, 256  ;;  %v3512_v62 = vsel %vm184_vm0, %v3448_v38, 0.0 }
  0x71   :  { %1237 = vbcast.lane.b32.xlu1 %v1231_v5, 264  ;;  %v3450_v5 = vmul.f32 %v8439_v44, %v9373_v19  ;;  %v9578_v19 = vrot.slane %v605_v3, %v9332_v42  ;;  %v9627_v44 = vrot.slane %v9608_v0, %v9337_v46 }
  0x72   :  { %1310 = vbcast.lane.b32.xlu0 %v1308_v13, 256 }
  0x73   :  { %v3518_v17 = vsel %vm184_vm0, %v3450_v5, 0.0  ;;  %v9587_v29 = vrot.slane %v9578_v19, %v9332_v42 }
  0x75   :  { %1314 = vbcast.lane.b32.xlu1 %v1308_v13, 264  ;;  %v3521_v13 = vsel %vm184_vm0, %v3451_v39, 0.0  ;;  %v9604_v33 = vrot.slane %v9587_v29, %v9337_v46 }
  0x76   :  { %1321 = vbcast.lane.b32.xlu0 %v1319_v16, 256 }
  0x77   :  { %v970_v41 = vmul.f32 %v9604_v33, %v129_v37  ;;  %v969_v48 = vmul.f32 %v9604_v33, %v128_v30 }
  0x79   :  { %1325 = vbcast.lane.b32.xlu1 %v1319_v16, 264  ;;  %v3465_v16 = vmul.f32 %v8454_v51, %v9361_v11  ;;  %v3569_v11 = vsel %vm184_vm0, %v3467_v23, 0.0  ;;  %v1052_v51 = vsel %vm184_vm0, %v970_v41, 0.0  ;;  %v1049_v56 = vsel %vm184_vm0, %v969_v48, 0.0  ;;  %v8458_v48 = vld [vmem:[%s15552_s7 + $0x2a8] sm:$0xff] }
  0x7b   :  { %v3563_v21 = vsel %vm184_vm0, %v3465_v16, 0.0 }
  0x95   :  { %204 = vmax.xlane.f32.xlu0 %v9458_v18 }
  0x99   :  { %252 = vmax.xlane.f32.xlu0 %v9467_v22 }
  0x9d   :  { %207 = vmax.xlane.f32.xlu1 %v9482_v1  ;;  %255 = vmax.xlane.f32.xlu0 %v9485_v25 }
  0xa1   :  { %1047 = vadd.xlane.f32.xlu1 %v1046_v12  ;;  %1044 = vadd.xlane.f32.xlu0 %v1043_v2  ;;  %v3566_v12 = vsel %vm184_vm0, %v3466_v36, 0.0  ;;  %v9600_v2 = vsel %vm184_vm0, %v129_v37, -inf  ;;  %v8457_v37 = vld [vmem:[%s15552_s7 + $0x2a0] sm:$0xff] }
  0xa5   :  { %1095 = vadd.xlane.f32.xlu1 %v1094_v34  ;;  %1092 = vadd.xlane.f32.xlu0 %v1091_v35  ;;  %v9611_v34 = vsel %vm184_vm0, %v128_v30, -inf  ;;  %v145_v35 = vld [vmem:[%s15552_s7 + $0xc8] sm:$0xff]  ;;  %v9681_v30 = vsel %vm184_vm0, %v8457_v37, -inf }
  0xa6   :  { %v986_v52 = vmul.f32 %v9627_v44, %v145_v35  ;;  %15574 = vst [vmem:[#allocation28_spill] sm:$0xff] %v9681_v30 }
  0xa8   :  { %v1100_v60 = vsel %vm184_vm0, %v986_v52, 0.0 }
  0xb6   :  { %1248 = vbcast.lane.b32.xlu1 %v1242_v8, 264 }
  0xb9   :  { %v9648_v5 = vpop.xlane.xlu1 %192 }
  0xba   :  { %1332 = vbcast.lane.b32.xlu1 %v1330_v40, 256  ;;  %15563 = vst [vmem:[#allocation17_spill] sm:$0xff] %v9648_v5 }
  0xbb   :  { %1244 = vbcast.lane.b32.xlu0 %v1242_v8, 256  ;;  %v144_v8 = vld [vmem:[%s15552_s7 + $0xc0] sm:$0xff] }
  0xbc   :  { %v9630_v47 = vsel %vm184_vm0, %v144_v8, -inf  ;;  %v985_v57 = vmul.f32 %v9627_v44, %v144_v8 }
  0xbd   :  { %v9652_v16 = vpop.xlane.xlu1 %195 }
  0xbe   :  { %1336 = vbcast.lane.b32.xlu1 %v1330_v40, 264  ;;  %v9622_v40 = vsel %vm184_vm0, %v145_v35, -inf  ;;  %v1097_v38 = vsel %vm184_vm0, %v985_v57, 0.0  ;;  %15565 = vst [vmem:[#allocation19_spill] sm:$0xff] %v9652_v16  ;;  %v8442_v35 = vld [vmem:[%s15552_s7 + $0x228] sm:$0xff] }
  0xbf   :  { %v9690_v41 = vsel %vm184_vm0, %v8442_v35, -inf }
  0xda   :  { %3033 = vmax.xlane.f32.xlu0 %v9511_v43 }
  0xde   :  { %3039 = vmax.xlane.f32.xlu0 %v9518_v45 }
  0xe2   :  { %3036 = vmax.xlane.f32.xlu1 %v9528_v49  ;;  %3042 = vmax.xlane.f32.xlu0 %v9531_v14 }
  0xe6   :  { %3084 = vmax.xlane.f32.xlu1 %v9542_v15  ;;  %3081 = vmax.xlane.f32.xlu0 %v9545_v54 }
  0xea   :  { %3090 = vmax.xlane.f32.xlu1 %v9556_v59  ;;  %3087 = vmax.xlane.f32.xlu0 %v9560_v61 }
  0xee   :  { %3516 = vadd.xlane.f32.xlu1 %v3515_v27  ;;  %3513 = vadd.xlane.f32.xlu0 %v3512_v62  ;;  %v9642_v27 = vsub.s32 3, %v9301_v26 }
  0xf0   :  { %15562 = vst [vmem:[#allocation16_spill] sm:$0xff] %v9642_v27  ;;  %v1253_v39 = vrot.slane %v9436_v28, %v9642_v27  ;;  %v1341_v62 = vrot.slane %v9448_v10, %v9642_v27 }
  0xf2   :  { %3522 = vadd.xlane.f32.xlu1 %v3521_v13  ;;  %3519 = vadd.xlane.f32.xlu0 %v3518_v17  ;;  %v9650_v13 = vpop.xlane.xlu0 %186  ;;  %v9656_v17 = vpop.xlane.xlu1 %237 }
  0xf3   :  { %15564 = vst [vmem:[#allocation18_spill] sm:$0xff] %v9650_v13  ;;  %15567 = vst [vmem:[#allocation21_spill] sm:$0xff] %v9656_v17  ;;  %v169_v13 = vld [vmem:[%s15552_s7 + $0x188] sm:$0xff] }
  0xf6   :  { %3564 = vadd.xlane.f32.xlu1 %v3563_v21  ;;  %3561 = vadd.xlane.f32.xlu0 %v3560_v4  ;;  %v9654_v3 = vpop.xlane.xlu0 %189  ;;  %v9660_v21 = vpop.xlane.xlu1 %243  ;;  %v8441_v4 = vld [vmem:[%s15552_s7 + $0x220] sm:$0xff] }
  0xf7   :  { %15566 = vst [vmem:[#allocation20_spill] sm:$0xff] %v9654_v3  ;;  %15569 = vst [vmem:[#allocation23_spill] sm:$0xff] %v9660_v21  ;;  %v9670_v36 = vsel %vm184_vm0, %v8441_v4, -inf  ;;  %v3452_v57 = vmul.f32 %v8441_v4, %v9411_v53 }
  0xfa   :  { %3570 = vadd.xlane.f32.xlu1 %v3569_v11  ;;  %3567 = vadd.xlane.f32.xlu0 %v3566_v12  ;;  %v9658_v20 = vpop.xlane.xlu0 %234  ;;  %v9664_v6 = vpop.xlane.xlu1 %1029 }
  0xfb   :  { %15568 = vst [vmem:[#allocation22_spill] sm:$0xff] %v9658_v20  ;;  %15571 = vst [vmem:[#allocation25_spill] sm:$0xff] %v9664_v6 }
  0xfe   :  { %213 = vmax.xlane.f32.xlu1 %v9600_v2  ;;  %210 = vmax.xlane.f32.xlu0 %v9611_v34  ;;  %v9662_v23 = vpop.xlane.xlu0 %240  ;;  %v9674_v12 = vpop.xlane.xlu1 %1035 }
  0xff   :  { %15570 = vst [vmem:[#allocation24_spill] sm:$0xff] %v9662_v23  ;;  %15573 = vst [vmem:[#allocation27_spill] sm:$0xff] %v9674_v12  ;;  %v670_v12 = vcombine.high %v9590_v31, %v9590_v31  ;;  %v9793_v31 = vld [vmem:[%s15554_s4 + $0x10] sm:$0xff] }
 0x100   :  { %v710_v23 = vrot.slane %v9793_v31, %v9332_v42 }
 0x102   :  { %261 = vmax.xlane.f32.xlu1 %v9622_v40  ;;  %258 = vmax.xlane.f32.xlu0 %v9630_v47  ;;  %v9672_v11 = vpop.xlane.xlu0 %1026  ;;  %v9696_v52 = vpop.xlane.xlu1 %1077  ;;  %v718_v55 = vcombine.high %v710_v23, %v710_v23 }
 0x103   :  { %15572 = vst [vmem:[#allocation26_spill] sm:$0xff] %v9672_v11  ;;  %15576 = vst [vmem:[#allocation30_spill] sm:$0xff] %v9696_v52  ;;  %v621_v52 = vcombine.high %v9578_v19, %v9578_v19 }
 0x105   :  { %v9780_v6 = vrot.slane %v621_v52, %v9332_v42  ;;  %v9800_v52 = vrot.slane %v670_v12, %v9332_v42  ;;  %v171_v12 = vld [vmem:[%s15552_s7 + $0x198] sm:$0xff] }
 0x106   :  { %1053 = vadd.xlane.f32.xlu1 %v1052_v51  ;;  %1050 = vadd.xlane.f32.xlu0 %v1049_v56  ;;  %v9686_v8 = vpop.xlane.xlu0 %1032  ;;  %v3453_v51 = vmul.f32 %v8442_v35, %v9411_v53  ;;  %v9699_v56 = vsel %vm184_vm0, %v8458_v48, -inf  ;;  %v9710_v9 = vpop.xlane.xlu1 %1083  ;;  %v9832_v3 = vsel %vm184_vm0, %v171_v12, -inf }
 0x107   :  { %15575 = vst [vmem:[#allocation29_spill] sm:$0xff] %v9686_v8  ;;  %15578 = vst [vmem:[#allocation32_spill] sm:$0xff] %v9710_v9  ;;  %v9808_v5 = vrot.slane %v9780_v6, %v9337_v46 }
 0x108   :  { %15597 = vst [vmem:[#allocation51_spill] sm:$0xff] %v9832_v3 }
 0x10a   :  { %1101 = vadd.xlane.f32.xlu1 %v1100_v60  ;;  %1098 = vadd.xlane.f32.xlu0 %v1097_v38  ;;  %v3527_v60 = vsel %vm184_vm0, %v3453_v51, 0.0  ;;  %v3469_v38 = vmul.f32 %v8458_v48, %v9425_v58  ;;  %v9708_v35 = vpop.xlane.xlu0 %1074  ;;  %v131_v51 = vld [vmem:[%s15552_s7 + $0x58] sm:$0xff]  ;;  %v130_v48 = vld [vmem:[%s15552_s7 + $0x50] sm:$0xff] }
 0x10b   :  { %15577 = vst [vmem:[#allocation31_spill] sm:$0xff] %v9708_v35  ;;  %v972_v16 = vmul.f32 %v9808_v5, %v131_v51 }
 0x10c   :  { %v3575_v53 = vsel %vm184_vm0, %v3469_v38, 0.0  ;;  %v147_v38 = vld [vmem:[%s15552_s7 + $0xd8] sm:$0xff] }
 0x11b   :  { %1259 = vbcast.lane.b32.xlu1 %v1253_v39, 264 }
 0x11f   :  { %1343 = vbcast.lane.b32.xlu1 %v1341_v62, 256 }
 0x120   :  { %1255 = vbcast.lane.b32.xlu0 %v1253_v39, 256  ;;  %v3524_v39 = vsel %vm184_vm0, %v3452_v57, 0.0  ;;  %v9725_v57 = vpop.xlane.xlu1 %201 }
 0x121   :  { %15581 = vst [vmem:[#allocation35_spill] sm:$0xff] %v9725_v57 }
 0x123   :  { %1347 = vbcast.lane.b32.xlu1 %v1341_v62, 264  ;;  %v3468_v62 = vmul.f32 %v8457_v37, %v9425_v58  ;;  %v9720_v58 = vpop.xlane.xlu0 %1080  ;;  %v9723_v37 = vsel %vm184_vm0, %v131_v51, -inf }
 0x124   :  { %15579 = vst [vmem:[#allocation33_spill] sm:$0xff] %v9720_v58  ;;  %15580 = vst [vmem:[#allocation34_spill] sm:$0xff] %v9723_v37  ;;  %v152_v58 = vld [vmem:[%s15552_s7 + $0x100] sm:$0xff]  ;;  %v9752_v9 = vpop.xlane.xlu1 %249 }
 0x125   :  { %v3572_v4 = vsel %vm184_vm0, %v3468_v62, 0.0  ;;  %v9739_v62 = vsel %vm184_vm0, %v147_v38, -inf  ;;  %15586 = vst [vmem:[#allocation40_spill] sm:$0xff] %v9752_v9  ;;  %v9762_v8 = vsel %vm184_vm0, %v152_v58, -inf  ;;  %v154_v9 = vld [vmem:[%s15552_s7 + $0x110] sm:$0xff] }
 0x126   :  { %15583 = vst [vmem:[#allocation37_spill] sm:$0xff] %v9739_v62  ;;  %15588 = vst [vmem:[#allocation42_spill] sm:$0xff] %v9762_v8  ;;  %v9785_v17 = vsel %vm184_vm0, %v154_v9, -inf }
 0x127   :  { %v9747_v57 = vpop.xlane.xlu0 %198  ;;  %15592 = vst [vmem:[#allocation46_spill] sm:$0xff] %v9785_v17 }
 0x128   :  { %15585 = vst [vmem:[#allocation39_spill] sm:$0xff] %v9747_v57  ;;  %v155_v57 = vld [vmem:[%s15552_s7 + $0x118] sm:$0xff]  ;;  %v9782_v20 = vpop.xlane.xlu1 %1041 }
 0x129   :  { %v9777_v19 = vsel %vm184_vm0, %v155_v57, -inf  ;;  %15591 = vst [vmem:[#allocation45_spill] sm:$0xff] %v9782_v20  ;;  %v9804_v20 = vsel %vm184_vm0, %v169_v13, -inf }
 0x12a   :  { %15590 = vst [vmem:[#allocation44_spill] sm:$0xff] %v9777_v19  ;;  %15593 = vst [vmem:[#allocation47_spill] sm:$0xff] %v9804_v20 }
 0x12b   :  { %v9773_v11 = vpop.xlane.xlu0 %246 }
 0x12c   :  { %15589 = vst [vmem:[#allocation43_spill] sm:$0xff] %v9773_v11  ;;  %v168_v11 = vld [vmem:[%s15552_s7 + $0x180] sm:$0xff] }
 0x12d   :  { %v9813_v21 = vsel %vm184_vm0, %v168_v11, -inf }
 0x12e   :  { %15594 = vst [vmem:[#allocation48_spill] sm:$0xff] %v9813_v21 }
 0x13f   :  { %3045 = vmax.xlane.f32.xlu0 %v9670_v36 }
 0x143   :  { %3093 = vmax.xlane.f32.xlu0 %v9681_v30 }
 0x147   :  { %3048 = vmax.xlane.f32.xlu1 %v9690_v41  ;;  %3096 = vmax.xlane.f32.xlu0 %v9699_v56 }
 0x14b   :  { %3528 = vadd.xlane.f32.xlu1 %v3527_v60  ;;  %3525 = vadd.xlane.f32.xlu0 %v3524_v39  ;;  %v9728_v60 = vsel %vm184_vm0, %v130_v48, -inf  ;;  %v146_v39 = vld [vmem:[%s15552_s7 + $0xd0] sm:$0xff] }
 0x14c   :  { %15582 = vst [vmem:[#allocation36_spill] sm:$0xff] %v9728_v60 }
 0x14f   :  { %3576 = vadd.xlane.f32.xlu1 %v3575_v53  ;;  %3573 = vadd.xlane.f32.xlu0 %v3572_v4  ;;  %v9742_v53 = vsel %vm184_vm0, %v146_v39, -inf  ;;  %v153_v4 = vld [vmem:[%s15552_s7 + $0x108] sm:$0xff] }
 0x150   :  { %15584 = vst [vmem:[#allocation38_spill] sm:$0xff] %v9742_v53  ;;  %v9757_v35 = vsel %vm184_vm0, %v153_v4, -inf }
 0x151   :  { %15587 = vst [vmem:[#allocation41_spill] sm:$0xff] %v9757_v35 }
 0x153   :  { %219 = vmax.xlane.f32.xlu1 %v9723_v37  ;;  %216 = vmax.xlane.f32.xlu0 %v9728_v60 }
 0x157   :  { %267 = vmax.xlane.f32.xlu1 %v9739_v62  ;;  %264 = vmax.xlane.f32.xlu0 %v9742_v53 }
 0x15b   :  { %285 = vmax.xlane.f32.xlu1 %v9757_v35  ;;  %282 = vmax.xlane.f32.xlu0 %v9762_v8  ;;  %v9823_v8 = vpop.xlane.xlu1 %1089  ;;  %v9828_v35 = vrot.slane %v9800_v52, %v9337_v46 }
 0x15c   :  { %15596 = vst [vmem:[#allocation50_spill] sm:$0xff] %v9823_v8  ;;  %v971_v8 = vmul.f32 %v9808_v5, %v130_v48  ;;  %v9858_v48 = vrot.slane %v718_v55, %v9332_v42 }
 0x15f   :  { %291 = vmax.xlane.f32.xlu1 %v9777_v19  ;;  %288 = vmax.xlane.f32.xlu0 %v9785_v17  ;;  %v9818_v19 = vpop.xlane.xlu0 %1038  ;;  %v170_v17 = vld [vmem:[%s15552_s7 + $0x190] sm:$0xff]  ;;  %v9862_v60 = vpop.permute.xlu1 %1226 }
 0x160   :  { %15595 = vst [vmem:[#allocation49_spill] sm:$0xff] %v9818_v19  ;;  %v9836_v19 = vrot.slane %v710_v23, %v9332_v42  ;;  %v9839_v50 = vsel %vm184_vm0, %v170_v17, -inf  ;;  %v1058_v23 = vsel %vm184_vm0, %v972_v16, 0.0  ;;  %15600 = vst [vmem:[#allocation54_spill] sm:$0xff] %v9862_v60 }
 0x161   :  { %15598 = vst [vmem:[#allocation52_spill] sm:$0xff] %v9839_v50 }
 0x162   :  { %v9855_v51 = vrot.slane %v9836_v19, %v9337_v46 }
 0x163   :  { %333 = vmax.xlane.f32.xlu1 %v9804_v20  ;;  %330 = vmax.xlane.f32.xlu0 %v9813_v21  ;;  %v9845_v20 = vld [vmem:[%s15554_s4 + $0x18] sm:$0xff]  ;;  %v988_v21 = vmul.f32 %v9828_v35, %v147_v38  ;;  %v9849_v53 = vpop.xlane.xlu0 %1086  ;;  %v1055_v38 = vsel %vm184_vm0, %v971_v8, 0.0  ;;  %s8507_s4 = sld [smem:[#allocation3 + $0x2]] }
 0x164   :  { %15599 = vst [vmem:[#allocation53_spill] sm:$0xff] %v9849_v53  ;;  %v759_v62 = vrot.slane %v9845_v20, %v9332_v42  ;;  %v987_v53 = vmul.f32 %v9828_v35, %v146_v39  ;;  %v994_v16 = vmul.f32 %v9855_v51, %v153_v4  ;;  %v993_v8 = vmul.f32 %v9855_v51, %v152_v58  ;;  %v9879_v39 = vpop.permute.xlu1 %1233 }
 0x165   :  { %15601 = vst [vmem:[#allocation55_spill] sm:$0xff] %v9879_v39 }
 0x166   :  { %v9873_v55 = vrot.slane %v759_v62, %v9332_v42  ;;  %v767_v37 = vcombine.high %v759_v62, %v759_v62  ;;  %v1103_v60 = vsel %vm184_vm0, %v987_v53, 0.0  ;;  %v1121_v53 = vsel %vm184_vm0, %v993_v8, 0.0 }
 0x167   :  { %339 = vmax.xlane.f32.xlu1 %v9832_v3  ;;  %336 = vmax.xlane.f32.xlu0 %v9839_v50  ;;  %v1106_v50 = vsel %vm184_vm0, %v988_v21, 0.0  ;;  %v9870_v3 = vrot.slane %v9858_v48, %v9337_v46  ;;  %v9877_v30 = vpop.permute.xlu0 %1222  ;;  %v1124_v21 = vsel %vm184_vm0, %v994_v16, 0.0 }
 0x168   :  { %v9888_v62 = vrot.slane %v767_v37, %v9332_v42  ;;  %v9900_v16 = vpop.permute.xlu1 %1237 }
 0x169   :  { %v996_v4 = vmul.f32 %v9870_v3, %v155_v57  ;;  %v995_v58 = vmul.f32 %v9870_v3, %v154_v9 }
 0x16a   :  { %v9898_v57 = vrot.slane %v9888_v62, %v9337_v46 }
 0x16b   :  { %1059 = vadd.xlane.f32.xlu1 %v1058_v23  ;;  %1056 = vadd.xlane.f32.xlu0 %v1055_v38  ;;  %v9885_v23 = vrot.slane %v9873_v55, %v9337_v46  ;;  %v9892_v38 = vpop.permute.xlu0 %1310  ;;  %v1127_v37 = vsel %vm184_vm0, %v995_v58, 0.0 }
 0x16c   :  { %15602 = vst [vmem:[#allocation56_spill] sm:$0xff] %v9892_v38  ;;  %v9910_v38 = vpop.permute.xlu1 %1314 }
 0x16d   :  { %v1009_v8 = vmul.f32 %v9885_v23, %v168_v11  ;;  %15604 = vst [vmem:[#allocation58_spill] sm:$0xff] %v9910_v38  ;;  %v748_v38 = vcombine.high %v9836_v19, %v9836_v19 }
 0x16f   :  { %1107 = vadd.xlane.f32.xlu1 %v1106_v50  ;;  %1104 = vadd.xlane.f32.xlu0 %v1103_v60  ;;  %v1130_v50 = vsel %vm184_vm0, %v996_v4, 0.0  ;;  %v1010_v60 = vmul.f32 %v9885_v23, %v169_v13  ;;  %v1169_v4 = vsel %vm184_vm0, %v1009_v8, 0.0  ;;  %v1011_v13 = vmul.f32 %v9898_v57, %v170_v17 }
 0x170   :  { %v9923_v17 = vsub.s32 4, %v9301_v26 }
 0x171   :  { %v1172_v9 = vsel %vm184_vm0, %v1010_v60, 0.0  ;;  %v1175_v11 = vsel %vm184_vm0, %v1011_v13, 0.0  ;;  %v9916_v60 = vpop.permute.xlu1 %1325 }
 0x172   :  { %15606 = vst [vmem:[#allocation60_spill] sm:$0xff] %v9916_v60  ;;  %15609 = vst [vmem:[#allocation63_spill] sm:$0xff] %v9923_v17  ;;  %v1352_v13 = vrot.slane %v9448_v10, %v9923_v17 }
 0x173   :  { %1125 = vadd.xlane.f32.xlu1 %v1124_v21  ;;  %1122 = vadd.xlane.f32.xlu0 %v1121_v53  ;;  %v1012_v21 = vmul.f32 %v9898_v57, %v171_v12  ;;  %v9908_v53 = vpop.permute.xlu0 %1321 }
 0x174   :  { %15603 = vst [vmem:[#allocation57_spill] sm:$0xff] %v9908_v53 }
 0x175   :  { %v1178_v58 = vsel %vm184_vm0, %v1012_v21, 0.0  ;;  %v1264_v21 = vrot.slane %v9436_v28, %v9923_v17 }
 0x177   :  { %1131 = vadd.xlane.f32.xlu1 %v1130_v50  ;;  %1128 = vadd.xlane.f32.xlu0 %v1127_v37  ;;  %v9914_v50 = vpop.xlane.xlu0 %204  ;;  %v9920_v37 = vpop.xlane.xlu1 %207 }
 0x178   :  { %15605 = vst [vmem:[#allocation59_spill] sm:$0xff] %v9914_v50  ;;  %15608 = vst [vmem:[#allocation62_spill] sm:$0xff] %v9920_v37 }
 0x17b   :  { %1173 = vadd.xlane.f32.xlu1 %v1172_v9  ;;  %1170 = vadd.xlane.f32.xlu0 %v1169_v4  ;;  %v9918_v12 = vpop.xlane.xlu0 %252  ;;  %v9927_v9 = vpop.xlane.xlu1 %1047 }
 0x17c   :  { %15607 = vst [vmem:[#allocation61_spill] sm:$0xff] %v9918_v12  ;;  %15611 = vst [vmem:[#allocation65_spill] sm:$0xff] %v9927_v9 }
 0x17f   :  { %1179 = vadd.xlane.f32.xlu1 %v1178_v58  ;;  %1176 = vadd.xlane.f32.xlu0 %v1175_v11  ;;  %v9925_v8 = vpop.xlane.xlu0 %255  ;;  %v9935_v58 = vpop.xlane.xlu1 %1095 }
 0x180   :  { %15610 = vst [vmem:[#allocation64_spill] sm:$0xff] %v9925_v8  ;;  %15613 = vst [vmem:[#allocation67_spill] sm:$0xff] %v9935_v58 }
 0x183   :  { %v9931_v4 = vpop.xlane.xlu0 %1044  ;;  %v9939_v12 = vpop.permute.xlu1 %1248 }
 0x184   :  { %15612 = vst [vmem:[#allocation66_spill] sm:$0xff] %v9931_v4  ;;  %15615 = vst [vmem:[#allocation69_spill] sm:$0xff] %v9939_v12 }
 0x187   :  { %v9937_v11 = vpop.xlane.xlu0 %1092  ;;  %v9943_v9 = vpop.permute.xlu1 %1332 }
 0x188   :  { %15614 = vst [vmem:[#allocation68_spill] sm:$0xff] %v9937_v11  ;;  %15617 = vst [vmem:[#allocation71_spill] sm:$0xff] %v9943_v9 }
 0x18b   :  { %v9941_v8 = vpop.permute.xlu0 %1244  ;;  %v9947_v4 = vpop.permute.xlu1 %1336 }
 0x18c   :  { %15616 = vst [vmem:[#allocation70_spill] sm:$0xff] %v9941_v8  ;;  %15619 = vst [vmem:[#allocation73_spill] sm:$0xff] %v9947_v4 }
 0x18f   :  { %v9945_v37 = vpop.xlane.xlu0 %3033  ;;  %v9951_v17 = vpop.xlane.xlu1 %3036 }
 0x190   :  { %1270 = vbcast.lane.b32.xlu1 %v1264_v21, 264  ;;  %15618 = vst [vmem:[#allocation72_spill] sm:$0xff] %v9945_v37  ;;  %15621 = vst [vmem:[#allocation75_spill] sm:$0xff] %v9951_v17 }
 0x193   :  { %v9949_v50 = vpop.xlane.xlu0 %3039  ;;  %v9955_v53 = vpop.xlane.xlu1 %3084 }
 0x194   :  { %1354 = vbcast.lane.b32.xlu1 %v1352_v13, 256  ;;  %15620 = vst [vmem:[#allocation74_spill] sm:$0xff] %v9949_v50  ;;  %15623 = vst [vmem:[#allocation77_spill] sm:$0xff] %v9955_v53  ;;  %v8459_v50 = vld [vmem:[%s15552_s7 + $0x2b0] sm:$0xff] }
 0x195   :  { %1266 = vbcast.lane.b32.xlu0 %v1264_v21, 256  ;;  %v8443_v21 = vld [vmem:[%s15552_s7 + $0x230] sm:$0xff]  ;;  %v3470_v60 = vmul.f32 %v8459_v50, %v9490_v32 }
 0x196   :  { %v9963_v11 = vsel %vm184_vm0, %v8443_v21, -inf }
 0x197   :  { %v9953_v58 = vpop.xlane.xlu0 %3042  ;;  %15625 = vst [vmem:[#allocation79_spill] sm:$0xff] %v9963_v11  ;;  %v9965_v37 = vpop.xlane.xlu1 %3090 }
 0x198   :  { %1358 = vbcast.lane.b32.xlu1 %v1352_v13, 264  ;;  %15622 = vst [vmem:[#allocation76_spill] sm:$0xff] %v9953_v58  ;;  %15626 = vst [vmem:[#allocation80_spill] sm:$0xff] %v9965_v37  ;;  %v9972_v58 = vsel %vm184_vm0, %v8459_v50, -inf  ;;  %v8460_v37 = vld [vmem:[%s15552_s7 + $0x2b8] sm:$0xff] }
 0x199   :  { %15627 = vst [vmem:[#allocation81_spill] sm:$0xff] %v9972_v58  ;;  %v9990_v4 = vsel %vm184_vm0, %v8460_v37, -inf  ;;  %v3471_v8 = vmul.f32 %v8460_v37, %v9490_v32  ;;  %v132_v37 = vld [vmem:[%s15552_s7 + $0x60] sm:$0xff] }
 0x19a   :  { %15631 = vst [vmem:[#allocation85_spill] sm:$0xff] %v9990_v4  ;;  %v10019_v50 = vsel %vm184_vm0, %v132_v37, -inf }
 0x19b   :  { %v9960_v13 = vpop.xlane.xlu0 %3081  ;;  %v9979_v17 = vpop.xlane.xlu1 %3516  ;;  %15637 = vst [vmem:[#allocation91_spill] sm:$0xff] %v10019_v50 }
 0x19c   :  { %15624 = vst [vmem:[#allocation78_spill] sm:$0xff] %v9960_v13  ;;  %v8444_v13 = vld [vmem:[%s15552_s7 + $0x238] sm:$0xff]  ;;  %15629 = vst [vmem:[#allocation83_spill] sm:$0xff] %v9979_v17 }
 0x19d   :  { %v9986_v9 = vsel %vm184_vm0, %v8444_v13, -inf }
 0x19e   :  { %15630 = vst [vmem:[#allocation84_spill] sm:$0xff] %v9986_v9 }
 0x19f   :  { %v9974_v53 = vpop.xlane.xlu0 %3087 }
 0x1a0   :  { %15628 = vst [vmem:[#allocation82_spill] sm:$0xff] %v9974_v53  ;;  %v3454_v53 = vmul.f32 %v8443_v21, %v9473_v24  ;;  %v3578_v21 = vsel %vm184_vm0, %v3470_v60, 0.0  ;;  %v149_v60 = vld [vmem:[%s15552_s7 + $0xe8] sm:$0xff] }
 0x1a3   :  { %v9997_v12 = vpop.xlane.xlu0 %3513 }
 0x1a4   :  { %15632 = vst [vmem:[#allocation86_spill] sm:$0xff] %v9997_v12 }
 0x1a7   :  { %v10011_v12 = vpop.xlane.xlu0 %3519 }
 0x1a8   :  { %15634 = vst [vmem:[#allocation88_spill] sm:$0xff] %v10011_v12 }
 0x1b4   :  { %3051 = vmax.xlane.f32.xlu0 %v9963_v11  ;;  %v3455_v11 = vmul.f32 %v8444_v13, %v9473_v24  ;;  %v10001_v13 = vpop.xlane.xlu1 %3522  ;;  %v3581_v24 = vsel %vm184_vm0, %v3471_v8, 0.0  ;;  %v10030_v8 = vsel %vm184_vm0, %v149_v60, -inf }
 0x1b5   :  { %15633 = vst [vmem:[#allocation87_spill] sm:$0xff] %v10001_v13  ;;  %15638 = vst [vmem:[#allocation92_spill] sm:$0xff] %v10030_v8  ;;  %v156_v13 = vld [vmem:[%s15552_s7 + $0x120] sm:$0xff] }
 0x1b6   :  { %v3533_v17 = vsel %vm184_vm0, %v3455_v11, 0.0  ;;  %v133_v11 = vld [vmem:[%s15552_s7 + $0x68] sm:$0xff] }
 0x1b8   :  { %3099 = vmax.xlane.f32.xlu0 %v9972_v58  ;;  %v3530_v58 = vsel %vm184_vm0, %v3454_v53, 0.0  ;;  %v10013_v32 = vpop.xlane.xlu1 %3564  ;;  %v10016_v53 = vsel %vm184_vm0, %v133_v11, -inf }
 0x1b9   :  { %15635 = vst [vmem:[#allocation89_spill] sm:$0xff] %v10013_v32  ;;  %15636 = vst [vmem:[#allocation90_spill] sm:$0xff] %v10016_v53  ;;  %v157_v32 = vld [vmem:[%s15552_s7 + $0x128] sm:$0xff] }
 0x1bc   :  { %3054 = vmax.xlane.f32.xlu1 %v9986_v9  ;;  %3102 = vmax.xlane.f32.xlu0 %v9990_v4  ;;  %v10042_v12 = vpop.xlane.xlu1 %3570 }
 0x1bd   :  { %15641 = vst [vmem:[#allocation95_spill] sm:$0xff] %v10042_v12  ;;  %v173_v12 = vld [vmem:[%s15552_s7 + $0x1a8] sm:$0xff] }
 0x1c0   :  { %3534 = vadd.xlane.f32.xlu1 %v3533_v17  ;;  %3531 = vadd.xlane.f32.xlu0 %v3530_v58  ;;  %v148_v17 = vld [vmem:[%s15552_s7 + $0xe0] sm:$0xff]  ;;  %v651_v58 = vcombine.high %v9587_v29, %v9587_v29  ;;  %v10050_v29 = vsel %vm184_vm0, %v157_v32, -inf }
 0x1c1   :  { %15642 = vst [vmem:[#allocation96_spill] sm:$0xff] %v10050_v29 }
 0x1c4   :  { %3582 = vadd.xlane.f32.xlu1 %v3581_v24  ;;  %3579 = vadd.xlane.f32.xlu0 %v3578_v21  ;;  %v10034_v24 = vpop.xlane.xlu0 %3561  ;;  %v10037_v21 = vsel %vm184_vm0, %v148_v17, -inf }
 0x1c5   :  { %15639 = vst [vmem:[#allocation93_spill] sm:$0xff] %v10034_v24  ;;  %15640 = vst [vmem:[#allocation94_spill] sm:$0xff] %v10037_v21  ;;  %v10053_v24 = vrot.slane %v651_v58, %v9337_v46  ;;  %v10069_v58 = vpop.xlane.xlu1 %213 }
 0x1c6   :  { %15646 = vst [vmem:[#allocation100_spill] sm:$0xff] %v10069_v58 }
 0x1c7   :  { %15643 = vst [vmem:[#allocation97_spill] sm:$0xff] %v10053_v24  ;;  %v974_v4 = vmul.f32 %v10053_v24, %v133_v11  ;;  %v10090_v11 = vrot.slane %v748_v38, %v9337_v46 }
 0x1c8   :  { %225 = vmax.xlane.f32.xlu1 %v10016_v53  ;;  %222 = vmax.xlane.f32.xlu0 %v10019_v50  ;;  %v700_v50 = vcombine.high %v9608_v0, %v9608_v0  ;;  %v10058_v53 = vsel %vm184_vm0, %v156_v13, -inf  ;;  %v10073_v0 = vsel %vm184_vm0, %v173_v12, -inf }
 0x1c9   :  { %15644 = vst [vmem:[#allocation98_spill] sm:$0xff] %v10058_v53  ;;  %15647 = vst [vmem:[#allocation101_spill] sm:$0xff] %v10073_v0  ;;  %v1064_v58 = vsel %vm184_vm0, %v974_v4, 0.0 }
 0x1ca   :  { %v10077_v9 = vrot.slane %v700_v50, %v9337_v46  ;;  %v797_v50 = vcombine.high %v9873_v55, %v9873_v55  ;;  %v997_v55 = vmul.f32 %v10090_v11, %v156_v13 }
 0x1cc   :  { %273 = vmax.xlane.f32.xlu1 %v10030_v8  ;;  %270 = vmax.xlane.f32.xlu0 %v10037_v21  ;;  %v172_v21 = vld [vmem:[%s15552_s7 + $0x1a0] sm:$0xff]  ;;  %v10066_v8 = vpop.xlane.xlu0 %3567  ;;  %v10103_v38 = vrot.slane %v797_v50, %v9337_v46 }
 0x1cd   :  { %15645 = vst [vmem:[#allocation99_spill] sm:$0xff] %v10066_v8  ;;  %v10082_v39 = vsel %vm184_vm0, %v172_v21, -inf  ;;  %v973_v8 = vmul.f32 %v10053_v24, %v132_v37  ;;  %v989_v37 = vmul.f32 %v10077_v9, %v148_v17  ;;  %v10098_v24 = vpop.xlane.xlu1 %261 }
 0x1ce   :  { %15648 = vst [vmem:[#allocation102_spill] sm:$0xff] %v10082_v39  ;;  %15650 = vst [vmem:[#allocation104_spill] sm:$0xff] %v10098_v24 }
 0x1d0   :  { %297 = vmax.xlane.f32.xlu1 %v10050_v29  ;;  %294 = vmax.xlane.f32.xlu0 %v10058_v53  ;;  %v990_v53 = vmul.f32 %v10077_v9, %v149_v60  ;;  %v10094_v19 = vpop.xlane.xlu0 %210  ;;  %v1061_v29 = vsel %vm184_vm0, %v973_v8, 0.0  ;;  %v998_v60 = vmul.f32 %v10090_v11, %v157_v32  ;;  %v1013_v32 = vmul.f32 %v10103_v38, %v172_v21 }
 0x1d1   :  { %15649 = vst [vmem:[#allocation103_spill] sm:$0xff] %v10094_v19  ;;  %v10109_v8 = vpop.xlane.xlu1 %1053 }
 0x1d2   :  { %v1112_v4 = vsel %vm184_vm0, %v990_v53, 0.0  ;;  %15652 = vst [vmem:[#allocation106_spill] sm:$0xff] %v10109_v8  ;;  %v1136_v17 = vsel %vm184_vm0, %v998_v60, 0.0  ;;  %v1133_v53 = vsel %vm184_vm0, %v997_v55, 0.0  ;;  %v1181_v13 = vsel %vm184_vm0, %v1013_v32, 0.0 }
 0x1d4   :  { %345 = vmax.xlane.f32.xlu1 %v10073_v0  ;;  %342 = vmax.xlane.f32.xlu0 %v10082_v39  ;;  %v1109_v39 = vsel %vm184_vm0, %v989_v37, 0.0  ;;  %v10107_v19 = vpop.xlane.xlu0 %258 }
 0x1d5   :  { %15651 = vst [vmem:[#allocation105_spill] sm:$0xff] %v10107_v19  ;;  %v10119_v37 = vpop.xlane.xlu1 %1101 }
 0x1d6   :  { %15654 = vst [vmem:[#allocation108_spill] sm:$0xff] %v10119_v37 }
 0x1d8   :  { %1065 = vadd.xlane.f32.xlu1 %v1064_v58  ;;  %1062 = vadd.xlane.f32.xlu0 %v1061_v29  ;;  %v1014_v29 = vmul.f32 %v10103_v38, %v173_v12  ;;  %v10116_v50 = vpop.xlane.xlu0 %1050  ;;  %v10126_v12 = vsub.s32 5, %v9301_v26 }
 0x1d9   :  { %15653 = vst [vmem:[#allocation107_spill] sm:$0xff] %v10116_v50 }
 0x1da   :  { %v1184_v58 = vsel %vm184_vm0, %v1014_v29, 0.0  ;;  %15656 = vst [vmem:[#allocation110_spill] sm:$0xff] %v10126_v12  ;;  %v1275_v55 = vrot.slane %v9436_v28, %v10126_v12 }
 0x1dc   :  { %1113 = vadd.xlane.f32.xlu1 %v1112_v4  ;;  %1110 = vadd.xlane.f32.xlu0 %v1109_v39  ;;  %v10121_v39 = vpop.xlane.xlu0 %1098  ;;  %v10123_v4 = vpop.permute.xlu1 %1259 }
 0x1dd   :  { %15655 = vst [vmem:[#allocation109_spill] sm:$0xff] %v10121_v39 }
 0x1e0   :  { %1137 = vadd.xlane.f32.xlu1 %v1136_v17  ;;  %1134 = vadd.xlane.f32.xlu0 %v1133_v53  ;;  %v10128_v21 = vpop.permute.xlu0 %1255  ;;  %v10130_v60 = vpop.permute.xlu1 %1343  ;;  %v1363_v53 = vrot.slane %v9448_v10, %v10126_v12 }
 0x1e1   :  { %15657 = vst [vmem:[#allocation111_spill] sm:$0xff] %v10130_v60 }
 0x1e4   :  { %1185 = vadd.xlane.f32.xlu1 %v1184_v58  ;;  %1182 = vadd.xlane.f32.xlu0 %v1181_v13  ;;  %v10134_v17 = vpop.xlane.xlu0 %3045  ;;  %v10136_v29 = vpop.permute.xlu1 %1347  ;;  %v10145_v58 = vld [vmem:[%s15559_s11 + $0x10] sm:$0xff] }
 0x1e5   :  { %15658 = vst [vmem:[#allocation112_spill] sm:$0xff] %v10134_v17  ;;  %v1396_v28 = vrot.slane %v10145_v58, %v9337_v46  ;;  %v1407_v10 = vrot.slane %v10145_v58, %v9441_v63 }
 0x1e8   :  { %v10140_v32 = vpop.xlane.xlu0 %3093  ;;  %v10147_v13 = vpop.xlane.xlu1 %3048 }
 0x1e9   :  { %15659 = vst [vmem:[#allocation113_spill] sm:$0xff] %v10140_v32  ;;  %15660 = vst [vmem:[#allocation114_spill] sm:$0xff] %v10147_v13  ;;  %v10160_v32 = vld [vmem:[%s15559_s11 + $0x18] sm:$0xff] }
 0x1ec   :  { %v10151_v17 = vpop.xlane.xlu0 %3096  ;;  %v10153_v39 = vpop.xlane.xlu1 %3528 }
 0x1ed   :  { %15661 = vst [vmem:[#allocation115_spill] sm:$0xff] %v10151_v17  ;;  %15662 = vst [vmem:[#allocation116_spill] sm:$0xff] %v10153_v39  ;;  %v1495_v39 = vrot.slane %v10160_v32, %v9441_v63 }
 0x1f0   :  { %v10164_v13 = vpop.xlane.xlu0 %3525 }
 0x1f1   :  { %15663 = vst [vmem:[#allocation117_spill] sm:$0xff] %v10164_v13 }
 0x1f4   :  { %v10170_v17 = vpop.xlane.xlu0 %3573 }
 0x1f5   :  { %1281 = vbcast.lane.b32.xlu1 %v1275_v55, 264  ;;  %15665 = vst [vmem:[#allocation119_spill] sm:$0xff] %v10170_v17 }
 0x1f9   :  { %1365 = vbcast.lane.b32.xlu1 %v1363_v53, 256 }
 0x1fa   :  { %1277 = vbcast.lane.b32.xlu0 %v1275_v55, 256  ;;  %v1484_v55 = vrot.slane %v10160_v32, %v9337_v46 }
 0x1fd   :  { %1369 = vbcast.lane.b32.xlu1 %v1363_v53, 264  ;;  %v10166_v53 = vpop.xlane.xlu1 %3576 }
 0x1fe   :  { %1398 = vbcast.lane.b32.xlu0 %v1396_v28, 256  ;;  %15664 = vst [vmem:[#allocation118_spill] sm:$0xff] %v10166_v53 }
 0x201   :  { %1402 = vbcast.lane.b32.xlu1 %v1396_v28, 264  ;;  %v10172_v37 = vpop.xlane.xlu1 %219  ;;  %v10174_v28 = vpop.xlane.xlu0 %216 }
 0x202   :  { %1409 = vbcast.lane.b32.xlu0 %v1407_v10, 256  ;;  %15666 = vst [vmem:[#allocation120_spill] sm:$0xff] %v10172_v37  ;;  %15667 = vst [vmem:[#allocation121_spill] sm:$0xff] %v10174_v28 }
 0x205   :  { %1413 = vbcast.lane.b32.xlu1 %v1407_v10, 264  ;;  %v10176_v50 = vpop.xlane.xlu1 %267  ;;  %v10178_v8 = vpop.xlane.xlu0 %264 }
 0x206   :  { %1486 = vbcast.lane.b32.xlu0 %v1484_v55, 256  ;;  %15668 = vst [vmem:[#allocation122_spill] sm:$0xff] %v10176_v50  ;;  %15669 = vst [vmem:[#allocation123_spill] sm:$0xff] %v10178_v8 }
 0x209   :  { %1490 = vbcast.lane.b32.xlu1 %v1484_v55, 264  ;;  %v10180_v13 = vpop.xlane.xlu1 %285  ;;  %v10182_v10 = vpop.xlane.xlu0 %282 }
 0x20a   :  { %1497 = vbcast.lane.b32.xlu0 %v1495_v39, 256  ;;  %15670 = vst [vmem:[#allocation124_spill] sm:$0xff] %v10180_v13  ;;  %15671 = vst [vmem:[#allocation125_spill] sm:$0xff] %v10182_v10  ;;  %v8461_v10 = vld [vmem:[%s15552_s7 + $0x2c0] sm:$0xff] }
 0x20b   :  { %v3472_v12 = vmul.f32 %v8461_v10, %v9627_v44 }
 0x20d   :  { %1501 = vbcast.lane.b32.xlu1 %v1495_v39, 264  ;;  %v10184_v53 = vpop.xlane.xlu1 %291  ;;  %v10186_v63 = vpop.xlane.xlu0 %288  ;;  %v8445_v39 = vld [vmem:[%s15552_s7 + $0x240] sm:$0xff] }
 0x20e   :  { %15672 = vst [vmem:[#allocation126_spill] sm:$0xff] %v10184_v53  ;;  %15673 = vst [vmem:[#allocation127_spill] sm:$0xff] %v10186_v63  ;;  %v10194_v28 = vsel %vm184_vm0, %v8445_v39, -inf  ;;  %v10205_v63 = vsel %vm184_vm0, %v8461_v10, -inf  ;;  %v3456_v19 = vmul.f32 %v8445_v39, %v9604_v33  ;;  %v3584_v39 = vsel %vm184_vm0, %v3472_v12, 0.0  ;;  %v151_v12 = vld [vmem:[%s15552_s7 + $0xf8] sm:$0xff] }
 0x20f   :  { %15675 = vst [vmem:[#allocation129_spill] sm:$0xff] %v10194_v28  ;;  %15678 = vst [vmem:[#allocation132_spill] sm:$0xff] %v10205_v63  ;;  %v10263_v10 = vsel %vm184_vm0, %v151_v12, -inf }
 0x210   :  { %v3536_v0 = vsel %vm184_vm0, %v3456_v19, 0.0  ;;  %v134_v19 = vld [vmem:[%s15552_s7 + $0x70] sm:$0xff]  ;;  %15689 = vst [vmem:[#allocation143_spill] sm:$0xff] %v10263_v10 }
 0x211   :  { %v10188_v55 = vpop.xlane.xlu1 %333  ;;  %v10196_v50 = vpop.xlane.xlu0 %330 }
 0x212   :  { %15674 = vst [vmem:[#allocation128_spill] sm:$0xff] %v10188_v55  ;;  %15676 = vst [vmem:[#allocation130_spill] sm:$0xff] %v10196_v50  ;;  %v8446_v55 = vld [vmem:[%s15552_s7 + $0x248] sm:$0xff] }
 0x213   :  { %v8462_v50 = vld [vmem:[%s15552_s7 + $0x2c8] sm:$0xff]  ;;  %v3457_v13 = vmul.f32 %v8446_v55, %v9604_v33 }
 0x214   :  { %v10223_v17 = vsel %vm184_vm0, %v8462_v50, -inf  ;;  %v3473_v24 = vmul.f32 %v8462_v50, %v9627_v44 }
 0x215   :  { %v10198_v8 = vpop.xlane.xlu1 %339  ;;  %v10210_v53 = vpop.xlane.xlu0 %336  ;;  %15682 = vst [vmem:[#allocation136_spill] sm:$0xff] %v10223_v17 }
 0x216   :  { %15677 = vst [vmem:[#allocation131_spill] sm:$0xff] %v10198_v8  ;;  %15679 = vst [vmem:[#allocation133_spill] sm:$0xff] %v10210_v53  ;;  %v10217_v8 = vsel %vm184_vm0, %v8446_v55, -inf  ;;  %v3539_v53 = vsel %vm184_vm0, %v3457_v13, 0.0  ;;  %v3587_v33 = vsel %vm184_vm0, %v3473_v24, 0.0  ;;  %v135_v13 = vld [vmem:[%s15552_s7 + $0x78] sm:$0xff] }
 0x217   :  { %15680 = vst [vmem:[#allocation134_spill] sm:$0xff] %v10217_v8  ;;  %v10247_v50 = vsel %vm184_vm0, %v135_v13, -inf  ;;  %v10252_v24 = vsel %vm184_vm0, %v134_v19, -inf }
 0x218   :  { %15686 = vst [vmem:[#allocation140_spill] sm:$0xff] %v10247_v50  ;;  %15688 = vst [vmem:[#allocation142_spill] sm:$0xff] %v10252_v24 }
 0x219   :  { %v10220_v37 = vpop.xlane.xlu1 %1059  ;;  %v10232_v55 = vpop.xlane.xlu0 %1056 }
 0x21a   :  { %15681 = vst [vmem:[#allocation135_spill] sm:$0xff] %v10220_v37  ;;  %15683 = vst [vmem:[#allocation137_spill] sm:$0xff] %v10232_v55 }
 0x21d   :  { %v10234_v37 = vpop.xlane.xlu1 %1107  ;;  %v10244_v44 = vpop.xlane.xlu0 %1104 }
 0x21e   :  { %15684 = vst [vmem:[#allocation138_spill] sm:$0xff] %v10234_v37  ;;  %15685 = vst [vmem:[#allocation139_spill] sm:$0xff] %v10244_v44  ;;  %v158_v37 = vld [vmem:[%s15552_s7 + $0x130] sm:$0xff] }
 0x221   :  { %v10273_v44 = vpop.xlane.xlu0 %1122 }
 0x222   :  { %15691 = vst [vmem:[#allocation145_spill] sm:$0xff] %v10273_v44  ;;  %v10291_v44 = vsel %vm184_vm0, %v158_v37, -inf }
 0x223   :  { %15695 = vst [vmem:[#allocation149_spill] sm:$0xff] %v10291_v44 }
 0x229   :  { %3057 = vmax.xlane.f32.xlu0 %v10194_v28 }
 0x22d   :  { %3105 = vmax.xlane.f32.xlu0 %v10205_v63 }
 0x231   :  { %3060 = vmax.xlane.f32.xlu1 %v10217_v8  ;;  %3108 = vmax.xlane.f32.xlu0 %v10223_v17  ;;  %v750_v17 = vcombine.high %v9858_v48, %v9858_v48  ;;  %v799_v48 = vcombine.high %v9888_v62, %v9888_v62 }
 0x235   :  { %3540 = vadd.xlane.f32.xlu1 %v3539_v53  ;;  %3537 = vadd.xlane.f32.xlu0 %v3536_v0  ;;  %v10249_v0 = vpop.xlane.xlu1 %1125  ;;  %v150_v53 = vld [vmem:[%s15552_s7 + $0xf0] sm:$0xff] }
 0x236   :  { %15687 = vst [vmem:[#allocation141_spill] sm:$0xff] %v10249_v0  ;;  %v159_v0 = vld [vmem:[%s15552_s7 + $0x138] sm:$0xff] }
 0x239   :  { %3588 = vadd.xlane.f32.xlu1 %v3587_v33  ;;  %3585 = vadd.xlane.f32.xlu0 %v3584_v39  ;;  %v653_v33 = vcombine.high %v9780_v6, %v9780_v6  ;;  %v10268_v39 = vsel %vm184_vm0, %v150_v53, -inf  ;;  %v10278_v55 = vpop.xlane.xlu1 %1131  ;;  %v10283_v6 = vsel %vm184_vm0, %v159_v0, -inf }
 0x23a   :  { %15690 = vst [vmem:[#allocation144_spill] sm:$0xff] %v10268_v39  ;;  %15692 = vst [vmem:[#allocation146_spill] sm:$0xff] %v10278_v55  ;;  %v175_v55 = vld [vmem:[%s15552_s7 + $0x1b8] sm:$0xff] }
 0x23b   :  { %15693 = vst [vmem:[#allocation147_spill] sm:$0xff] %v10283_v6 }
 0x23d   :  { %231 = vmax.xlane.f32.xlu1 %v10247_v50  ;;  %228 = vmax.xlane.f32.xlu0 %v10252_v24  ;;  %v10286_v24 = vrot.slane %v653_v33, %v9337_v46  ;;  %v702_v50 = vcombine.high %v9800_v52, %v9800_v52  ;;  %v10304_v33 = vsel %vm184_vm0, %v175_v55, -inf  ;;  %v10312_v28 = vpop.xlane.xlu1 %1173 }
 0x23e   :  { %15697 = vst [vmem:[#allocation151_spill] sm:$0xff] %v10304_v33  ;;  %15699 = vst [vmem:[#allocation153_spill] sm:$0xff] %v10312_v28 }
 0x23f   :  { %15694 = vst [vmem:[#allocation148_spill] sm:$0xff] %v10286_v24  ;;  %v976_v52 = vmul.f32 %v10286_v24, %v135_v13  ;;  %v10308_v63 = vrot.slane %v702_v50, %v9337_v46  ;;  %v10323_v50 = vrot.slane %v750_v17, %v9337_v46  ;;  %v10336_v17 = vrot.slane %v799_v48, %v9337_v46 }
 0x241   :  { %279 = vmax.xlane.f32.xlu1 %v10263_v10  ;;  %276 = vmax.xlane.f32.xlu0 %v10268_v39  ;;  %v174_v39 = vld [vmem:[%s15552_s7 + $0x1b0] sm:$0xff]  ;;  %v10300_v10 = vpop.xlane.xlu0 %1128  ;;  %15698 = vst [vmem:[#allocation152_spill] sm:$0xff] %v10308_v63  ;;  %v992_v13 = vmul.f32 %v10308_v63, %v151_v12  ;;  %15701 = vst [vmem:[#allocation155_spill] sm:$0xff] %v10323_v50  ;;  %v1000_v12 = vmul.f32 %v10323_v50, %v159_v0 }
 0x242   :  { %15696 = vst [vmem:[#allocation150_spill] sm:$0xff] %v10300_v10  ;;  %v10315_v8 = vsel %vm184_vm0, %v174_v39, -inf  ;;  %v975_v10 = vmul.f32 %v10286_v24, %v134_v19  ;;  %v10331_v19 = vpop.xlane.xlu1 %1179  ;;  %15704 = vst [vmem:[#allocation158_spill] sm:$0xff] %v10336_v17  ;;  %v999_v62 = vmul.f32 %v10323_v50, %v158_v37  ;;  %v1015_v0 = vmul.f32 %v10336_v17, %v174_v39 }
 0x243   :  { %15700 = vst [vmem:[#allocation154_spill] sm:$0xff] %v10315_v8  ;;  %15703 = vst [vmem:[#allocation157_spill] sm:$0xff] %v10331_v19  ;;  %v10361_v39 = vsub.s32 6, %v9301_v26 }
 0x244   :  { %v1067_v28 = vsel %vm184_vm0, %v975_v10, 0.0  ;;  %v1187_v37 = vsel %vm184_vm0, %v1015_v0, 0.0 }
 0x245   :  { %303 = vmax.xlane.f32.xlu1 %v10283_v6  ;;  %300 = vmax.xlane.f32.xlu0 %v10291_v44  ;;  %v1070_v44 = vsel %vm184_vm0, %v976_v52, 0.0  ;;  %v991_v6 = vmul.f32 %v10308_v63, %v150_v53  ;;  %v10329_v60 = vpop.xlane.xlu0 %1170  ;;  %v1118_v52 = vsel %vm184_vm0, %v992_v13, 0.0  ;;  %v1142_v53 = vsel %vm184_vm0, %v1000_v12, 0.0  ;;  %15712 = vst [vmem:[#allocation166_spill] sm:$0xff] %v10361_v39 }
 0x246   :  { %15702 = vst [vmem:[#allocation156_spill] sm:$0xff] %v10329_v60  ;;  %v1139_v13 = vsel %vm184_vm0, %v999_v62, 0.0 }
 0x249   :  { %351 = vmax.xlane.f32.xlu1 %v10304_v33  ;;  %348 = vmax.xlane.f32.xlu0 %v10315_v8  ;;  %v1115_v8 = vsel %vm184_vm0, %v991_v6, 0.0  ;;  %v10340_v10 = vpop.xlane.xlu0 %1176 }
 0x24a   :  { %15705 = vst [vmem:[#allocation159_spill] sm:$0xff] %v10340_v10 }
 0x24d   :  { %1071 = vadd.xlane.f32.xlu1 %v1070_v44  ;;  %1068 = vadd.xlane.f32.xlu0 %v1067_v28  ;;  %v1016_v44 = vmul.f32 %v10336_v17, %v175_v55  ;;  %v10344_v28 = vpop.permute.xlu1 %1270  ;;  %v10350_v48 = vpop.permute.xlu0 %1266 }
 0x24e   :  { %15706 = vst [vmem:[#allocation160_spill] sm:$0xff] %v10344_v28  ;;  %15707 = vst [vmem:[#allocation161_spill] sm:$0xff] %v10350_v48 }
 0x24f   :  { %v1190_v6 = vsel %vm184_vm0, %v1016_v44, 0.0 }
 0x251   :  { %1119 = vadd.xlane.f32.xlu1 %v1118_v52  ;;  %1116 = vadd.xlane.f32.xlu0 %v1115_v8  ;;  %v10352_v52 = vpop.permute.xlu1 %1354  ;;  %v10354_v8 = vpop.xlane.xlu0 %3051 }
 0x252   :  { %15708 = vst [vmem:[#allocation162_spill] sm:$0xff] %v10352_v52  ;;  %15709 = vst [vmem:[#allocation163_spill] sm:$0xff] %v10354_v8 }
 0x255   :  { %1143 = vadd.xlane.f32.xlu1 %v1142_v53  ;;  %1140 = vadd.xlane.f32.xlu0 %v1139_v13  ;;  %v10356_v55 = vpop.permute.xlu1 %1358  ;;  %v10358_v12 = vpop.xlane.xlu0 %3099  ;;  %v10368_v53 = vld [vmem:[%s15559_s11] sm:$0xff] }
 0x256   :  { %15710 = vst [vmem:[#allocation164_spill] sm:$0xff] %v10356_v55  ;;  %15711 = vst [vmem:[#allocation165_spill] sm:$0xff] %v10358_v12  ;;  %v1286_v44 = vrot.slane %v10368_v53, %v10361_v39 }
 0x259   :  { %1191 = vadd.xlane.f32.xlu1 %v1190_v6  ;;  %1188 = vadd.xlane.f32.xlu0 %v1187_v37  ;;  %v10363_v62 = vpop.xlane.xlu1 %3054  ;;  %v10372_v13 = vpop.xlane.xlu0 %3102  ;;  %v10379_v6 = vld [vmem:[%s15559_s11 + $0x8] sm:$0xff] }
 0x25a   :  { %15713 = vst [vmem:[#allocation167_spill] sm:$0xff] %v10363_v62  ;;  %15714 = vst [vmem:[#allocation168_spill] sm:$0xff] %v10372_v13  ;;  %v1374_v37 = vrot.slane %v10379_v6, %v10361_v39  ;;  %v1418_v13 = vrot.slane %v10145_v58, %v9501_v7  ;;  %v1506_v62 = vrot.slane %v10160_v32, %v9501_v7  ;;  %v8469_v39 = vld [vmem:[%s15552_s7 + $0x300] sm:$0xff] }
 0x25b   :  { %v10461_v17 = vsel %vm184_vm0, %v8469_v39, -inf }
 0x25c   :  { %15739 = vst [vmem:[#allocation193_spill] sm:$0xff] %v10461_v17 }
 0x25d   :  { %v10374_v0 = vpop.xlane.xlu1 %3534  ;;  %v10383_v12 = vpop.xlane.xlu0 %3531 }
 0x25e   :  { %15715 = vst [vmem:[#allocation169_spill] sm:$0xff] %v10374_v0  ;;  %15716 = vst [vmem:[#allocation170_spill] sm:$0xff] %v10383_v12 }
 0x261   :  { %v10385_v8 = vpop.xlane.xlu1 %3582  ;;  %v10389_v0 = vpop.xlane.xlu0 %3579 }
 0x262   :  { %15717 = vst [vmem:[#allocation171_spill] sm:$0xff] %v10385_v8  ;;  %15718 = vst [vmem:[#allocation172_spill] sm:$0xff] %v10389_v0 }
 0x265   :  { %v10393_v10 = vpop.xlane.xlu1 %225  ;;  %v10395_v19 = vpop.xlane.xlu0 %222 }
 0x266   :  { %15719 = vst [vmem:[#allocation173_spill] sm:$0xff] %v10393_v10  ;;  %15720 = vst [vmem:[#allocation174_spill] sm:$0xff] %v10395_v19 }
 0x269   :  { %v10397_v12 = vpop.xlane.xlu1 %273 }
 0x26a   :  { %1292 = vbcast.lane.b32.xlu1 %v1286_v44, 264  ;;  %15721 = vst [vmem:[#allocation175_spill] sm:$0xff] %v10397_v12 }
 0x26d   :  { %v10401_v8 = vpop.xlane.xlu1 %297 }
 0x26e   :  { %1376 = vbcast.lane.b32.xlu1 %v1374_v37, 256  ;;  %15723 = vst [vmem:[#allocation177_spill] sm:$0xff] %v10401_v8 }
 0x26f   :  { %1288 = vbcast.lane.b32.xlu0 %v1286_v44, 256  ;;  %v10399_v44 = vpop.xlane.xlu0 %270 }
 0x270   :  { %15722 = vst [vmem:[#allocation176_spill] sm:$0xff] %v10399_v44 }
 0x271   :  { %v10405_v0 = vpop.xlane.xlu1 %345 }
 0x272   :  { %1380 = vbcast.lane.b32.xlu1 %v1374_v37, 264  ;;  %15725 = vst [vmem:[#allocation179_spill] sm:$0xff] %v10405_v0  ;;  %v8464_v0 = vld [vmem:[%s15552_s7 + $0x2d8] sm:$0xff] }
 0x273   :  { %1420 = vbcast.lane.b32.xlu0 %v1418_v13, 256  ;;  %v10403_v37 = vpop.xlane.xlu0 %294 }
 0x274   :  { %15724 = vst [vmem:[#allocation178_spill] sm:$0xff] %v10403_v37  ;;  %v8463_v37 = vld [vmem:[%s15552_s7 + $0x2d0] sm:$0xff] }
 0x275   :  { %v10409_v7 = vpop.xlane.xlu1 %1065  ;;  %v3474_v28 = vmul.f32 %v8463_v37, %v9828_v35 }
 0x276   :  { %1424 = vbcast.lane.b32.xlu1 %v1418_v13, 264  ;;  %15727 = vst [vmem:[#allocation181_spill] sm:$0xff] %v10409_v7  ;;  %v10428_v7 = vsel %vm184_vm0, %v8463_v37, -inf }
 0x277   :  { %1508 = vbcast.lane.b32.xlu0 %v1506_v62, 256  ;;  %v10407_v60 = vpop.xlane.xlu0 %342  ;;  %15732 = vst [vmem:[#allocation186_spill] sm:$0xff] %v10428_v7 }
 0x278   :  { %15726 = vst [vmem:[#allocation180_spill] sm:$0xff] %v10407_v60 }
 0x279   :  { %v10413_v13 = vpop.xlane.xlu1 %1113 }
 0x27a   :  { %1512 = vbcast.lane.b32.xlu1 %v1506_v62, 264  ;;  %15729 = vst [vmem:[#allocation183_spill] sm:$0xff] %v10413_v13  ;;  %v8447_v62 = vld [vmem:[%s15552_s7 + $0x250] sm:$0xff]  ;;  %v8448_v13 = vld [vmem:[%s15552_s7 + $0x258] sm:$0xff] }
 0x27b   :  { %v10411_v10 = vpop.xlane.xlu0 %1062  ;;  %v10419_v44 = vsel %vm184_vm0, %v8447_v62, -inf  ;;  %v10440_v8 = vsel %vm184_vm0, %v8448_v13, -inf  ;;  %v3459_v52 = vmul.f32 %v8448_v13, %v9808_v5  ;;  %v3458_v55 = vmul.f32 %v8447_v62, %v9808_v5 }
 0x27c   :  { %15728 = vst [vmem:[#allocation182_spill] sm:$0xff] %v10411_v10  ;;  %15730 = vst [vmem:[#allocation184_spill] sm:$0xff] %v10419_v44 }
 0x27d   :  { %v10430_v10 = vpop.xlane.xlu1 %1137  ;;  %15734 = vst [vmem:[#allocation188_spill] sm:$0xff] %v10440_v8 }
 0x27e   :  { %15733 = vst [vmem:[#allocation187_spill] sm:$0xff] %v10430_v10  ;;  %v8470_v10 = vld [vmem:[%s15552_s7 + $0x308] sm:$0xff] }
 0x27f   :  { %v10425_v60 = vpop.xlane.xlu0 %1110  ;;  %v10458_v33 = vsel %vm184_vm0, %v8470_v10, -inf  ;;  %v3481_v62 = vmul.f32 %v8470_v10, %v9855_v51 }
 0x280   :  { %15731 = vst [vmem:[#allocation185_spill] sm:$0xff] %v10425_v60  ;;  %v10443_v60 = vsel %vm184_vm0, %v8464_v0, -inf  ;;  %15738 = vst [vmem:[#allocation192_spill] sm:$0xff] %v10458_v33 }
 0x281   :  { %15735 = vst [vmem:[#allocation189_spill] sm:$0xff] %v10443_v60  ;;  %v10451_v19 = vpop.xlane.xlu1 %1185 }
 0x282   :  { %15737 = vst [vmem:[#allocation191_spill] sm:$0xff] %v10451_v19  ;;  %v8471_v19 = vld [vmem:[%s15552_s7 + $0x310] sm:$0xff] }
 0x283   :  { %v10445_v12 = vpop.xlane.xlu0 %1134  ;;  %v10477_v24 = vsel %vm184_vm0, %v8471_v19, -inf }
 0x284   :  { %15736 = vst [vmem:[#allocation190_spill] sm:$0xff] %v10445_v12  ;;  %v8472_v12 = vld [vmem:[%s15552_s7 + $0x318] sm:$0xff]  ;;  %15742 = vst [vmem:[#allocation196_spill] sm:$0xff] %v10477_v24 }
 0x285   :  { %v10472_v50 = vsel %vm184_vm0, %v8472_v12, -inf }
 0x286   :  { %15740 = vst [vmem:[#allocation194_spill] sm:$0xff] %v10472_v50 }
 0x287   :  { %v10474_v63 = vpop.xlane.xlu0 %1182 }
 0x288   :  { %15741 = vst [vmem:[#allocation195_spill] sm:$0xff] %v10474_v63 }
 0x296   :  { %3063 = vmax.xlane.f32.xlu0 %v10419_v44  ;;  %v10495_v44 = vpop.permute.xlu0 %1277 }
 0x297   :  { %15746 = vst [vmem:[#allocation200_spill] sm:$0xff] %v10495_v44 }
 0x29a   :  { %3111 = vmax.xlane.f32.xlu0 %v10428_v7  ;;  %v10479_v7 = vpop.permute.xlu1 %1281  ;;  %v10519_v48 = vpop.permute.xlu0 %1398 }
 0x29b   :  { %15743 = vst [vmem:[#allocation197_spill] sm:$0xff] %v10479_v7  ;;  %v8488_v7 = vld [vmem:[%s15552_s7 + $0x398] sm:$0xff]  ;;  %15750 = vst [vmem:[#allocation204_spill] sm:$0xff] %v10519_v48 }
 0x29e   :  { %3066 = vmax.xlane.f32.xlu1 %v10440_v8  ;;  %3114 = vmax.xlane.f32.xlu0 %v10443_v60  ;;  %v10508_v8 = vsel %vm184_vm0, %v8488_v7, -inf }
 0x29f   :  { %15748 = vst [vmem:[#allocation202_spill] sm:$0xff] %v10508_v8 }
 0x2a2   :  { %3132 = vmax.xlane.f32.xlu1 %v10458_v33  ;;  %3129 = vmax.xlane.f32.xlu0 %v10461_v17  ;;  %v8486_v33 = vld [vmem:[%s15552_s7 + $0x388] sm:$0xff]  ;;  %v8485_v17 = vld [vmem:[%s15552_s7 + $0x380] sm:$0xff] }
 0x2a3   :  { %v10490_v60 = vsel %vm184_vm0, %v8486_v33, -inf  ;;  %v10493_v63 = vsel %vm184_vm0, %v8485_v17, -inf  ;;  %v3497_v10 = vmul.f32 %v8486_v33, %v9885_v23  ;;  %v752_v33 = vcombine.high %v9845_v20, %v9845_v20 }
 0x2a4   :  { %15744 = vst [vmem:[#allocation198_spill] sm:$0xff] %v10490_v60  ;;  %15745 = vst [vmem:[#allocation199_spill] sm:$0xff] %v10493_v63 }
 0x2a6   :  { %3138 = vmax.xlane.f32.xlu1 %v10472_v50  ;;  %3135 = vmax.xlane.f32.xlu0 %v10477_v24  ;;  %v10501_v50 = vpop.permute.xlu1 %1365  ;;  %v8487_v24 = vld [vmem:[%s15552_s7 + $0x390] sm:$0xff] }
 0x2a7   :  { %15747 = vst [vmem:[#allocation201_spill] sm:$0xff] %v10501_v50  ;;  %v10512_v44 = vsel %vm184_vm0, %v8487_v24, -inf  ;;  %v3475_v50 = vmul.f32 %v8464_v0, %v9828_v35  ;;  %v3611_v35 = vsel %vm184_vm0, %v3481_v62, 0.0 }
 0x2a8   :  { %15749 = vst [vmem:[#allocation203_spill] sm:$0xff] %v10512_v44 }
 0x2a9   :  { %v3593_v5 = vsel %vm184_vm0, %v3475_v50, 0.0  ;;  %v703_v50 = vcombine.high %v9793_v31, %v9793_v31 }
 0x2aa   :  { %3180 = vmax.xlane.f32.xlu1 %v10490_v60  ;;  %3177 = vmax.xlane.f32.xlu0 %v10493_v63  ;;  %v3545_v60 = vsel %vm184_vm0, %v3459_v52, 0.0  ;;  %v3542_v63 = vsel %vm184_vm0, %v3458_v55, 0.0  ;;  %v10523_v13 = vpop.permute.xlu1 %1369  ;;  %v3480_v52 = vmul.f32 %v8469_v39, %v9855_v51  ;;  %v3483_v55 = vmul.f32 %v8472_v12, %v9870_v3 }
 0x2ab   :  { %v10550_v31 = vrot.slane %v703_v50, %v9332_v42 }
 0x2ac   :  { %v3617_v51 = vsel %vm184_vm0, %v3483_v55, 0.0 }
 0x2ae   :  { %3186 = vmax.xlane.f32.xlu1 %v10508_v8  ;;  %3183 = vmax.xlane.f32.xlu0 %v10512_v44  ;;  %v3590_v44 = vsel %vm184_vm0, %v3474_v28, 0.0  ;;  %v10529_v8 = vpop.permute.xlu0 %1409  ;;  %v10531_v0 = vpop.permute.xlu1 %1402 }
 0x2af   :  { %15751 = vst [vmem:[#allocation205_spill] sm:$0xff] %v10529_v8  ;;  %15752 = vst [vmem:[#allocation206_spill] sm:$0xff] %v10531_v0  ;;  %v15815_v8 = vld [vmem:[#allocation81_spill] sm:$0xff] }
 0x2b2   :  { %3546 = vadd.xlane.f32.xlu1 %v3545_v60  ;;  %3543 = vadd.xlane.f32.xlu0 %v3542_v63  ;;  %v3608_v63 = vsel %vm184_vm0, %v3480_v52, 0.0  ;;  %v3482_v60 = vmul.f32 %v8471_v19, %v9870_v3  ;;  %v10541_v28 = vpop.permute.xlu0 %1486  ;;  %v10545_v12 = vpop.permute.xlu1 %1413  ;;  %v3659_v3 = vsel %vm184_vm0, %v3497_v10, 0.0  ;;  %v3499_v19 = vmul.f32 %v8488_v7, %v9898_v57 }
 0x2b3   :  { %15753 = vst [vmem:[#allocation207_spill] sm:$0xff] %v10541_v28  ;;  %15754 = vst [vmem:[#allocation208_spill] sm:$0xff] %v10545_v12  ;;  %v10563_v7 = vrot.slane %v10550_v31, %v9332_v42  ;;  %v10566_v52 = vrot.slane %v752_v33, %v9332_v42 }
 0x2b4   :  { %v3614_v39 = vsel %vm184_vm0, %v3482_v60, 0.0 }
 0x2b5   :  { %15757 = vst [vmem:[#allocation211_spill] sm:$0xff] %v10563_v7  ;;  %v10586_v60 = vrot.slane %v10566_v52, %v9332_v42 }
 0x2b6   :  { %3594 = vadd.xlane.f32.xlu1 %v3593_v5  ;;  %3591 = vadd.xlane.f32.xlu0 %v3590_v44  ;;  %v3496_v44 = vmul.f32 %v8485_v17, %v9885_v23  ;;  %v3498_v5 = vmul.f32 %v8487_v24, %v9898_v57  ;;  %v10556_v62 = vpop.permute.xlu0 %1497  ;;  %v10558_v23 = vpop.permute.xlu1 %1490  ;;  %v3665_v17 = vsel %vm184_vm0, %v3499_v19, 0.0  ;;  %v161_v57 = vld [vmem:[%s15552_s7 + $0x148] sm:$0xff]  ;;  %v160_v24 = vld [vmem:[%s15552_s7 + $0x140] sm:$0xff] }
 0x2b7   :  { %15755 = vst [vmem:[#allocation209_spill] sm:$0xff] %v10556_v62  ;;  %15756 = vst [vmem:[#allocation210_spill] sm:$0xff] %v10558_v23  ;;  %v10578_v55 = vsel %vm184_vm0, %v161_v57, -inf  ;;  %v10589_v50 = vsel %vm184_vm0, %v160_v24, -inf  ;;  %v10607_v19 = vrot.slane %v10586_v60, %v9337_v46 }
 0x2b8   :  { %v3656_v37 = vsel %vm184_vm0, %v3496_v44, 0.0  ;;  %v3662_v20 = vsel %vm184_vm0, %v3498_v5, 0.0  ;;  %15759 = vst [vmem:[#allocation213_spill] sm:$0xff] %v10578_v55  ;;  %15761 = vst [vmem:[#allocation215_spill] sm:$0xff] %v10586_v60 }
 0x2b9   :  { %15762 = vst [vmem:[#allocation216_spill] sm:$0xff] %v10589_v50  ;;  %15765 = vst [vmem:[#allocation219_spill] sm:$0xff] %v10607_v19 }
 0x2ba   :  { %3612 = vadd.xlane.f32.xlu1 %v3611_v35  ;;  %3609 = vadd.xlane.f32.xlu0 %v3608_v63  ;;  %v10575_v35 = vpop.xlane.xlu0 %3057  ;;  %v10582_v63 = vrot.slane %v10563_v7, %v9337_v46  ;;  %v10594_v10 = vpop.permute.xlu1 %1501 }
 0x2bb   :  { %15758 = vst [vmem:[#allocation212_spill] sm:$0xff] %v10575_v35  ;;  %15763 = vst [vmem:[#allocation217_spill] sm:$0xff] %v10594_v10 }
 0x2bc   :  { %15760 = vst [vmem:[#allocation214_spill] sm:$0xff] %v10582_v63  ;;  %v1001_v5 = vmul.f32 %v10582_v63, %v160_v24 }
 0x2be   :  { %3618 = vadd.xlane.f32.xlu1 %v3617_v51  ;;  %3615 = vadd.xlane.f32.xlu0 %v3614_v39  ;;  %v177_v51 = vld [vmem:[%s15552_s7 + $0x1c8] sm:$0xff]  ;;  %v176_v39 = vld [vmem:[%s15552_s7 + $0x1c0] sm:$0xff]  ;;  %v10609_v33 = vpop.xlane.xlu0 %3105  ;;  %v1145_v35 = vsel %vm184_vm0, %v1001_v5, 0.0 }
 0x2bf   :  { %v10602_v44 = vsel %vm184_vm0, %v177_v51, -inf  ;;  %15766 = vst [vmem:[#allocation220_spill] sm:$0xff] %v10609_v33  ;;  %v1017_v28 = vmul.f32 %v10607_v19, %v176_v39 }
 0x2c0   :  { %15764 = vst [vmem:[#allocation218_spill] sm:$0xff] %v10602_v44 }
 0x2c2   :  { %3660 = vadd.xlane.f32.xlu1 %v3659_v3  ;;  %3657 = vadd.xlane.f32.xlu0 %v3656_v37  ;;  %v1002_v3 = vmul.f32 %v10582_v63, %v161_v57  ;;  %v10612_v37 = vsel %vm184_vm0, %v176_v39, -inf  ;;  %v1018_v57 = vmul.f32 %v10607_v19, %v177_v51  ;;  %v10623_v33 = vpop.xlane.xlu0 %3108  ;;  %v398_v51 = vmax.f32 %v9458_v18, %v9482_v1 }
 0x2c3   :  { %15767 = vst [vmem:[#allocation221_spill] sm:$0xff] %v10612_v37  ;;  %15769 = vst [vmem:[#allocation223_spill] sm:$0xff] %v10623_v33  ;;  %v3280_v18 = vmax.f32 %v9545_v54, %v9542_v15  ;;  %v3287_v1 = vmax.f32 %v9560_v61, %v9556_v59 }
 0x2c4   :  { %v1196_v24 = vsel %vm184_vm0, %v1018_v57, 0.0  ;;  %v3231_v57 = vmax.f32 %v9518_v45, %v9531_v14 }
 0x2c5   :  { %v3281_v15 = vrot.slane %v3280_v18, 4  ;;  %v3288_v54 = vrot.slane %v3287_v1, 4 }
 0x2c6   :  { %3666 = vadd.xlane.f32.xlu1 %v3665_v17  ;;  %3663 = vadd.xlane.f32.xlu0 %v3662_v20  ;;  %v10615_v17 = vpop.xlane.xlu1 %3060  ;;  %v1148_v20 = vsel %vm184_vm0, %v1002_v3, 0.0  ;;  %v10629_v62 = vpop.xlane.xlu0 %3537  ;;  %v3232_v14 = vrot.slane %v3231_v57, 4 }
 0x2c7   :  { %15768 = vst [vmem:[#allocation222_spill] sm:$0xff] %v10615_v17  ;;  %v1193_v17 = vsel %vm184_vm0, %v1017_v28, 0.0  ;;  %15771 = vst [vmem:[#allocation225_spill] sm:$0xff] %v10629_v62  ;;  %v454_v28 = vmax.f32 %v9467_v22, %v9485_v25 }
 0x2c9   :  { %v455_v25 = vrot.slane %v454_v28, 4 }
 0x2ca   :  { %309 = vmax.xlane.f32.xlu1 %v10578_v55  ;;  %306 = vmax.xlane.f32.xlu0 %v10589_v50  ;;  %v10625_v23 = vpop.xlane.xlu1 %3540  ;;  %v10635_v39 = vpop.xlane.xlu0 %3585 }
 0x2cb   :  { %15770 = vst [vmem:[#allocation224_spill] sm:$0xff] %v10625_v23  ;;  %15773 = vst [vmem:[#allocation227_spill] sm:$0xff] %v10635_v39  ;;  %v405_v39 = vmax.f32 %v9611_v34, %v9600_v2 }
 0x2ce   :  { %357 = vmax.xlane.f32.xlu1 %v10602_v44  ;;  %354 = vmax.xlane.f32.xlu0 %v10612_v37  ;;  %v10631_v3 = vpop.xlane.xlu1 %3588  ;;  %v10656_v22 = vpop.xlane.xlu0 %228 }
 0x2cf   :  { %15772 = vst [vmem:[#allocation226_spill] sm:$0xff] %v10631_v3  ;;  %15776 = vst [vmem:[#allocation230_spill] sm:$0xff] %v10656_v22  ;;  %v3282_v3 = vmax.f32 %v3280_v18, %v3281_v15 }
 0x2d2   :  { %1149 = vadd.xlane.f32.xlu1 %v1148_v20  ;;  %1146 = vadd.xlane.f32.xlu0 %v1145_v35  ;;  %v10637_v5 = vpop.xlane.xlu1 %231  ;;  %v10640_v20 = vsub.s32 7, %v9301_v26  ;;  %v399_v35 = vrot.slane %v398_v51, 4  ;;  %v10664_v22 = vpop.xlane.xlu0 %276 }
 0x2d3   :  { %15774 = vst [vmem:[#allocation228_spill] sm:$0xff] %v10637_v5  ;;  %15778 = vst [vmem:[#allocation232_spill] sm:$0xff] %v10664_v22 }
 0x2d4   :  { %15775 = vst [vmem:[#allocation229_spill] sm:$0xff] %v10640_v20  ;;  %v400_v5 = vmax.f32 %v398_v51, %v399_v35  ;;  %v1385_v59 = vrot.slane %v10379_v6, %v10640_v20  ;;  %v456_v51 = vmax.f32 %v454_v28, %v455_v25  ;;  %v3233_v35 = vmax.f32 %v3231_v57, %v3232_v14  ;;  %v15780_v25 = vld [vmem:[#allocation28_spill] sm:$0xff] }
 0x2d5   :  { %v3238_v6 = vmax.f32 %v9670_v36, %v9690_v41  ;;  %v1429_v28 = vrot.slane %v10145_v58, %v9642_v27  ;;  %v3294_v18 = vmax.f32 %v15780_v25, %v9699_v56  ;;  %v1517_v41 = vrot.slane %v10160_v32, %v9642_v27  ;;  %v15783_v56 = vld [vmem:[#allocation34_spill] sm:$0xff] }
 0x2d6   :  { %1197 = vadd.xlane.f32.xlu1 %v1196_v24  ;;  %1194 = vadd.xlane.f32.xlu0 %v1193_v17  ;;  %v3224_v17 = vmax.f32 %v9511_v43, %v9528_v49  ;;  %v1297_v24 = vrot.slane %v10368_v53, %v10640_v20  ;;  %v461_v43 = vmax.f32 %v9630_v47, %v9622_v40  ;;  %v10660_v45 = vpop.xlane.xlu1 %279  ;;  %v401_v61 = vrot.slane %v400_v5, 2 }
 0x2d7   :  { %15777 = vst [vmem:[#allocation231_spill] sm:$0xff] %v10660_v45  ;;  %v406_v53 = vrot.slane %v405_v39, 4  ;;  %v3289_v40 = vmax.f32 %v3287_v1, %v3288_v54  ;;  %v457_v23 = vrot.slane %v456_v51, 2  ;;  %v3234_v57 = vrot.slane %v3233_v35, 2 }
 0x2d8   :  { %v3225_v49 = vrot.slane %v3224_v17, 4  ;;  %v462_v2 = vrot.slane %v461_v43, 4  ;;  %v402_v45 = vmax.f32 %v400_v5, %v401_v61  ;;  %v3283_v1 = vrot.slane %v3282_v3, 2 }
 0x2d9   :  { %v407_v62 = vmax.f32 %v405_v39, %v406_v53  ;;  %v10674_v39 = vpop.xlane.xlu0 %300  ;;  %v3239_v54 = vrot.slane %v3238_v6, 4  ;;  %v3295_v61 = vrot.slane %v3294_v18, 4  ;;  %v15784_v53 = vld [vmem:[#allocation36_spill] sm:$0xff] }
 0x2da   :  { %v3226_v34 = vmax.f32 %v3224_v17, %v3225_v49  ;;  %v10666_v47 = vpop.xlane.xlu1 %303  ;;  %v463_v33 = vmax.f32 %v461_v43, %v462_v2  ;;  %v3290_v49 = vrot.slane %v3289_v40, 2  ;;  %v403_v14 = vrot.slane %v402_v45, 1  ;;  %15781 = vst [vmem:[#allocation28_spill] sm:$0xff] %v10674_v39 }
 0x2db   :  { %15779 = vst [vmem:[#allocation233_spill] sm:$0xff] %v10666_v47  ;;  %v408_v5 = vrot.slane %v407_v62, 2  ;;  %v458_v43 = vmax.f32 %v456_v51, %v457_v23  ;;  %v412_v2 = vmax.f32 %v15784_v53, %v15783_v56  ;;  %v8953_v23 = vld [vmem:[%s15552_s7 + $0x8] sm:$0xff]  ;;  %v3296_v53 = vmax.f32 %v3294_v18, %v3295_v61 }
 0x2dc   :  { %v3227_v17 = vrot.slane %v3226_v34, 2  ;;  %v464_v15 = vrot.slane %v463_v33, 2  ;;  %v3291_v25 = vmax.f32 %v3289_v40, %v3290_v49  ;;  %v15785_v51 = vld [vmem:[#allocation54_spill] sm:$0xff]  ;;  %v404_v56 = vmax.f32 %v402_v45, %v403_v14  ;;  %v8956_v45 = vld [vmem:[%s15552_s7 + $0x200] sm:$0xff] }
 0x2dd   :  { %v1570_v39 = vmul.f32 %v8953_v23, %v15785_v51  ;;  %v413_v27 = vrot.slane %v412_v2, 4  ;;  %v10692_v23 = vpop.xlane.xlu0 %348  ;;  %v3297_v22 = vrot.slane %v3296_v53, 2 }
 0x2de   :  { %v10676_v36 = vpop.xlane.xlu1 %351  ;;  %v3228_v58 = vmax.f32 %v3226_v34, %v3227_v17  ;;  %v409_v34 = vmax.f32 %v407_v62, %v408_v5  ;;  %v15787_v17 = vld [vmem:[#allocation38_spill] sm:$0xff]  ;;  %v465_v40 = vmax.f32 %v463_v33, %v464_v15  ;;  %15788 = vst [vmem:[#allocation34_spill] sm:$0xff] %v10692_v23  ;;  %v3704_v33 = vmul.f32 %v8956_v45, %v9877_v30 }
 0x2df   :  { %15782 = vst [vmem:[#allocation234_spill] sm:$0xff] %v10676_v36  ;;  %v8954_v36 = vld [vmem:[%s15552_s7] sm:$0xff]  ;;  %v1634_v18 = vsel %vm184_vm0, %v1570_v39, 0.0 }
 0x2e0   :  { %v1569_v32 = vmul.f32 %v8954_v36, %v9877_v30  ;;  %v8955_v36 = vld [vmem:[%s15552_s7 + $0x208] sm:$0xff]  ;;  %v410_v15 = vrot.slane %v409_v34, 1  ;;  %v414_v30 = vmax.f32 %v412_v2, %v413_v27  ;;  %v3768_v39 = vsel %vm184_vm0, %v3704_v33, 0.0 }
 0x2e1   :  { %v3705_v62 = vmul.f32 %v8955_v36, %v15785_v51  ;;  %v10710_v0 = vpop.xlane.xlu0 %1068 }
 0x2e2   :  { %v10702_v14 = vpop.xlane.xlu1 %1071  ;;  %v1633_v5 = vsel %vm184_vm0, %v1569_v32, 0.0  ;;  %v411_v10 = vmax.f32 %v409_v34, %v410_v15  ;;  %15791 = vst [vmem:[#allocation54_spill] sm:$0xff] %v10710_v0  ;;  %v3298_v34 = vmax.f32 %v3296_v53, %v3297_v22  ;;  %v8960_v22 = vld [vmem:[%s15552_s7 + $0x210] sm:$0xff]  ;;  %v15814_v0 = vld [vmem:[#allocation85_spill] sm:$0xff] }
 0x2e3   :  { %15789 = vst [vmem:[#allocation36_spill] sm:$0xff] %v10702_v14  ;;  %v3769_v14 = vsel %vm184_vm0, %v3705_v62, 0.0  ;;  %v8959_v62 = vld [vmem:[%s15552_s7 + $0x218] sm:$0xff]  ;;  %v3301_v48 = vmax.f32 %v15815_v8, %v15814_v0  ;;  %v10941_v8 = vld [vmem:[%s15552_s7 + $0x328] sm:$0xff] }
 0x2e4   :  { %v3707_v33 = vmul.f32 %v8959_v62, %v9900_v16  ;;  %v3299_v15 = vrot.slane %v3298_v34, 1 }
 0x2e7   :  { %1303 = vbcast.lane.b32.xlu1 %v1297_v24, 264 }
 0x2eb   :  { %1387 = vbcast.lane.b32.xlu1 %v1385_v59, 256 }
 0x2ec   :  { %1299 = vbcast.lane.b32.xlu0 %v1297_v24, 256  ;;  %v3235_v24 = vmax.f32 %v3233_v35, %v3234_v57  ;;  %v15786_v35 = vld [vmem:[#allocation37_spill] sm:$0xff] }
 0x2ed   :  { %v468_v57 = vmax.f32 %v15787_v17, %v15786_v35  ;;  %v466_v35 = vrot.slane %v465_v40, 1  ;;  %v15790_v17 = vld [vmem:[#allocation12_spill] sm:$0xff] }
 0x2ee   :  { %v3236_v49 = vrot.slane %v3235_v24, 1  ;;  %v2830_v36 = vsel %vm2285_vm3, %v404_v56, %v15790_v17  ;;  %v10718_v56 = vpop.xlane.xlu1 %1119  ;;  %v15796_v17 = vld [vmem:[#allocation58_spill] sm:$0xff] }
 0x2ef   :  { %1391 = vbcast.lane.b32.xlu1 %v1385_v59, 264  ;;  %v3284_v59 = vmax.f32 %v3282_v3, %v3283_v1  ;;  %v459_v3 = vrot.slane %v458_v43, 1  ;;  %v3229_v1 = vrot.slane %v3228_v58, 1  ;;  %15793 = vst [vmem:[#allocation37_spill] sm:$0xff] %v10718_v56 }
 0x2f0   :  { %1431 = vbcast.lane.b32.xlu0 %v1429_v28, 256  ;;  %v3237_v45 = vmax.f32 %v3235_v24, %v3236_v49  ;;  %v467_v24 = vmax.f32 %v465_v40, %v466_v35  ;;  %v3778_v35 = vsel %vm184_vm0, %v3707_v33, 0.0  ;;  %v8967_v33 = vld [vmem:[%s15552_s7 + $0x90] sm:$0xff] }
 0x2f1   :  { %v3285_v47 = vrot.slane %v3284_v59, 1  ;;  %v460_v61 = vmax.f32 %v458_v43, %v459_v3  ;;  %v3230_v23 = vmax.f32 %v3228_v58, %v3229_v1  ;;  %v15792_v43 = vld [vmem:[#allocation13_spill] sm:$0xff]  ;;  %v8957_v58 = vld [vmem:[%s15552_s7 + $0x18] sm:$0xff]  ;;  %v3770_v1 = vadd.f32 %v3769_v14, %v3768_v39 }
 0x2f2   :  { %v1572_v27 = vmul.f32 %v8957_v58, %v9900_v16  ;;  %v15797_v39 = vld [vmem:[#allocation60_spill] sm:$0xff] }
 0x2f3   :  { %1435 = vbcast.lane.b32.xlu1 %v1429_v28, 264  ;;  %v3240_v28 = vmax.f32 %v3238_v6, %v3239_v54  ;;  %v3292_v6 = vrot.slane %v3291_v25, 1  ;;  %v469_v54 = vrot.slane %v468_v57, 4  ;;  %v3286_v20 = vmax.f32 %v3284_v59, %v3285_v47  ;;  %v8958_v47 = vld [vmem:[%s15552_s7 + $0x10] sm:$0xff]  ;;  %v8964_v58 = vld [vmem:[%s15552_s7 + $0x298] sm:$0xff] }
 0x2f4   :  { %1519 = vbcast.lane.b32.xlu0 %v1517_v41, 256  ;;  %v2837_v3 = vsel %vm2285_vm3, %v460_v61, %v15792_v43  ;;  %v15794_v59 = vld [vmem:[#allocation55_spill] sm:$0xff]  ;;  %v10729_v40 = vsel %vm2281_vm1, %v3237_v45, %v3230_v23  ;;  %v8962_v45 = vld [vmem:[%s15552_s7 + $0x98] sm:$0xff]  ;;  %v10757_v43 = vpop.xlane.xlu1 %1143 }
 0x2f5   :  { %v3241_v51 = vrot.slane %v3240_v28, 2  ;;  %v3293_v32 = vmax.f32 %v3291_v25, %v3292_v6  ;;  %v470_v12 = vmax.f32 %v468_v57, %v469_v54  ;;  %v1571_v25 = vmul.f32 %v8958_v47, %v15794_v59  ;;  %15798 = vst [vmem:[#allocation12_spill] sm:$0xff] %v10757_v43 }
 0x2f6   :  { %v415_v57 = vrot.slane %v414_v30, 2  ;;  %v10735_v6 = vsel %vm2287_vm4, %v411_v10, %v2830_v36  ;;  %v3706_v53 = vmul.f32 %v8960_v22, %v15794_v59  ;;  %v10743_v16 = vsel %vm2287_vm4, %v467_v24, %v2837_v3  ;;  %v10746_v10 = vpop.xlane.xlu0 %1116  ;;  %v8965_v59 = vld [vmem:[%s15552_s7 + $0x80] sm:$0xff] }
 0x2f7   :  { %1523 = vbcast.lane.b32.xlu1 %v1517_v41, 264  ;;  %v1635_v41 = vadd.f32 %v1634_v18, %v1633_v5  ;;  %v3242_v2 = vmax.f32 %v3240_v28, %v3241_v51  ;;  %v10732_v28 = vsel %vm2281_vm1, %v3293_v32, %v3286_v20  ;;  %v471_v14 = vrot.slane %v470_v12, 2  ;;  %15795 = vst [vmem:[#allocation38_spill] sm:$0xff] %v10746_v10  ;;  %v8961_v51 = vld [vmem:[%s15552_s7 + $0x88] sm:$0xff]  ;;  %v15800_v22 = vld [vmem:[#allocation57_spill] sm:$0xff] }
 0x2f8   :  { %v1643_v18 = vsel %vm184_vm0, %v1572_v27, 0.0  ;;  %v3771_v5 = vrot.slane %v3770_v1, 4  ;;  %v1642_v20 = vsel %vm184_vm0, %v1571_v25, 0.0  ;;  %v416_v54 = vmax.f32 %v414_v30, %v415_v57  ;;  %v15799_v25 = vld [vmem:[#allocation56_spill] sm:$0xff] }
 0x2f9   :  { %v1636_v49 = vrot.slane %v1635_v41, 4  ;;  %v3243_v23 = vrot.slane %v3242_v2, 1  ;;  %v1586_v36 = vmul.f32 %v8961_v51, %v15796_v17  ;;  %v1588_v32 = vmul.f32 %v8962_v45, %v15797_v39 }
 0x2fa   :  { %v1644_v30 = vadd.f32 %v1643_v18, %v1642_v20  ;;  %v3723_v27 = vmul.f32 %v8964_v58, %v15797_v39  ;;  %v472_v24 = vmax.f32 %v470_v12, %v471_v14  ;;  %v3777_v47 = vsel %vm184_vm0, %v3706_v53, 0.0  ;;  %v8968_v53 = vld [vmem:[%s15552_s7 + $0x290] sm:$0xff] }
 0x2fb   :  { %v1637_v61 = vadd.f32 %v1636_v49, %v1635_v41  ;;  %v8963_v41 = vld [vmem:[%s15552_s7 + $0x288] sm:$0xff]  ;;  %v1585_v57 = vmul.f32 %v8965_v59, %v15799_v25  ;;  %v8966_v49 = vld [vmem:[%s15552_s7 + $0x280] sm:$0xff]  ;;  %v1587_v12 = vmul.f32 %v8967_v33, %v15800_v22  ;;  %v3779_v14 = vadd.f32 %v3778_v35, %v3777_v47  ;;  %v10788_v47 = vpop.xlane.xlu0 %1140 }
 0x2fc   :  { %v3721_v3 = vmul.f32 %v8963_v41, %v15796_v17  ;;  %v3720_v62 = vmul.f32 %v8966_v49, %v15799_v25  ;;  %v3722_v18 = vmul.f32 %v8968_v53, %v15800_v22  ;;  %v3244_v20 = vmax.f32 %v3242_v2, %v3243_v23  ;;  %15801 = vst [vmem:[#allocation13_spill] sm:$0xff] %v10788_v47  ;;  %v15804_v47 = vld [vmem:[#allocation70_spill] sm:$0xff] }
 0x2fd   :  { %v3300_v51 = vmax.f32 %v3298_v34, %v3299_v15  ;;  %v1638_v17 = vrot.slane %v1637_v61, 2  ;;  %v3772_v45 = vadd.f32 %v3771_v5, %v3770_v1  ;;  %v1706_v39 = vsel %vm184_vm0, %v1586_v36, 0.0  ;;  %v10793_v34 = vpop.xlane.xlu1 %1191 }
 0x2fe   :  { %v1715_v41 = vsel %vm184_vm0, %v1588_v32, 0.0  ;;  %v1645_v58 = vrot.slane %v1644_v30, 4  ;;  %v3841_v59 = vsel %vm184_vm0, %v3721_v3, 0.0  ;;  %v3850_v25 = vsel %vm184_vm0, %v3723_v27, 0.0  ;;  %15802 = vst [vmem:[#allocation55_spill] sm:$0xff] %v10793_v34  ;;  %v8970_v34 = vld [vmem:[%s15552_s7 + $0x20] sm:$0xff] }
 0x2ff   :  { %v417_v35 = vrot.slane %v416_v54, 1  ;;  %v1705_v49 = vsel %vm184_vm0, %v1585_v57, 0.0  ;;  %v3840_v33 = vsel %vm184_vm0, %v3720_v62, 0.0  ;;  %v1714_v2 = vsel %vm184_vm0, %v1587_v12, 0.0  ;;  %v8969_v57 = vld [vmem:[%s15552_s7 + $0x28] sm:$0xff]  ;;  %v15803_v62 = vld [vmem:[#allocation69_spill] sm:$0xff] }
 0x300   :  { %v473_v1 = vrot.slane %v472_v24, 1  ;;  %v3780_v23 = vrot.slane %v3779_v14, 4  ;;  %v3849_v5 = vsel %vm184_vm0, %v3722_v18, 0.0  ;;  %v1707_v15 = vadd.f32 %v1706_v39, %v1705_v49  ;;  %v8972_v39 = vld [vmem:[%s15552_s7 + $0x228] sm:$0xff] }
 0x301   :  { %v1716_v36 = vadd.f32 %v1715_v41, %v1714_v2  ;;  %v10796_v32 = vadd.f32 %v1638_v17, %v1637_v61  ;;  %v3773_v3 = vrot.slane %v3772_v45, 2  ;;  %v3842_v27 = vadd.f32 %v3841_v59, %v3840_v33  ;;  %v10822_v33 = vpop.xlane.xlu0 %1188 }
 0x302   :  { %v3851_v22 = vadd.f32 %v3850_v25, %v3849_v5  ;;  %v1646_v53 = vadd.f32 %v1645_v58, %v1644_v30  ;;  %v1574_v12 = vmul.f32 %v8969_v57, %v15803_v62  ;;  %v1573_v18 = vmul.f32 %v8970_v34, %v15804_v47  ;;  %v8971_v30 = vld [vmem:[%s15552_s7 + $0x220] sm:$0xff]  ;;  %15805 = vst [vmem:[#allocation58_spill] sm:$0xff] %v10822_v33  ;;  %v10827_v57 = vpop.permute.xlu1 %1292 }
 0x303   :  { %v10808_v61 = vsel %vm2283_vm2, %v3244_v20, %v10729_v40  ;;  %v3708_v17 = vmul.f32 %v8971_v30, %v15804_v47  ;;  %v3709_v41 = vmul.f32 %v8972_v39, %v15803_v62  ;;  %v10820_v58 = vsel %vm2283_vm2, %v3300_v51, %v10732_v28 }
 0x304   :  { %v418_v59 = vmax.f32 %v416_v54, %v417_v35  ;;  %v3781_v25 = vadd.f32 %v3780_v23, %v3779_v14  ;;  %v1708_v40 = vrot.slane %v1707_v15, 4  ;;  %v1717_v20 = vrot.slane %v1716_v36, 4  ;;  %v10834_v54 = vld [vmem:[%s15552_s7 + $0x260] sm:$0xff] }
 0x305   :  { %v474_v49 = vmax.f32 %v472_v24, %v473_v1  ;;  %v1640_v2 = vrot.slane %v10796_v32, 1  ;;  %v10825_v47 = vadd.f32 %v3773_v3, %v3772_v45  ;;  %v3843_v34 = vrot.slane %v3842_v27, 4 }
 0x306   :  { %v3852_v5 = vrot.slane %v3851_v22, 4  ;;  %v1647_v62 = vrot.slane %v1646_v53, 2  ;;  %v1652_v30 = vsel %vm184_vm0, %v1574_v12, 0.0  ;;  %v1651_v28 = vsel %vm184_vm0, %v1573_v18, 0.0  ;;  %v8973_v12 = vld [vmem:[%s15552_s7 + $0xa8] sm:$0xff]  ;;  %v15807_v18 = vld [vmem:[#allocation73_spill] sm:$0xff] }
 0x307   :  { %v3786_v24 = vsel %vm184_vm0, %v3708_v17, 0.0  ;;  %v3787_v14 = vsel %vm184_vm0, %v3709_v41, 0.0  ;;  %v10840_v51 = vsel %vm184_vm0, %v10834_v54, -inf  ;;  %v3782_v45 = vrot.slane %v3781_v25, 2 }
 0x308   :  { %v1709_v35 = vadd.f32 %v1708_v40, %v1707_v15  ;;  %v1718_v1 = vadd.f32 %v1717_v20, %v1716_v36  ;;  %v10844_v23 = vsel %vm2289_vm5, %v418_v59, %v10735_v6  ;;  %v15433_v3 = vmov 0.0   ;;  %v15809_v40 = vld [vmem:[#allocation84_spill] sm:$0xff]  ;;  %v15810_v20 = vld [vmem:[#allocation79_spill] sm:$0xff] }
 0x309   :  { %15806 = vst [vmem:[#allocation60_spill] sm:$0xff] %v10844_v23  ;;  %105 = vst.msk [vmem:[#allocation2 + $0x28] sm:$0xff] %vm99_vm6, %v15433_v3  ;;  %v3844_v6 = vadd.f32 %v3843_v34, %v3842_v27  ;;  %v3853_v15 = vadd.f32 %v3852_v5, %v3851_v22  ;;  %v1653_v36 = vadd.f32 %v1652_v30, %v1651_v28  ;;  %v3775_v39 = vrot.slane %v10825_v47, 1  ;;  %v10886_v27 = vld [vmem:[%s15552_s7 + $0x2e0] sm:$0xff]  ;;  %v10896_v30 = vpop.permute.xlu1 %1376 }
 0x30a   :  { %100 = vst.msk [vmem:[#allocation2] sm:$0xff] %vm99_vm6, %v15433_v3  ;;  %101 = vst.msk [vmem:[#allocation2 + $0x8] sm:$0xff] %vm99_vm6, %v15433_v3  ;;  %v1590_v17 = vmul.f32 %v8973_v12, %v15807_v18  ;;  %v3788_v41 = vadd.f32 %v3787_v14, %v3786_v24  ;;  %v10877_v59 = vsel %vm2289_vm5, %v474_v49, %v10743_v16  ;;  %v8974_v16 = vld [vmem:[%s15552_s7 + $0xa0] sm:$0xff]  ;;  %v15811_v49 = vld [vmem:[#allocation71_spill] sm:$0xff]  ;;  %v10900_v28 = vsel %vm184_vm0, %v10886_v27, -inf }
 0x30b   :  { %102 = vst.msk [vmem:[#allocation2 + $0x10] sm:$0xff] %vm99_vm6, %v15433_v3  ;;  %103 = vst.msk [vmem:[#allocation2 + $0x18] sm:$0xff] %vm99_vm6, %v15433_v3  ;;  %v3245_v33 = vmax.f32 %v15810_v20, %v15809_v40  ;;  %v10890_v22 = vadd.f32 %v1640_v2, %v10796_v32  ;;  %v1648_v34 = vadd.f32 %v1647_v62, %v1646_v53  ;;  %v1710_v14 = vrot.slane %v1709_v35, 2  ;;  %v8975_v32 = vld [vmem:[%s15552_s7 + $0x2a8] sm:$0xff] }
 0x30c   :  { %104 = vst.msk [vmem:[#allocation2 + $0x20] sm:$0xff] %vm99_vm6, %v15433_v3  ;;  %106 = vst.msk [vmem:[#allocation2 + $0x30] sm:$0xff] %vm99_vm6, %v15433_v3  ;;  %v1589_v5 = vmul.f32 %v8974_v16, %v15811_v49  ;;  %v3783_v24 = vadd.f32 %v3782_v45, %v3781_v25  ;;  %v1719_v12 = vrot.slane %v1718_v1, 2  ;;  %v3725_v53 = vmul.f32 %v8975_v32, %v15807_v18  ;;  %v10910_v16 = vld [vmem:[%s15552_s7 + $0x268] sm:$0xff]  ;;  %v8976_v25 = vld [vmem:[%s15552_s7 + $0x2a0] sm:$0xff] }
 0x30d   :  { %107 = vst.msk [vmem:[#allocation2 + $0x38] sm:$0xff] %vm99_vm6, %v15433_v3  ;;  %108 = vst.msk [vmem:[#allocation2 + $0x40] sm:$0xff] %vm99_vm6, %v15433_v3  ;;  %v3845_v2 = vrot.slane %v3844_v6, 2  ;;  %v3854_v62 = vrot.slane %v3853_v15, 2  ;;  %v1654_v40 = vrot.slane %v1653_v36, 4  ;;  %v1724_v20 = vsel %vm184_vm0, %v1590_v17, 0.0  ;;  %v10936_v7 = vpop.permute.xlu1 %1380 }
 0x30e   :  { %109 = vst.msk [vmem:[#allocation2 + $0x48] sm:$0xff] %vm99_vm6, %v15433_v3  ;;  %110 = vst.msk [vmem:[#allocation2 + $0x50] sm:$0xff] %vm99_vm6, %v15433_v3  ;;  %v3724_v45 = vmul.f32 %v8976_v25, %v15811_v49  ;;  %v3789_v43 = vrot.slane %v3788_v41, 4  ;;  %v3246_v10 = vrot.slane %v3245_v33, 4  ;;  %v10919_v18 = vld [vmem:[%s15552_s7 + $0x2e8] sm:$0xff]  ;;  %v10924_v17 = vsel %vm184_vm0, %v10910_v16, -inf }
 0x30f   :  { %111 = vst.msk [vmem:[#allocation2 + $0x58] sm:$0xff] %vm99_vm6, %v15433_v3  ;;  %15808 = vst [vmem:[#allocation56_spill] sm:$0xff] %v10877_v59  ;;  %v10881_v3 = vpop.permute.xlu0 %1288  ;;  %v1649_v32 = vrot.slane %v1648_v34, 1  ;;  %v1723_v56 = vsel %vm184_vm0, %v1589_v5, 0.0  ;;  %v10931_v49 = vsel %vm184_vm0, %v10919_v18, -inf  ;;  %v3784_v25 = vrot.slane %v3783_v24, 1 }
 0x310   :  { %15812 = vst [vmem:[#allocation57_spill] sm:$0xff] %v10896_v30  ;;  %15813 = vst [vmem:[#allocation69_spill] sm:$0xff] %v10900_v28  ;;  %v1720_v37 = vadd.f32 %v1719_v12, %v1718_v1  ;;  %v1725_v44 = vadd.f32 %v1724_v20, %v1723_v56  ;;  %v3859_v50 = vsel %vm184_vm0, %v3725_v53, 0.0  ;;  %v1711_v19 = vadd.f32 %v1710_v14, %v1709_v35  ;;  %v10948_v35 = vld [vmem:[%s15552_s7 + $0x320] sm:$0xff] }
 0x311   :  { %15816 = vst [vmem:[#allocation70_spill] sm:$0xff] %v10931_v49  ;;  %v3846_v63 = vadd.f32 %v3845_v2, %v3844_v6  ;;  %v3855_v26 = vadd.f32 %v3854_v62, %v3853_v15  ;;  %v1655_v60 = vadd.f32 %v1654_v40, %v1653_v36  ;;  %v3858_v0 = vsel %vm184_vm0, %v3724_v45, 0.0  ;;  %v10963_v40 = vld [vmem:[%s15552_s7 + $0x3a8] sm:$0xff]  ;;  %v15822_v20 = vld [vmem:[#allocation97_spill] sm:$0xff] }
 0x312   :  { %v3790_v56 = vadd.f32 %v3789_v43, %v3788_v41  ;;  %v3247_v1 = vmax.f32 %v3245_v33, %v3246_v10  ;;  %v10953_v6 = vsel %vm184_vm0, %v10941_v8, -inf  ;;  %v3776_v15 = vadd.f32 %v3775_v39, %v10825_v47  ;;  %v10969_v39 = vld [vmem:[%s15552_s7 + $0x3a0] sm:$0xff] }
 0x313   :  { %3069 = vmax.xlane.f32.xlu0 %v10840_v51  ;;  %v10934_v55 = vpop.permute.xlu0 %1420  ;;  %15818 = vst [vmem:[#allocation84_spill] sm:$0xff] %v10953_v6  ;;  %v3860_v36 = vadd.f32 %v3859_v50, %v3858_v0  ;;  %v3302_v5 = vrot.slane %v3301_v48, 4  ;;  %v10958_v14 = vsel %vm184_vm0, %v10948_v35, -inf  ;;  %v1650_v10 = vadd.f32 %v1649_v32, %v1648_v34  ;;  %v10980_v0 = vpop.permute.xlu1 %1424 }
 0x314   :  { %15817 = vst [vmem:[#allocation73_spill] sm:$0xff] %v10934_v55  ;;  %15819 = vst [vmem:[#allocation79_spill] sm:$0xff] %v10958_v14  ;;  %v3785_v43 = vadd.f32 %v3784_v25, %v3783_v24  ;;  %v1721_v33 = vrot.slane %v1720_v37, 1  ;;  %v1726_v41 = vrot.slane %v1725_v44, 4  ;;  %v1712_v12 = vrot.slane %v1711_v19, 1 }
 0x315   :  { %v3847_v53 = vrot.slane %v3846_v63, 1  ;;  %v3856_v2 = vrot.slane %v3855_v26, 1  ;;  %v1656_v62 = vrot.slane %v1655_v60, 2  ;;  %v3791_v50 = vrot.slane %v3790_v56, 2  ;;  %15823 = vst [vmem:[#allocation81_spill] sm:$0xff] %v10980_v0 }
 0x316   :  { %v3248_v47 = vrot.slane %v3247_v1, 2  ;;  %v10976_v24 = vsel %vm184_vm0, %v10963_v40, -inf  ;;  %v3461_v45 = vmul.f32 %v10910_v16, %v15822_v20  ;;  %v3861_v32 = vrot.slane %v3860_v36, 4 }
 0x317   :  { %3117 = vmax.xlane.f32.xlu0 %v10900_v28  ;;  %v10971_v34 = vpop.permute.xlu0 %1508  ;;  %15821 = vst [vmem:[#allocation85_spill] sm:$0xff] %v10976_v24  ;;  %v3303_v25 = vmax.f32 %v3301_v48, %v3302_v5  ;;  %v10984_v55 = vsel %vm184_vm0, %v10969_v39, -inf  ;;  %v1722_v59 = vadd.f32 %v1721_v33, %v1720_v37  ;;  %v1727_v23 = vadd.f32 %v1726_v41, %v1725_v44  ;;  %v8980_v33 = vld [vmem:[%s15552_s7 + $0x230] sm:$0xff] }
 0x318   :  { %15820 = vst [vmem:[#allocation71_spill] sm:$0xff] %v10971_v34  ;;  %15824 = vst [vmem:[#allocation97_spill] sm:$0xff] %v10984_v55  ;;  %v3460_v34 = vmul.f32 %v10834_v54, %v15822_v20  ;;  %v1713_v28 = vadd.f32 %v1712_v12, %v1711_v19  ;;  %v3848_v48 = vadd.f32 %v3847_v53, %v3846_v63  ;;  %v11031_v12 = vpop.permute.xlu1 %1512  ;;  %vm5080_vm6 = vcmask 384256  }
 0x319   :  { %v3857_v5 = vadd.f32 %v3856_v2, %v3855_v26  ;;  %v1657_v0 = vadd.f32 %v1656_v62, %v1655_v60  ;;  %v10998_v30 = vmax.f32 %v3247_v1, %v3248_v47  ;;  %v3477_v37 = vmul.f32 %v10919_v18, %v10077_v9  ;;  %v8977_v1 = vld [vmem:[%s15552_s7 + $0x38] sm:$0xff]  ;;  %15826 = vst [vmem:[#allocation236_spill] sm:$0xff] %v11031_v12  ;;  %v15869_v12 = vld [vmem:[#allocation189_spill] sm:$0xff] }
 0x31a   :  { %v3862_v44 = vadd.f32 %v3861_v32, %v3860_v36  ;;  %v3304_v19 = vrot.slane %v3303_v25, 2  ;;  %v3548_v26 = vsel %vm184_vm0, %v3460_v34, 0.0  ;;  %v3476_v63 = vmul.f32 %v10886_v27, %v10077_v9  ;;  %v8978_v36 = vld [vmem:[%s15552_s7 + $0x238] sm:$0xff] }
 0x31b   :  { %3072 = vmax.xlane.f32.xlu1 %v10924_v17  ;;  %3120 = vmax.xlane.f32.xlu0 %v10931_v49  ;;  %v10996_v49 = vadd.f32 %v3791_v50, %v3790_v56  ;;  %v11010_v60 = vsel %vm2281_vm1, %v1722_v59, %v1713_v28  ;;  %v1728_v56 = vrot.slane %v1727_v23, 2  ;;  %v1658_v9 = vrot.slane %v1657_v0, 1  ;;  %v8979_v59 = vld [vmem:[%s15552_s7 + $0x30] sm:$0xff] }
 0x31c   :  { %v1575_v28 = vmul.f32 %v8979_v59, %v10128_v21  ;;  %v3710_v41 = vmul.f32 %v8980_v33, %v10128_v21  ;;  %v3250_v53 = vrot.slane %v10998_v30, 1  ;;  %v3599_v62 = vsel %vm184_vm0, %v3477_v37, 0.0  ;;  %v15834_v33 = vld [vmem:[#allocation111_spill] sm:$0xff] }
 0x31d   :  { %v3485_v50 = vmul.f32 %v10941_v8, %v10090_v11  ;;  %v3863_v47 = vrot.slane %v3862_v44, 2  ;;  %v3305_v34 = vmax.f32 %v3303_v25, %v3304_v19  ;;  %v3484_v21 = vmul.f32 %v10948_v35, %v10090_v11  ;;  %v8981_v25 = vld [vmem:[%s15552_s7 + $0xb8] sm:$0xff] }
 0x31e   :  { %v11043_v32 = vadd.f32 %v1728_v56, %v1727_v23  ;;  %v1660_v37 = vsel %vm184_vm0, %v1575_v28, 0.0  ;;  %v3795_v8 = vsel %vm184_vm0, %v3710_v41, 0.0  ;;  %v1592_v19 = vmul.f32 %v8981_v25, %v10136_v29  ;;  %v8982_v11 = vld [vmem:[%s15552_s7 + $0x2b8] sm:$0xff]  ;;  %v15832_v56 = vld [vmem:[#allocation94_spill] sm:$0xff] }
 0x31f   :  { %3144 = vmax.xlane.f32.xlu1 %v10953_v6  ;;  %3141 = vmax.xlane.f32.xlu0 %v10958_v14  ;;  %v10990_v14 = vsel %vm2281_vm1, %v1650_v10, %v10890_v22  ;;  %v10993_v6 = vsel %vm2281_vm1, %v3785_v43, %v3776_v15  ;;  %v3551_v22 = vsel %vm184_vm0, %v3461_v45, 0.0  ;;  %v1576_v15 = vmul.f32 %v8977_v1, %v10123_v4 }
 0x320   :  { %v3711_v10 = vmul.f32 %v8978_v36, %v10123_v4  ;;  %v11021_v43 = vsel %vm2281_vm1, %v3857_v5, %v3848_v48  ;;  %v3793_v4 = vrot.slane %v10996_v49, 1  ;;  %v3596_v45 = vsel %vm184_vm0, %v3476_v63, 0.0  ;;  %v15831_v63 = vld [vmem:[#allocation92_spill] sm:$0xff] }
 0x321   :  { %v1661_v48 = vsel %vm184_vm0, %v1576_v15, 0.0  ;;  %v3727_v23 = vmul.f32 %v8982_v11, %v10136_v29  ;;  %v475_v15 = vmax.f32 %v15832_v56, %v15831_v63  ;;  %v3501_v59 = vmul.f32 %v10963_v40, %v10103_v38  ;;  %v8983_v29 = vld [vmem:[%s15552_s7 + $0xb0] sm:$0xff] }
 0x322   :  { %v3796_v5 = vsel %vm184_vm0, %v3711_v10, 0.0  ;;  %v3623_v10 = vsel %vm184_vm0, %v3485_v50, 0.0  ;;  %v719_v28 = vcombine.high %v10550_v31, %v10550_v31  ;;  %v1591_v41 = vmul.f32 %v8983_v29, %v15834_v33 }
 0x323   :  { %3192 = vmax.xlane.f32.xlu1 %v10976_v24  ;;  %3189 = vmax.xlane.f32.xlu0 %v10984_v55  ;;  %v11001_v20 = vpop.xlane.xlu0 %3063  ;;  %v3620_v50 = vsel %vm184_vm0, %v3484_v21, 0.0  ;;  %v3500_v40 = vmul.f32 %v10969_v39, %v10103_v38  ;;  %v3797_v31 = vadd.f32 %v3796_v5, %v3795_v8  ;;  %v3306_v25 = vrot.slane %v3305_v34, 1  ;;  %v163_v5 = vld [vmem:[%s15552_s7 + $0x158] sm:$0xff] }
 0x324   :  { %15825 = vst [vmem:[#allocation235_spill] sm:$0xff] %v11001_v20  ;;  %v3864_v11 = vadd.f32 %v3863_v47, %v3862_v44  ;;  %v1733_v63 = vsel %vm184_vm0, %v1592_v19, 0.0  ;;  %v3868_v56 = vsel %vm184_vm0, %v3727_v23, 0.0  ;;  %v3671_v38 = vsel %vm184_vm0, %v3501_v59, 0.0 }
 0x325   :  { %v11090_v39 = vrot.slane %v719_v28, %v9332_v42  ;;  %v1732_v44 = vsel %vm184_vm0, %v1591_v41, 0.0  ;;  %v476_v47 = vrot.slane %v475_v15, 4  ;;  %v3798_v8 = vrot.slane %v3797_v31, 4 }
 0x326   :  { %v1734_v19 = vadd.f32 %v1733_v63, %v1732_v44  ;;  %v3865_v59 = vrot.slane %v3864_v11, 1  ;;  %v3251_v28 = vmax.f32 %v10998_v30, %v3250_v53 }
 0x327   :  { %3552 = vadd.xlane.f32.xlu1 %v3551_v22  ;;  %3549 = vadd.xlane.f32.xlu0 %v3548_v26  ;;  %v11035_v2 = vpop.xlane.xlu0 %3111  ;;  %v15828_v22 = vld [vmem:[#allocation90_spill] sm:$0xff]  ;;  %v15829_v26 = vld [vmem:[#allocation91_spill] sm:$0xff]  ;;  %15837 = vst [vmem:[#allocation111_spill] sm:$0xff] %v11090_v39  ;;  %v11114_v63 = vrot.slane %v11090_v39, %v9337_v46  ;;  %v477_v53 = vmax.f32 %v475_v15, %v476_v47 }
 0x328   :  { %15827 = vst [vmem:[#allocation237_spill] sm:$0xff] %v11035_v2  ;;  %v419_v1 = vmax.f32 %v15829_v26, %v15828_v22  ;;  %v1659_v22 = vadd.f32 %v1658_v9, %v1657_v0  ;;  %v1662_v26 = vadd.f32 %v1661_v48, %v1660_v37  ;;  %v768_v0 = vcombine.high %v10566_v52, %v10566_v52 }
 0x329   :  { %v3668_v48 = vsel %vm184_vm0, %v3500_v40, 0.0  ;;  %v3794_v52 = vadd.f32 %v3793_v4, %v10996_v49  ;;  %v11110_v40 = vsel %vm184_vm0, %v163_v5, -inf  ;;  %15841 = vst [vmem:[#allocation241_spill] sm:$0xff] %v11114_v63  ;;  %v11139_v15 = vsel %vm2285_vm3, %v3251_v28, %v10808_v61  ;;  %v15849_v28 = vld [vmem:[#allocation160_spill] sm:$0xff] }
 0x32a   :  { %v420_v29 = vrot.slane %v419_v1, 4  ;;  %v1663_v37 = vrot.slane %v1662_v26, 4  ;;  %15840 = vst [vmem:[#allocation240_spill] sm:$0xff] %v11110_v40  ;;  %v11117_v49 = vrot.slane %v768_v0, %v9332_v42  ;;  %v11121_v30 = vsel %vm2283_vm2, %v1659_v22, %v10990_v14  ;;  %v178_v0 = vld [vmem:[%s15552_s7 + $0x1d0] sm:$0xff] }
 0x32b   :  { %3600 = vadd.xlane.f32.xlu1 %v3599_v62  ;;  %v11059_v35 = vpop.xlane.xlu1 %3066  ;;  %3597 = vadd.xlane.f32.xlu0 %v3596_v45  ;;  %v11063_v36 = vpop.xlane.xlu0 %3114  ;;  %v8984_v62 = vld [vmem:[%s15552_s7 + $0x2b0] sm:$0xff]  ;;  %v11135_v14 = vsel %vm2283_vm2, %v3794_v52, %v10993_v6 }
 0x32c   :  { %15830 = vst [vmem:[#allocation90_spill] sm:$0xff] %v11059_v35  ;;  %15833 = vst [vmem:[#allocation91_spill] sm:$0xff] %v11063_v36  ;;  %v3726_v45 = vmul.f32 %v8984_v62, %v15834_v33  ;;  %v1730_v33 = vrot.slane %v11043_v32, 1  ;;  %v421_v41 = vmax.f32 %v419_v1, %v420_v29  ;;  %v179_v1 = vld [vmem:[%s15552_s7 + $0x1d8] sm:$0xff]  ;;  %v1735_v29 = vrot.slane %v1734_v19, 4 }
 0x32d   :  { %15842 = vst [vmem:[#allocation242_spill] sm:$0xff] %v11117_v49  ;;  %v11152_v6 = vsel %vm184_vm0, %v179_v1, -inf  ;;  %v11157_v61 = vrot.slane %v11117_v49, %v9337_v46 }
 0x32e   :  { %v3867_v9 = vsel %vm184_vm0, %v3726_v45, 0.0  ;;  %v3307_v45 = vmax.f32 %v3305_v34, %v3306_v25  ;;  %v1731_v4 = vadd.f32 %v1730_v33, %v11043_v32  ;;  %v1664_v25 = vadd.f32 %v1663_v37, %v1662_v26  ;;  %15846 = vst [vmem:[#allocation246_spill] sm:$0xff] %v11152_v6 }
 0x32f   :  { %3624 = vadd.xlane.f32.xlu1 %v3623_v10  ;;  %v11083_v36 = vpop.xlane.xlu1 %3132  ;;  %3621 = vadd.xlane.f32.xlu0 %v3620_v50  ;;  %v11086_v21 = vpop.xlane.xlu0 %3129  ;;  %v3869_v23 = vadd.f32 %v3868_v56, %v3867_v9  ;;  %v162_v10 = vld [vmem:[%s15552_s7 + $0x150] sm:$0xff]  ;;  %v3799_v56 = vadd.f32 %v3798_v8, %v3797_v31  ;;  %v3866_v32 = vadd.f32 %v3865_v59, %v3864_v11  ;;  %v422_v22 = vrot.slane %v421_v41, 2 }
 0x330   :  { %15835 = vst [vmem:[#allocation92_spill] sm:$0xff] %v11083_v36  ;;  %15836 = vst [vmem:[#allocation94_spill] sm:$0xff] %v11086_v21  ;;  %v11125_v34 = vsel %vm184_vm0, %v162_v10, -inf  ;;  %v11146_v31 = vsel %vm2285_vm3, %v3307_v45, %v10820_v58  ;;  %v1004_v11 = vmul.f32 %v11114_v63, %v163_v5  ;;  %v11161_v44 = vsel %vm2283_vm2, %v1731_v4, %v11010_v60  ;;  %v8985_v60 = vld [vmem:[%s15552_s7 + $0x48] sm:$0xff] }
 0x331   :  { %15843 = vst [vmem:[#allocation243_spill] sm:$0xff] %v11125_v34  ;;  %15847 = vst [vmem:[#allocation247_spill] sm:$0xff] %v11157_v61  ;;  %v478_v9 = vrot.slane %v477_v53, 2  ;;  %v11164_v58 = vsel %vm184_vm0, %v178_v0, -inf  ;;  %v1003_v47 = vmul.f32 %v11114_v63, %v162_v10  ;;  %v3800_v37 = vrot.slane %v3799_v56, 2  ;;  %v8986_v10 = vld [vmem:[%s15552_s7 + $0x248] sm:$0xff] }
 0x332   :  { %15848 = vst [vmem:[#allocation248_spill] sm:$0xff] %v11164_v58  ;;  %v1736_v8 = vadd.f32 %v1735_v29, %v1734_v19  ;;  %v11169_v5 = vsel %vm2283_vm2, %v3866_v32, %v11021_v43  ;;  %v11171_v59 = vmax.f32 %v421_v41, %v422_v22  ;;  %v1578_v45 = vmul.f32 %v8985_v60, %v15849_v28  ;;  %v8987_v43 = vld [vmem:[%s15552_s7 + $0x40] sm:$0xff] }
 0x333   :  { %3672 = vadd.xlane.f32.xlu1 %v3671_v38  ;;  %v11105_v62 = vpop.xlane.xlu1 %3138  ;;  %3669 = vadd.xlane.f32.xlu0 %v3668_v48  ;;  %v11107_v50 = vpop.xlane.xlu0 %3135  ;;  %v3870_v38 = vrot.slane %v3869_v23, 4  ;;  %v1665_v48 = vrot.slane %v1664_v25, 2  ;;  %v3713_v4 = vmul.f32 %v8986_v10, %v15849_v28  ;;  %v8988_v29 = vld [vmem:[%s15552_s7 + $0x240] sm:$0xff]  ;;  %v1154_v22 = vsel %vm184_vm0, %v1004_v11, 0.0  ;;  %v8989_v10 = vld [vmem:[%s15552_s7 + $0xc8] sm:$0xff] }
 0x334   :  { %15838 = vst [vmem:[#allocation238_spill] sm:$0xff] %v11105_v62  ;;  %15839 = vst [vmem:[#allocation239_spill] sm:$0xff] %v11107_v50  ;;  %v1020_v60 = vmul.f32 %v11157_v61, %v179_v1  ;;  %v479_v28 = vmax.f32 %v477_v53, %v478_v9  ;;  %v1737_v21 = vrot.slane %v1736_v8, 2  ;;  %v8990_v53 = vld [vmem:[%s15552_s7 + $0xc0] sm:$0xff]  ;;  %v15854_v1 = vld [vmem:[#allocation162_spill] sm:$0xff]  ;;  %v424_v62 = vrot.slane %v11171_v59, 1 }
 0x335   :  { %v3871_v52 = vadd.f32 %v3870_v38, %v3869_v23  ;;  %v15851_v23 = vld [vmem:[#allocation161_spill] sm:$0xff]  ;;  %v1593_v11 = vmul.f32 %v8990_v53, %v15854_v1  ;;  %v8991_v9 = vld [vmem:[%s15552_s7 + $0x2c8] sm:$0xff] }
 0x336   :  { %v1577_v41 = vmul.f32 %v8987_v43, %v15851_v23  ;;  %v3712_v38 = vmul.f32 %v8988_v29, %v15851_v23  ;;  %v15853_v43 = vld [vmem:[#allocation164_spill] sm:$0xff]  ;;  %v1666_v23 = vadd.f32 %v1665_v48, %v1664_v25  ;;  %v3801_v29 = vadd.f32 %v3800_v37, %v3799_v56 }
 0x337   :  { %315 = vmax.xlane.f32.xlu1 %v11110_v40  ;;  %v11142_v26 = vpop.xlane.xlu1 %3180  ;;  %312 = vmax.xlane.f32.xlu0 %v11125_v34  ;;  %v11149_v33 = vpop.xlane.xlu0 %3177  ;;  %v1594_v42 = vmul.f32 %v8989_v10, %v15853_v43  ;;  %v3872_v36 = vrot.slane %v3871_v52, 2  ;;  %v15855_v10 = vld [vmem:[#allocation134_spill] sm:$0xff]  ;;  %v3805_v48 = vsel %vm184_vm0, %v3713_v4, 0.0 }
 0x338   :  { %15844 = vst [vmem:[#allocation244_spill] sm:$0xff] %v11142_v26  ;;  %15845 = vst [vmem:[#allocation245_spill] sm:$0xff] %v11149_v33  ;;  %v1151_v33 = vsel %vm184_vm0, %v1003_v47, 0.0  ;;  %v1019_v26 = vmul.f32 %v11157_v61, %v178_v0  ;;  %v3729_v47 = vmul.f32 %v8991_v9, %v15853_v43  ;;  %v15856_v0 = vld [vmem:[#allocation129_spill] sm:$0xff]  ;;  %v1669_v37 = vsel %vm184_vm0, %v1577_v41, 0.0 }
 0x339   :  { %v3252_v25 = vmax.f32 %v15856_v0, %v15855_v10  ;;  %v8992_v43 = vld [vmem:[%s15552_s7 + $0x2c0] sm:$0xff]  ;;  %v15859_v10 = vld [vmem:[#allocation136_spill] sm:$0xff]  ;;  %v1667_v50 = vrot.slane %v1666_v23, 1 }
 0x33a   :  { %v3728_v9 = vmul.f32 %v8992_v43, %v15854_v1  ;;  %v15860_v0 = vld [vmem:[#allocation132_spill] sm:$0xff]  ;;  %v1199_v41 = vsel %vm184_vm0, %v1019_v26, 0.0  ;;  %v3877_v35 = vsel %vm184_vm0, %v3729_v47, 0.0  ;;  %v480_v43 = vrot.slane %v479_v28, 1 }
 0x33b   :  { %363 = vmax.xlane.f32.xlu1 %v11152_v6  ;;  %v11182_v19 = vpop.xlane.xlu1 %3186  ;;  %360 = vmax.xlane.f32.xlu0 %v11164_v58  ;;  %v11193_v32 = vpop.xlane.xlu0 %3183  ;;  %v3308_v4 = vmax.f32 %v15860_v0, %v15859_v10  ;;  %v3253_v10 = vrot.slane %v3252_v25, 4  ;;  %v15863_v0 = vld [vmem:[#allocation140_spill] sm:$0xff]  ;;  %v1668_v47 = vadd.f32 %v1667_v50, %v1666_v23 }
 0x33c   :  { %15850 = vst [vmem:[#allocation160_spill] sm:$0xff] %v11182_v19  ;;  %15852 = vst [vmem:[#allocation161_spill] sm:$0xff] %v11193_v32  ;;  %v1670_v32 = vsel %vm184_vm0, %v1578_v45, 0.0  ;;  %v3804_v45 = vsel %vm184_vm0, %v3712_v38, 0.0  ;;  %v1202_v19 = vsel %vm184_vm0, %v1020_v60, 0.0  ;;  %v3802_v38 = vrot.slane %v3801_v29, 1 }
 0x33d   :  { %v3806_v60 = vadd.f32 %v3805_v48, %v3804_v45 }
 0x33f   :  { %1155 = vadd.xlane.f32.xlu1 %v1154_v22  ;;  %v11214_v56 = vpop.xlane.xlu1 %3546  ;;  %1152 = vadd.xlane.f32.xlu0 %v1151_v33  ;;  %v11219_v53 = vpop.xlane.xlu0 %3543  ;;  %v1742_v22 = vsel %vm184_vm0, %v1594_v42, 0.0  ;;  %v1738_v33 = vadd.f32 %v1737_v21, %v1736_v8  ;;  %v3873_v42 = vadd.f32 %v3872_v36, %v3871_v52  ;;  %v3876_v21 = vsel %vm184_vm0, %v3728_v9, 0.0 }
 0x340   :  { %15857 = vst [vmem:[#allocation164_spill] sm:$0xff] %v11214_v56  ;;  %15858 = vst [vmem:[#allocation162_spill] sm:$0xff] %v11219_v53  ;;  %v1671_v53 = vadd.f32 %v1670_v32, %v1669_v37  ;;  %v1741_v56 = vsel %vm184_vm0, %v1593_v11, 0.0  ;;  %v3309_v8 = vrot.slane %v3308_v4, 4  ;;  %v15864_v32 = vld [vmem:[#allocation142_spill] sm:$0xff]  ;;  %v15865_v37 = vld [vmem:[#allocation143_spill] sm:$0xff] }
 0x341   :  { %v1743_v2 = vadd.f32 %v1742_v22, %v1741_v56  ;;  %v426_v48 = vmax.f32 %v15864_v32, %v15863_v0  ;;  %v15866_v11 = vld [vmem:[#allocation144_spill] sm:$0xff]  ;;  %v1739_v20 = vrot.slane %v1738_v33, 1  ;;  %v3807_v52 = vrot.slane %v3806_v60, 4 }
 0x342   :  { %v482_v45 = vmax.f32 %v15866_v11, %v15865_v37  ;;  %v1672_v36 = vrot.slane %v1671_v53, 4  ;;  %v15867_v56 = vld [vmem:[#allocation188_spill] sm:$0xff]  ;;  %v3874_v6 = vrot.slane %v3873_v42, 1  ;;  %v11249_v0 = vmax.f32 %v11171_v59, %v424_v62 }
 0x343   :  { %1203 = vadd.xlane.f32.xlu1 %v1202_v19  ;;  %v11233_v1 = vpop.xlane.xlu1 %3594  ;;  %1200 = vadd.xlane.f32.xlu0 %v1199_v41  ;;  %v11235_v26 = vpop.xlane.xlu0 %3591  ;;  %v3803_v19 = vadd.f32 %v3802_v38, %v3801_v29  ;;  %v15868_v22 = vld [vmem:[#allocation184_spill] sm:$0xff]  ;;  %v11251_v32 = vmax.f32 %v479_v28, %v480_v43  ;;  %v1744_v50 = vrot.slane %v1743_v2, 4  ;;  %v3310_v29 = vmax.f32 %v3308_v4, %v3309_v8 }
 0x344   :  { %15861 = vst [vmem:[#allocation134_spill] sm:$0xff] %v11233_v1  ;;  %15862 = vst [vmem:[#allocation129_spill] sm:$0xff] %v11235_v26  ;;  %v3878_v1 = vadd.f32 %v3877_v35, %v3876_v21  ;;  %v3259_v41 = vmax.f32 %v15868_v22, %v15867_v56  ;;  %v15870_v26 = vld [vmem:[#allocation186_spill] sm:$0xff]  ;;  %v3254_v35 = vmax.f32 %v3252_v25, %v3253_v10  ;;  %v427_v38 = vrot.slane %v426_v48, 4  ;;  %v15874_v10 = vld [vmem:[#allocation197_spill] sm:$0xff] }
 0x345   :  { %v3315_v58 = vmax.f32 %v15870_v26, %v15869_v12  ;;  %v483_v21 = vrot.slane %v482_v45, 4  ;;  %v11257_v37 = vsel %vm2285_vm3, %v1668_v47, %v11121_v30  ;;  %v11261_v12 = vsel %vm2285_vm3, %v3803_v19, %v11135_v14  ;;  %v8993_v30 = vld [vmem:[%s15552_s7 + $0x58] sm:$0xff]  ;;  %v8996_v22 = vld [vmem:[%s15552_s7 + $0x250] sm:$0xff] }
 0x346   :  { %v1740_v26 = vadd.f32 %v1739_v20, %v1738_v33  ;;  %v3879_v62 = vrot.slane %v3878_v1, 4  ;;  %v1673_v59 = vadd.f32 %v1672_v36, %v1671_v53  ;;  %v3808_v28 = vadd.f32 %v3807_v52, %v3806_v60  ;;  %v8994_v20 = vld [vmem:[%s15552_s7 + $0x50] sm:$0xff]  ;;  %v15875_v14 = vld [vmem:[#allocation200_spill] sm:$0xff] }
 0x347   :  { %v11246_v9 = vpop.xlane.xlu1 %3612  ;;  %v11253_v23 = vpop.xlane.xlu0 %3609  ;;  %v3260_v43 = vrot.slane %v3259_v41, 4  ;;  %v3316_v11 = vrot.slane %v3315_v58, 4  ;;  %v11265_v25 = vadd.f32 %v3874_v6, %v3873_v42  ;;  %v1745_v4 = vadd.f32 %v1744_v50, %v1743_v2  ;;  %v8995_v36 = vld [vmem:[%s15552_s7 + $0x258] sm:$0xff] }
 0x348   :  { %15871 = vst [vmem:[#allocation136_spill] sm:$0xff] %v11246_v9  ;;  %15872 = vst [vmem:[#allocation132_spill] sm:$0xff] %v11253_v23  ;;  %v1580_v8 = vmul.f32 %v8993_v30, %v15874_v10  ;;  %v1579_v53 = vmul.f32 %v8994_v20, %v15875_v14  ;;  %v3255_v60 = vrot.slane %v3254_v35, 2  ;;  %v3311_v47 = vrot.slane %v3310_v29, 2  ;;  %v15879_v20 = vld [vmem:[#allocation63_spill] sm:$0xff] }
 0x349   :  { %v428_v19 = vmax.f32 %v426_v48, %v427_v38  ;;  %v484_v6 = vmax.f32 %v482_v45, %v483_v21  ;;  %v11279_v2 = vsel %vm2285_vm3, %v1740_v26, %v11161_v44  ;;  %v3880_v42 = vadd.f32 %v3879_v62, %v3878_v1 }
 0x34a   :  { %v3715_v52 = vmul.f32 %v8995_v36, %v15874_v10  ;;  %v3714_v50 = vmul.f32 %v8996_v22, %v15875_v14  ;;  %v1674_v30 = vrot.slane %v1673_v59, 2  ;;  %v3809_v48 = vrot.slane %v3808_v28, 2  ;;  %v11298_v10 = vld [vmem:[%s15559_s11 + $0x10] sm:$0xff] }
 0x34b   :  { %v11263_v56 = vpop.xlane.xlu1 %3618  ;;  %v11275_v33 = vpop.xlane.xlu0 %3615  ;;  %v3261_v45 = vmax.f32 %v3259_v41, %v3260_v43  ;;  %v3317_v38 = vmax.f32 %v3315_v58, %v3316_v11  ;;  %v1746_v44 = vrot.slane %v1745_v4, 2  ;;  %v1679_v1 = vsel %vm184_vm0, %v1580_v8, 0.0 }
 0x34c   :  { %15873 = vst [vmem:[#allocation140_spill] sm:$0xff] %v11263_v56  ;;  %15876 = vst [vmem:[#allocation142_spill] sm:$0xff] %v11275_v33  ;;  %v1678_v26 = vsel %vm184_vm0, %v1579_v53, 0.0  ;;  %v1440_v14 = vrot.slane %v11298_v10, %v15879_v20  ;;  %v3256_v36 = vmax.f32 %v3254_v35, %v3255_v60  ;;  %v3312_v41 = vmax.f32 %v3310_v29, %v3311_v47  ;;  %v8998_v53 = vld [vmem:[%s15552_s7 + $0xd8] sm:$0xff]  ;;  %v8999_v60 = vld [vmem:[%s15552_s7 + $0xd0] sm:$0xff] }
 0x34d   :  { %v429_v58 = vrot.slane %v428_v19, 2  ;;  %v485_v43 = vrot.slane %v484_v6, 2  ;;  %v3881_v11 = vrot.slane %v3880_v42, 2  ;;  %v3814_v22 = vsel %vm184_vm0, %v3715_v52, 0.0  ;;  %v15881_v47 = vld [vmem:[#allocation201_spill] sm:$0xff] }
 0x34e   :  { %v3813_v8 = vsel %vm184_vm0, %v3714_v50, 0.0  ;;  %v1680_v23 = vadd.f32 %v1679_v1, %v1678_v26  ;;  %v3262_v9 = vrot.slane %v3261_v45, 2  ;;  %v3318_v33 = vrot.slane %v3317_v38, 2 }
 0x34f   :  { %v11289_v21 = vpop.xlane.xlu1 %3660  ;;  %v11293_v62 = vpop.xlane.xlu0 %3657  ;;  %v3810_v35 = vadd.f32 %v3809_v48, %v3808_v28  ;;  %v1747_v29 = vadd.f32 %v1746_v44, %v1745_v4  ;;  %v1595_v52 = vmul.f32 %v8999_v60, %v15881_v47  ;;  %v3257_v1 = vrot.slane %v3256_v36, 1  ;;  %v9001_v60 = vld [vmem:[%s15552_s7 + $0x2d8] sm:$0xff] }
 0x350   :  { %15877 = vst [vmem:[#allocation143_spill] sm:$0xff] %v11289_v21  ;;  %15878 = vst [vmem:[#allocation144_spill] sm:$0xff] %v11293_v62  ;;  %v1596_v62 = vmul.f32 %v8998_v53, %v10523_v13  ;;  %v1675_v21 = vadd.f32 %v1674_v30, %v1673_v59  ;;  %v11319_v59 = vld [vmem:[%s15559_s11 + $0x18] sm:$0xff]  ;;  %v3313_v28 = vrot.slane %v3312_v41, 1  ;;  %v430_v4 = vmax.f32 %v428_v19, %v429_v58 }
 0x351   :  { %15883 = vst [vmem:[#allocation189_spill] sm:$0xff] %v11319_v59  ;;  %v1528_v30 = vrot.slane %v11319_v59, %v15879_v20  ;;  %v3815_v48 = vadd.f32 %v3814_v22, %v3813_v8  ;;  %v3882_v44 = vadd.f32 %v3881_v11, %v3880_v42  ;;  %v486_v26 = vmax.f32 %v484_v6, %v485_v43  ;;  %v9002_v6 = vld [vmem:[%s15552_s7 + $0x2d0] sm:$0xff] }
 0x352   :  { %v1751_v53 = vsel %vm184_vm0, %v1596_v62, 0.0  ;;  %v1681_v34 = vrot.slane %v1680_v23, 4  ;;  %v3263_v40 = vmax.f32 %v3261_v45, %v3262_v9  ;;  %v3319_v55 = vmax.f32 %v3317_v38, %v3318_v33 }
 0x353   :  { %v11308_v56 = vpop.xlane.xlu1 %3666  ;;  %v11314_v50 = vpop.xlane.xlu0 %3663  ;;  %v3811_v20 = vrot.slane %v3810_v35, 1  ;;  %v1748_v61 = vrot.slane %v1747_v29, 1  ;;  %v1750_v19 = vsel %vm184_vm0, %v1595_v52, 0.0  ;;  %v3730_v42 = vmul.f32 %v9002_v6, %v15881_v47 }
 0x354   :  { %15880 = vst [vmem:[#allocation188_spill] sm:$0xff] %v11308_v56  ;;  %15882 = vst [vmem:[#allocation184_spill] sm:$0xff] %v11314_v50  ;;  %1446 = vbcast.lane.b32.xlu1 %v1440_v14, 264  ;;  %v3731_v50 = vmul.f32 %v9001_v60, %v10523_v13  ;;  %v1676_v56 = vrot.slane %v1675_v21, 1  ;;  %v3258_v13 = vmax.f32 %v3256_v36, %v3257_v1  ;;  %v3816_v43 = vrot.slane %v3815_v48, 4 }
 0x355   :  { %v3314_v58 = vmax.f32 %v3312_v41, %v3313_v28  ;;  %v1752_v9 = vadd.f32 %v1751_v53, %v1750_v19  ;;  %v3883_v33 = vrot.slane %v3882_v44, 1  ;;  %v431_v45 = vrot.slane %v430_v4, 1 }
 0x356   :  { %v487_v38 = vrot.slane %v486_v26, 1  ;;  %v3886_v11 = vsel %vm184_vm0, %v3731_v50, 0.0  ;;  %v4889_v22 = vsel %vm2285_vm3, %v11265_v25, %v11169_v5  ;;  %v1682_v8 = vadd.f32 %v1681_v34, %v1680_v23 }
 0x357   :  { %v11328_v24 = vpop.xlane.xlu1 %309  ;;  %v11335_v62 = vpop.xlane.xlu0 %306  ;;  %v3264_v52 = vrot.slane %v3263_v40, 1  ;;  %v3320_v47 = vrot.slane %v3319_v55, 1  ;;  %v1677_v6 = vadd.f32 %v1676_v56, %v1675_v21  ;;  %v3812_v36 = vadd.f32 %v3811_v20, %v3810_v35  ;;  %v9003_v20 = vld [vmem:[%s15552_s7 + $0x68] sm:$0xff] }
 0x358   :  { %15884 = vst [vmem:[#allocation186_spill] sm:$0xff] %v11328_v24  ;;  %15885 = vst [vmem:[#allocation197_spill] sm:$0xff] %v11335_v62  ;;  %1530 = vbcast.lane.b32.xlu1 %v1528_v30, 256  ;;  %v1749_v41 = vadd.f32 %v1748_v61, %v1747_v29  ;;  %v3885_v1 = vsel %vm184_vm0, %v3730_v42, 0.0  ;;  %v3817_v50 = vadd.f32 %v3816_v43, %v3815_v48  ;;  %v1753_v53 = vrot.slane %v1752_v9, 4 }
 0x359   :  { %1442 = vbcast.lane.b32.xlu0 %v1440_v14, 256  ;;  %v4955_v14 = vsel %vm2287_vm4, %v3258_v13, %v11139_v15  ;;  %v3887_v19 = vadd.f32 %v3886_v11, %v3885_v1  ;;  %v3884_v5 = vadd.f32 %v3883_v33, %v3882_v44  ;;  %v4962_v34 = vsel %vm2287_vm4, %v3314_v58, %v11146_v31 }
 0x35a   :  { %v11350_v23 = vmax.f32 %v430_v4, %v431_v45  ;;  %v11352_v56 = vmax.f32 %v486_v26, %v487_v38  ;;  %v1683_v61 = vrot.slane %v1682_v8, 2  ;;  %v3265_v25 = vmax.f32 %v3263_v40, %v3264_v52 }
 0x35b   :  { %v11341_v60 = vpop.xlane.xlu1 %357  ;;  %v11344_v28 = vpop.xlane.xlu0 %354  ;;  %v3321_v21 = vmax.f32 %v3319_v55, %v3320_v47  ;;  %v1582_v15 = vmul.f32 %v9003_v20, %v10827_v57  ;;  %v11362_v29 = vsel %vm2287_vm4, %v1677_v6, %v11257_v37  ;;  %v11366_v31 = vsel %vm2287_vm4, %v3812_v36, %v11261_v12  ;;  %v9004_v55 = vld [vmem:[%s15552_s7 + $0x60] sm:$0xff]  ;;  %v9005_v6 = vld [vmem:[%s15552_s7 + $0xe8] sm:$0xff] }
 0x35c   :  { %15886 = vst [vmem:[#allocation200_spill] sm:$0xff] %v11341_v60  ;;  %15887 = vst [vmem:[#allocation201_spill] sm:$0xff] %v11344_v28  ;;  %1534 = vbcast.lane.b32.xlu1 %v1528_v30, 264  ;;  %v11370_v40 = vsel %vm2287_vm4, %v1749_v41, %v11279_v2  ;;  %v1581_v30 = vmul.f32 %v9004_v55, %v10881_v3  ;;  %v3818_v48 = vrot.slane %v3817_v50, 2  ;;  %v3888_v37 = vrot.slane %v3887_v19, 4 }
 0x35d   :  { %v11378_v44 = vadd.f32 %v1753_v53, %v1752_v9  ;;  %v3266_v12 = vmax.f32 %v10840_v51, %v10924_v17  ;;  %v11383_v26 = vsel %vm2287_vm4, %v3884_v5, %v4889_v22  ;;  %v3717_v2 = vmul.f32 %v10910_v16, %v10827_v57  ;;  %v11405_v57 = vld [vmem:[%s15552_s7 + $0x278] sm:$0xff]  ;;  %v15891_v16 = vld [vmem:[#allocation57_spill] sm:$0xff]  ;;  %v15893_v53 = vld [vmem:[#allocation70_spill] sm:$0xff] }
 0x35e   :  { %v3716_v42 = vmul.f32 %v10834_v54, %v10881_v3  ;;  %v3733_v13 = vmul.f32 %v10919_v18, %v10936_v7  ;;  %v11391_v58 = vadd.f32 %v1683_v61, %v1682_v8  ;;  %v11394_v43 = vsel %vm2289_vm5, %v3265_v25, %v4955_v14  ;;  %v11410_v54 = vld [vmem:[%s15552_s7 + $0x270] sm:$0xff]  ;;  %v9006_v14 = vld [vmem:[%s15552_s7 + $0xe0] sm:$0xff] }
 0x35f   :  { %v11358_v35 = vpop.xlane.xlu1 %1149  ;;  %v11376_v4 = vpop.xlane.xlu0 %1146  ;;  %v11397_v9 = vsel %vm2289_vm5, %v3321_v21, %v4962_v34  ;;  %v1688_v51 = vsel %vm184_vm0, %v1582_v15, 0.0  ;;  %v1687_v3 = vsel %vm184_vm0, %v1581_v30, 0.0  ;;  %v3732_v18 = vmul.f32 %v10886_v27, %v15891_v16  ;;  %v11444_v61 = vld [vmem:[%s15552_s7 + $0x2f0] sm:$0xff] }
 0x360   :  { %15888 = vst [vmem:[#allocation249_spill] sm:$0xff] %v11358_v35  ;;  %15889 = vst [vmem:[#allocation250_spill] sm:$0xff] %v11376_v4  ;;  %v11419_v45 = vsel %vm184_vm0, %v11410_v54, -inf  ;;  %v11423_v38 = vsel %vm184_vm0, %v11405_v57, -inf  ;;  %v11425_v11 = vadd.f32 %v3818_v48, %v3817_v50  ;;  %v3889_v8 = vadd.f32 %v3888_v37, %v3887_v19  ;;  %v15894_v19 = vld [vmem:[#allocation69_spill] sm:$0xff] }
 0x361   :  { %v3267_v52 = vrot.slane %v3266_v12, 4  ;;  %v3823_v47 = vsel %vm184_vm0, %v3717_v2, 0.0  ;;  %v3822_v27 = vsel %vm184_vm0, %v3716_v42, 0.0  ;;  %v1598_v36 = vmul.f32 %v9005_v6, %v10936_v7  ;;  %v11449_v7 = vld [vmem:[%s15552_s7 + $0x2f8] sm:$0xff] }
 0x362   :  { %v3895_v41 = vsel %vm184_vm0, %v3733_v13, 0.0  ;;  %v1689_v1 = vadd.f32 %v1688_v51, %v1687_v3  ;;  %v1597_v50 = vmul.f32 %v9006_v14, %v15891_v16  ;;  %v3322_v5 = vmax.f32 %v15894_v19, %v15893_v53  ;;  %v9007_v51 = vld [vmem:[%s15552_s7 + $0x78] sm:$0xff] }
 0x363   :  { %v11400_v17 = vpop.xlane.xlu1 %1197  ;;  %v11415_v33 = vpop.xlane.xlu0 %1194  ;;  %v3273_v25 = vmax.f32 %v11419_v45, %v11423_v38  ;;  %v3894_v21 = vsel %vm184_vm0, %v3732_v18, 0.0  ;;  %v11457_v55 = vsel %vm184_vm0, %v11444_v61, -inf  ;;  %v11461_v30 = vsel %vm184_vm0, %v11449_v7, -inf  ;;  %v9008_v18 = vld [vmem:[%s15552_s7 + $0x70] sm:$0xff] }
 0x364   :  { %15890 = vst [vmem:[#allocation251_spill] sm:$0xff] %v11400_v17  ;;  %15892 = vst [vmem:[#allocation57_spill] sm:$0xff] %v11415_v33  ;;  %v3890_v48 = vrot.slane %v3889_v8, 2  ;;  %v3824_v37 = vadd.f32 %v3823_v47, %v3822_v27  ;;  %v3896_v2 = vadd.f32 %v3895_v41, %v3894_v21  ;;  %v1760_v13 = vsel %vm184_vm0, %v1598_v36, 0.0 }
 0x365   :  { %v3268_v14 = vmax.f32 %v3266_v12, %v3267_v52  ;;  %v3323_v53 = vrot.slane %v3322_v5, 4  ;;  %v3329_v36 = vmax.f32 %v11457_v55, %v11461_v30  ;;  %v1690_v41 = vrot.slane %v1689_v1, 4  ;;  %v9009_v52 = vld [vmem:[%s15552_s7 + $0xf0] sm:$0xff] }
 0x366   :  { %v1759_v19 = vsel %vm184_vm0, %v1597_v50, 0.0  ;;  %v3897_v33 = vrot.slane %v3896_v2, 4 }
 0x367   :  { %v1304_v34 = vpop.permute.xlu1 %1303  ;;  %v1300_v15 = vpop.permute.xlu0 %1299  ;;  %v1761_v22 = vadd.f32 %v1760_v13, %v1759_v19  ;;  %v3324_v4 = vmax.f32 %v3322_v5, %v3323_v53 }
 0x368   :  { %v3719_v20 = vmul.f32 %v11405_v57, %v1304_v34  ;;  %v3718_v42 = vmul.f32 %v11410_v54, %v1300_v15  ;;  %v1584_v3 = vmul.f32 %v9007_v51, %v1304_v34  ;;  %v1583_v6 = vmul.f32 %v9008_v18, %v1300_v15 }
 0x369   :  { %v3274_v34 = vrot.slane %v3273_v25, 4  ;;  %v3891_v51 = vadd.f32 %v3890_v48, %v3889_v8  ;;  %v3269_v18 = vrot.slane %v3268_v14, 2  ;;  %v1691_v8 = vadd.f32 %v1690_v41, %v1689_v1  ;;  %v9010_v48 = vld [vmem:[%s15552_s7 + $0xf8] sm:$0xff] }
 0x36a   :  { %v3832_v16 = vsel %vm184_vm0, %v3719_v20, 0.0  ;;  %v3831_v47 = vsel %vm184_vm0, %v3718_v42, 0.0  ;;  %v3825_v20 = vrot.slane %v3824_v37, 4  ;;  %v1697_v17 = vsel %vm184_vm0, %v1584_v3, 0.0 }
 0x36b   :  { %v1388_v27 = vpop.permute.xlu1 %1387  ;;  %v3833_v21 = vadd.f32 %v3832_v16, %v3831_v47  ;;  %v1696_v12 = vsel %vm184_vm0, %v1583_v6, 0.0  ;;  %v3330_v47 = vrot.slane %v3329_v36, 4  ;;  %v3275_v6 = vmax.f32 %v3273_v25, %v3274_v34 }
 0x36c   :  { %v1599_v15 = vmul.f32 %v9009_v52, %v1388_v27  ;;  %v3734_v42 = vmul.f32 %v11444_v61, %v1388_v27  ;;  %v3826_v19 = vadd.f32 %v3825_v20, %v3824_v37  ;;  %v1762_v35 = vrot.slane %v1761_v22, 4 }
 0x36d   :  { %v3834_v50 = vrot.slane %v3833_v21, 4  ;;  %v3898_v28 = vadd.f32 %v3897_v33, %v3896_v2  ;;  %v1698_v52 = vadd.f32 %v1697_v17, %v1696_v12  ;;  %v3331_v24 = vmax.f32 %v3329_v36, %v3330_v47 }
 0x36e   :  { %v1768_v27 = vsel %vm184_vm0, %v1599_v15, 0.0  ;;  %v3903_v5 = vsel %vm184_vm0, %v3734_v42, 0.0  ;;  %v15895_v25 = vrot.slane %v11378_v44, 2  ;;  %v3325_v33 = vrot.slane %v3324_v4, 2 }
 0x36f   :  { %v1392_v16 = vpop.permute.xlu1 %1391  ;;  %v3835_v41 = vadd.f32 %v3834_v50, %v3833_v21  ;;  %v3276_v17 = vrot.slane %v3275_v6, 2  ;;  %v3270_v2 = vmax.f32 %v3268_v14, %v3269_v18  ;;  %v1699_v34 = vrot.slane %v1698_v52, 4 }
 0x370   :  { %v1600_v13 = vmul.f32 %v9010_v48, %v1392_v16  ;;  %v3735_v3 = vmul.f32 %v11449_v7, %v1392_v16  ;;  %v3820_v48 = vrot.slane %v11425_v11, 1  ;;  %v1756_v37 = vadd.f32 %v15895_v25, %v11378_v44 }
 0x371   :  { %v3892_v15 = vrot.slane %v3891_v51, 1  ;;  %v1692_v42 = vrot.slane %v1691_v8, 2  ;;  %v3827_v16 = vrot.slane %v3826_v19, 2  ;;  %v3899_v21 = vrot.slane %v3898_v28, 2 }
 0x372   :  { %v1769_v53 = vsel %vm184_vm0, %v1600_v13, 0.0  ;;  %v3904_v1 = vsel %vm184_vm0, %v3735_v3, 0.0  ;;  %v1763_v13 = vadd.f32 %v1762_v35, %v1761_v22  ;;  %v3836_v50 = vrot.slane %v3835_v41, 2 }
 0x373   :  { %v1770_v60 = vadd.f32 %v1769_v53, %v1768_v27  ;;  %v3905_v62 = vadd.f32 %v3904_v1, %v3903_v5  ;;  %v3332_v36 = vrot.slane %v3331_v24, 2  ;;  %v1685_v47 = vrot.slane %v11391_v58, 1 }
 0x374   :  { %v1757_v27 = vrot.slane %v1756_v37, 1  ;;  %v3326_v5 = vmax.f32 %v3324_v4, %v3325_v33  ;;  %v3277_v44 = vmax.f32 %v3275_v6, %v3276_v17  ;;  %v3271_v53 = vrot.slane %v3270_v2, 1 }
 0x375   :  { %v1771_v20 = vrot.slane %v1770_v60, 4  ;;  %v3906_v12 = vrot.slane %v3905_v62, 4  ;;  %v1700_v1 = vadd.f32 %v1699_v34, %v1698_v52  ;;  %v3821_v25 = vadd.f32 %v3820_v48, %v11425_v11 }
 0x376   :  { %v3893_v63 = vadd.f32 %v3892_v15, %v3891_v51  ;;  %v3828_v35 = vadd.f32 %v3827_v16, %v3826_v19  ;;  %v1764_v22 = vrot.slane %v1763_v13, 2  ;;  %v3837_v49 = vadd.f32 %v3836_v50, %v3835_v41  ;;  %v11506_v19 = vld [vmem:[%s15552_s7 + $0x338] sm:$0xff] }
 0x377   :  { %v3907_v3 = vadd.f32 %v3906_v12, %v3905_v62  ;;  %v1772_v14 = vadd.f32 %v1771_v20, %v1770_v60  ;;  %v1693_v62 = vadd.f32 %v1692_v42, %v1691_v8  ;;  %v3900_v12 = vadd.f32 %v3899_v21, %v3898_v28  ;;  %v8492_v50 = vld [vmem:[%s15552_s7 + $0x3b8] sm:$0xff] }
 0x378   :  { %3075 = vmax.xlane.f32.xlu0 %v11419_v45  ;;  %v3333_v39 = vmax.f32 %v3331_v24, %v3332_v36  ;;  %v1686_v59 = vadd.f32 %v1685_v47, %v11391_v58  ;;  %v1758_v4 = vadd.f32 %v1757_v27, %v1756_v37  ;;  %v3327_v6 = vrot.slane %v3326_v5, 1 }
 0x379   :  { %v3908_v18 = vrot.slane %v3907_v3, 2  ;;  %v3278_v33 = vrot.slane %v3277_v44, 1  ;;  %v3272_v52 = vmax.f32 %v3270_v2, %v3271_v53  ;;  %v1701_v60 = vrot.slane %v1700_v1, 2  ;;  %v15898_v53 = vld [vmem:[#allocation60_spill] sm:$0xff] }
 0x37a   :  { %v1773_v17 = vrot.slane %v1772_v14, 2  ;;  %v3829_v45 = vrot.slane %v3828_v35, 1  ;;  %v1765_v11 = vadd.f32 %v1764_v22, %v1763_v13  ;;  %v4884_v51 = vsel %vm2289_vm5, %v3821_v25, %v11366_v31 }
 0x37b   :  { %v3909_v34 = vadd.f32 %v3908_v18, %v3907_v3  ;;  %v4891_v28 = vsel %vm2289_vm5, %v3893_v63, %v11383_v26  ;;  %v1694_v24 = vrot.slane %v1693_v62, 1  ;;  %v3901_v8 = vrot.slane %v3900_v12, 1  ;;  %v11518_v26 = vld [vmem:[%s15552_s7 + $0x330] sm:$0xff]  ;;  %v15896_v3 = vld [vmem:[#allocation148_spill] sm:$0xff]  ;;  %v4844_v18 = vld [vmem:[%s15899_s25] sm:$0xff] }
 0x37c   :  { %3123 = vmax.xlane.f32.xlu0 %v11457_v55  ;;  %v3838_v58 = vrot.slane %v3837_v49, 1  ;;  %v3334_v41 = vrot.slane %v3333_v39, 1  ;;  %v3328_v48 = vmax.f32 %v3326_v5, %v3327_v6  ;;  %v3279_v37 = vmax.f32 %v3277_v44, %v3278_v33  ;;  %v4916_v44 = vld [vmem:[%s15897_s0] sm:$0xff]  ;;  %v15901_v6 = vld [vmem:[#allocation152_spill] sm:$0xff] }
 0x37d   :  { %v11511_v55 = vsel %vm184_vm0, %v11506_v19, -inf  ;;  %v2760_v63 = vsel %vm2289_vm5, %v1686_v59, %v11362_v29  ;;  %v1702_v31 = vadd.f32 %v1701_v60, %v1700_v1  ;;  %v1774_v2 = vadd.f32 %v1773_v17, %v1772_v14 }
 0x37e   :  { %v3910_v20 = vrot.slane %v3909_v34, 1  ;;  %v3830_v15 = vadd.f32 %v3829_v45, %v3828_v35  ;;  %v1766_v42 = vrot.slane %v1765_v11, 1  ;;  %v11525_v16 = vsel %vm184_vm0, %v11518_v26, -inf }
 0x37f   :  { %v2767_v59 = vsel %vm2289_vm5, %v1758_v4, %v11370_v40  ;;  %v1695_v29 = vadd.f32 %v1694_v24, %v1693_v62  ;;  %v3902_v13 = vadd.f32 %v3901_v8, %v3900_v12  ;;  %v3839_v21 = vadd.f32 %v3838_v58, %v3837_v49  ;;  %v15900_v12 = vld [vmem:[#allocation56_spill] sm:$0xff] }
 0x380   :  { %3078 = vmax.xlane.f32.xlu1 %v11423_v38  ;;  %3126 = vmax.xlane.f32.xlu0 %v11461_v30  ;;  %v4957_v38 = vsel %vm2291_vm7, %v3272_v52, %v11394_v43  ;;  %v3335_v30 = vmax.f32 %v3333_v39, %v3334_v41  ;;  %v11534_v43 = vsel %vm184_vm0, %v8492_v50, -inf  ;;  %v3463_v36 = vmul.f32 %v11405_v57, %v15896_v3  ;;  %v8491_v39 = vld [vmem:[%s15552_s7 + $0x3b0] sm:$0xff] }
 0x381   :  { %v4958_v47 = vsel %vm2293_vm8, %v3279_v37, %v4957_v38  ;;  %v4964_v40 = vsel %vm2291_vm7, %v3328_v48, %v11397_v9  ;;  %v1703_v27 = vrot.slane %v1702_v31, 1  ;;  %v1775_v49 = vrot.slane %v1774_v2, 1 }
 0x382   :  { %v3911_v5 = vadd.f32 %v3910_v20, %v3909_v34  ;;  %v2833_v57 = vsel %vm2291_vm7, %v11249_v0, %v15898_v53  ;;  %v1767_v1 = vadd.f32 %v1766_v42, %v1765_v11  ;;  %v11552_v9 = vsel %vm184_vm0, %v8491_v39, -inf  ;;  %v4917_v0 = vld [vmem:[%s15897_s0 + $0x8] sm:$0xff] }
 0x383   :  { %v3462_v14 = vmul.f32 %v11410_v54, %v15896_v3  ;;  %v4885_v25 = vsel %vm2291_vm7, %v3830_v15, %v4884_v51  ;;  %v4892_v22 = vsel %vm2291_vm7, %v3902_v13, %v4891_v28  ;;  %v4965_v62 = vsel %vm2293_vm8, %v3335_v30, %v4964_v40  ;;  %v15906_v13 = vld [vmem:[#allocation158_spill] sm:$0xff] }
 0x384   :  { %3150 = vmax.xlane.f32.xlu1 %v11511_v55  ;;  %3147 = vmax.xlane.f32.xlu0 %v11525_v16  ;;  %v4886_v35 = vsel %vm2293_vm8, %v3839_v21, %v4885_v25  ;;  %v2840_v54 = vsel %vm2291_vm7, %v11251_v32, %v15900_v12  ;;  %v3557_v4 = vsel %vm184_vm0, %v3463_v36, 0.0  ;;  %v3479_v33 = vmul.f32 %v11449_v7, %v15901_v6  ;;  %v4845_v32 = vld [vmem:[%s15899_s25 + $0x8] sm:$0xff] }
 0x385   :  { %v4984_v52 = vmul.f32 %v4958_v47, %v4916_v44  ;;  %v2834_v60 = vsel %vm2293_vm8, %v11350_v23, %v2833_v57  ;;  %v1704_v17 = vadd.f32 %v1703_v27, %v1702_v31  ;;  %v1776_v34 = vadd.f32 %v1775_v49, %v1774_v2  ;;  %v15903_v31 = vld [vmem:[#allocation155_spill] sm:$0xff]  ;;  %v165_v27 = vld [vmem:[%s15552_s7 + $0x168] sm:$0xff]  ;;  %v164_v49 = vld [vmem:[%s15552_s7 + $0x160] sm:$0xff] }
 0x386   :  { %v4912_v45 = vmul.f32 %v4886_v35, %v4844_v18  ;;  %v4893_v11 = vsel %vm2293_vm8, %v3911_v5, %v4892_v22  ;;  %v3554_v51 = vsel %vm184_vm0, %v3462_v14, 0.0  ;;  %v3478_v7 = vmul.f32 %v11444_v61, %v15901_v6  ;;  %v15908_v47 = vld [vmem:[#allocation211_spill] sm:$0xff]  ;;  %v180_v14 = vld [vmem:[%s15552_s7 + $0x1e0] sm:$0xff] }
 0x387   :  { %v4985_v28 = vmul.f32 %v4965_v62, %v4917_v0  ;;  %v2841_v23 = vsel %vm2293_vm8, %v11352_v56, %v2840_v54  ;;  %v2761_v24 = vsel %vm2291_vm7, %v1695_v29, %v2760_v63  ;;  %v2768_v8 = vsel %vm2291_vm7, %v1767_v1, %v2767_v59  ;;  %v181_v1 = vld [vmem:[%s15552_s7 + $0x1e8] sm:$0xff] }
 0x388   :  { %3198 = vmax.xlane.f32.xlu1 %v11534_v43  ;;  %3195 = vmax.xlane.f32.xlu0 %v11552_v9  ;;  %v3605_v58 = vsel %vm184_vm0, %v3479_v33, 0.0  ;;  %v11588_v41 = vadd.f32 %v4984_v52, %v4912_v45  ;;  %v4913_v48 = vmul.f32 %v4893_v11, %v4845_v32  ;;  %v2860_v37 = vmul.f32 %v4916_v44, %v2834_v60  ;;  %v15910_v44 = vld [vmem:[#allocation215_spill] sm:$0xff]  ;;  %v15914_v52 = vld [vmem:[#allocation110_spill] sm:$0xff]  ;;  %v11663_v45 = vpop.permute.xlu0 %1431 }
 0x389   :  { %v3487_v2 = vmul.f32 %v11506_v19, %v15903_v31  ;;  %v2762_v61 = vsel %vm2293_vm8, %v1704_v17, %v2761_v24  ;;  %v2769_v20 = vsel %vm2293_vm8, %v1776_v34, %v2768_v8  ;;  %v2861_v56 = vmul.f32 %v4917_v0, %v2841_v23  ;;  %v15915_v17 = vld [vmem:[#allocation189_spill] sm:$0xff]  ;;  %15916 = vst [vmem:[#allocation211_spill] sm:$0xff] %v11663_v45  ;;  %v11670_v23 = vpop.permute.xlu1 %1435 }
 0x38a   :  { %15902 = vst [vmem:[#allocation70_spill] sm:$0xff] %v11588_v41  ;;  %v3602_v63 = vsel %vm184_vm0, %v3478_v7, 0.0  ;;  %v3486_v38 = vmul.f32 %v11518_v26, %v15903_v31  ;;  %v11597_v15 = vadd.f32 %v4985_v28, %v4913_v48  ;;  %v2788_v42 = vmul.f32 %v4844_v18, %v2762_v61  ;;  %15920 = vst [vmem:[#allocation252_spill] sm:$0xff] %v11670_v23  ;;  %v15921_v24 = vld [vmem:[#allocation9_spill] sm:$0xff]  ;;  %v15923_v48 = vld [vmem:[#allocation19_spill] sm:$0xff] }
 0x38b   :  { %v2789_v59 = vmul.f32 %v4845_v32, %v2769_v20  ;;  %v3629_v19 = vsel %vm184_vm0, %v3487_v2, 0.0  ;;  %v3503_v21 = vmul.f32 %v8492_v50, %v15906_v13  ;;  %v3502_v36 = vmul.f32 %v8491_v39, %v15906_v13  ;;  %v15924_v31 = vld [vmem:[#allocation20_spill] sm:$0xff]  ;;  %v15925_v61 = vld [vmem:[#allocation41_spill] sm:$0xff]  ;;  %v15926_v20 = vld [vmem:[#allocation42_spill] sm:$0xff] }
 0x38c   :  { %3558 = vadd.xlane.f32.xlu1 %v3557_v4  ;;  %3555 = vadd.xlane.f32.xlu0 %v3554_v51  ;;  %15904 = vst [vmem:[#allocation69_spill] sm:$0xff] %v11597_v15  ;;  %v11599_v29 = vadd.f32 %v2860_v37, %v2788_v42  ;;  %v3626_v3 = vsel %vm184_vm0, %v3486_v38, 0.0  ;;  %v749_v40 = vcombine.high %v15908_v47, %v15908_v47  ;;  %v11622_v5 = vsel %vm184_vm0, %v165_v27, -inf  ;;  %v11665_v32 = vpop.permute.xlu0 %1519  ;;  %v15928_v38 = vld [vmem:[#allocation46_spill] sm:$0xff] }
 0x38d   :  { %v11603_v30 = vadd.f32 %v2861_v56, %v2789_v59  ;;  %v3677_v26 = vsel %vm184_vm0, %v3503_v21, 0.0  ;;  %v3674_v50 = vsel %vm184_vm0, %v3502_v36, 0.0  ;;  %v798_v53 = vcombine.high %v15910_v44, %v15910_v44  ;;  %15917 = vst [vmem:[#allocation215_spill] sm:$0xff] %v11665_v32  ;;  %v11688_v59 = vpop.permute.xlu1 %1523  ;;  %v15931_v21 = vld [vmem:[#allocation24_spill] sm:$0xff]  ;;  %v15932_v36 = vld [vmem:[#allocation47_spill] sm:$0xff] }
 0x38e   :  { %15905 = vst [vmem:[#allocation148_spill] sm:$0xff] %v11599_v29  ;;  %2911 = vst.msk [vmem:[#allocation2 + $0x20] sm:$0xff] %vm184_vm0, %v11599_v29  ;;  %v11625_v39 = vrot.slane %v749_v40, %v9337_v46  ;;  %v11630_v57 = vsel %vm184_vm0, %v164_v49, -inf  ;;  %v11641_v18 = vsel %vm184_vm0, %v181_v1, -inf  ;;  %v11648_v22 = vsel %vm184_vm0, %v180_v14, -inf  ;;  %v8477_v40 = vld [vmem:[%s15552_s7 + $0x340] sm:$0xff] }
 0x38f   :  { %15907 = vst [vmem:[#allocation60_spill] sm:$0xff] %v11603_v30  ;;  %2912 = vst.msk [vmem:[#allocation2 + $0x28] sm:$0xff] %vm184_vm0, %v11603_v30  ;;  %v11645_v35 = vrot.slane %v798_v53, %v9337_v46  ;;  %v1451_v60 = vrot.slane %v11298_v10, %v15914_v52  ;;  %v1539_v34 = vrot.slane %v15915_v17, %v15914_v52  ;;  %v15918_v11 = vlaneseq  ;;  %v15936_v53 = vld [vmem:[#allocation51_spill] sm:$0xff]  ;;  %v15966_v30 = vld [vmem:[#allocation45_spill] sm:$0xff] }
 0x390   :  { %3606 = vadd.xlane.f32.xlu1 %v3605_v58  ;;  %3603 = vadd.xlane.f32.xlu0 %v3602_v63  ;;  %15909 = vst [vmem:[#allocation56_spill] sm:$0xff] %v11625_v39  ;;  %15911 = vst [vmem:[#allocation152_spill] sm:$0xff] %v11641_v18  ;;  %v1006_v25 = vmul.f32 %v11625_v39, %v165_v27  ;;  %v1005_v0 = vmul.f32 %v11625_v39, %v164_v49  ;;  %v15927_v63 = vld [vmem:[#allocation44_spill] sm:$0xff]  ;;  %v15935_v49 = vld [vmem:[#allocation18_spill] sm:$0xff] }
 0x391   :  { %15912 = vst [vmem:[#allocation155_spill] sm:$0xff] %v11645_v35  ;;  %15913 = vst [vmem:[#allocation158_spill] sm:$0xff] %v11648_v22  ;;  %v1022_v12 = vmul.f32 %v11645_v35, %v181_v1  ;;  %v1021_v4 = vmul.f32 %v11645_v35, %v180_v14  ;;  %v1990_v51 = vand.u32 127, %v15918_v11  ;;  %v489_v56 = vmax.f32 %v15926_v20, %v15925_v61  ;;  %v15937_v1 = vld [vmem:[#allocation52_spill] sm:$0xff]  ;;  %v15946_v20 = vld [vmem:[#allocation29_spill] sm:$0xff] }
 0x392   :  { %v1160_v62 = vsel %vm184_vm0, %v1006_v25, 0.0  ;;  %v1157_v54 = vsel %vm184_vm0, %v1005_v0, 0.0  ;;  %v496_v42 = vmax.f32 %v15928_v38, %v15927_v63  ;;  %15929 = vst [vmem:[#allocation19_spill] sm:$0xff] %v11688_v59  ;;  %v552_v14 = vmax.f32 %v15937_v1, %v15936_v53  ;;  %v15939_v0 = vld [vmem:[#allocation21_spill] sm:$0xff]  ;;  %v16115_v32 = vld [vmem:[#allocation79_spill] sm:$0xff] }
 0x393   :  { %v1208_v6 = vsel %vm184_vm0, %v1022_v12, 0.0  ;;  %v1205_v33 = vsel %vm184_vm0, %v1021_v4, 0.0  ;;  %v1995_v7 = vadd.s32 4294967288, %v1990_v51  ;;  %v11676_v8 = vsub.s32 %v1990_v51, %v15921_v24  ;;  %v15940_v12 = vld [vmem:[#allocation22_spill] sm:$0xff]  ;;  %v15943_v51 = vld [vmem:[#allocation25_spill] sm:$0xff] }
 0x394   :  { %3630 = vadd.xlane.f32.xlu1 %v3629_v19  ;;  %3627 = vadd.xlane.f32.xlu0 %v3626_v3  ;;  %v15930_v19 = vld [vmem:[#allocation23_spill] sm:$0xff]  ;;  %v11706_v25 = vsel %vm184_vm0, %v8477_v40, -inf  ;;  %v553_v38 = vrot.slane %v552_v14, 4 }
 0x395   :  { %v11673_v10 = vsub.s32 %v1995_v7, %v15921_v24  ;;  %v2476_v3 = vrot.slane %v15931_v21, %v11676_v8  ;;  %v2395_v44 = vrot.slane %v15935_v49, %v11676_v8  ;;  %15938 = vst [vmem:[#allocation20_spill] sm:$0xff] %v11706_v25  ;;  %v15944_v24 = vld [vmem:[#allocation26_spill] sm:$0xff]  ;;  %v2005_v63 = vrot.slane %v15946_v20, %v11676_v8 }
 0x397   :  { %v2408_v37 = vrot.slane %v15923_v48, %v11673_v10  ;;  %v2399_v2 = vrot.slane %v15924_v31, %v11673_v10  ;;  %v2480_v13 = vrot.slane %v15930_v19, %v11673_v10  ;;  %v1999_v7 = vrot.slane %v15943_v51, %v11673_v10  ;;  %v15956_v51 = vld [vmem:[#allocation31_spill] sm:$0xff] }
 0x398   :  { %3678 = vadd.xlane.f32.xlu1 %v3677_v26  ;;  %3675 = vadd.xlane.f32.xlu0 %v3674_v50  ;;  %v15933_v26 = vld [vmem:[#allocation48_spill] sm:$0xff]  ;;  %v15934_v50 = vld [vmem:[#allocation17_spill] sm:$0xff]  ;;  %v1994_v48 = vrot.slane %v15944_v24, %v11676_v8  ;;  %v2018_v29 = vrot.slane %v15966_v30, %v11673_v10 }
 0x399   :  { %v545_v47 = vmax.f32 %v15933_v26, %v15932_v36  ;;  %v2404_v27 = vrot.slane %v15934_v50, %v11676_v8  ;;  %v2481_v11 = vsel %vm2000_vm9, %v2480_v13, %v2476_v3  ;;  %v15948_v50 = vld [vmem:[#allocation96_spill] sm:$0xff] }
 0x39a   :  { %v11747_v53 = vsel %vm2000_vm9, %v1999_v7, %v1994_v48  ;;  %v2068_v7 = vrot.slane %v15956_v51, %v11676_v8  ;;  %v15957_v24 = vld [vmem:[#allocation32_spill] sm:$0xff]  ;;  %v15963_v51 = vld [vmem:[#allocation39_spill] sm:$0xff] }
 0x39b   :  { %v2409_v4 = vsel %vm2000_vm9, %v2408_v37, %v2404_v27  ;;  %v546_v31 = vrot.slane %v545_v47, 4  ;;  %v8493_v37 = vld [vmem:[%s15552_s7 + $0x3c0] sm:$0xff]  ;;  %v15949_v27 = vld [vmem:[#allocation98_spill] sm:$0xff]  ;;  %v2081_v48 = vrot.slane %v15957_v24, %v11673_v10  ;;  %v2413_v24 = vrot.slane %v15963_v51, %v11676_v8 }
 0x39c   :  { %321 = vmax.xlane.f32.xlu1 %v11622_v5  ;;  %318 = vmax.xlane.f32.xlu0 %v11630_v57  ;;  %v11732_v19 = vsel %vm184_vm0, %v8493_v37, -inf  ;;  %v503_v49 = vmax.f32 %v15949_v27, %v15948_v50 }
 0x39d   :  { %15947 = vst [vmem:[#allocation44_spill] sm:$0xff] %v11732_v19  ;;  %v547_v1 = vmax.f32 %v545_v47, %v546_v31 }
 0x39e   :  { %v504_v20 = vrot.slane %v503_v49, 4 }
 0x39f   :  { %v548_v27 = vrot.slane %v547_v1, 2 }
 0x3a0   :  { %369 = vmax.xlane.f32.xlu1 %v11641_v18  ;;  %366 = vmax.xlane.f32.xlu0 %v11648_v22  ;;  %v11668_v28 = vpop.xlane.xlu0 %3069  ;;  %v505_v51 = vmax.f32 %v503_v49, %v504_v20 }
 0x3a1   :  { %15919 = vst [vmem:[#allocation189_spill] sm:$0xff] %v11668_v28 }
 0x3a4   :  { %1161 = vadd.xlane.f32.xlu1 %v1160_v62  ;;  %1158 = vadd.xlane.f32.xlu0 %v1157_v54  ;;  %v11678_v58 = vpop.xlane.xlu0 %3117  ;;  %v2471_v62 = vrot.slane %v15939_v0, %v11673_v10  ;;  %v2467_v54 = vrot.slane %v15940_v12, %v11676_v8  ;;  %v8494_v0 = vld [vmem:[%s15552_s7 + $0x3c8] sm:$0xff] }
 0x3a5   :  { %15922 = vst [vmem:[#allocation9_spill] sm:$0xff] %v11678_v58  ;;  %v11763_v47 = vsel %vm184_vm0, %v8494_v0, -inf }
 0x3a6   :  { %v2472_v21 = vsel %vm2000_vm9, %v2471_v62, %v2467_v54  ;;  %v554_v54 = vmax.f32 %v552_v14, %v553_v38  ;;  %15954 = vst [vmem:[#allocation47_spill] sm:$0xff] %v11763_v47  ;;  %v15958_v14 = vld [vmem:[#allocation33_spill] sm:$0xff]  ;;  %v15960_v38 = vld [vmem:[#allocation102_spill] sm:$0xff] }
 0x3a7   :  { %v11739_v3 = vsel %vm2281_vm1, %v2481_v11, %v2472_v21  ;;  %v2077_v31 = vrot.slane %v15958_v14, %v11676_v8 }
 0x3a8   :  { %1209 = vadd.xlane.f32.xlu1 %v1208_v6  ;;  %1206 = vadd.xlane.f32.xlu0 %v1205_v33  ;;  %v2400_v6 = vsel %vm2000_vm9, %v2399_v2, %v2395_v44  ;;  %v490_v33 = vrot.slane %v489_v56, 4  ;;  %v11714_v17 = vpop.xlane.xlu1 %3072  ;;  %v15945_v2 = vld [vmem:[#allocation27_spill] sm:$0xff]  ;;  %v8478_v44 = vld [vmem:[%s15552_s7 + $0x348] sm:$0xff]  ;;  %v555_v14 = vrot.slane %v554_v54, 2 }
 0x3a9   :  { %15941 = vst [vmem:[#allocation41_spill] sm:$0xff] %v11714_v17  ;;  %v2009_v61 = vrot.slane %v15945_v2, %v11673_v10  ;;  %v11735_v13 = vsel %vm2281_vm1, %v2409_v4, %v2400_v6 }
 0x3aa   :  { %v491_v36 = vmax.f32 %v489_v56, %v490_v33  ;;  %v11754_v56 = vsel %vm184_vm0, %v8478_v44, -inf }
 0x3ab   :  { %15950 = vst [vmem:[#allocation46_spill] sm:$0xff] %v11754_v56  ;;  %v2010_v12 = vsel %vm2000_vm9, %v2009_v61, %v2005_v63  ;;  %v15959_v63 = vld [vmem:[#allocation101_spill] sm:$0xff] }
 0x3ac   :  { %v11758_v4 = vpop.xlane.xlu1 %3144  ;;  %v492_v2 = vrot.slane %v491_v36, 2  ;;  %v559_v21 = vmax.f32 %v15960_v38, %v15959_v63  ;;  %v15964_v38 = vld [vmem:[#allocation40_spill] sm:$0xff] }
 0x3ad   :  { %15952 = vst [vmem:[#allocation23_spill] sm:$0xff] %v11758_v4 }
 0x3ae   :  { %v493_v15 = vmax.f32 %v491_v36, %v492_v2  ;;  %v560_v58 = vrot.slane %v559_v21, 4  ;;  %v167_v2 = vld [vmem:[%s15552_s7 + $0x178] sm:$0xff] }
 0x3b9   :  { %1457 = vbcast.lane.b32.xlu1 %v1451_v60, 264 }
 0x3bd   :  { %1541 = vbcast.lane.b32.xlu1 %v1539_v34, 256 }
 0x3be   :  { %1453 = vbcast.lane.b32.xlu0 %v1451_v60, 256  ;;  %v497_v60 = vrot.slane %v496_v42, 4 }
 0x3c0   :  { %v498_v26 = vmax.f32 %v496_v42, %v497_v60  ;;  %v15951_v42 = vld [vmem:[#allocation214_spill] sm:$0xff] }
 0x3c1   :  { %1545 = vbcast.lane.b32.xlu1 %v1539_v34, 264  ;;  %v11716_v34 = vpop.xlane.xlu0 %3120  ;;  %v3489_v62 = vmul.f32 %v8478_v44, %v15951_v42  ;;  %v3488_v33 = vmul.f32 %v8477_v40, %v15951_v42  ;;  %v15955_v60 = vld [vmem:[#allocation30_spill] sm:$0xff]  ;;  %v15961_v40 = vld [vmem:[#allocation35_spill] sm:$0xff] }
 0x3c2   :  { %15942 = vst [vmem:[#allocation42_spill] sm:$0xff] %v11716_v34  ;;  %v2072_v11 = vrot.slane %v15955_v60, %v11673_v10  ;;  %v499_v61 = vrot.slane %v498_v26, 2  ;;  %v2417_v50 = vrot.slane %v15961_v40, %v11673_v10  ;;  %v15962_v42 = vld [vmem:[#allocation219_spill] sm:$0xff]  ;;  %v11794_v34 = vpop.xlane.xlu1 %3192 }
 0x3c3   :  { %v3635_v44 = vsel %vm184_vm0, %v3489_v62, 0.0  ;;  %v3505_v60 = vmul.f32 %v8494_v0, %v15962_v42  ;;  %v3632_v52 = vsel %vm184_vm0, %v3488_v33, 0.0  ;;  %v3504_v63 = vmul.f32 %v8493_v37, %v15962_v42  ;;  %v15965_v40 = vld [vmem:[#allocation43_spill] sm:$0xff]  ;;  %v15967_v62 = vld [vmem:[#allocation49_spill] sm:$0xff]  ;;  %15968 = vst [vmem:[#allocation48_spill] sm:$0xff] %v11794_v34  ;;  %v15994_v34 = vld [vmem:[#allocation68_spill] sm:$0xff] }
 0x3c4   :  { %v2485_v4 = vrot.slane %v15965_v40, %v11676_v8  ;;  %v2014_v0 = vrot.slane %v15967_v62, %v11676_v8  ;;  %v500_v41 = vmax.f32 %v498_v26, %v499_v61  ;;  %v2073_v37 = vsel %vm2000_vm9, %v2072_v11, %v2068_v7  ;;  %v15970_v40 = vld [vmem:[#allocation111_spill] sm:$0xff]  ;;  %v15972_v61 = vld [vmem:[#allocation53_spill] sm:$0xff] }
 0x3c5   :  { %v11760_v6 = vpop.xlane.xlu0 %3141  ;;  %v549_v42 = vmax.f32 %v547_v1, %v548_v27  ;;  %v751_v30 = vcombine.high %v15970_v40, %v15970_v40  ;;  %v2082_v62 = vsel %vm2000_vm9, %v2081_v48, %v2077_v31  ;;  %v2418_v36 = vsel %vm2000_vm9, %v2417_v50, %v2413_v24  ;;  %v15971_v1 = vld [vmem:[#allocation50_spill] sm:$0xff] }
 0x3c6   :  { %15953 = vst [vmem:[#allocation24_spill] sm:$0xff] %v11760_v6  ;;  %v2489_v6 = vrot.slane %v15964_v38, %v11673_v10  ;;  %v3683_v38 = vsel %vm184_vm0, %v3505_v60, 0.0  ;;  %v556_v26 = vmax.f32 %v554_v54, %v555_v14  ;;  %v3680_v49 = vsel %vm184_vm0, %v3504_v63, 0.0  ;;  %v166_v54 = vld [vmem:[%s15552_s7 + $0x170] sm:$0xff] }
 0x3c7   :  { %v2090_v7 = vrot.slane %v15971_v1, %v11673_v10  ;;  %v2086_v20 = vrot.slane %v15972_v61, %v11676_v8  ;;  %v494_v48 = vrot.slane %v493_v15, 1  ;;  %v501_v31 = vrot.slane %v500_v41, 1 }
 0x3c8   :  { %v2490_v11 = vsel %vm2000_vm9, %v2489_v6, %v2485_v4  ;;  %v506_v50 = vrot.slane %v505_v51, 2  ;;  %v561_v27 = vmax.f32 %v559_v21, %v560_v58  ;;  %v11818_v4 = vsel %vm184_vm0, %v167_v2, -inf  ;;  %v15975_v6 = vld [vmem:[#allocation242_spill] sm:$0xff] }
 0x3c9   :  { %v11796_v33 = vpop.xlane.xlu0 %3189  ;;  %15973 = vst [vmem:[#allocation18_spill] sm:$0xff] %v11818_v4  ;;  %v800_v60 = vcombine.high %v15975_v6, %v15975_v6  ;;  %v2282_v24 = vsel %vm2281_vm1, %v2010_v12, %v11747_v53  ;;  %v2295_v14 = vsel %vm2281_vm1, %v2082_v62, %v2073_v37  ;;  %v557_v63 = vrot.slane %v556_v26, 1 }
 0x3ca   :  { %15969 = vst [vmem:[#allocation17_spill] sm:$0xff] %v11796_v33  ;;  %v11833_v21 = vsel %vm184_vm0, %v166_v54, -inf  ;;  %v2681_v40 = vsel %vm2283_vm2, %v2418_v36, %v11735_v13  ;;  %v2688_v53 = vsel %vm2283_vm2, %v2490_v11, %v11739_v3  ;;  %v2091_v37 = vsel %vm2000_vm9, %v2090_v7, %v2086_v20  ;;  %v15982_v7 = vld [vmem:[#allocation149_spill] sm:$0xff] }
 0x3cb   :  { %15978 = vst [vmem:[#allocation22_spill] sm:$0xff] %v11833_v21  ;;  %v495_v62 = vmax.f32 %v493_v15, %v494_v48  ;;  %v507_v1 = vmax.f32 %v505_v51, %v506_v50  ;;  %v562_v61 = vrot.slane %v561_v27, 2  ;;  %v11854_v36 = vrot.slane %v800_v60, %v9337_v46  ;;  %v15985_v48 = vld [vmem:[#allocation62_spill] sm:$0xff] }
 0x3cc   :  { %v558_v11 = vmax.f32 %v556_v26, %v557_v63  ;;  %v15988_v60 = vld [vmem:[#allocation154_spill] sm:$0xff] }
 0x3cd   :  { %v11830_v58 = vpop.xlane.xlu0 %3549  ;;  %15980 = vst [vmem:[#allocation26_spill] sm:$0xff] %v11854_v36 }
 0x3ce   :  { %15977 = vst [vmem:[#allocation21_spill] sm:$0xff] %v11830_v58  ;;  %v2296_v58 = vsel %vm2283_vm2, %v2091_v37, %v2295_v14 }
 0x3dd   :  { %3153 = vmax.xlane.f32.xlu0 %v11706_v25 }
 0x3e1   :  { %3201 = vmax.xlane.f32.xlu0 %v11732_v19 }
 0x3e5   :  { %3156 = vmax.xlane.f32.xlu1 %v11754_v56  ;;  %3204 = vmax.xlane.f32.xlu0 %v11763_v47 }
 0x3e9   :  { %3636 = vadd.xlane.f32.xlu1 %v3635_v44  ;;  %3633 = vadd.xlane.f32.xlu0 %v3632_v52  ;;  %v2019_v52 = vsel %vm2000_vm9, %v2018_v29, %v2014_v0  ;;  %v550_v44 = vrot.slane %v549_v42, 1  ;;  %v11821_v29 = vrot.slane %v751_v30, %v9337_v46  ;;  %v11828_v0 = vpop.xlane.xlu1 %3552  ;;  %v182_v30 = vld [vmem:[%s15552_s7 + $0x1f0] sm:$0xff]  ;;  %v508_v46 = vrot.slane %v507_v1, 1 }
 0x3ea   :  { %15976 = vst [vmem:[#allocation52_spill] sm:$0xff] %v11828_v0  ;;  %v2284_v12 = vsel %vm2283_vm2, %v2019_v52, %v2282_v24  ;;  %v15981_v52 = vld [vmem:[#allocation147_spill] sm:$0xff]  ;;  %v15989_v24 = vld [vmem:[#allocation65_spill] sm:$0xff] }
 0x3eb   :  { %15974 = vst [vmem:[#allocation51_spill] sm:$0xff] %v11821_v29  ;;  %v551_v6 = vmax.f32 %v549_v42, %v550_v44  ;;  %v1008_v3 = vmul.f32 %v11821_v29, %v167_v2  ;;  %v510_v15 = vmax.f32 %v15982_v7, %v15981_v52  ;;  %v1007_v51 = vmul.f32 %v11821_v29, %v166_v54  ;;  %v15984_v42 = vld [vmem:[#allocation59_spill] sm:$0xff]  ;;  %v15986_v2 = vld [vmem:[#allocation64_spill] sm:$0xff]  ;;  %v15990_v52 = vld [vmem:[#allocation66_spill] sm:$0xff] }
 0x3ec   :  { %v2422_v20 = vrot.slane %v15984_v42, %v11676_v8  ;;  %v2498_v50 = vrot.slane %v15986_v2, %v11673_v10  ;;  %v15987_v44 = vld [vmem:[#allocation151_spill] sm:$0xff]  ;;  %v2027_v63 = vrot.slane %v15989_v24, %v11673_v10  ;;  %v2023_v7 = vrot.slane %v15990_v52, %v11676_v8  ;;  %v11876_v42 = vpop.xlane.xlu0 %3597 }
 0x3ed   :  { %3684 = vadd.xlane.f32.xlu1 %v3683_v38  ;;  %3681 = vadd.xlane.f32.xlu0 %v3680_v49  ;;  %v183_v38 = vld [vmem:[%s15552_s7 + $0x1f8] sm:$0xff]  ;;  %v502_v49 = vmax.f32 %v500_v41, %v501_v31  ;;  %v11859_v41 = vsel %vm184_vm0, %v182_v30, -inf  ;;  %v2426_v31 = vrot.slane %v15985_v48, %v11673_v10  ;;  %v566_v26 = vmax.f32 %v15988_v60, %v15987_v44  ;;  %v11874_v33 = vpop.xlane.xlu1 %3600  ;;  %v15993_v48 = vld [vmem:[#allocation67_spill] sm:$0xff] }
 0x3ee   :  { %v11850_v13 = vsel %vm184_vm0, %v183_v38, -inf  ;;  %15983 = vst [vmem:[#allocation27_spill] sm:$0xff] %v11859_v41  ;;  %v563_v54 = vmax.f32 %v561_v27, %v562_v61  ;;  %15991 = vst [vmem:[#allocation29_spill] sm:$0xff] %v11874_v33  ;;  %v2099_v2 = vrot.slane %v15993_v48, %v11673_v10  ;;  %v2095_v44 = vrot.slane %v15994_v34, %v11676_v8  ;;  %v15995_v27 = vld [vmem:[#allocation61_spill] sm:$0xff] }
 0x3ef   :  { %15979 = vst [vmem:[#allocation25_spill] sm:$0xff] %v11850_v13  ;;  %15992 = vst [vmem:[#allocation96_spill] sm:$0xff] %v11876_v42  ;;  %v1166_v60 = vsel %vm184_vm0, %v1008_v3, 0.0  ;;  %v1024_v24 = vmul.f32 %v11854_v36, %v183_v38  ;;  %v2494_v61 = vrot.slane %v15995_v27, %v11676_v8  ;;  %v511_v52 = vrot.slane %v510_v15, 4 }
 0x3f0   :  { %v1163_v42 = vsel %vm184_vm0, %v1007_v51, 0.0  ;;  %v1023_v33 = vmul.f32 %v11854_v36, %v182_v30  ;;  %v2427_v48 = vsel %vm2000_vm9, %v2426_v31, %v2422_v20  ;;  %v2842_v34 = vsel %vm2281_vm1, %v502_v49, %v495_v62  ;;  %v15996_v51 = vld [vmem:[#allocation75_spill] sm:$0xff]  ;;  %v15997_v30 = vld [vmem:[#allocation76_spill] sm:$0xff] }
 0x3f1   :  { %327 = vmax.xlane.f32.xlu1 %v11818_v4  ;;  %324 = vmax.xlane.f32.xlu0 %v11833_v21  ;;  %v567_v0 = vrot.slane %v566_v26, 4  ;;  %v2499_v28 = vsel %vm2000_vm9, %v2498_v50, %v2494_v61  ;;  %v2028_v3 = vsel %vm2000_vm9, %v2027_v63, %v2023_v7  ;;  %v509_v38 = vmax.f32 %v507_v1, %v508_v46  ;;  %v11903_v31 = vpop.xlane.xlu1 %3624  ;;  %v11905_v46 = vpop.xlane.xlu0 %3621  ;;  %v16000_v63 = vld [vmem:[#allocation72_spill] sm:$0xff] }
 0x3f2   :  { %v564_v17 = vrot.slane %v563_v54, 1  ;;  %v2100_v27 = vsel %vm2000_vm9, %v2099_v2, %v2095_v44  ;;  %v4532_v14 = vrot.slane %v15997_v30, %v11673_v10  ;;  %v1214_v37 = vsel %vm184_vm0, %v1024_v24, 0.0  ;;  %15998 = vst [vmem:[#allocation98_spill] sm:$0xff] %v11903_v31  ;;  %15999 = vst [vmem:[#allocation214_spill] sm:$0xff] %v11905_v46  ;;  %v16005_v24 = vld [vmem:[#allocation87_spill] sm:$0xff] }
 0x3f3   :  { %v2682_v62 = vsel %vm2285_vm3, %v2427_v48, %v2681_v40  ;;  %v2849_v49 = vsel %vm2281_vm1, %v558_v11, %v551_v6  ;;  %v512_v20 = vmax.f32 %v510_v15, %v511_v52  ;;  %v1211_v1 = vsel %vm184_vm0, %v1023_v33, 0.0  ;;  %v16010_v30 = vld [vmem:[#allocation95_spill] sm:$0xff] }
 0x3f4   :  { %v2689_v50 = vsel %vm2285_vm3, %v2499_v28, %v2688_v53  ;;  %v4519_v7 = vrot.slane %v16000_v63, %v11676_v8  ;;  %v568_v44 = vmax.f32 %v566_v26, %v567_v0  ;;  %v11914_v40 = vsel %vm2285_vm3, %v2028_v3, %v2284_v12  ;;  %v16002_v53 = vld [vmem:[#allocation77_spill] sm:$0xff]  ;;  %v16003_v0 = vld [vmem:[#allocation80_spill] sm:$0xff]  ;;  %v16004_v12 = vld [vmem:[#allocation82_spill] sm:$0xff] }
 0x3f5   :  { %375 = vmax.xlane.f32.xlu1 %v11850_v13  ;;  %372 = vmax.xlane.f32.xlu0 %v11859_v41  ;;  %v4523_v41 = vrot.slane %v15996_v51, %v11673_v10  ;;  %v11917_v6 = vsel %vm2285_vm3, %v2100_v27, %v2296_v58  ;;  %v11920_v11 = vsel %vm2283_vm2, %v509_v38, %v2842_v34  ;;  %v513_v52 = vrot.slane %v512_v20, 2  ;;  %v16008_v34 = vld [vmem:[#allocation83_spill] sm:$0xff]  ;;  %v16009_v38 = vld [vmem:[#allocation86_spill] sm:$0xff]  ;;  %v16012_v63 = vld [vmem:[#allocation100_spill] sm:$0xff] }
 0x3f6   :  { %v565_v15 = vmax.f32 %v563_v54, %v564_v17  ;;  %v4604_v26 = vrot.slane %v16003_v0, %v11673_v10  ;;  %v4600_v58 = vrot.slane %v16004_v12, %v11676_v8  ;;  %v4140_v61 = vrot.slane %v16005_v24, %v11673_v10  ;;  %v16006_v17 = vld [vmem:[#allocation88_spill] sm:$0xff]  ;;  %v11950_v0 = vpop.xlane.xlu0 %3669  ;;  %v16016_v12 = vld [vmem:[#allocation89_spill] sm:$0xff] }
 0x3f7   :  { %v4524_v28 = vsel %vm2000_vm9, %v4523_v41, %v4519_v7  ;;  %v4136_v54 = vrot.slane %v16006_v17, %v11676_v8  ;;  %v16007_v41 = vld [vmem:[#allocation78_spill] sm:$0xff]  ;;  %v4131_v3 = vrot.slane %v16008_v34, %v11673_v10  ;;  %v4127_v27 = vrot.slane %v16009_v38, %v11676_v8  ;;  %16015 = vst [vmem:[#allocation31_spill] sm:$0xff] %v11950_v0  ;;  %v16017_v17 = vld [vmem:[#allocation93_spill] sm:$0xff]  ;;  %v16018_v34 = vld [vmem:[#allocation104_spill] sm:$0xff] }
 0x3f8   :  { %v4591_v48 = vrot.slane %v16007_v41, %v11676_v8  ;;  %v569_v51 = vrot.slane %v568_v44, 2  ;;  %v2435_v7 = vrot.slane %v16012_v63, %v11673_v10  ;;  %v4203_v24 = vrot.slane %v16016_v12, %v11673_v10 }
 0x3f9   :  { %1167 = vadd.xlane.f32.xlu1 %v1166_v60  ;;  %1164 = vadd.xlane.f32.xlu0 %v1163_v42  ;;  %v16001_v42 = vld [vmem:[#allocation74_spill] sm:$0xff]  ;;  %v4595_v60 = vrot.slane %v16002_v53, %v11673_v10  ;;  %v11948_v53 = vpop.xlane.xlu1 %3672  ;;  %v4199_v41 = vrot.slane %v16017_v17, %v11676_v8  ;;  %v2507_v38 = vrot.slane %v16018_v34, %v11673_v10 }
 0x3fa   :  { %v4528_v2 = vrot.slane %v16001_v42, %v11676_v8  ;;  %v16013_v42 = vld [vmem:[#allocation103_spill] sm:$0xff]  ;;  %16014 = vst [vmem:[#allocation30_spill] sm:$0xff] %v11948_v53  ;;  %v4605_v63 = vsel %vm2000_vm9, %v4604_v26, %v4600_v58  ;;  %v11963_v53 = vsel %vm2283_vm2, %v565_v15, %v2849_v49  ;;  %v514_v0 = vmax.f32 %v512_v20, %v513_v52  ;;  %v16024_v52 = vld [vmem:[#allocation114_spill] sm:$0xff] }
 0x3fb   :  { %v4596_v12 = vsel %vm2000_vm9, %v4595_v60, %v4591_v48  ;;  %v4132_v17 = vsel %vm2000_vm9, %v4131_v3, %v4127_v27  ;;  %v570_v31 = vmax.f32 %v568_v44, %v569_v51  ;;  %v16021_v58 = vld [vmem:[#allocation107_spill] sm:$0xff]  ;;  %v4204_v15 = vsel %vm2000_vm9, %v4203_v24, %v4199_v41  ;;  %v16022_v44 = vld [vmem:[#allocation108_spill] sm:$0xff]  ;;  %v16023_v60 = vld [vmem:[#allocation109_spill] sm:$0xff]  ;;  %v11988_v51 = vpop.xlane.xlu0 %312 }
 0x3fc   :  { %v4533_v33 = vsel %vm2000_vm9, %v4532_v14, %v4528_v2  ;;  %v4212_v14 = vrot.slane %v16010_v30, %v11673_v10  ;;  %v2431_v2 = vrot.slane %v16013_v42, %v11676_v8  ;;  %v16019_v30 = vld [vmem:[#allocation105_spill] sm:$0xff]  ;;  %v4141_v42 = vsel %vm2000_vm9, %v4140_v61, %v4136_v54  ;;  %16026 = vst [vmem:[#allocation33_spill] sm:$0xff] %v11988_v51 }
 0x3fd   :  { %1215 = vadd.xlane.f32.xlu1 %v1214_v37  ;;  %1212 = vadd.xlane.f32.xlu0 %v1211_v1  ;;  %v16011_v37 = vld [vmem:[#allocation99_spill] sm:$0xff]  ;;  %v4804_v46 = vsel %vm2281_vm1, %v4533_v33, %v4524_v28  ;;  %v2032_v61 = vrot.slane %v16021_v58, %v11676_v8  ;;  %v4811_v49 = vsel %vm2281_vm1, %v4605_v63, %v4596_v12  ;;  %v515_v3 = vrot.slane %v514_v0, 1  ;;  %v11986_v27 = vpop.xlane.xlu1 %315 }
 0x3fe   :  { %v4208_v1 = vrot.slane %v16011_v37, %v11676_v8  ;;  %v2503_v37 = vrot.slane %v16019_v30, %v11676_v8  ;;  %v2436_v36 = vsel %vm2000_vm9, %v2435_v7, %v2431_v2  ;;  %v16020_v30 = vld [vmem:[#allocation106_spill] sm:$0xff]  ;;  %v11976_v20 = vsel %vm2281_vm1, %v4141_v42, %v4132_v17  ;;  %16025 = vst [vmem:[#allocation32_spill] sm:$0xff] %v11986_v27  ;;  %v16027_v7 = vld [vmem:[#allocation115_spill] sm:$0xff]  ;;  %v16029_v42 = vld [vmem:[#allocation113_spill] sm:$0xff] }
 0x3ff   :  { %v2036_v26 = vrot.slane %v16020_v30, %v11673_v10  ;;  %v2108_v33 = vrot.slane %v16022_v44, %v11673_v10  ;;  %v2104_v54 = vrot.slane %v16023_v60, %v11676_v8  ;;  %v4541_v48 = vrot.slane %v16024_v52, %v11673_v10  ;;  %v16030_v17 = vld [vmem:[#allocation192_spill] sm:$0xff]  ;;  %v16035_v44 = vld [vmem:[#allocation199_spill] sm:$0xff]  ;;  %v16041_v27 = vld [vmem:[#allocation118_spill] sm:$0xff] }
 0x400   :  { %v4213_v34 = vsel %vm2000_vm9, %v4212_v14, %v4208_v1  ;;  %v2508_v28 = vsel %vm2000_vm9, %v2507_v38, %v2503_v37  ;;  %v11994_v1 = vsel %vm2287_vm4, %v2436_v36, %v2682_v62  ;;  %v4613_v2 = vrot.slane %v16027_v7, %v11673_v10  ;;  %v16028_v37 = vld [vmem:[#allocation112_spill] sm:$0xff]  ;;  %v16032_v36 = vld [vmem:[#allocation194_spill] sm:$0xff] }
 0x401   :  { %v11991_v14 = vsel %vm2281_vm1, %v4213_v34, %v4204_v15  ;;  %v571_v24 = vrot.slane %v570_v31, 1  ;;  %v11999_v41 = vsel %vm2287_vm4, %v2508_v28, %v2689_v50  ;;  %v2037_v38 = vsel %vm2000_vm9, %v2036_v26, %v2032_v61  ;;  %v16031_v34 = vld [vmem:[#allocation193_spill] sm:$0xff]  ;;  %v16033_v62 = vld [vmem:[#allocation196_spill] sm:$0xff]  ;;  %v16034_v15 = vld [vmem:[#allocation198_spill] sm:$0xff] }
 0x402   :  { %v4537_v63 = vrot.slane %v16028_v37, %v11676_v8  ;;  %v4609_v12 = vrot.slane %v16029_v42, %v11676_v8  ;;  %v3336_v30 = vmax.f32 %v16031_v34, %v16030_v17  ;;  %v3343_v58 = vmax.f32 %v16033_v62, %v16032_v36  ;;  %v12015_v50 = vld [vmem:[%s15559_s11 + $0x10] sm:$0xff]  ;;  %v16036_v26 = vld [vmem:[#allocation166_spill] sm:$0xff]  ;;  %v16039_v36 = vld [vmem:[#allocation116_spill] sm:$0xff] }
 0x403   :  { %v3392_v60 = vmax.f32 %v16035_v44, %v16034_v15  ;;  %v1462_v61 = vrot.slane %v12015_v50, %v16036_v26  ;;  %v2109_v28 = vsel %vm2000_vm9, %v2108_v33, %v2104_v54  ;;  %v516_v7 = vmax.f32 %v514_v0, %v515_v3  ;;  %v16037_v37 = vld [vmem:[#allocation202_spill] sm:$0xff]  ;;  %v16038_v42 = vld [vmem:[#allocation203_spill] sm:$0xff]  ;;  %v16040_v15 = vld [vmem:[#allocation117_spill] sm:$0xff] }
 0x404   :  { %v4542_v52 = vsel %vm2000_vm9, %v4541_v48, %v4537_v63  ;;  %v3399_v17 = vmax.f32 %v16038_v42, %v16037_v37  ;;  %v4614_v34 = vsel %vm2000_vm9, %v4613_v2, %v4609_v12  ;;  %v4149_v62 = vrot.slane %v16039_v36, %v11673_v10  ;;  %v16042_v33 = vld [vmem:[#allocation119_spill] sm:$0xff]  ;;  %v16043_v0 = vld [vmem:[#allocation120_spill] sm:$0xff]  ;;  %v16044_v3 = vld [vmem:[#allocation121_spill] sm:$0xff]  ;;  %v12036_v2 = vpop.xlane.xlu1 %363  ;;  %v12038_v12 = vpop.xlane.xlu0 %360 }
 0x405   :  { %v4145_v44 = vrot.slane %v16040_v15, %v11676_v8  ;;  %v572_v51 = vmax.f32 %v570_v31, %v571_v24  ;;  %v4221_v13 = vrot.slane %v16041_v27, %v11673_v10  ;;  %v4217_v54 = vrot.slane %v16042_v33, %v11676_v8  ;;  %16045 = vst [vmem:[#allocation101_spill] sm:$0xff] %v12036_v2  ;;  %v12043_v31 = vld [vmem:[%s15559_s11 + $0x18] sm:$0xff]  ;;  %v16047_v15 = vld [vmem:[#allocation122_spill] sm:$0xff] }
 0x406   :  { %v2444_v48 = vrot.slane %v16043_v0, %v11673_v10  ;;  %v2440_v63 = vrot.slane %v16044_v3, %v11676_v8  ;;  %16046 = vst [vmem:[#allocation102_spill] sm:$0xff] %v12038_v12  ;;  %v3337_v37 = vrot.slane %v3336_v30, 4  ;;  %v3344_v42 = vrot.slane %v3343_v58, 4  ;;  %v16048_v0 = vld [vmem:[#allocation123_spill] sm:$0xff] }
 0x407   :  { %v3393_v36 = vrot.slane %v3392_v60, 4  ;;  %v1550_v27 = vrot.slane %v12043_v31, %v16036_v26  ;;  %v12049_v24 = vsel %vm2287_vm4, %v2037_v38, %v11914_v40  ;;  %v2516_v33 = vrot.slane %v16047_v15, %v11673_v10  ;;  %v16049_v40 = vld [vmem:[#allocation213_spill] sm:$0xff]  ;;  %v16050_v38 = vld [vmem:[#allocation216_spill] sm:$0xff] }
 0x408   :  { %v2512_v3 = vrot.slane %v16048_v0, %v11676_v8  ;;  %v3400_v12 = vrot.slane %v3399_v17, 4  ;;  %v12057_v2 = vsel %vm2287_vm4, %v2109_v28, %v11917_v6  ;;  %v12060_v29 = vsel %vm2283_vm2, %v4542_v52, %v4804_v46 }
 0x409   :  { %v12064_v26 = vsel %vm2285_vm3, %v516_v7, %v11920_v11  ;;  %v517_v21 = vmax.f32 %v16050_v38, %v16049_v40  ;;  %v12069_v15 = vsel %vm2283_vm2, %v4614_v34, %v4811_v49  ;;  %v4150_v0 = vsel %vm2000_vm9, %v4149_v62, %v4145_v44  ;;  %v16051_v40 = vld [vmem:[#allocation124_spill] sm:$0xff]  ;;  %v16052_v34 = vld [vmem:[#allocation125_spill] sm:$0xff] }
 0x40a   :  { %v4222_v4 = vsel %vm2000_vm9, %v4221_v13, %v4217_v54  ;;  %v12075_v6 = vsel %vm2285_vm3, %v572_v51, %v11963_v53  ;;  %v2445_v46 = vsel %vm2000_vm9, %v2444_v48, %v2440_v63  ;;  %v3338_v28 = vmax.f32 %v3336_v30, %v3337_v37  ;;  %v12083_v13 = vpop.xlane.xlu1 %1155  ;;  %v12085_v54 = vpop.xlane.xlu0 %1152  ;;  %v16055_v53 = vld [vmem:[#allocation126_spill] sm:$0xff]  ;;  %v16056_v30 = vld [vmem:[#allocation127_spill] sm:$0xff]  ;;  %v16058_v37 = vld [vmem:[#allocation133_spill] sm:$0xff] }
 0x40b   :  { %v3345_v52 = vmax.f32 %v3343_v58, %v3344_v42  ;;  %v3394_v11 = vmax.f32 %v3392_v60, %v3393_v36  ;;  %v2517_v7 = vsel %vm2000_vm9, %v2516_v33, %v2512_v3  ;;  %v2543_v49 = vrot.slane %v16051_v40, %v11673_v10  ;;  %16053 = vst [vmem:[#allocation35_spill] sm:$0xff] %v12083_v13  ;;  %v16057_v60 = vld [vmem:[#allocation131_spill] sm:$0xff]  ;;  %v16060_v36 = vld [vmem:[#allocation137_spill] sm:$0xff]  ;;  %v16061_v3 = vld [vmem:[#allocation218_spill] sm:$0xff] }
 0x40c   :  { %v2539_v62 = vrot.slane %v16052_v34, %v11676_v8  ;;  %v3401_v44 = vmax.f32 %v3399_v17, %v3400_v12  ;;  %16054 = vst [vmem:[#allocation219_spill] sm:$0xff] %v12085_v54  ;;  %v2552_v51 = vrot.slane %v16055_v53, %v11673_v10  ;;  %v2548_v58 = vrot.slane %v16056_v30, %v11676_v8  ;;  %v16059_v17 = vld [vmem:[#allocation135_spill] sm:$0xff]  ;;  %v16062_v38 = vld [vmem:[#allocation221_spill] sm:$0xff] }
 0x40d   :  { %v2624_v48 = vrot.slane %v16057_v60, %v11673_v10  ;;  %v518_v63 = vrot.slane %v517_v21, 4  ;;  %v2620_v42 = vrot.slane %v16058_v37, %v11676_v8  ;;  %v2045_v12 = vrot.slane %v16059_v17, %v11673_v10 }
 0x40e   :  { %1468 = vbcast.lane.b32.xlu1 %v1462_v61, 264  ;;  %v2041_v33 = vrot.slane %v16060_v36, %v11676_v8  ;;  %v573_v40 = vmax.f32 %v16062_v38, %v16061_v3  ;;  %v12103_v34 = vsel %vm2283_vm2, %v4150_v0, %v11976_v20  ;;  %v3339_v53 = vrot.slane %v3338_v28, 2  ;;  %v16063_v3 = vld [vmem:[#allocation128_spill] sm:$0xff]  ;;  %v12125_v13 = vpop.xlane.xlu1 %1203 }
 0x40f   :  { %v3346_v30 = vrot.slane %v3345_v52, 2  ;;  %v3395_v60 = vrot.slane %v3394_v11, 2  ;;  %v12111_v37 = vsel %vm2289_vm5, %v2445_v46, %v11994_v1  ;;  %v12115_v17 = vsel %vm2289_vm5, %v2517_v7, %v11999_v41  ;;  %16065 = vst [vmem:[#allocation39_spill] sm:$0xff] %v12125_v13  ;;  %v12127_v41 = vpop.xlane.xlu0 %1200  ;;  %v16067_v7 = vld [vmem:[#allocation138_spill] sm:$0xff] }
 0x410   :  { %v3402_v36 = vrot.slane %v3401_v44, 2  ;;  %v2544_v20 = vsel %vm2000_vm9, %v2543_v49, %v2539_v62  ;;  %v2553_v0 = vsel %vm2000_vm9, %v2552_v51, %v2548_v58  ;;  %v519_v38 = vmax.f32 %v517_v21, %v518_v63  ;;  %16066 = vst [vmem:[#allocation40_spill] sm:$0xff] %v12127_v41  ;;  %v16068_v21 = vld [vmem:[#allocation139_spill] sm:$0xff]  ;;  %v16072_v41 = vld [vmem:[#allocation150_spill] sm:$0xff] }
 0x411   :  { %v2625_v54 = vsel %vm2000_vm9, %v2624_v48, %v2620_v42  ;;  %v2046_v1 = vsel %vm2000_vm9, %v2045_v12, %v2041_v33  ;;  %v574_v46 = vrot.slane %v573_v40, 4  ;;  %v2117_v49 = vrot.slane %v16067_v7, %v11673_v10  ;;  %v16070_v48 = vld [vmem:[#allocation145_spill] sm:$0xff]  ;;  %v16071_v33 = vld [vmem:[#allocation146_spill] sm:$0xff] }
 0x412   :  { %1552 = vbcast.lane.b32.xlu1 %v1550_v27, 256  ;;  %v3340_v62 = vmax.f32 %v3338_v28, %v3339_v53  ;;  %v3347_v51 = vmax.f32 %v3345_v52, %v3346_v30  ;;  %v3396_v58 = vmax.f32 %v3394_v11, %v3395_v60  ;;  %v2113_v63 = vrot.slane %v16068_v21, %v11676_v8  ;;  %v16073_v28 = vld [vmem:[#allocation153_spill] sm:$0xff]  ;;  %v16074_v53 = vld [vmem:[#allocation156_spill] sm:$0xff]  ;;  %v16076_v21 = vld [vmem:[#allocation159_spill] sm:$0xff]  ;;  %v12160_v19 = vpop.permute.xlu1 %1446 }
 0x413   :  { %1464 = vbcast.lane.b32.xlu0 %v1462_v61, 256  ;;  %v12107_v61 = vsel %vm2283_vm2, %v4222_v4, %v11991_v14  ;;  %v16064_v4 = vld [vmem:[#allocation130_spill] sm:$0xff]  ;;  %v2140_v42 = vrot.slane %v16070_v48, %v11676_v8  ;;  %v3403_v12 = vmax.f32 %v3401_v44, %v3402_v36  ;;  %v2153_v13 = vrot.slane %v16071_v33, %v11673_v10  ;;  %v16075_v60 = vld [vmem:[#allocation157_spill] sm:$0xff] }
 0x414   :  { %v2611_v14 = vrot.slane %v16064_v4, %v11676_v8  ;;  %v2149_v35 = vrot.slane %v16072_v41, %v11676_v8  ;;  %v2216_v52 = vrot.slane %v16073_v28, %v11673_v10  ;;  %v520_v11 = vrot.slane %v519_v38, 2  ;;  %16077 = vst [vmem:[#allocation43_spill] sm:$0xff] %v12160_v19 }
 0x415   :  { %v2212_v30 = vrot.slane %v16074_v53, %v11676_v8  ;;  %v2225_v7 = vrot.slane %v16075_v60, %v11673_v10  ;;  %v575_v44 = vmax.f32 %v573_v40, %v574_v46  ;;  %v3341_v48 = vrot.slane %v3340_v62, 1 }
 0x416   :  { %1556 = vbcast.lane.b32.xlu1 %v1550_v27, 264  ;;  %v2615_v27 = vrot.slane %v16063_v3, %v11673_v10  ;;  %v16069_v3 = vld [vmem:[#allocation141_spill] sm:$0xff]  ;;  %v3348_v33 = vrot.slane %v3347_v51, 1  ;;  %v3397_v39 = vrot.slane %v3396_v58, 1  ;;  %v12151_v41 = vsel %vm2281_vm1, %v2553_v0, %v2544_v20 }
 0x417   :  { %v2144_v4 = vrot.slane %v16069_v3, %v11673_v10  ;;  %v2221_v3 = vrot.slane %v16076_v21, %v11676_v8  ;;  %v12158_v53 = vsel %vm2289_vm5, %v2046_v1, %v12049_v24  ;;  %v3404_v60 = vrot.slane %v3403_v12, 1  ;;  %v12162_v21 = vpop.permute.xlu0 %1442 }
 0x418   :  { %v2616_v36 = vsel %vm2000_vm9, %v2615_v27, %v2611_v14  ;;  %16078 = vst [vmem:[#allocation45_spill] sm:$0xff] %v12162_v21  ;;  %v2118_v40 = vsel %vm2000_vm9, %v2117_v49, %v2113_v63  ;;  %v16079_v14 = vld [vmem:[#allocation167_spill] sm:$0xff]  ;;  %v521_v0 = vmax.f32 %v519_v38, %v520_v11  ;;  %v2217_v46 = vsel %vm2000_vm9, %v2216_v52, %v2212_v30  ;;  %v16081_v49 = vld [vmem:[#allocation168_spill] sm:$0xff]  ;;  %v16083_v38 = vld [vmem:[#allocation170_spill] sm:$0xff] }
 0x419   :  { %v12154_v28 = vsel %vm2281_vm1, %v2625_v54, %v2616_v36  ;;  %v2145_v27 = vsel %vm2000_vm9, %v2144_v4, %v2140_v42  ;;  %v4550_v20 = vrot.slane %v16079_v14, %v11673_v10  ;;  %v2154_v54 = vsel %vm2000_vm9, %v2153_v13, %v2149_v35  ;;  %v16080_v36 = vld [vmem:[#allocation163_spill] sm:$0xff]  ;;  %v16082_v4 = vld [vmem:[#allocation169_spill] sm:$0xff]  ;;  %v16089_v14 = vld [vmem:[#allocation174_spill] sm:$0xff] }
 0x41a   :  { %v2226_v24 = vsel %vm2000_vm9, %v2225_v7, %v2221_v3  ;;  %v576_v1 = vrot.slane %v575_v44, 2  ;;  %v4546_v19 = vrot.slane %v16080_v36, %v11676_v8  ;;  %v3342_v47 = vmax.f32 %v3340_v62, %v3341_v48  ;;  %v16085_v30 = vld [vmem:[#allocation171_spill] sm:$0xff]  ;;  %v16086_v62 = vld [vmem:[#allocation172_spill] sm:$0xff]  ;;  %v16088_v48 = vld [vmem:[#allocation173_spill] sm:$0xff]  ;;  %v12192_v36 = vpop.permute.xlu1 %1530 }
 0x41b   :  { %v3349_v21 = vmax.f32 %v3347_v51, %v3348_v33  ;;  %v3398_v25 = vmax.f32 %v3396_v58, %v3397_v39  ;;  %v4622_v63 = vrot.slane %v16081_v49, %v11673_v10  ;;  %v4158_v42 = vrot.slane %v16082_v4, %v11673_v10  ;;  %v12179_v52 = vpop.xlane.xlu0 %3075  ;;  %v16087_v58 = vld [vmem:[#allocation165_spill] sm:$0xff]  ;;  %16090 = vst [vmem:[#allocation111_spill] sm:$0xff] %v12192_v36 }
 0x41c   :  { %v4154_v35 = vrot.slane %v16083_v38, %v11676_v8  ;;  %v3405_v13 = vmax.f32 %v3403_v12, %v3404_v60  ;;  %16084 = vst [vmem:[#allocation49_spill] sm:$0xff] %v12179_v52  ;;  %v4551_v11 = vsel %vm2000_vm9, %v4550_v20, %v4546_v19  ;;  %v4230_v7 = vrot.slane %v16085_v30, %v11673_v10  ;;  %v16095_v30 = vld [vmem:[#allocation205_spill] sm:$0xff] }
 0x41d   :  { %v4226_v39 = vrot.slane %v16086_v62, %v11676_v8  ;;  %v522_v51 = vrot.slane %v521_v0, 1  ;;  %v4618_v3 = vrot.slane %v16087_v58, %v11676_v8  ;;  %v2453_v33 = vrot.slane %v16088_v48, %v11673_v10  ;;  %v9016_v62 = vld [vmem:[%s15552_s7 + $0x310] sm:$0xff]  ;;  %v16096_v58 = vld [vmem:[#allocation206_spill] sm:$0xff] }
 0x41e   :  { %v2449_v12 = vrot.slane %v16089_v14, %v11676_v8  ;;  %v577_v60 = vmax.f32 %v575_v44, %v576_v1  ;;  %v12196_v19 = vsel %vm2289_vm5, %v2118_v40, %v12057_v2  ;;  %v12199_v20 = vsel %vm2281_vm1, %v2154_v54, %v2145_v27  ;;  %v16091_v27 = vld [vmem:[#allocation175_spill] sm:$0xff]  ;;  %v9018_v48 = vld [vmem:[%s15552_s7 + $0x308] sm:$0xff] }
 0x41f   :  { %v12202_v49 = vsel %vm2281_vm1, %v2226_v24, %v2217_v46  ;;  %v12205_v4 = vsel %vm2281_vm1, %v3349_v21, %v3342_v47  ;;  %v12209_v38 = vsel %vm2285_vm3, %v4551_v11, %v12060_v29  ;;  %v4623_v44 = vsel %vm2000_vm9, %v4622_v63, %v4618_v3  ;;  %v16092_v46 = vld [vmem:[#allocation176_spill] sm:$0xff]  ;;  %v9013_v29 = vld [vmem:[%s15552_s7 + $0x100] sm:$0xff]  ;;  %v12230_v11 = vpop.xlane.xlu0 %3123 }
 0x420   :  { %v4159_v1 = vsel %vm2000_vm9, %v4158_v42, %v4154_v35  ;;  %v12214_v2 = vsel %vm2281_vm1, %v3405_v13, %v3398_v25  ;;  %v4231_v40 = vsel %vm2000_vm9, %v4230_v7, %v4226_v39  ;;  %v2525_v54 = vrot.slane %v16091_v27, %v11673_v10  ;;  %v16093_v63 = vld [vmem:[#allocation204_spill] sm:$0xff]  ;;  %v9014_v25 = vld [vmem:[%s15552_s7 + $0x300] sm:$0xff]  ;;  %16094 = vst [vmem:[#allocation50_spill] sm:$0xff] %v12230_v11 }
 0x421   :  { %v2521_v47 = vrot.slane %v16092_v46, %v11676_v8  ;;  %v523_v21 = vmax.f32 %v521_v0, %v522_v51  ;;  %v2454_v24 = vsel %vm2000_vm9, %v2453_v33, %v2449_v12  ;;  %v1601_v42 = vmul.f32 %v9013_v29, %v16093_v63  ;;  %v9015_v0 = vld [vmem:[%s15552_s7 + $0x110] sm:$0xff]  ;;  %v9017_v51 = vld [vmem:[%s15552_s7 + $0x108] sm:$0xff]  ;;  %v9019_v27 = vld [vmem:[%s15552_s7 + $0x118] sm:$0xff] }
 0x422   :  { %v3736_v35 = vmul.f32 %v9014_v25, %v16093_v63  ;;  %v578_v13 = vrot.slane %v577_v60, 1  ;;  %v1603_v7 = vmul.f32 %v9015_v0, %v16095_v30  ;;  %v3738_v39 = vmul.f32 %v9016_v62, %v16095_v30  ;;  %v16097_v46 = vld [vmem:[#allocation208_spill] sm:$0xff]  ;;  %v12264_v0 = vpop.permute.xlu1 %1534 }
 0x423   :  { %v1602_v3 = vmul.f32 %v9017_v51, %v16096_v58  ;;  %v3737_v33 = vmul.f32 %v9018_v48, %v16096_v58  ;;  %v12250_v14 = vsel %vm2285_vm3, %v4623_v44, %v12069_v15  ;;  %v12254_v12 = vsel %vm2285_vm3, %v4159_v1, %v12103_v34  ;;  %v9020_v63 = vld [vmem:[%s15552_s7 + $0x318] sm:$0xff]  ;;  %16098 = vst [vmem:[#allocation53_spill] sm:$0xff] %v12264_v0  ;;  %v16101_v48 = vld [vmem:[#allocation210_spill] sm:$0xff] }
 0x424   :  { %v1604_v29 = vmul.f32 %v9019_v27, %v16097_v46  ;;  %v3739_v25 = vmul.f32 %v9020_v63, %v16097_v46  ;;  %v12268_v15 = vsel %vm2285_vm3, %v4231_v40, %v12107_v61  ;;  %v12272_v34 = vsel %vm2291_vm7, %v2454_v24, %v12111_v37  ;;  %v9021_v51 = vld [vmem:[%s15552_s7 + $0x198] sm:$0xff]  ;;  %v16099_v61 = vld [vmem:[#allocation217_spill] sm:$0xff]  ;;  %v8479_v37 = vld [vmem:[%s15552_s7 + $0x350] sm:$0xff] }
 0x425   :  { %v2526_v44 = vsel %vm2000_vm9, %v2525_v54, %v2521_v47  ;;  %v12277_v1 = vsel %vm2287_vm4, %v523_v21, %v12064_v26  ;;  %v1777_v30 = vsel %vm184_vm0, %v1601_v42, 0.0  ;;  %v3912_v62 = vsel %vm184_vm0, %v3736_v35, 0.0  ;;  %v16100_v35 = vld [vmem:[#allocation209_spill] sm:$0xff]  ;;  %v16104_v46 = vld [vmem:[#allocation207_spill] sm:$0xff]  ;;  %v9025_v63 = vld [vmem:[%s15552_s7 + $0x388] sm:$0xff] }
 0x426   :  { %v1620_v40 = vmul.f32 %v9021_v51, %v16099_v61  ;;  %v12285_v58 = vmax.f32 %v577_v60, %v578_v13  ;;  %v1786_v54 = vsel %vm184_vm0, %v1603_v7, 0.0  ;;  %v3921_v26 = vsel %vm184_vm0, %v3738_v39, 0.0  ;;  %v9022_v60 = vld [vmem:[%s15552_s7 + $0x190] sm:$0xff]  ;;  %v9023_v7 = vld [vmem:[%s15552_s7 + $0x188] sm:$0xff]  ;;  %v12304_v27 = vpop.xlane.xlu1 %3078  ;;  %v9026_v51 = vld [vmem:[%s15552_s7 + $0x398] sm:$0xff] }
 0x427   :  { %v1778_v47 = vsel %vm184_vm0, %v1602_v3, 0.0  ;;  %v3913_v21 = vsel %vm184_vm0, %v3737_v33, 0.0  ;;  %v1787_v24 = vsel %vm184_vm0, %v1604_v29, 0.0  ;;  %v3922_v42 = vsel %vm184_vm0, %v3739_v25, 0.0  ;;  %16102 = vst [vmem:[#allocation242_spill] sm:$0xff] %v12304_v27  ;;  %v12306_v3 = vpop.xlane.xlu0 %3126  ;;  %v9024_v33 = vld [vmem:[%s15552_s7 + $0x180] sm:$0xff] }
 0x428   :  { %v1619_v13 = vmul.f32 %v9022_v60, %v16100_v35  ;;  %v1618_v39 = vmul.f32 %v9023_v7, %v16101_v48  ;;  %16103 = vst [vmem:[#allocation147_spill] sm:$0xff] %v12306_v3  ;;  %v1617_v29 = vmul.f32 %v9024_v33, %v16104_v46  ;;  %v3753_v25 = vmul.f32 %v9025_v63, %v16101_v48  ;;  %v9027_v33 = vld [vmem:[%s15552_s7 + $0x380] sm:$0xff]  ;;  %v8495_v48 = vld [vmem:[%s15552_s7 + $0x3d0] sm:$0xff] }
 0x429   :  { %v3755_v60 = vmul.f32 %v9026_v51, %v16099_v61  ;;  %v12321_v7 = vsel %vm184_vm0, %v8479_v37, -inf  ;;  %v1779_v3 = vadd.f32 %v1778_v47, %v1777_v30  ;;  %v3914_v11 = vadd.f32 %v3913_v21, %v3912_v62  ;;  %v9028_v30 = vld [vmem:[%s15552_s7 + $0x390] sm:$0xff]  ;;  %v16107_v47 = vld [vmem:[#allocation177_spill] sm:$0xff] }
 0x42a   :  { %16105 = vst [vmem:[#allocation149_spill] sm:$0xff] %v12321_v7  ;;  %v3752_v0 = vmul.f32 %v9027_v33, %v16104_v46  ;;  %v1859_v36 = vsel %vm184_vm0, %v1620_v40, 0.0  ;;  %v12333_v61 = vsel %vm2291_vm7, %v2526_v44, %v12115_v17  ;;  %v1788_v63 = vadd.f32 %v1787_v24, %v1786_v54  ;;  %v16108_v40 = vld [vmem:[#allocation178_spill] sm:$0xff]  ;;  %v8480_v24 = vld [vmem:[%s15552_s7 + $0x358] sm:$0xff] }
 0x42b   :  { %16106 = vst [vmem:[#allocation59_spill] sm:$0xff] %v12333_v61  ;;  %v3923_v51 = vadd.f32 %v3922_v42, %v3921_v26  ;;  %v3754_v62 = vmul.f32 %v9028_v30, %v16100_v35  ;;  %v2561_v21 = vrot.slane %v16107_v47, %v11673_v10  ;;  %v2557_v46 = vrot.slane %v16108_v40, %v11676_v8  ;;  %v12356_v30 = vpop.xlane.xlu1 %3150  ;;  %v12358_v47 = vpop.xlane.xlu0 %3147 }
 0x42c   :  { %v1858_v33 = vsel %vm184_vm0, %v1619_v13, 0.0  ;;  %v1850_v52 = vsel %vm184_vm0, %v1618_v39, 0.0  ;;  %v3985_v17 = vsel %vm184_vm0, %v3753_v25, 0.0  ;;  %v3994_v54 = vsel %vm184_vm0, %v3755_v60, 0.0  ;;  %16110 = vst [vmem:[#allocation64_spill] sm:$0xff] %v12356_v30  ;;  %16111 = vst [vmem:[#allocation151_spill] sm:$0xff] %v12358_v47 }
 0x42d   :  { %v1860_v44 = vadd.f32 %v1859_v36, %v1858_v33  ;;  %v12349_v26 = vsel %vm184_vm0, %v8495_v48, -inf  ;;  %v1780_v42 = vrot.slane %v1779_v3, 4  ;;  %v3915_v35 = vrot.slane %v3914_v11, 4  ;;  %v8496_v36 = vld [vmem:[%s15552_s7 + $0x3d8] sm:$0xff] }
 0x42e   :  { %16109 = vst [vmem:[#allocation62_spill] sm:$0xff] %v12349_v26  ;;  %v1849_v13 = vsel %vm184_vm0, %v1617_v29, 0.0  ;;  %v3984_v39 = vsel %vm184_vm0, %v3752_v0, 0.0  ;;  %v1789_v25 = vrot.slane %v1788_v63, 4  ;;  %v3924_v60 = vrot.slane %v3923_v51, 4  ;;  %v16113_v0 = vld [vmem:[#allocation241_spill] sm:$0xff] }
 0x42f   :  { %v3993_v40 = vsel %vm184_vm0, %v3754_v62, 0.0  ;;  %v1851_v33 = vadd.f32 %v1850_v52, %v1849_v13  ;;  %v3986_v27 = vadd.f32 %v3985_v17, %v3984_v39  ;;  %v12366_v29 = vsel %vm184_vm0, %v8480_v24, -inf  ;;  %v16114_v47 = vld [vmem:[#allocation84_spill] sm:$0xff]  ;;  %v16117_v52 = vld [vmem:[#allocation179_spill] sm:$0xff] }
 0x430   :  { %16112 = vst [vmem:[#allocation154_spill] sm:$0xff] %v12366_v29  ;;  %v3491_v30 = vmul.f32 %v8480_v24, %v16113_v0  ;;  %v1861_v56 = vrot.slane %v1860_v44, 4  ;;  %v3350_v59 = vmax.f32 %v16115_v32, %v16114_v47  ;;  %v12372_v45 = vsel %vm184_vm0, %v8496_v36, -inf  ;;  %v16118_v17 = vld [vmem:[#allocation180_spill] sm:$0xff] }
 0x431   :  { %16116 = vst [vmem:[#allocation65_spill] sm:$0xff] %v12372_v45  ;;  %v3490_v23 = vmul.f32 %v8479_v37, %v16113_v0  ;;  %v2633_v62 = vrot.slane %v16117_v52, %v11673_v10  ;;  %v1781_v13 = vadd.f32 %v1780_v42, %v1779_v3  ;;  %v12382_v24 = vsel %vm2287_vm4, %v12285_v58, %v12075_v6  ;;  %v12385_v0 = vpop.xlane.xlu1 %3198  ;;  %v12387_v52 = vpop.xlane.xlu0 %3195  ;;  %v16121_v42 = vld [vmem:[#allocation247_spill] sm:$0xff] }
 0x432   :  { %3159 = vmax.xlane.f32.xlu0 %v12321_v7  ;;  %v3995_v7 = vadd.f32 %v3994_v54, %v3993_v40  ;;  %v2629_v54 = vrot.slane %v16118_v17, %v11676_v8  ;;  %v3916_v39 = vadd.f32 %v3915_v35, %v3914_v11  ;;  %v1790_v40 = vadd.f32 %v1789_v25, %v1788_v63  ;;  %v16122_v25 = vld [vmem:[#allocation181_spill] sm:$0xff] }
 0x433   :  { %v3925_v32 = vadd.f32 %v3924_v60, %v3923_v51  ;;  %v1852_v47 = vrot.slane %v1851_v33, 4  ;;  %16119 = vst [vmem:[#allocation66_spill] sm:$0xff] %v12385_v0  ;;  %16120 = vst [vmem:[#allocation67_spill] sm:$0xff] %v12387_v52  ;;  %v3641_v3 = vsel %vm184_vm0, %v3491_v30, 0.0  ;;  %v3507_v17 = vmul.f32 %v8496_v36, %v16121_v42  ;;  %v16123_v52 = vld [vmem:[#allocation85_spill] sm:$0xff]  ;;  %v16125_v30 = vld [vmem:[#allocation182_spill] sm:$0xff] }
 0x434   :  { %v3996_v37 = vrot.slane %v3995_v7, 4  ;;  %v1862_v6 = vadd.f32 %v1861_v56, %v1860_v44  ;;  %v3351_v58 = vrot.slane %v3350_v59, 4  ;;  %v3638_v11 = vsel %vm184_vm0, %v3490_v23, 0.0  ;;  %v16124_v0 = vld [vmem:[#allocation97_spill] sm:$0xff] }
 0x435   :  { %v3506_v63 = vmul.f32 %v8495_v48, %v16121_v42  ;;  %v2562_v51 = vsel %vm2000_vm9, %v2561_v21, %v2557_v46  ;;  %v2634_v35 = vsel %vm2000_vm9, %v2633_v62, %v2629_v54  ;;  %v2054_v60 = vrot.slane %v16122_v25, %v11673_v10 }
 0x436   :  { %3207 = vmax.xlane.f32.xlu0 %v12349_v26  ;;  %v3987_v26 = vrot.slane %v3986_v27, 4  ;;  %v1791_v36 = vrot.slane %v1790_v40, 2  ;;  %v3926_v56 = vrot.slane %v3925_v32, 2  ;;  %v1853_v44 = vadd.f32 %v1852_v47, %v1851_v33  ;;  %v16128_v47 = vld [vmem:[#allocation240_spill] sm:$0xff] }
 0x437   :  { %v1782_v23 = vrot.slane %v1781_v13, 2  ;;  %v3917_v22 = vrot.slane %v3916_v39, 2  ;;  %v3689_v21 = vsel %vm184_vm0, %v3507_v17, 0.0  ;;  %v1863_v46 = vrot.slane %v1862_v6, 2  ;;  %v12416_v17 = vpop.xlane.xlu0 %3555 }
 0x438   :  { %v3988_v48 = vadd.f32 %v3987_v26, %v3986_v27  ;;  %v3997_v62 = vadd.f32 %v3996_v37, %v3995_v7  ;;  %v3352_v54 = vmax.f32 %v3350_v59, %v3351_v58  ;;  %v3686_v42 = vsel %vm184_vm0, %v3506_v63, 0.0  ;;  %v12414_v26 = vpop.xlane.xlu1 %3558  ;;  %16131 = vst [vmem:[#allocation76_spill] sm:$0xff] %v12416_v17  ;;  %v16134_v17 = vld [vmem:[#allocation187_spill] sm:$0xff] }
 0x439   :  { %16130 = vst [vmem:[#allocation75_spill] sm:$0xff] %v12414_v26  ;;  %v1792_v7 = vadd.f32 %v1791_v36, %v1790_v40  ;;  %v3927_v37 = vadd.f32 %v3926_v56, %v3925_v32  ;;  %v1854_v58 = vrot.slane %v1853_v44, 2  ;;  %v16135_v40 = vld [vmem:[#allocation190_spill] sm:$0xff]  ;;  %v16136_v56 = vld [vmem:[#allocation191_spill] sm:$0xff] }
 0x43a   :  { %3162 = vmax.xlane.f32.xlu1 %v12366_v29  ;;  %3210 = vmax.xlane.f32.xlu0 %v12372_v45  ;;  %v3406_v45 = vmax.f32 %v16124_v0, %v16123_v52  ;;  %v2050_v29 = vrot.slane %v16125_v30, %v11676_v8  ;;  %v12406_v0 = vsel %vm2283_vm2, %v2562_v51, %v12151_v41  ;;  %v16132_v41 = vld [vmem:[#allocation183_spill] sm:$0xff]  ;;  %v3989_v25 = vrot.slane %v3988_v48, 2 }
 0x43b   :  { %16126 = vst [vmem:[#allocation68_spill] sm:$0xff] %v12406_v0  ;;  %v12410_v52 = vsel %vm2283_vm2, %v2634_v35, %v12154_v28  ;;  %v16133_v28 = vld [vmem:[#allocation185_spill] sm:$0xff]  ;;  %v1783_v51 = vadd.f32 %v1782_v23, %v1781_v13  ;;  %v3918_v35 = vadd.f32 %v3917_v22, %v3916_v39  ;;  %v1864_v30 = vadd.f32 %v1863_v46, %v1862_v6  ;;  %v16137_v22 = vld [vmem:[#allocation195_spill] sm:$0xff]  ;;  %v16138_v46 = vld [vmem:[#allocation246_spill] sm:$0xff] }
 0x43c   :  { %16127 = vst [vmem:[#allocation61_spill] sm:$0xff] %v12410_v52  ;;  %v3407_v33 = vrot.slane %v3406_v45, 4  ;;  %v2055_v59 = vsel %vm2000_vm9, %v2054_v60, %v2050_v29  ;;  %v2122_v63 = vrot.slane %v16133_v28, %v11676_v8  ;;  %v2162_v29 = vrot.slane %v16134_v17, %v11673_v10  ;;  %v12433_v17 = vpop.xlane.xlu1 %3606  ;;  %v12435_v52 = vpop.xlane.xlu0 %3603 }
 0x43d   :  { %v2158_v32 = vrot.slane %v16135_v40, %v11676_v8  ;;  %v3928_v28 = vrot.slane %v3927_v37, 1  ;;  %v1855_v13 = vadd.f32 %v1854_v58, %v1853_v44  ;;  %v2230_v39 = vrot.slane %v16137_v22, %v11676_v8  ;;  %16140 = vst [vmem:[#allocation72_spill] sm:$0xff] %v12433_v17  ;;  %16141 = vst [vmem:[#allocation74_spill] sm:$0xff] %v12435_v52 }
 0x43e   :  { %3642 = vadd.xlane.f32.xlu1 %v3641_v3  ;;  %3639 = vadd.xlane.f32.xlu0 %v3638_v11  ;;  %v16129_v3 = vld [vmem:[#allocation243_spill] sm:$0xff]  ;;  %v2126_v11 = vrot.slane %v16132_v41, %v11673_v10  ;;  %v3408_v60 = vmax.f32 %v3406_v45, %v3407_v33  ;;  %v1793_v41 = vrot.slane %v1792_v7, 1  ;;  %v1784_v6 = vrot.slane %v1783_v51, 1 }
 0x43f   :  { %v524_v27 = vmax.f32 %v16129_v3, %v16128_v47  ;;  %v3998_v47 = vrot.slane %v3997_v62, 2  ;;  %v3353_v3 = vrot.slane %v3352_v54, 2  ;;  %v3919_v23 = vrot.slane %v3918_v35, 1 }
 0x440   :  { %v3990_v45 = vadd.f32 %v3989_v25, %v3988_v48  ;;  %v1865_v33 = vrot.slane %v1864_v30, 1  ;;  %v2127_v44 = vsel %vm2000_vm9, %v2126_v11, %v2122_v63  ;;  %v3409_v58 = vrot.slane %v3408_v60, 2  ;;  %v12454_v11 = vpop.xlane.xlu0 %3627 }
 0x441   :  { %v525_v36 = vrot.slane %v524_v27, 4  ;;  %v3999_v40 = vadd.f32 %v3998_v47, %v3997_v62  ;;  %v3354_v0 = vmax.f32 %v3352_v54, %v3353_v3  ;;  %v2163_v18 = vsel %vm2000_vm9, %v2162_v29, %v2158_v32  ;;  %16143 = vst [vmem:[#allocation80_spill] sm:$0xff] %v12454_v11  ;;  %v9030_v29 = vld [vmem:[%s15552_s7 + $0x328] sm:$0xff] }
 0x442   :  { %3690 = vadd.xlane.f32.xlu1 %v3689_v21  ;;  %3687 = vadd.xlane.f32.xlu0 %v3686_v42  ;;  %v2234_v21 = vrot.slane %v16136_v56, %v11673_v10  ;;  %v16139_v42 = vld [vmem:[#allocation248_spill] sm:$0xff]  ;;  %v12439_v56 = vsel %vm2291_vm7, %v2055_v59, %v12158_v53  ;;  %v1794_v61 = vadd.f32 %v1793_v41, %v1792_v7  ;;  %v3991_v62 = vrot.slane %v3990_v45, 1 }
 0x443   :  { %v580_v26 = vmax.f32 %v16139_v42, %v16138_v46  ;;  %v526_v22 = vmax.f32 %v524_v27, %v525_v36  ;;  %v3929_v46 = vadd.f32 %v3928_v28, %v3927_v37  ;;  %v1856_v42 = vrot.slane %v1855_v13, 1  ;;  %v12452_v37 = vpop.xlane.xlu1 %3630  ;;  %v9031_v28 = vld [vmem:[%s15552_s7 + $0x120] sm:$0xff] }
 0x444   :  { %v2235_v17 = vsel %vm2000_vm9, %v2234_v21, %v2230_v39  ;;  %v1785_v52 = vadd.f32 %v1784_v6, %v1783_v51  ;;  %v3920_v48 = vadd.f32 %v3919_v23, %v3918_v35  ;;  %v1866_v54 = vadd.f32 %v1865_v33, %v1864_v30  ;;  %16142 = vst [vmem:[#allocation77_spill] sm:$0xff] %v12452_v37  ;;  %v9032_v6 = vld [vmem:[%s15552_s7 + $0x320] sm:$0xff]  ;;  %v16148_v33 = vld [vmem:[#allocation220_spill] sm:$0xff] }
 0x445   :  { %v581_v25 = vrot.slane %v580_v26, 4  ;;  %v4000_v47 = vrot.slane %v3999_v40, 1  ;;  %v3355_v3 = vrot.slane %v3354_v0, 1  ;;  %v12446_v53 = vsel %vm2291_vm7, %v2127_v44, %v12196_v19 }
 0x446   :  { %v12450_v27 = vsel %vm2283_vm2, %v2163_v18, %v12199_v20  ;;  %v3410_v59 = vmax.f32 %v3408_v60, %v3409_v58  ;;  %v527_v7 = vrot.slane %v526_v22, 2  ;;  %v12458_v63 = vsel %vm2283_vm2, %v2235_v17, %v12202_v49  ;;  %v9029_v18 = vld [vmem:[%s15552_s7 + $0x128] sm:$0xff]  ;;  %v16144_v20 = vld [vmem:[#allocation81_spill] sm:$0xff]  ;;  %v16147_v17 = vld [vmem:[#allocation212_spill] sm:$0xff] }
 0x447   :  { %v12461_v51 = vsel %vm2281_vm1, %v1794_v61, %v1785_v52  ;;  %v12464_v19 = vsel %vm2281_vm1, %v3929_v46, %v3920_v48  ;;  %v1857_v35 = vadd.f32 %v1856_v42, %v1855_v13  ;;  %v1606_v30 = vmul.f32 %v9029_v18, %v16144_v20  ;;  %v16145_v60 = vld [vmem:[#allocation229_spill] sm:$0xff]  ;;  %v9033_v58 = vld [vmem:[%s15552_s7 + $0x1a8] sm:$0xff]  ;;  %v16150_v46 = vld [vmem:[#allocation236_spill] sm:$0xff] }
 0x448   :  { %v3741_v49 = vmul.f32 %v9030_v29, %v16144_v20  ;;  %v582_v32 = vmax.f32 %v580_v26, %v581_v25  ;;  %v1473_v61 = vrot.slane %v12015_v50, %v16145_v60  ;;  %v3992_v52 = vadd.f32 %v3991_v62, %v3990_v45  ;;  %v16146_v13 = vld [vmem:[#allocation73_spill] sm:$0xff]  ;;  %v12499_v62 = vpop.xlane.xlu1 %3678 }
 0x449   :  { %v12477_v36 = vsel %vm2281_vm1, %v1866_v54, %v1857_v35  ;;  %v4001_v21 = vadd.f32 %v4000_v47, %v3999_v40  ;;  %v3356_v41 = vmax.f32 %v3354_v0, %v3355_v3  ;;  %v1605_v39 = vmul.f32 %v9031_v28, %v16146_v13  ;;  %v16149_v40 = vld [vmem:[#allocation222_spill] sm:$0xff]  ;;  %16151 = vst [vmem:[#allocation82_spill] sm:$0xff] %v12499_v62  ;;  %v12501_v54 = vpop.xlane.xlu0 %3675  ;;  %v16153_v3 = vld [vmem:[#allocation223_spill] sm:$0xff]  ;;  %v16154_v35 = vld [vmem:[#allocation224_spill] sm:$0xff] }
 0x44a   :  { %v3740_v26 = vmul.f32 %v9032_v6, %v16146_v13  ;;  %v3411_v23 = vrot.slane %v3410_v59, 1  ;;  %v528_v50 = vmax.f32 %v526_v22, %v527_v7  ;;  %v4555_v45 = vrot.slane %v16147_v17, %v11676_v8  ;;  %16152 = vst [vmem:[#allocation87_spill] sm:$0xff] %v12501_v54  ;;  %v9034_v20 = vld [vmem:[%s15552_s7 + $0x1a0] sm:$0xff] }
 0x44b   :  { %v4627_v0 = vrot.slane %v16148_v33, %v11676_v8  ;;  %v4559_v44 = vrot.slane %v16149_v40, %v11673_v10  ;;  %v1622_v42 = vmul.f32 %v9033_v58, %v16150_v46  ;;  %v1796_v48 = vsel %vm184_vm0, %v1606_v30, 0.0  ;;  %v16155_v30 = vld [vmem:[#allocation71_spill] sm:$0xff]  ;;  %v9036_v40 = vld [vmem:[%s15552_s7 + $0x3a0] sm:$0xff] }
 0x44c   :  { %v3931_v25 = vsel %vm184_vm0, %v3741_v49, 0.0  ;;  %v583_v22 = vrot.slane %v582_v32, 2  ;;  %v1561_v47 = vrot.slane %v12043_v31, %v16145_v60  ;;  %v4631_v7 = vrot.slane %v16153_v3, %v11673_v10  ;;  %v9035_v49 = vld [vmem:[%s15552_s7 + $0x3a8] sm:$0xff]  ;;  %v16156_v31 = vld [vmem:[#allocation225_spill] sm:$0xff] }
 0x44d   :  { %v4167_v18 = vrot.slane %v16154_v35, %v11673_v10  ;;  %v1621_v29 = vmul.f32 %v9034_v20, %v16155_v30  ;;  %v3757_v28 = vmul.f32 %v9035_v49, %v16150_v46  ;;  %v4163_v13 = vrot.slane %v16156_v31, %v11676_v8  ;;  %v16184_v62 = vld [vmem:[#allocation61_spill] sm:$0xff] }
 0x44e   :  { %v1795_v6 = vsel %vm184_vm0, %v1605_v39, 0.0  ;;  %v3930_v17 = vsel %vm184_vm0, %v3740_v26, 0.0  ;;  %v529_v33 = vrot.slane %v528_v50, 1  ;;  %v3756_v58 = vmul.f32 %v9036_v40, %v16155_v30 }
 0x44f   :  { %v1797_v3 = vadd.f32 %v1796_v48, %v1795_v6  ;;  %v3932_v35 = vadd.f32 %v3931_v25, %v3930_v17  ;;  %v1868_v20 = vsel %vm184_vm0, %v1622_v42, 0.0  ;;  %v12527_v46 = vsel %vm2281_vm1, %v4001_v21, %v3992_v52  ;;  %v16157_v52 = vld [vmem:[#allocation226_spill] sm:$0xff]  ;;  %v16162_v17 = vld [vmem:[#allocation232_spill] sm:$0xff] }
 0x450   :  { %v12531_v49 = vsel %vm2283_vm2, %v3356_v41, %v12205_v4  ;;  %v3412_v39 = vmax.f32 %v3410_v59, %v3411_v23  ;;  %v584_v26 = vmax.f32 %v582_v32, %v583_v22  ;;  %v4560_v31 = vsel %vm2000_vm9, %v4559_v44, %v4555_v45  ;;  %v12540_v4 = vpop.xlane.xlu1 %321  ;;  %v12542_v59 = vpop.xlane.xlu0 %318  ;;  %v16158_v32 = vld [vmem:[#allocation227_spill] sm:$0xff]  ;;  %v16159_v44 = vld [vmem:[#allocation228_spill] sm:$0xff] }
 0x451   :  { %v4632_v60 = vsel %vm2000_vm9, %v4631_v7, %v4627_v0  ;;  %v1867_v30 = vsel %vm184_vm0, %v1621_v29, 0.0  ;;  %v4003_v48 = vsel %vm184_vm0, %v3757_v28, 0.0  ;;  %v4168_v42 = vsel %vm2000_vm9, %v4167_v18, %v4163_v13  ;;  %v16160_v29 = vld [vmem:[#allocation230_spill] sm:$0xff] }
 0x452   :  { %v4239_v21 = vrot.slane %v16157_v52, %v11673_v10  ;;  %v1869_v25 = vadd.f32 %v1868_v20, %v1867_v30  ;;  %v530_v6 = vmax.f32 %v528_v50, %v529_v33  ;;  %v4235_v41 = vrot.slane %v16158_v32, %v11676_v8  ;;  %v16164_v52 = vld [vmem:[#allocation36_spill] sm:$0xff] }
 0x453   :  { %1479 = vbcast.lane.b32.xlu1 %v1473_v61, 264  ;;  %v4002_v23 = vsel %vm184_vm0, %v3756_v58, 0.0  ;;  %v1798_v45 = vrot.slane %v1797_v3, 4  ;;  %v3933_v0 = vrot.slane %v3932_v35, 4  ;;  %v2462_v22 = vrot.slane %v16159_v44, %v11673_v10 }
 0x454   :  { %v4004_v7 = vadd.f32 %v4003_v48, %v4002_v23  ;;  %v585_v18 = vrot.slane %v584_v26, 1  ;;  %v3357_v50 = vmax.f32 %v11525_v16, %v11511_v55  ;;  %v2458_v28 = vrot.slane %v16160_v29, %v11676_v8  ;;  %v16167_v23 = vld [vmem:[#allocation38_spill] sm:$0xff] }
 0x455   :  { %v2530_v33 = vrot.slane %v16162_v17, %v11676_v8  ;;  %v3413_v40 = vmax.f32 %v11552_v9, %v11534_v43  ;;  %v12561_v58 = vsel %vm2287_vm4, %v4560_v31, %v12209_v38  ;;  %v12565_v55 = vsel %vm2287_vm4, %v4632_v60, %v12250_v14  ;;  %v12582_v31 = vpop.xlane.xlu1 %369  ;;  %v16170_v17 = vld [vmem:[#allocation34_spill] sm:$0xff] }
 0x456   :  { %v1870_v16 = vrot.slane %v1869_v25, 4  ;;  %v12573_v20 = vsel %vm2287_vm4, %v4168_v42, %v12254_v12  ;;  %v1799_v30 = vadd.f32 %v1798_v45, %v1797_v3  ;;  %v3934_v48 = vadd.f32 %v3933_v0, %v3932_v35 }
 0x457   :  { %1563 = vbcast.lane.b32.xlu1 %v1561_v47, 256  ;;  %v12577_v43 = vsel %vm2289_vm5, %v530_v6, %v12277_v1  ;;  %v4240_v9 = vsel %vm2000_vm9, %v4239_v21, %v4235_v41  ;;  %v4005_v38 = vrot.slane %v4004_v7, 4  ;;  %v3358_v14 = vrot.slane %v3357_v50, 4  ;;  %v16163_v1 = vld [vmem:[#allocation233_spill] sm:$0xff]  ;;  %v16165_v6 = vld [vmem:[#allocation54_spill] sm:$0xff] }
 0x458   :  { %1475 = vbcast.lane.b32.xlu0 %v1473_v61, 256  ;;  %v16161_v61 = vld [vmem:[#allocation231_spill] sm:$0xff]  ;;  %v531_v60 = vmax.f32 %v11630_v57, %v11622_v5  ;;  %v2463_v12 = vsel %vm2000_vm9, %v2462_v22, %v2458_v28  ;;  %v586_v35 = vmax.f32 %v584_v26, %v585_v18  ;;  %v2570_v42 = vrot.slane %v16163_v1, %v11673_v10  ;;  %v16166_v57 = vld [vmem:[#allocation37_spill] sm:$0xff]  ;;  %v16168_v26 = vld [vmem:[#allocation28_spill] sm:$0xff] }
 0x459   :  { %v2534_v13 = vrot.slane %v16161_v61, %v11673_v10  ;;  %v2063_v21 = vrot.slane %v16164_v52, %v11673_v10  ;;  %v2059_v32 = vrot.slane %v16165_v6, %v11676_v8  ;;  %v1871_v5 = vadd.f32 %v1870_v16, %v1869_v25  ;;  %v16169_v25 = vld [vmem:[#allocation234_spill] sm:$0xff] }
 0x45a   :  { %v2135_v41 = vrot.slane %v16166_v57, %v11673_v10  ;;  %v2131_v45 = vrot.slane %v16167_v23, %v11676_v8  ;;  %v1800_v0 = vrot.slane %v1799_v30, 2  ;;  %v3935_v44 = vrot.slane %v3934_v48, 2  ;;  %v16172_v23 = vld [vmem:[#allocation152_spill] sm:$0xff] }
 0x45b   :  { %1567 = vbcast.lane.b32.xlu1 %v1561_v47, 264  ;;  %v12569_v47 = vsel %vm2283_vm2, %v3412_v39, %v12214_v2  ;;  %v12584_v2 = vpop.xlane.xlu0 %366  ;;  %v2535_v3 = vsel %vm2000_vm9, %v2534_v13, %v2530_v33  ;;  %v3414_v39 = vrot.slane %v3413_v40, 4  ;;  %v2566_v22 = vrot.slane %v16168_v26, %v11676_v8  ;;  %v16173_v26 = vld [vmem:[#allocation158_spill] sm:$0xff] }
 0x45c   :  { %v4006_v18 = vadd.f32 %v4005_v38, %v4004_v7  ;;  %v3359_v29 = vmax.f32 %v3357_v50, %v3358_v14  ;;  %v532_v28 = vrot.slane %v531_v60, 4  ;;  %v12602_v61 = vsel %vm2287_vm4, %v4240_v9, %v12268_v15  ;;  %v12615_v50 = vpop.xlane.xlu1 %1161  ;;  %v16171_v9 = vld [vmem:[#allocation59_spill] sm:$0xff] }
 0x45d   :  { %v2642_v13 = vrot.slane %v16169_v25, %v11673_v10  ;;  %v2638_v33 = vrot.slane %v16170_v17, %v11676_v8  ;;  %v3415_v16 = vmax.f32 %v3413_v40, %v3414_v39  ;;  %v2686_v1 = vsel %vm2293_vm8, %v2463_v12, %v12272_v34 }
 0x45e   :  { %v2064_v52 = vsel %vm2000_vm9, %v2063_v21, %v2059_v32  ;;  %v1872_v6 = vrot.slane %v1871_v5, 2  ;;  %v12613_v7 = vsel %vm2289_vm5, %v586_v35, %v12382_v24  ;;  %v2693_v38 = vsel %vm2293_vm8, %v2535_v3, %v16171_v9  ;;  %v12631_v3 = vld [vmem:[%s16174_s27] sm:$0xff] }
 0x45f   :  { %v12617_v15 = vpop.xlane.xlu0 %1158  ;;  %v2136_v14 = vsel %vm2000_vm9, %v2135_v41, %v2131_v45  ;;  %v1801_v40 = vadd.f32 %v1800_v0, %v1799_v30  ;;  %v3936_v39 = vadd.f32 %v3935_v44, %v3934_v48  ;;  %v2571_v34 = vsel %vm2000_vm9, %v2570_v42, %v2566_v22  ;;  %16175 = vst [vmem:[#allocation88_spill] sm:$0xff] %v12631_v3  ;;  %v16176_v48 = vld [vmem:[#allocation12_spill] sm:$0xff]  ;;  %v16177_v42 = vld [vmem:[#allocation13_spill] sm:$0xff]  ;;  %v16180_v44 = vld [vmem:[#allocation55_spill] sm:$0xff] }
 0x460   :  { %v4007_v12 = vrot.slane %v4006_v18, 2  ;;  %v3360_v21 = vrot.slane %v3359_v29, 2  ;;  %v533_v32 = vmax.f32 %v531_v60, %v532_v28  ;;  %v2643_v57 = vsel %vm2000_vm9, %v2642_v13, %v2638_v33  ;;  %v12647_v0 = vld [vmem:[%s16179_s24] sm:$0xff]  ;;  %v16181_v22 = vld [vmem:[#allocation58_spill] sm:$0xff]  ;;  %v12658_v9 = vpop.xlane.xlu1 %1209 }
 0x461   :  { %v2294_v24 = vsel %vm2293_vm8, %v2064_v52, %v12439_v56  ;;  %v3416_v35 = vrot.slane %v3415_v16, 2  ;;  %v587_v25 = vmax.f32 %v16173_v26, %v16172_v23  ;;  %v2301_v30 = vsel %vm2293_vm8, %v2136_v14, %v12446_v53  ;;  %v12642_v56 = vld [vmem:[%s16174_s27 + $0x8] sm:$0xff] }
 0x462   :  { %v2171_v60 = vrot.slane %v16176_v48, %v11673_v10  ;;  %v2167_v41 = vrot.slane %v16177_v42, %v11676_v8  ;;  %v1873_v45 = vadd.f32 %v1872_v6, %v1871_v5  ;;  %16178 = vst [vmem:[#allocation78_spill] sm:$0xff] %v12642_v56  ;;  %v2243_v53 = vrot.slane %v16180_v44, %v11673_v10  ;;  %v12656_v5 = vld [vmem:[%s16179_s24 + $0x8] sm:$0xff] }
 0x463   :  { %v2239_v28 = vrot.slane %v16181_v22, %v11676_v8  ;;  %v1802_v13 = vrot.slane %v1801_v40, 1  ;;  %v3937_v17 = vrot.slane %v3936_v39, 1  ;;  %16182 = vst [vmem:[#allocation83_spill] sm:$0xff] %v12656_v5  ;;  %v4008_v33 = vadd.f32 %v4007_v12, %v4006_v18  ;;  %v12660_v14 = vpop.xlane.xlu0 %1206  ;;  %v16183_v22 = vld [vmem:[#allocation68_spill] sm:$0xff] }
 0x464   :  { %v3361_v52 = vmax.f32 %v3359_v29, %v3360_v21  ;;  %v534_v6 = vrot.slane %v533_v32, 2  ;;  %v2712_v23 = vmul.f32 %v2686_v1, %v12631_v3  ;;  %v3417_v26 = vmax.f32 %v3415_v16, %v3416_v35 }
 0x465   :  { %v588_v48 = vrot.slane %v587_v25, 4  ;;  %v2713_v42 = vmul.f32 %v2693_v38, %v12642_v56  ;;  %v2320_v44 = vmul.f32 %v2294_v24, %v12647_v0  ;;  %v12667_v54 = vsel %vm2285_vm3, %v2571_v34, %v16183_v22  ;;  %v9037_v24 = vld [vmem:[%s15552_s7 + $0x138] sm:$0xff] }
 0x466   :  { %v12671_v18 = vsel %vm2285_vm3, %v2643_v57, %v16184_v62  ;;  %v1874_v29 = vrot.slane %v1873_v45, 1  ;;  %v2321_v12 = vmul.f32 %v2301_v30, %v12656_v5  ;;  %v2172_v21 = vsel %vm2000_vm9, %v2171_v60, %v2167_v41  ;;  %v16185_v34 = vld [vmem:[#allocation252_spill] sm:$0xff] }
 0x467   :  { %v2244_v16 = vsel %vm2000_vm9, %v2243_v53, %v2239_v28  ;;  %v1803_v1 = vadd.f32 %v1802_v13, %v1801_v40  ;;  %v3938_v35 = vadd.f32 %v3937_v17, %v3936_v39  ;;  %v4009_v38 = vrot.slane %v4008_v33, 1  ;;  %v9038_v62 = vld [vmem:[%s15552_s7 + $0x338] sm:$0xff]  ;;  %v9039_v39 = vld [vmem:[%s15552_s7 + $0x130] sm:$0xff]  ;;  %v12694_v17 = vpop.permute.xlu1 %1457 }
 0x468   :  { %v1608_v22 = vmul.f32 %v9037_v24, %v16185_v34  ;;  %v3362_v11 = vrot.slane %v3361_v52, 1  ;;  %v535_v37 = vmax.f32 %v533_v32, %v534_v6  ;;  %v3743_v57 = vmul.f32 %v9038_v62, %v16185_v34  ;;  %v16187_v53 = vld [vmem:[#allocation211_spill] sm:$0xff]  ;;  %16188 = vst [vmem:[#allocation95_spill] sm:$0xff] %v12694_v17  ;;  %v12696_v6 = vpop.permute.xlu0 %1453 }
 0x469   :  { %v3418_v30 = vrot.slane %v3417_v26, 1  ;;  %v589_v60 = vmax.f32 %v587_v25, %v588_v48  ;;  %v12684_v41 = vadd.f32 %v2712_v23, %v2320_v44  ;;  %v1875_v40 = vadd.f32 %v1874_v29, %v1873_v45  ;;  %v9040_v32 = vld [vmem:[%s15552_s7 + $0x330] sm:$0xff]  ;;  %16189 = vst [vmem:[#allocation99_spill] sm:$0xff] %v12696_v6  ;;  %v16215_v6 = vld [vmem:[#allocation162_spill] sm:$0xff] }
 0x46a   :  { %v1607_v28 = vmul.f32 %v9039_v39, %v16187_v53  ;;  %v3742_v13 = vmul.f32 %v9040_v32, %v16187_v53  ;;  %v12698_v25 = vadd.f32 %v2713_v42, %v2321_v12  ;;  %v12702_v45 = vsel %vm2285_vm3, %v2172_v21, %v12450_v27  ;;  %v12719_v42 = vld [vmem:[%s15552_s7 + $0x360] sm:$0xff]  ;;  %v9042_v34 = vld [vmem:[%s15552_s7 + $0x1b0] sm:$0xff]  ;;  %v16199_v39 = vld [vmem:[#allocation44_spill] sm:$0xff] }
 0x46b   :  { %16186 = vst [vmem:[#allocation86_spill] sm:$0xff] %v12684_v41  ;;  %v12706_v23 = vsel %vm2285_vm3, %v2244_v16, %v12458_v63  ;;  %v12710_v48 = vsel %vm2283_vm2, %v1803_v1, %v12461_v51  ;;  %v12714_v44 = vsel %vm2283_vm2, %v3938_v35, %v12464_v19  ;;  %16190 = vst [vmem:[#allocation100_spill] sm:$0xff] %v12719_v42  ;;  %v1805_v27 = vsel %vm184_vm0, %v1608_v22, 0.0  ;;  %v9041_v51 = vld [vmem:[%s15552_s7 + $0x1b8] sm:$0xff]  ;;  %v16191_v16 = vld [vmem:[#allocation19_spill] sm:$0xff] }
 0x46c   :  { %v4010_v29 = vadd.f32 %v4009_v38, %v4008_v33  ;;  %v3363_v12 = vmax.f32 %v3361_v52, %v3362_v11  ;;  %v536_v21 = vrot.slane %v535_v37, 1  ;;  %v3940_v63 = vsel %vm184_vm0, %v3743_v57, 0.0  ;;  %v12733_v11 = vpop.xlane.xlu0 %3153  ;;  %v16196_v57 = vld [vmem:[#allocation46_spill] sm:$0xff]  ;;  %v16217_v41 = vld [vmem:[#allocation129_spill] sm:$0xff] }
 0x46d   :  { %v1624_v1 = vmul.f32 %v9041_v51, %v16191_v16  ;;  %v3419_v19 = vmax.f32 %v3417_v26, %v3418_v30  ;;  %v590_v35 = vrot.slane %v589_v60, 2  ;;  %v12729_v24 = vsel %vm2283_vm2, %v1875_v40, %v12477_v36  ;;  %16193 = vst [vmem:[#allocation89_spill] sm:$0xff] %v12733_v11  ;;  %v16195_v26 = vld [vmem:[#allocation215_spill] sm:$0xff]  ;;  %v16197_v36 = vld [vmem:[#allocation20_spill] sm:$0xff] }
 0x46e   :  { %16192 = vst [vmem:[#allocation103_spill] sm:$0xff] %v12729_v24  ;;  %v1804_v33 = vsel %vm184_vm0, %v1607_v28, 0.0  ;;  %v3939_v38 = vsel %vm184_vm0, %v3742_v13, 0.0  ;;  %v12737_v52 = vsel %vm184_vm0, %v12719_v42, -inf  ;;  %v1623_v22 = vmul.f32 %v9042_v34, %v16195_v26  ;;  %v16198_v40 = vld [vmem:[#allocation47_spill] sm:$0xff]  ;;  %v12750_v28 = vld [vmem:[%s15552_s7 + $0x3e0] sm:$0xff] }
 0x46f   :  { %16194 = vst [vmem:[#allocation93_spill] sm:$0xff] %v12737_v52  ;;  %v1806_v62 = vadd.f32 %v1805_v27, %v1804_v33  ;;  %v3364_v30 = vmax.f32 %v16197_v36, %v16196_v57  ;;  %v3420_v53 = vmax.f32 %v16199_v39, %v16198_v40  ;;  %16200 = vst [vmem:[#allocation104_spill] sm:$0xff] %v12750_v28  ;;  %v12760_v33 = vpop.permute.xlu1 %1541  ;;  %v1877_v34 = vsel %vm184_vm0, %v1624_v1, 0.0  ;;  %v9043_v57 = vld [vmem:[%s15552_s7 + $0x3b8] sm:$0xff]  ;;  %v12793_v40 = vld [vmem:[%s15552_s7 + $0x3e8] sm:$0xff] }
 0x470   :  { %v12754_v32 = vsel %vm2283_vm2, %v4010_v29, %v12527_v46  ;;  %v3941_v13 = vadd.f32 %v3940_v63, %v3939_v38  ;;  %v12758_v51 = vsel %vm2285_vm3, %v3363_v12, %v12531_v49  ;;  %v537_v27 = vmax.f32 %v535_v37, %v536_v21  ;;  %16202 = vst [vmem:[#allocation106_spill] sm:$0xff] %v12760_v33  ;;  %v16203_v49 = vld [vmem:[#allocation235_spill] sm:$0xff]  ;;  %v16204_v12 = vld [vmem:[#allocation237_spill] sm:$0xff] }
 0x471   :  { %16201 = vst [vmem:[#allocation105_spill] sm:$0xff] %v12754_v32  ;;  %v3759_v36 = vmul.f32 %v9043_v57, %v16191_v16  ;;  %v12769_v46 = vsel %vm2285_vm3, %v3419_v19, %v12569_v47  ;;  %v591_v29 = vmax.f32 %v589_v60, %v590_v35  ;;  %v4564_v37 = vrot.slane %v16203_v49, %v11676_v8  ;;  %v9044_v63 = vld [vmem:[%s15552_s7 + $0x3b0] sm:$0xff]  ;;  %v12787_v47 = vld [vmem:[%s15552_s7 + $0x368] sm:$0xff]  ;;  %v16211_v32 = vld [vmem:[#allocation56_spill] sm:$0xff] }
 0x472   :  { %v4636_v21 = vrot.slane %v16204_v12, %v11676_v8  ;;  %v3758_v1 = vmul.f32 %v9044_v63, %v16195_v26  ;;  %v12782_v16 = vsel %vm184_vm0, %v12750_v28, -inf  ;;  %16206 = vst [vmem:[#allocation108_spill] sm:$0xff] %v12787_v47  ;;  %v1876_v60 = vsel %vm184_vm0, %v1623_v22, 0.0  ;;  %16207 = vst [vmem:[#allocation109_spill] sm:$0xff] %v12793_v40  ;;  %v16208_v26 = vld [vmem:[#allocation90_spill] sm:$0xff]  ;;  %v12801_v63 = vpop.xlane.xlu0 %3201 }
 0x473   :  { %16205 = vst [vmem:[#allocation107_spill] sm:$0xff] %v12782_v16  ;;  %v1807_v19 = vrot.slane %v1806_v62, 4  ;;  %v3365_v35 = vrot.slane %v3364_v30, 4  ;;  %v3421_v38 = vrot.slane %v3420_v53, 4  ;;  %v4568_v39 = vrot.slane %v16208_v26, %v11673_v10  ;;  %16210 = vst [vmem:[#allocation115_spill] sm:$0xff] %v12801_v63 }
 0x474   :  { %v3942_v57 = vrot.slane %v3941_v13, 4  ;;  %v1878_v49 = vadd.f32 %v1877_v34, %v1876_v60  ;;  %v12799_v12 = vsel %vm2291_vm7, %v537_v27, %v12577_v43  ;;  %v4012_v22 = vsel %vm184_vm0, %v3759_v36, 0.0  ;;  %v16212_v34 = vld [vmem:[#allocation91_spill] sm:$0xff]  ;;  %v16213_v43 = vld [vmem:[#allocation164_spill] sm:$0xff] }
 0x475   :  { %16209 = vst [vmem:[#allocation114_spill] sm:$0xff] %v12799_v12  ;;  %v592_v11 = vrot.slane %v591_v29, 1  ;;  %v12807_v33 = vsel %vm184_vm0, %v12787_v47, -inf  ;;  %v3493_v26 = vmul.f32 %v12787_v47, %v16211_v32  ;;  %v4640_v60 = vrot.slane %v16212_v34, %v11673_v10  ;;  %v12815_v12 = vpop.permute.xlu1 %1545 }
 0x476   :  { %v4176_v27 = vrot.slane %v16213_v43, %v11673_v10  ;;  %16214 = vst [vmem:[#allocation112_spill] sm:$0xff] %v12815_v12  ;;  %v12819_v36 = vsel %vm184_vm0, %v12793_v40, -inf  ;;  %v3492_v63 = vmul.f32 %v12719_v42, %v16211_v32  ;;  %v4011_v24 = vsel %vm184_vm0, %v3758_v1, 0.0  ;;  %v16216_v12 = vld [vmem:[#allocation134_spill] sm:$0xff] }
 0x477   :  { %3165 = vmax.xlane.f32.xlu0 %v12737_v52  ;;  %v3366_v52 = vmax.f32 %v3364_v30, %v3365_v35  ;;  %v3422_v47 = vmax.f32 %v3420_v53, %v3421_v38  ;;  %v4172_v34 = vrot.slane %v16215_v6, %v11676_v8  ;;  %v3943_v17 = vadd.f32 %v3942_v57, %v3941_v13  ;;  %v16218_v30 = vld [vmem:[#allocation155_spill] sm:$0xff] }
 0x478   :  { %v1879_v56 = vrot.slane %v1878_v49, 4  ;;  %v4013_v43 = vadd.f32 %v4012_v22, %v4011_v24  ;;  %v4248_v5 = vrot.slane %v16216_v12, %v11673_v10  ;;  %v4244_v3 = vrot.slane %v16217_v41, %v11676_v8  ;;  %v12838_v24 = vpop.xlane.xlu0 %3204 }
 0x479   :  { %v3509_v53 = vmul.f32 %v12793_v40, %v16218_v30  ;;  %v4569_v6 = vsel %vm2000_vm9, %v4568_v39, %v4564_v37  ;;  %v593_v32 = vmax.f32 %v591_v29, %v592_v11  ;;  %v12836_v13 = vpop.xlane.xlu1 %3156  ;;  %16220 = vst [vmem:[#allocation192_spill] sm:$0xff] %v12838_v24  ;;  %v3644_v1 = vsel %vm184_vm0, %v3492_v63, 0.0  ;;  %v16221_v29 = vld [vmem:[#allocation186_spill] sm:$0xff]  ;;  %v16222_v63 = vld [vmem:[#allocation197_spill] sm:$0xff] }
 0x47a   :  { %16219 = vst [vmem:[#allocation113_spill] sm:$0xff] %v12836_v13  ;;  %v4641_v41 = vsel %vm2000_vm9, %v4640_v60, %v4636_v21  ;;  %v3367_v38 = vrot.slane %v3366_v52, 2  ;;  %v3423_v57 = vrot.slane %v3422_v47, 2  ;;  %v4177_v12 = vsel %vm2000_vm9, %v4176_v27, %v4172_v34 }
 0x47b   :  { %3213 = vmax.xlane.f32.xlu0 %v12782_v16  ;;  %v1808_v16 = vadd.f32 %v1807_v19, %v1806_v62  ;;  %v3647_v62 = vsel %vm184_vm0, %v3493_v26, 0.0  ;;  %v3508_v19 = vmul.f32 %v12750_v28, %v16218_v30  ;;  %v3944_v22 = vrot.slane %v3943_v17, 2 }
 0x47c   :  { %v1880_v26 = vadd.f32 %v1879_v56, %v1878_v49  ;;  %v4014_v37 = vrot.slane %v4013_v43, 4  ;;  %v4249_v11 = vsel %vm2000_vm9, %v4248_v5, %v4244_v3  ;;  %v2579_v39 = vrot.slane %v16221_v29, %v11673_v10  ;;  %v12867_v49 = vld [vmem:[%s15552_s7 + $0x378] sm:$0xff] }
 0x47d   :  { %v1809_v35 = vrot.slane %v1808_v16, 2  ;;  %v2575_v24 = vrot.slane %v16222_v63, %v11676_v8  ;;  %v3695_v21 = vsel %vm184_vm0, %v3509_v53, 0.0  ;;  %v12853_v60 = vsel %vm2289_vm5, %v4569_v6, %v12561_v58  ;;  %16224 = vst [vmem:[#allocation194_spill] sm:$0xff] %v12867_v49 }
 0x47e   :  { %v12857_v56 = vsel %vm2289_vm5, %v4641_v41, %v12565_v55  ;;  %v12861_v3 = vsel %vm2291_vm7, %v593_v32, %v12613_v7  ;;  %v3692_v5 = vsel %vm184_vm0, %v3508_v19, 0.0  ;;  %v12871_v27 = vsel %vm2289_vm5, %v4177_v12, %v12573_v20  ;;  %v12876_v55 = vld [vmem:[%s15552_s7 + $0x370] sm:$0xff]  ;;  %v12882_v32 = vpop.xlane.xlu1 %3636  ;;  %v16230_v19 = vld [vmem:[#allocation22_spill] sm:$0xff] }
 0x47f   :  { %3168 = vmax.xlane.f32.xlu1 %v12807_v33  ;;  %3216 = vmax.xlane.f32.xlu0 %v12819_v36  ;;  %16223 = vst [vmem:[#allocation193_spill] sm:$0xff] %v12861_v3  ;;  %v1810_v58 = vadd.f32 %v1809_v35, %v1808_v16  ;;  %v3368_v34 = vmax.f32 %v3366_v52, %v3367_v38  ;;  %16225 = vst [vmem:[#allocation196_spill] sm:$0xff] %v12876_v55  ;;  %v1881_v53 = vrot.slane %v1880_v26, 2  ;;  %v16228_v52 = vld [vmem:[#allocation200_spill] sm:$0xff]  ;;  %v16232_v35 = vld [vmem:[#allocation249_spill] sm:$0xff] }
 0x480   :  { %v12880_v7 = vsel %vm2289_vm5, %v4249_v11, %v12602_v61  ;;  %v3945_v30 = vadd.f32 %v3944_v22, %v3943_v17  ;;  %v4015_v6 = vadd.f32 %v4014_v37, %v4013_v43  ;;  %16226 = vst [vmem:[#allocation198_spill] sm:$0xff] %v12882_v32  ;;  %v2580_v20 = vsel %vm2000_vm9, %v2579_v39, %v2575_v24  ;;  %v16231_v17 = vld [vmem:[#allocation201_spill] sm:$0xff]  ;;  %v12908_v22 = vld [vmem:[%s15552_s7 + $0x3f8] sm:$0xff]  ;;  %v16236_v37 = vld [vmem:[#allocation251_spill] sm:$0xff] }
 0x481   :  { %v2651_v16 = vrot.slane %v16228_v52, %v11673_v10  ;;  %v12893_v61 = vsel %vm184_vm0, %v12867_v49, -inf  ;;  %v2647_v43 = vrot.slane %v16231_v17, %v11676_v8  ;;  %v2180_v38 = vrot.slane %v16232_v35, %v11673_v10  ;;  %16235 = vst [vmem:[#allocation203_spill] sm:$0xff] %v12908_v22 }
 0x482   :  { %v12903_v12 = vsel %vm184_vm0, %v12876_v55, -inf  ;;  %v2252_v11 = vrot.slane %v16236_v37, %v11673_v10  ;;  %v1811_v29 = vrot.slane %v1810_v58, 1  ;;  %v3369_v39 = vrot.slane %v3368_v34, 1  ;;  %v12934_v3 = vpop.xlane.xlu1 %3684 }
 0x483   :  { %3648 = vadd.xlane.f32.xlu1 %v3647_v62  ;;  %3645 = vadd.xlane.f32.xlu0 %v3644_v1  ;;  %v3424_v62 = vmax.f32 %v3422_v47, %v3423_v57  ;;  %v12884_v1 = vpop.xlane.xlu0 %3633  ;;  %v16229_v47 = vld [vmem:[#allocation18_spill] sm:$0xff]  ;;  %16234 = vst [vmem:[#allocation202_spill] sm:$0xff] %v12903_v12  ;;  %v4016_v17 = vrot.slane %v4015_v6, 2  ;;  %v12922_v35 = vsel %vm2287_vm4, %v2580_v20, %v12667_v54  ;;  %v12927_v37 = vsel %vm184_vm0, %v12908_v22, -inf }
 0x484   :  { %16227 = vst [vmem:[#allocation199_spill] sm:$0xff] %v12884_v1  ;;  %v538_v41 = vmax.f32 %v16230_v19, %v16229_v47  ;;  %v16233_v57 = vld [vmem:[#allocation250_spill] sm:$0xff]  ;;  %v3946_v47 = vrot.slane %v3945_v30, 1  ;;  %v1882_v19 = vadd.f32 %v1881_v53, %v1880_v26  ;;  %v16239_v1 = vld [vmem:[#allocation51_spill] sm:$0xff]  ;;  %v16240_v26 = vld [vmem:[#allocation25_spill] sm:$0xff]  ;;  %v1812_v42 = vadd.f32 %v1811_v29, %v1810_v58 }
 0x485   :  { %v2176_v24 = vrot.slane %v16233_v57, %v11676_v8  ;;  %v3425_v63 = vrot.slane %v3424_v62, 1  ;;  %v3495_v32 = vmul.f32 %v12867_v49, %v16239_v1  ;;  %v16241_v53 = vld [vmem:[#allocation27_spill] sm:$0xff]  ;;  %16242 = vst [vmem:[#allocation117_spill] sm:$0xff] %v12934_v3  ;;  %v3494_v20 = vmul.f32 %v12876_v55, %v16239_v1  ;;  %v16244_v58 = vld [vmem:[#allocation26_spill] sm:$0xff]  ;;  %v16248_v29 = vld [vmem:[#allocation149_spill] sm:$0xff] }
 0x486   :  { %v539_v57 = vrot.slane %v538_v41, 4  ;;  %v594_v13 = vmax.f32 %v16241_v53, %v16240_v26  ;;  %v3370_v49 = vmax.f32 %v3368_v34, %v3369_v39  ;;  %v1883_v26 = vrot.slane %v1882_v19, 1 }
 0x487   :  { %3696 = vadd.xlane.f32.xlu1 %v3695_v21  ;;  %3693 = vadd.xlane.f32.xlu0 %v3692_v5  ;;  %v12915_v21 = vld [vmem:[%s15552_s7 + $0x3f0] sm:$0xff]  ;;  %v16238_v5 = vld [vmem:[#allocation57_spill] sm:$0xff]  ;;  %v12936_v28 = vpop.xlane.xlu0 %3681  ;;  %v2181_v40 = vsel %vm2000_vm9, %v2180_v38, %v2176_v24  ;;  %v12946_v53 = vadd.f32 %v4016_v17, %v4015_v6  ;;  %v3653_v1 = vsel %vm184_vm0, %v3495_v32, 0.0  ;;  %v3511_v34 = vmul.f32 %v12908_v22, %v16244_v58  ;;  %v16253_v17 = vld [vmem:[#allocation42_spill] sm:$0xff] }
 0x488   :  { %16237 = vst [vmem:[#allocation116_spill] sm:$0xff] %v12915_v21  ;;  %v2248_v52 = vrot.slane %v16238_v5, %v11676_v8  ;;  %v2652_v5 = vsel %vm2000_vm9, %v2651_v16, %v2647_v43  ;;  %16243 = vst [vmem:[#allocation118_spill] sm:$0xff] %v12936_v28  ;;  %v12940_v54 = vsel %vm184_vm0, %v12915_v21, -inf  ;;  %v3947_v43 = vadd.f32 %v3946_v47, %v3945_v30  ;;  %v16252_v47 = vld [vmem:[#allocation189_spill] sm:$0xff] }
 0x489   :  { %v12951_v28 = vsel %vm2287_vm4, %v2652_v5, %v12671_v18  ;;  %v540_v3 = vmax.f32 %v538_v41, %v539_v57  ;;  %v595_v30 = vrot.slane %v594_v13, 4  ;;  %v3650_v6 = vsel %vm184_vm0, %v3494_v20, 0.0 }
 0x48a   :  { %v2253_v16 = vsel %vm2000_vm9, %v2252_v11, %v2248_v52  ;;  %v3510_v38 = vmul.f32 %v12915_v21, %v16244_v58  ;;  %v12970_v32 = vsel %vm2285_vm3, %v1812_v42, %v12710_v48  ;;  %v12974_v41 = vsel %vm2287_vm4, %v3370_v49, %v12758_v51  ;;  %v16247_v11 = vld [vmem:[#allocation154_spill] sm:$0xff]  ;;  %v12989_v42 = vpop.xlane.xlu1 %327  ;;  %v16249_v51 = vld [vmem:[#allocation41_spill] sm:$0xff]  ;;  %v16265_v21 = vld [vmem:[#allocation35_spill] sm:$0xff] }
 0x48b   :  { %3174 = vmax.xlane.f32.xlu1 %v12893_v61  ;;  %3171 = vmax.xlane.f32.xlu0 %v12903_v12  ;;  %v3426_v12 = vmax.f32 %v3424_v62, %v3425_v63  ;;  %v12959_v62 = vsel %vm2287_vm4, %v2181_v40, %v12702_v45  ;;  %v12966_v18 = vsel %vm2287_vm4, %v2253_v16, %v12706_v23  ;;  %v12991_v39 = vpop.xlane.xlu0 %324  ;;  %v541_v49 = vrot.slane %v540_v3, 2  ;;  %v16251_v63 = vld [vmem:[#allocation62_spill] sm:$0xff]  ;;  %v16254_v16 = vld [vmem:[#allocation52_spill] sm:$0xff]  ;;  %v16256_v58 = vld [vmem:[#allocation29_spill] sm:$0xff] }
 0x48c   :  { %16245 = vst [vmem:[#allocation119_spill] sm:$0xff] %v12970_v32  ;;  %v12982_v40 = vsel %vm2285_vm3, %v3947_v43, %v12714_v44  ;;  %v12984_v24 = vadd.f32 %v1883_v26, %v1882_v19  ;;  %v3371_v48 = vmax.f32 %v16248_v29, %v16247_v11  ;;  %v3701_v52 = vsel %vm184_vm0, %v3511_v34, 0.0  ;;  %v16255_v26 = vld [vmem:[#allocation21_spill] sm:$0xff]  ;;  %v16257_v34 = vld [vmem:[#allocation96_spill] sm:$0xff]  ;;  %v16264_v23 = vld [vmem:[#allocation102_spill] sm:$0xff] }
 0x48d   :  { %v12978_v45 = vsel %vm2287_vm4, %v3426_v12, %v12769_v46  ;;  %16246 = vst [vmem:[#allocation120_spill] sm:$0xff] %v12982_v40  ;;  %v4577_v46 = vrot.slane %v16249_v51, %v11673_v10  ;;  %v16250_v12 = vld [vmem:[#allocation65_spill] sm:$0xff]  ;;  %v4573_v19 = vrot.slane %v16252_v47, %v11676_v8  ;;  %v4649_v57 = vrot.slane %v16253_v17, %v11673_v10  ;;  %v9045_v17 = vld [vmem:[%s15552_s7 + $0x148] sm:$0xff] }
 0x48e   :  { %v3427_v44 = vmax.f32 %v16251_v63, %v16250_v12  ;;  %v13002_v5 = vmax.f32 %v594_v13, %v595_v30  ;;  %v3698_v20 = vsel %vm184_vm0, %v3510_v38, 0.0  ;;  %v4185_v43 = vrot.slane %v16254_v16, %v11673_v10  ;;  %v16258_v29 = vld [vmem:[#allocation9_spill] sm:$0xff]  ;;  %v16259_v13 = vld [vmem:[#allocation32_spill] sm:$0xff]  ;;  %v16261_v16 = vld [vmem:[#allocation43_spill] sm:$0xff] }
 0x48f   :  { %3222 = vmax.xlane.f32.xlu1 %v12927_v37  ;;  %3219 = vmax.xlane.f32.xlu0 %v12940_v54  ;;  %v4253_v11 = vrot.slane %v16257_v34, %v11676_v8  ;;  %v4645_v51 = vrot.slane %v16258_v29, %v11676_v8  ;;  %v2588_v30 = vrot.slane %v16259_v13, %v11673_v10  ;;  %v16260_v38 = vld [vmem:[#allocation33_spill] sm:$0xff]  ;;  %v3372_v63 = vrot.slane %v3371_v48, 4  ;;  %v9046_v13 = vld [vmem:[%s15552_s7 + $0x348] sm:$0xff] }
 0x490   :  { %v2584_v12 = vrot.slane %v16260_v38, %v11676_v8  ;;  %v4578_v47 = vsel %vm2000_vm9, %v4577_v46, %v4573_v19  ;;  %v3428_v34 = vrot.slane %v3427_v44, 4  ;;  %v9047_v46 = vld [vmem:[%s15552_s7 + $0x140] sm:$0xff]  ;;  %v2189_v55 = vrot.slane %v16265_v21, %v11673_v10 }
 0x491   :  { %v4650_v29 = vsel %vm2000_vm9, %v4649_v57, %v4645_v51  ;;  %v16262_v19 = vld [vmem:[#allocation45_spill] sm:$0xff]  ;;  %v13041_v57 = vpop.xlane.xlu0 %372  ;;  %v13054_v40 = vmax.f32 %v3371_v48, %v3372_v63  ;;  %v4809_v63 = vsel %vm2291_vm7, %v4578_v47, %v12853_v60 }
 0x492   :  { %v1609_v38 = vmul.f32 %v9047_v46, %v16262_v19  ;;  %v2656_v46 = vrot.slane %v16264_v23, %v11676_v8  ;;  %v2589_v22 = vsel %vm2000_vm9, %v2588_v30, %v2584_v12  ;;  %v13061_v32 = vmax.f32 %v3427_v44, %v3428_v34  ;;  %v16269_v12 = vld [vmem:[#allocation242_spill] sm:$0xff]  ;;  %v16270_v60 = vld [vmem:[#allocation49_spill] sm:$0xff] }
 0x493   :  { %3654 = vadd.xlane.f32.xlu1 %v3653_v1  ;;  %3651 = vadd.xlane.f32.xlu0 %v3650_v6  ;;  %v4181_v1 = vrot.slane %v16255_v26, %v11676_v8  ;;  %v4257_v6 = vrot.slane %v16256_v58, %v11673_v10  ;;  %v1610_v26 = vmul.f32 %v9045_v17, %v16261_v16 }
 0x494   :  { %v13024_v58 = vmax.f32 %v540_v3, %v541_v49  ;;  %v9048_v3 = vld [vmem:[%s15552_s7 + $0x340] sm:$0xff]  ;;  %v1813_v30 = vsel %vm184_vm0, %v1609_v38, 0.0  ;;  %v4586_v48 = vrot.slane %v16269_v12, %v11673_v10  ;;  %v13082_v38 = vsel %vm2289_vm5, %v2589_v22, %v12922_v35 }
 0x495   :  { %v3744_v49 = vmul.f32 %v9048_v3, %v16262_v19  ;;  %v4186_v51 = vsel %vm2000_vm9, %v4185_v43, %v4181_v1  ;;  %v4258_v17 = vsel %vm2000_vm9, %v4257_v6, %v4253_v11  ;;  %v16266_v19 = vld [vmem:[#allocation219_spill] sm:$0xff]  ;;  %v16268_v6 = vld [vmem:[#allocation40_spill] sm:$0xff]  ;;  %v4582_v47 = vrot.slane %v16270_v60, %v11676_v8 }
 0x496   :  { %v2185_v3 = vrot.slane %v16266_v19, %v11676_v8  ;;  %v16267_v43 = vld [vmem:[#allocation39_spill] sm:$0xff]  ;;  %v2257_v11 = vrot.slane %v16268_v6, %v11676_v8  ;;  %v13072_v19 = vsel %vm2291_vm7, %v4650_v29, %v12857_v56  ;;  %v4417_v34 = vsel %vm2291_vm7, %v4186_v51, %v12871_v27  ;;  %v1165_v56 = vpop.xlane.xlu0 %1164 }
 0x497   :  { %3702 = vadd.xlane.f32.xlu1 %v3701_v52  ;;  %3699 = vadd.xlane.f32.xlu0 %v3698_v20  ;;  %v3745_v52 = vmul.f32 %v9046_v13, %v16261_v16  ;;  %v13039_v20 = vpop.xlane.xlu1 %375  ;;  %v16263_v16 = vld [vmem:[#allocation101_spill] sm:$0xff]  ;;  %v2261_v1 = vrot.slane %v16267_v43, %v11673_v10  ;;  %v3948_v21 = vsel %vm184_vm0, %v3744_v49, 0.0  ;;  %v16271_v51 = vld [vmem:[#allocation75_spill] sm:$0xff] }
 0x498   :  { %v2660_v13 = vrot.slane %v16263_v16, %v11673_v10  ;;  %v1814_v16 = vsel %vm184_vm0, %v1610_v26, 0.0  ;;  %v2190_v29 = vsel %vm2000_vm9, %v2189_v55, %v2185_v3  ;;  %v16272_v55 = vld [vmem:[#allocation76_spill] sm:$0xff] }
 0x499   :  { %v3949_v23 = vsel %vm184_vm0, %v3745_v52, 0.0  ;;  %v4424_v52 = vsel %vm2291_vm7, %v4258_v17, %v12880_v7  ;;  %v4587_v7 = vsel %vm2000_vm9, %v4586_v48, %v4582_v47  ;;  %v4194_v17 = vrot.slane %v16271_v51, %v11673_v10  ;;  %v9050_v48 = vld [vmem:[%s15552_s7 + $0x3c0] sm:$0xff] }
 0x49a   :  { %v2661_v26 = vsel %vm2000_vm9, %v2660_v13, %v2656_v46  ;;  %v2262_v13 = vsel %vm2000_vm9, %v2261_v1, %v2257_v11  ;;  %v13088_v46 = vadd.f32 %v1814_v16, %v1813_v30  ;;  %v13090_v43 = vadd.f32 %v3949_v23, %v3948_v21  ;;  %v16273_v1 = vld [vmem:[#allocation72_spill] sm:$0xff]  ;;  %v16274_v11 = vld [vmem:[#allocation74_spill] sm:$0xff]  ;;  %v9049_v30 = vld [vmem:[%s15552_s7 + $0x1c0] sm:$0xff]  ;;  %v1213_v44 = vpop.xlane.xlu0 %1212 }
 0x49b   :  { %v1168_v49 = vpop.xlane.xlu1 %1167  ;;  %v13094_v27 = vsel %vm2289_vm5, %v2661_v26, %v12951_v28  ;;  %v4190_v3 = vrot.slane %v16272_v55, %v11676_v8  ;;  %v4266_v6 = vrot.slane %v16273_v1, %v11673_v10  ;;  %v4262_v16 = vrot.slane %v16274_v11, %v11676_v8  ;;  %v16275_v21 = vld [vmem:[#allocation111_spill] sm:$0xff]  ;;  %v16276_v47 = vld [vmem:[#allocation53_spill] sm:$0xff] }
 0x49c   :  { %v2306_v28 = vsel %vm2289_vm5, %v2190_v29, %v12959_v62  ;;  %v2313_v23 = vsel %vm2289_vm5, %v2262_v13, %v12966_v18  ;;  %v13115_v12 = vmul.f32 %v9049_v30, %v16275_v21  ;;  %v13121_v26 = vmul.f32 %v9050_v48, %v16275_v21  ;;  %v9051_v18 = vld [vmem:[%s15552_s7 + $0x1c8] sm:$0xff]  ;;  %v16278_v1 = vld [vmem:[#allocation147_spill] sm:$0xff] }
 0x49d   :  { %v1816_v60 = vrot.slane %v13088_v46, 4  ;;  %v3951_v62 = vrot.slane %v13090_v43, 4  ;;  %v1626_v29 = vmul.f32 %v9051_v18, %v16276_v47  ;;  %v16277_v13 = vld [vmem:[#allocation50_spill] sm:$0xff]  ;;  %v4810_v55 = vsel %vm2293_vm8, %v4587_v7, %v4809_v63 }
 0x49e   :  { %v4654_v51 = vrot.slane %v16277_v13, %v11676_v8  ;;  %v4658_v11 = vrot.slane %v16278_v1, %v11673_v10  ;;  %v2198_v30 = vrot.slane %v12615_v50, %v11673_v10  ;;  %v2194_v21 = vrot.slane %v12617_v15, %v11676_v8 }
 0x49f   :  { %v1216_v48 = vpop.xlane.xlu1 %1215  ;;  %v4195_v35 = vsel %vm2000_vm9, %v4194_v17, %v4190_v3  ;;  %v4267_v18 = vsel %vm2000_vm9, %v4266_v6, %v4262_v16  ;;  %v2207_v22 = vrot.slane %v1168_v49, %v11673_v10  ;;  %v2203_v13 = vrot.slane %v1165_v56, %v11676_v8 }
 0x4a0   :  { %v2597_v63 = vrot.slane %v12540_v4, %v11673_v10  ;;  %v2593_v7 = vrot.slane %v12542_v59, %v11676_v8  ;;  %v2270_v50 = vrot.slane %v12658_v9, %v11673_v10  ;;  %v2266_v15 = vrot.slane %v12660_v14, %v11676_v8 }
 0x4a1   :  { %v2606_v17 = vrot.slane %v12989_v42, %v11673_v10  ;;  %v2602_v49 = vrot.slane %v12991_v39, %v11676_v8  ;;  %v2279_v56 = vrot.slane %v1216_v48, %v11673_v10  ;;  %v2275_v3 = vrot.slane %v1213_v44, %v11676_v8 }
 0x4a2   :  { %v4418_v4 = vsel %vm2293_vm8, %v4195_v35, %v4417_v34  ;;  %v2669_v59 = vrot.slane %v12582_v31, %v11673_v10  ;;  %v2665_v9 = vrot.slane %v12584_v2, %v11676_v8  ;;  %v2199_v14 = vsel %vm2000_vm9, %v2198_v30, %v2194_v21  ;;  %v9052_v34 = vld [vmem:[%s15552_s7 + $0x3c8] sm:$0xff]  ;;  %v16280_v30 = vld [vmem:[#allocation88_spill] sm:$0xff] }
 0x4a3   :  { %v4659_v42 = vsel %vm2000_vm9, %v4658_v11, %v4654_v51  ;;  %v2678_v39 = vrot.slane %v13039_v20, %v11673_v10  ;;  %v2674_v44 = vrot.slane %v13041_v57, %v11676_v8  ;;  %v2208_v6 = vsel %vm2000_vm9, %v2207_v22, %v2203_v13  ;;  %v16279_v22 = vld [vmem:[#allocation70_spill] sm:$0xff]  ;;  %v16282_v13 = vld [vmem:[#allocation83_spill] sm:$0xff] }
 0x4a4   :  { %v3761_v31 = vmul.f32 %v9052_v34, %v16276_v47  ;;  %v4425_v2 = vsel %vm2293_vm8, %v4267_v18, %v4424_v52  ;;  %v2598_v35 = vsel %vm2000_vm9, %v2597_v63, %v2593_v7  ;;  %v2271_v16 = vsel %vm2000_vm9, %v2270_v50, %v2266_v15 }
 0x4a5   :  { %v2307_v51 = vsel %vm2291_vm7, %v2199_v14, %v2306_v28  ;;  %v2607_v20 = vsel %vm2000_vm9, %v2606_v17, %v2602_v49  ;;  %v2280_v57 = vsel %vm2000_vm9, %v2279_v56, %v2275_v3  ;;  %v4444_v1 = vmul.f32 %v4418_v4, %v12647_v0  ;;  %v13191_v28 = vld [vmem:[%s16179_s24 + $0x10] sm:$0xff] }
 0x4a6   :  { %v4817_v47 = vsel %vm2293_vm8, %v4659_v42, %v13072_v19  ;;  %v2670_v52 = vsel %vm2000_vm9, %v2669_v59, %v2665_v9  ;;  %v2308_v11 = vsel %vm2293_vm8, %v2208_v6, %v2307_v51  ;;  %v4836_v21 = vmul.f32 %v4810_v55, %v16280_v30  ;;  %v16281_v19 = vld [vmem:[#allocation86_spill] sm:$0xff]  ;;  %v9053_v51 = vld [vmem:[%s15552_s7 + $0x158] sm:$0xff] }
 0x4a7   :  { %v2699_v48 = vsel %vm2291_vm7, %v2598_v35, %v13082_v38  ;;  %v2314_v18 = vsel %vm2291_vm7, %v2271_v16, %v2313_v23  ;;  %v2679_v0 = vsel %vm2000_vm9, %v2678_v39, %v2674_v44  ;;  %v4445_v63 = vmul.f32 %v4425_v2, %v16282_v13  ;;  %v13207_v38 = vld [vmem:[%s16174_s27 + $0x10] sm:$0xff]  ;;  %v13212_v23 = vld [vmem:[%s16179_s24 + $0x18] sm:$0xff]  ;;  %s9112_s24 = smov 47  }
 0x4a8   :  { %2917 = vrot.lane.b32.xlu1 %v12698_v25, %s9101_s5  ;;  %v1817_v7 = vadd.f32 %v1816_v60, %v13088_v46  ;;  %v3952_v55 = vadd.f32 %v3951_v62, %v13090_v43  ;;  %v2700_v50 = vsel %vm2293_vm8, %v2607_v20, %v2699_v48  ;;  %v2315_v15 = vsel %vm2293_vm8, %v2280_v57, %v2314_v18  ;;  %v16283_v46 = vld [vmem:[#allocation69_spill] sm:$0xff]  ;;  %v16285_v60 = vld [vmem:[#allocation78_spill] sm:$0xff]  ;;  %v16290_v20 = vld [vmem:[#allocation95_spill] sm:$0xff] }
 0x4a9   :  { %v2706_v17 = vsel %vm2291_vm7, %v2670_v52, %v13094_v27  ;;  %v13218_v43 = vadd.f32 %v4836_v21, %v4444_v1  ;;  %v4837_v62 = vmul.f32 %v4817_v47, %v16285_v60  ;;  %v2322_v49 = vmul.f32 %v2308_v11, %v13191_v28  ;;  %v13231_v27 = vld [vmem:[%s16174_s27 + $0x18] sm:$0xff]  ;;  %v9055_v1 = vld [vmem:[%s15552_s7 + $0x150] sm:$0xff]  ;;  %v16295_v60 = vld [vmem:[#allocation93_spill] sm:$0xff]  ;;  %s13873_s27 = sld [smem:[#allocation5]] }
 0x4aa   :  { %v1886_v56 = vsel %vm184_vm0, %v1626_v29, 0.0  ;;  %v4021_v3 = vsel %vm184_vm0, %v3761_v31, 0.0  ;;  %v16286_v4 = vrot.slane %v13054_v40, 2  ;;  %v2707_v9 = vsel %vm2293_vm8, %v2679_v0, %v2706_v17  ;;  %v16291_v47 = vld [vmem:[#allocation99_spill] sm:$0xff] }
 0x4ab   :  { %16284 = vst [vmem:[#allocation121_spill] sm:$0xff] %v13218_v43  ;;  %v16287_v14 = vrot.slane %v13061_v32, 2  ;;  %v13238_v29 = vadd.f32 %v4837_v62, %v4445_v63  ;;  %v2714_v39 = vmul.f32 %v2700_v50, %v13207_v38  ;;  %v1818_v44 = vrot.slane %v1817_v7, 2  ;;  %v9056_v11 = vld [vmem:[%s15552_s7 + $0x350] sm:$0xff] }
 0x4ac   :  { %5034 = vrot.lane.b32.xlu1 %v16279_v22, %s9102_s2  ;;  %v3375_v59 = vmax.f32 %v13054_v40, %v16286_v4  ;;  %v2323_v40 = vmul.f32 %v2315_v15, %v13212_v23  ;;  %v3953_v6 = vrot.slane %v3952_v55, 2  ;;  %v1885_v34 = vsel %vm184_vm0, %v13115_v12, 0.0  ;;  %v9054_v12 = vld [vmem:[%s15552_s7 + $0x358] sm:$0xff]  ;;  %v16296_v4 = vld [vmem:[#allocation107_spill] sm:$0xff] }
 0x4ad   :  { %2915 = vrot.lane.b32.xlu0 %v16281_v19, %s9101_s5  ;;  %v3431_v42 = vmax.f32 %v13061_v32, %v16287_v14  ;;  %16288 = vst [vmem:[#allocation122_spill] sm:$0xff] %v13238_v29  ;;  %v4020_v31 = vsel %vm184_vm0, %v13121_v26, 0.0  ;;  %v1887_v2 = vadd.f32 %v1886_v56, %v1885_v34  ;;  %v13248_v35 = vadd.f32 %v2714_v39, %v2322_v49  ;;  %v1469_v49 = vpop.permute.xlu1 %1468  ;;  %v16299_v34 = vld [vmem:[#allocation105_spill] sm:$0xff] }
 0x4ae   :  { %v4022_v32 = vadd.f32 %v4021_v3, %v4020_v31  ;;  %v2715_v16 = vmul.f32 %v2707_v9, %v13231_v27  ;;  %v1612_v57 = vmul.f32 %v9053_v51, %v16290_v20  ;;  %v3747_v26 = vmul.f32 %v9054_v12, %v16290_v20  ;;  %v16300_v20 = vld [vmem:[#allocation202_spill] sm:$0xff] }
 0x4af   :  { %16289 = vst [vmem:[#allocation123_spill] sm:$0xff] %v13248_v35  ;;  %v1611_v52 = vmul.f32 %v9055_v1, %v16291_v47  ;;  %v3746_v30 = vmul.f32 %v9056_v11, %v16291_v47  ;;  %v16292_v21 = vrot.slane %v13002_v5, 2  ;;  %v3376_v18 = vrot.slane %v3375_v59, 1  ;;  %v16301_v1 = vld [vmem:[#allocation60_spill] sm:$0xff] }
 0x4b0   :  { %5036 = vrot.lane.b32.xlu1 %v16283_v46, %s9102_s2  ;;  %v3432_v0 = vrot.slane %v3431_v42, 1  ;;  %v13272_v13 = vadd.f32 %v2715_v16, %v2323_v40  ;;  %v16294_v63 = vrot.slane %v12946_v53, 1  ;;  %v1819_v15 = vadd.f32 %v1818_v44, %v1817_v7  ;;  %v16297_v40 = vld [vmem:[#allocation103_spill] sm:$0xff]  ;;  %v9057_v11 = vld [vmem:[%s15552_s7 + $0x1d8] sm:$0xff] }
 0x4b1   :  { %5051 = vrot.lane.b32.xlu0 %v13218_v43, %s9103_s30  ;;  %v598_v48 = vmax.f32 %v13002_v5, %v16292_v21  ;;  %v543_v17 = vrot.slane %v13024_v58, 1  ;;  %v3378_v62 = vmax.f32 %v16295_v60, %v12807_v33  ;;  %v3954_v56 = vadd.f32 %v3953_v6, %v3952_v55 }
 0x4b2   :  { %16293 = vst [vmem:[#allocation213_spill] sm:$0xff] %v13272_v13  ;;  %v4019_v50 = vadd.f32 %v16294_v63, %v12946_v53  ;;  %v1888_v5 = vrot.slane %v1887_v2, 4  ;;  %v4023_v3 = vrot.slane %v4022_v32, 4  ;;  %v3434_v9 = vmax.f32 %v16296_v4, %v12819_v36  ;;  %v16298_v36 = vld [vmem:[#allocation148_spill] sm:$0xff] }
 0x4b3   :  { %v1823_v14 = vsel %vm184_vm0, %v1612_v57, 0.0  ;;  %v3958_v53 = vsel %vm184_vm0, %v3747_v26, 0.0  ;;  %v1822_v7 = vsel %vm184_vm0, %v1611_v52, 0.0  ;;  %v3957_v39 = vsel %vm184_vm0, %v3746_v30, 0.0  ;;  %v16302_v30 = vld [vmem:[#allocation112_spill] sm:$0xff] }
 0x4b4   :  { %5053 = vrot.lane.b32.xlu1 %v13238_v29, %s9103_s30  ;;  %v13291_v33 = vsel %vm2285_vm3, %v12984_v24, %v16297_v40  ;;  %v599_v55 = vrot.slane %v598_v48, 1  ;;  %v3377_v44 = vmax.f32 %v3375_v59, %v3376_v18  ;;  %v3433_v6 = vmax.f32 %v3431_v42, %v3432_v0  ;;  %v1465_v42 = vpop.permute.xlu0 %1464 }
 0x4b5   :  { %2919 = vrot.lane.b32.xlu0 %v13248_v35, %s9101_s5  ;;  %v13297_v31 = vsel %vm2285_vm3, %v4019_v50, %v16299_v34  ;;  %v1820_v16 = vrot.slane %v1819_v15, 1  ;;  %v3379_v51 = vrot.slane %v3378_v62, 4  ;;  %v3385_v57 = vmax.f32 %v16300_v20, %v12893_v61  ;;  %v13310_v61 = vpop.permute.xlu1 %1552 }
 0x4b6   :  { %v1889_v12 = vadd.f32 %v1888_v5, %v1887_v2  ;;  %v13302_v24 = vmax.f32 %v13024_v58, %v543_v17  ;;  %v1824_v26 = vadd.f32 %v1823_v14, %v1822_v7  ;;  %v3959_v59 = vadd.f32 %v3958_v53, %v3957_v39  ;;  %v9059_v53 = vld [vmem:[%s15552_s7 + $0x168] sm:$0xff]  ;;  %v16304_v39 = vld [vmem:[#allocation108_spill] sm:$0xff] }
 0x4b7   :  { %v3955_v47 = vrot.slane %v3954_v56, 1  ;;  %v4024_v52 = vadd.f32 %v4023_v3, %v4022_v32  ;;  %v1628_v21 = vmul.f32 %v9057_v11, %v16302_v30  ;;  %v3435_v18 = vrot.slane %v3434_v9, 4  ;;  %v16303_v3 = vld [vmem:[#allocation106_spill] sm:$0xff] }
 0x4b8   :  { %2921 = vrot.lane.b32.xlu1 %v13272_v13, %s9101_s5  ;;  %v13312_v2 = vmax.f32 %v598_v48, %v599_v55  ;;  %v13316_v58 = vsel %vm2289_vm5, %v3377_v44, %v12974_v41  ;;  %v13320_v0 = vsel %vm2289_vm5, %v3433_v6, %v12978_v45  ;;  %v13322_v32 = vadd.f32 %v1820_v16, %v1819_v15  ;;  %v9058_v45 = vld [vmem:[%s15552_s7 + $0x1d0] sm:$0xff]  ;;  %v9060_v55 = vld [vmem:[%s15552_s7 + $0x160] sm:$0xff]  ;;  %v16305_v6 = vld [vmem:[#allocation100_spill] sm:$0xff]  ;;  %s9111_s5 = smov 31  }
 0x4b9   :  { %2872 = vrot.lane.b32.xlu0 %v16298_v36, %s9104_s29  ;;  %v3380_v63 = vmax.f32 %v3378_v62, %v3379_v51  ;;  %v3386_v50 = vrot.slane %v3385_v57, 4  ;;  %v3441_v17 = vmax.f32 %v12940_v54, %v12927_v37  ;;  %v15534_v60 = vmov 0.0|0.0  }
 0x4ba   :  { %8816 = vmatprep.subr.bf16.mxu0 %v15534_v60  ;;  %8822 = vmatprep.subr.bf16.mxu1 %v15534_v60  ;;  %v1890_v48 = vrot.slane %v1889_v12, 2  ;;  %v1825_v5 = vrot.slane %v1824_v26, 4  ;;  %v3960_v41 = vrot.slane %v3959_v59, 4  ;;  %v1627_v15 = vmul.f32 %v9058_v45, %v16303_v3 }
 0x4bb   :  { %v13334_v62 = vadd.f32 %v3955_v47, %v3954_v56  ;;  %v4025_v14 = vrot.slane %v4024_v52, 2  ;;  %v1895_v37 = vsel %vm184_vm0, %v1628_v21, 0.0  ;;  %v3436_v54 = vmax.f32 %v3434_v9, %v3435_v18  ;;  %v9061_v56 = vld [vmem:[%s15552_s7 + $0x3d8] sm:$0xff]  ;;  %v1557_v47 = vpop.permute.xlu1 %1556 }
 0x4bc   :  { %2874 = vrot.lane.b32.xlu1 %v16301_v1, %s9104_s29  ;;  %v1614_v7 = vmul.f32 %v9059_v53, %v1469_v49  ;;  %v3749_v40 = vmul.f32 %v16304_v39, %v1469_v49  ;;  %v1613_v44 = vmul.f32 %v9060_v55, %v1465_v42  ;;  %v3748_v34 = vmul.f32 %v16305_v6, %v1465_v42  ;;  %v9062_v42 = vld [vmem:[%s15552_s7 + $0x3d0] sm:$0xff] }
 0x4bd   :  { %v3763_v9 = vmul.f32 %v9061_v56, %v16302_v30  ;;  %v3381_v16 = vrot.slane %v3380_v63, 2  ;;  %v3387_v51 = vmax.f32 %v3385_v57, %v3386_v50  ;;  %v3442_v20 = vrot.slane %v3441_v17, 4 }
 0x4be   :  { %v1891_v11 = vadd.f32 %v1890_v48, %v1889_v12  ;;  %v1826_v21 = vadd.f32 %v1825_v5, %v1824_v26  ;;  %v3961_v49 = vadd.f32 %v3960_v41, %v3959_v59  ;;  %v1894_v18 = vsel %vm184_vm0, %v1627_v15, 0.0 }
 0x4bf   :  { %v13332_v4 = vpop.xlane.xlu0 %3159  ;;  %v4026_v53 = vadd.f32 %v4025_v14, %v4024_v52  ;;  %v3762_v39 = vmul.f32 %v9062_v42, %v16303_v3  ;;  %v1896_v55 = vadd.f32 %v1895_v37, %v1894_v18  ;;  %v3437_v30 = vrot.slane %v3436_v54, 2  ;;  %v9063_v3 = vld [vmem:[%s15552_s7 + $0x1e8] sm:$0xff]  ;;  %v16307_v18 = vld [vmem:[#allocation104_spill] sm:$0xff] }
 0x4c0   :  { %v1832_v57 = vsel %vm184_vm0, %v1614_v7, 0.0  ;;  %v3967_v50 = vsel %vm184_vm0, %v3749_v40, 0.0  ;;  %v1831_v12 = vsel %vm184_vm0, %v1613_v44, 0.0  ;;  %v3966_v26 = vsel %vm184_vm0, %v3748_v34, 0.0  ;;  %v16306_v7 = vld [vmem:[#allocation109_spill] sm:$0xff] }
 0x4c1   :  { %v4030_v59 = vsel %vm184_vm0, %v3763_v9, 0.0  ;;  %v3382_v48 = vmax.f32 %v3380_v63, %v3381_v16  ;;  %v3388_v52 = vrot.slane %v3387_v51, 2  ;;  %v3443_v5 = vmax.f32 %v3441_v17, %v3442_v20  ;;  %v9064_v16 = vld [vmem:[%s15552_s7 + $0x1e0] sm:$0xff] }
 0x4c2   :  { %v1827_v15 = vrot.slane %v1826_v21, 2  ;;  %v3962_v14 = vrot.slane %v3961_v49, 2  ;;  %v1630_v37 = vmul.f32 %v9063_v3, %v1557_v47  ;;  %v3765_v40 = vmul.f32 %v16306_v7, %v1557_v47 }
 0x4c3   :  { %v13350_v45 = vpop.xlane.xlu0 %3207  ;;  %v4029_v44 = vsel %vm184_vm0, %v3762_v39, 0.0  ;;  %v3438_v34 = vmax.f32 %v3436_v54, %v3437_v30  ;;  %v1833_v56 = vadd.f32 %v1832_v57, %v1831_v12  ;;  %v3968_v63 = vadd.f32 %v3967_v50, %v3966_v26 }
 0x4c4   :  { %v1897_v9 = vrot.slane %v1896_v55, 4  ;;  %v4031_v17 = vadd.f32 %v4030_v59, %v4029_v44  ;;  %v1629_v20 = vmul.f32 %v9064_v16, %v13310_v61  ;;  %v3764_v42 = vmul.f32 %v16307_v18, %v13310_v61 }
 0x4c5   :  { %v1892_v3 = vrot.slane %v1891_v11, 1  ;;  %v4027_v47 = vrot.slane %v4026_v53, 1  ;;  %v3389_v7 = vmax.f32 %v3387_v51, %v3388_v52  ;;  %v3444_v60 = vrot.slane %v3443_v5, 2 }
 0x4c6   :  { %v1828_v54 = vadd.f32 %v1827_v15, %v1826_v21  ;;  %v3963_v39 = vadd.f32 %v3962_v14, %v3961_v49  ;;  %v1904_v30 = vsel %vm184_vm0, %v1630_v37, 0.0  ;;  %v4039_v57 = vsel %vm184_vm0, %v3765_v40, 0.0  ;;  %v16308_v14 = vld [vmem:[#allocation119_spill] sm:$0xff]  ;;  %v16309_v40 = vld [vmem:[#allocation120_spill] sm:$0xff] }
 0x4c7   :  { %v13361_v41 = vpop.xlane.xlu1 %3162  ;;  %v13367_v6 = vpop.xlane.xlu0 %3210  ;;  %v3383_v12 = vrot.slane %v3382_v48, 1  ;;  %v3439_v26 = vrot.slane %v3438_v34, 1  ;;  %v1834_v59 = vrot.slane %v1833_v56, 4  ;;  %v3969_v44 = vrot.slane %v3968_v63, 4 }
 0x4c8   :  { %v1898_v16 = vadd.f32 %v1897_v9, %v1896_v55  ;;  %v4032_v61 = vrot.slane %v4031_v17, 4  ;;  %v1903_v18 = vsel %vm184_vm0, %v1629_v20, 0.0  ;;  %v4038_v51 = vsel %vm184_vm0, %v3764_v42, 0.0 }
 0x4c9   :  { %v3390_v52 = vrot.slane %v3389_v7, 1  ;;  %v3445_v35 = vmax.f32 %v3443_v5, %v3444_v60  ;;  %v1905_v21 = vadd.f32 %v1904_v30, %v1903_v18  ;;  %v4040_v49 = vadd.f32 %v4039_v57, %v4038_v51 }
 0x4ca   :  { %v2773_v37 = vsel %vm2287_vm4, %v13322_v32, %v16308_v14  ;;  %v4897_v29 = vsel %vm2287_vm4, %v13334_v62, %v16309_v40  ;;  %v1829_v55 = vrot.slane %v1828_v54, 1  ;;  %v3964_v9 = vrot.slane %v3963_v39, 1 }
 0x4cb   :  { %v13376_v13 = vpop.xlane.xlu1 %3642  ;;  %v13380_v50 = vpop.xlane.xlu0 %3639  ;;  %v13394_v20 = vadd.f32 %v1892_v3, %v1891_v11  ;;  %v13396_v42 = vadd.f32 %v4027_v47, %v4026_v53  ;;  %v1835_v60 = vadd.f32 %v1834_v59, %v1833_v56  ;;  %v3970_v5 = vadd.f32 %v3969_v44, %v3968_v63  ;;  %v9065_v11 = vld [vmem:[%s15552_s7 + $0x178] sm:$0xff]  ;;  %v16310_v3 = vld [vmem:[#allocation194_spill] sm:$0xff] }
 0x4cc   :  { %v1899_v30 = vrot.slane %v1898_v16, 2  ;;  %v4033_v57 = vadd.f32 %v4032_v61, %v4031_v17  ;;  %v3384_v18 = vmax.f32 %v3382_v48, %v3383_v12  ;;  %v13398_v51 = vmax.f32 %v3438_v34, %v3439_v26  ;;  %v9066_v48 = vld [vmem:[%s15552_s7 + $0x170] sm:$0xff] }
 0x4cd   :  { %v3391_v32 = vmax.f32 %v3389_v7, %v3390_v52  ;;  %v3446_v14 = vrot.slane %v3445_v35, 1  ;;  %v1906_v46 = vrot.slane %v1905_v21, 4  ;;  %v4041_v1 = vrot.slane %v4040_v49, 4  ;;  %v16311_v7 = vld [vmem:[#allocation196_spill] sm:$0xff] }
 0x4ce   :  { %v1830_v40 = vadd.f32 %v1829_v55, %v1828_v54  ;;  %v3965_v22 = vadd.f32 %v3964_v9, %v3963_v39  ;;  %v1836_v47 = vrot.slane %v1835_v60, 2  ;;  %v3971_v17 = vrot.slane %v3970_v5, 2 }
 0x4cf   :  { %v13384_v15 = vpop.xlane.xlu1 %3690  ;;  %v13392_v43 = vpop.xlane.xlu0 %3687  ;;  %v13408_v26 = vadd.f32 %v1899_v30, %v1898_v16  ;;  %v4034_v54 = vrot.slane %v4033_v57, 2  ;;  %v1907_v44 = vadd.f32 %v1906_v46, %v1905_v21  ;;  %v4042_v61 = vadd.f32 %v4041_v1, %v4040_v49  ;;  %v16312_v46 = vld [vmem:[#allocation116_spill] sm:$0xff] }
 0x4d0   :  { %v1837_v16 = vadd.f32 %v1836_v47, %v1835_v60  ;;  %v3972_v30 = vadd.f32 %v3971_v17, %v3970_v5  ;;  %v9068_v5 = vld [vmem:[%s15552_s7 + $0x1f8] sm:$0xff] }
 0x4d1   :  { %v4035_v21 = vadd.f32 %v4034_v54, %v4033_v57  ;;  %v16313_v57 = vld [vmem:[#allocation203_spill] sm:$0xff] }
 0x4d2   :  { %v1838_v54 = vrot.slane %v1837_v16, 1 }
 0x4d3   :  { %v1480_v62 = vpop.permute.xlu1 %1479  ;;  %v1476_v63 = vpop.permute.xlu0 %1475 }
 0x4d4   :  { %v1616_v53 = vmul.f32 %v9065_v11, %v1480_v62  ;;  %v3751_v56 = vmul.f32 %v16310_v3, %v1480_v62  ;;  %v1615_v34 = vmul.f32 %v9066_v48, %v1476_v63  ;;  %v3750_v12 = vmul.f32 %v16311_v7, %v1476_v63 }
 0x4d5   :  { %v13414_v62 = vmax.f32 %v3445_v35, %v3446_v14  ;;  %v4898_v63 = vsel %vm2289_vm5, %v3965_v22, %v4897_v29  ;;  %v1901_v35 = vrot.slane %v13408_v26, 1  ;;  %v1908_v14 = vrot.slane %v1907_v44, 2 }
 0x4d6   :  { %v1841_v39 = vsel %vm184_vm0, %v1616_v53, 0.0  ;;  %v3976_v59 = vsel %vm184_vm0, %v3751_v56, 0.0  ;;  %v1840_v52 = vsel %vm184_vm0, %v1615_v34, 0.0  ;;  %v3975_v55 = vsel %vm184_vm0, %v3750_v12, 0.0  ;;  %v9067_v53 = vld [vmem:[%s15552_s7 + $0x1f0] sm:$0xff] }
 0x4d7   :  { %v1564_v9 = vpop.permute.xlu1 %1563  ;;  %v1842_v11 = vadd.f32 %v1841_v39, %v1840_v52  ;;  %v3977_v3 = vadd.f32 %v3976_v59, %v3975_v55  ;;  %v2774_v34 = vsel %vm2289_vm5, %v1830_v40, %v2773_v37  ;;  %v4043_v7 = vrot.slane %v4042_v61, 2 }
 0x4d8   :  { %v1631_v56 = vmul.f32 %v9067_v53, %v1564_v9  ;;  %v3766_v1 = vmul.f32 %v16312_v46, %v1564_v9  ;;  %v4971_v22 = vsel %vm2291_vm7, %v3384_v18, %v13316_v58  ;;  %v3973_v39 = vrot.slane %v3972_v30, 1  ;;  %v16314_v53 = vld [vmem:[#allocation114_spill] sm:$0xff] }
 0x4d9   :  { %v1843_v49 = vrot.slane %v1842_v11, 4  ;;  %v3978_v48 = vrot.slane %v3977_v3, 4  ;;  %v1909_v46 = vadd.f32 %v1908_v14, %v1907_v44 }
 0x4da   :  { %v1912_v37 = vsel %vm184_vm0, %v1631_v56, 0.0  ;;  %v4047_v40 = vsel %vm184_vm0, %v3766_v1, 0.0  ;;  %v2848_v56 = vsel %vm2293_vm8, %v13302_v24, %v16314_v53  ;;  %v4044_v1 = vadd.f32 %v4043_v7, %v4042_v61 }
 0x4db   :  { %v1568_v12 = vpop.permute.xlu1 %1567  ;;  %v1844_v29 = vadd.f32 %v1843_v49, %v1842_v11  ;;  %v3979_v60 = vadd.f32 %v3978_v48, %v3977_v3  ;;  %v4918_v11 = vld [vmem:[%s15897_s0 + $0x10] sm:$0xff]  ;;  %v4972_v3 = vsel %vm2293_vm8, %v3391_v32, %v4971_v22  ;;  %v4978_v32 = vsel %vm2291_vm7, %v13398_v51, %v13320_v0 }
 0x4dc   :  { %v1632_v47 = vmul.f32 %v9068_v5, %v1568_v12  ;;  %v3767_v17 = vmul.f32 %v16313_v57, %v1568_v12  ;;  %v1839_v12 = vadd.f32 %v1838_v54, %v1837_v16  ;;  %v3974_v5 = vadd.f32 %v3973_v39, %v3972_v30  ;;  %v4846_v16 = vld [vmem:[%s15899_s25 + $0x10] sm:$0xff] }
 0x4dd   :  { %v1845_v59 = vrot.slane %v1844_v29, 2  ;;  %v3980_v52 = vrot.slane %v3979_v60, 2  ;;  %v2862_v22 = vmul.f32 %v4918_v11, %v2848_v56  ;;  %v1910_v24 = vrot.slane %v1909_v46, 1  ;;  %v16315_v56 = vld [vmem:[#allocation193_spill] sm:$0xff] }
 0x4de   :  { %v1913_v55 = vsel %vm184_vm0, %v1632_v47, 0.0  ;;  %v4048_v58 = vsel %vm184_vm0, %v3767_v17, 0.0  ;;  %v4036_v17 = vrot.slane %v4035_v21, 1  ;;  %v4045_v44 = vrot.slane %v4044_v1, 1 }
 0x4df   :  { %v1914_v18 = vadd.f32 %v1913_v55, %v1912_v37  ;;  %v4049_v9 = vadd.f32 %v4048_v58, %v4047_v40  ;;  %v1846_v49 = vadd.f32 %v1845_v59, %v1844_v29  ;;  %v3981_v48 = vadd.f32 %v3980_v52, %v3979_v60 }
 0x4e0   :  { %v4986_v55 = vmul.f32 %v4972_v3, %v4918_v11  ;;  %v4899_v29 = vsel %vm2291_vm7, %v3974_v5, %v4898_v63  ;;  %v2775_v60 = vsel %vm2291_vm7, %v1839_v12, %v2774_v34  ;;  %v1902_v54 = vadd.f32 %v1901_v35, %v13408_v26  ;;  %v4919_v35 = vld [vmem:[%s15897_s0 + $0x18] sm:$0xff]  ;;  %s9106_s0 = smov 17  }
 0x4e1   :  { %v1915_v47 = vrot.slane %v1914_v18, 4  ;;  %v4050_v57 = vrot.slane %v4049_v9, 4  ;;  %v1847_v37 = vrot.slane %v1846_v49, 1  ;;  %v3982_v40 = vrot.slane %v3981_v48, 1 }
 0x4e2   :  { %v4037_v39 = vadd.f32 %v4036_v17, %v4035_v21  ;;  %v1911_v11 = vadd.f32 %v1910_v24, %v1909_v46  ;;  %v4046_v3 = vadd.f32 %v4045_v44, %v4044_v1  ;;  %v4979_v53 = vsel %vm2293_vm8, %v13414_v62, %v4978_v32  ;;  %v16318_v44 = vld [vmem:[#allocation160_spill] sm:$0xff] }
 0x4e3   :  { %v1916_v58 = vadd.f32 %v1915_v47, %v1914_v18  ;;  %v4051_v36 = vadd.f32 %v4050_v57, %v4049_v9  ;;  %v1848_v61 = vadd.f32 %v1847_v37, %v1846_v49  ;;  %v3983_v14 = vadd.f32 %v3982_v40, %v3981_v48  ;;  %v4847_v49 = vld [vmem:[%s15899_s25 + $0x18] sm:$0xff]  ;;  %s9107_s25 = smov 127  }
 0x4e4   :  { %v2855_v63 = vsel %vm2293_vm8, %v13312_v2, %v16315_v56  ;;  %v2780_v46 = vsel %vm2287_vm4, %v13394_v20, %v13291_v33  ;;  %v4904_v62 = vsel %vm2287_vm4, %v13396_v42, %v13297_v31  ;;  %v4987_v12 = vmul.f32 %v4979_v53, %v4919_v35  ;;  %v16326_v53 = vld [vmem:[#allocation244_spill] sm:$0xff] }
 0x4e5   :  { %v1917_v30 = vrot.slane %v1916_v58, 2  ;;  %v4052_v7 = vrot.slane %v4051_v36, 2  ;;  %v4900_v0 = vsel %vm2293_vm8, %v3983_v14, %v4899_v29  ;;  %v2776_v51 = vsel %vm2293_vm8, %v1848_v61, %v2775_v60  ;;  %v16319_v14 = vld [vmem:[#allocation161_spill] sm:$0xff]  ;;  %v16321_v29 = vld [vmem:[#allocation142_spill] sm:$0xff] }
 0x4e6   :  { %v4914_v18 = vmul.f32 %v4900_v0, %v4846_v16  ;;  %v2790_v9 = vmul.f32 %v4846_v16, %v2776_v51  ;;  %v4905_v48 = vsel %vm2289_vm5, %v4037_v39, %v4904_v62  ;;  %v2781_v33 = vsel %vm2289_vm5, %v1902_v54, %v2780_v46  ;;  %v16322_v54 = vld [vmem:[#allocation188_spill] sm:$0xff] }
 0x4e7   :  { %v1918_v59 = vadd.f32 %v1917_v30, %v1916_v58  ;;  %v4053_v52 = vadd.f32 %v4052_v7, %v4051_v36  ;;  %v4906_v20 = vsel %vm2291_vm7, %v4046_v3, %v4905_v48  ;;  %v2782_v31 = vsel %vm2291_vm7, %v1911_v11, %v2781_v33  ;;  %v16316_v58 = vld [vmem:[#allocation238_spill] sm:$0xff]  ;;  %v16320_v30 = vld [vmem:[#allocation140_spill] sm:$0xff] }
 0x4e8   :  { %v13456_v21 = vadd.f32 %v4986_v55, %v4914_v18  ;;  %v13461_v36 = vadd.f32 %v2862_v22, %v2790_v9  ;;  %v2863_v42 = vmul.f32 %v4919_v35, %v2855_v63  ;;  %v4676_v32 = vrot.slane %v16316_v58, %v11673_v10  ;;  %v16317_v22 = vld [vmem:[#allocation239_spill] sm:$0xff]  ;;  %v16323_v0 = vld [vmem:[#allocation184_spill] sm:$0xff]  ;;  %v16325_v9 = vld [vmem:[#allocation94_spill] sm:$0xff] }
 0x4e9   :  { %v1919_v34 = vrot.slane %v1918_v59, 1  ;;  %v4054_v26 = vrot.slane %v4053_v52, 1  ;;  %v4672_v24 = vrot.slane %v16317_v22, %v11676_v8  ;;  %v4748_v61 = vrot.slane %v16318_v44, %v11673_v10  ;;  %v16327_v63 = vld [vmem:[#allocation245_spill] sm:$0xff]  ;;  %v16328_v35 = vld [vmem:[#allocation136_spill] sm:$0xff]  ;;  %v16336_v44 = vld [vmem:[#allocation98_spill] sm:$0xff] }
 0x4ea   :  { %5038 = vrot.lane.b32.xlu0 %v13456_v21, %s9102_s2  ;;  %2913 = vst.msk [vmem:[#allocation2 + $0x30] sm:$0xff] %vm184_vm0, %v13461_v36  ;;  %v4744_v16 = vrot.slane %v16319_v14, %v11676_v8  ;;  %v4284_v7 = vrot.slane %v16320_v30, %v11673_v10  ;;  %v4280_v60 = vrot.slane %v16321_v29, %v11676_v8  ;;  %v16329_v62 = vld [vmem:[#allocation132_spill] sm:$0xff]  ;;  %v16337_v14 = vld [vmem:[#allocation214_spill] sm:$0xff]  ;;  %v16339_v29 = vld [vmem:[#allocation31_spill] sm:$0xff] }
 0x4eb   :  { %v1920_v1 = vadd.f32 %v1919_v34, %v1918_v59  ;;  %v4055_v2 = vadd.f32 %v4054_v26, %v4053_v52  ;;  %v4356_v39 = vrot.slane %v16322_v54, %v11673_v10  ;;  %v4352_v51 = vrot.slane %v16323_v0, %v11676_v8  ;;  %v16324_v52 = vld [vmem:[#allocation92_spill] sm:$0xff]  ;;  %v16338_v30 = vld [vmem:[#allocation30_spill] sm:$0xff] }
 0x4ec   :  { %v4667_v18 = vrot.slane %v16324_v52, %v11673_v10  ;;  %v4663_v11 = vrot.slane %v16325_v9, %v11676_v8  ;;  %v4677_v3 = vsel %vm2000_vm9, %v4676_v32, %v4672_v24  ;;  %v4739_v56 = vrot.slane %v16326_v53, %v11673_v10  ;;  %v16331_v33 = vld [vmem:[#allocation144_spill] sm:$0xff]  ;;  %v16335_v32 = vld [vmem:[#allocation17_spill] sm:$0xff] }
 0x4ed   :  { %v4907_v5 = vsel %vm2293_vm8, %v4055_v2, %v4906_v20  ;;  %v2783_v47 = vsel %vm2293_vm8, %v1920_v1, %v2782_v31  ;;  %v4735_v34 = vrot.slane %v16327_v63, %v11676_v8  ;;  %v4749_v26 = vsel %vm2000_vm9, %v4748_v61, %v4744_v16 }
 0x4ee   :  { %v4915_v57 = vmul.f32 %v4907_v5, %v4847_v49  ;;  %v2791_v17 = vmul.f32 %v4847_v49, %v2783_v47  ;;  %2893 = vrot.lane.b32.xlu0 %v16281_v19, %s9106_s0  ;;  %v4275_v46 = vrot.slane %v16328_v35, %v11673_v10  ;;  %v4271_v1 = vrot.slane %v16329_v62, %v11676_v8  ;;  %v16330_v49 = vld [vmem:[#allocation143_spill] sm:$0xff]  ;;  %v16333_v47 = vld [vmem:[#allocation24_spill] sm:$0xff] }
 0x4ef   :  { %v4285_v2 = vsel %vm2000_vm9, %v4284_v7, %v4280_v60  ;;  %v4347_v48 = vrot.slane %v16330_v49, %v11673_v10  ;;  %v4343_v20 = vrot.slane %v16331_v33, %v11676_v8  ;;  %v4753_v22 = vrot.slane %v16335_v32, %v11676_v8  ;;  %v16340_v62 = vld [vmem:[#allocation64_spill] sm:$0xff]  ;;  %v16348_v32 = vld [vmem:[#allocation113_spill] sm:$0xff] }
 0x4f0   :  { %v13484_v37 = vadd.f32 %v4987_v12, %v4915_v57  ;;  %v13486_v40 = vadd.f32 %v2863_v42, %v2791_v17  ;;  %v4357_v12 = vsel %vm2000_vm9, %v4356_v39, %v4352_v51  ;;  %v16332_v42 = vld [vmem:[#allocation23_spill] sm:$0xff]  ;;  %v4681_v57 = vrot.slane %v16333_v47, %v11676_v8  ;;  %v16334_v17 = vld [vmem:[#allocation48_spill] sm:$0xff] }
 0x4f1   :  { %v4685_v5 = vrot.slane %v16332_v42, %v11673_v10  ;;  %v4757_v58 = vrot.slane %v16334_v17, %v11673_v10  ;;  %v4293_v61 = vrot.slane %v16336_v44, %v11673_v10  ;;  %v4289_v16 = vrot.slane %v16337_v14, %v11676_v8  ;;  %v16345_v42 = vld [vmem:[#allocation80_spill] sm:$0xff]  ;;  %v16347_v17 = vld [vmem:[#allocation87_spill] sm:$0xff] }
 0x4f2   :  { %5040 = vrot.lane.b32.xlu1 %v13484_v37, %s9102_s2  ;;  %2914 = vst.msk [vmem:[#allocation2 + $0x38] sm:$0xff] %vm184_vm0, %v13486_v40  ;;  %v4365_v7 = vrot.slane %v16338_v30, %v11673_v10  ;;  %v4361_v60 = vrot.slane %v16339_v29, %v11676_v8  ;;  %v4668_v54 = vsel %vm2000_vm9, %v4667_v18, %v4663_v11  ;;  %v16341_v18 = vld [vmem:[#allocation151_spill] sm:$0xff]  ;;  %v16349_v44 = vld [vmem:[#allocation192_spill] sm:$0xff]  ;;  %s9108_s2 = smov 33  }
 0x4f3   :  { %v4740_v39 = vsel %vm2000_vm9, %v4739_v56, %v4735_v34  ;;  %v4818_v0 = vsel %vm2281_vm1, %v4677_v3, %v4668_v54  ;;  %v4276_v52 = vsel %vm2000_vm9, %v4275_v46, %v4271_v1  ;;  %v4348_v9 = vsel %vm2000_vm9, %v4347_v48, %v4343_v20  ;;  %v16342_v1 = vld [vmem:[#allocation66_spill] sm:$0xff]  ;;  %v16343_v48 = vld [vmem:[#allocation67_spill] sm:$0xff]  ;;  %v16344_v20 = vld [vmem:[#allocation77_spill] sm:$0xff] }
 0x4f4   :  { %v4825_v51 = vsel %vm2281_vm1, %v4749_v26, %v4740_v39  ;;  %v4426_v63 = vsel %vm2281_vm1, %v4285_v2, %v4276_v52  ;;  %v4433_v35 = vsel %vm2281_vm1, %v4357_v12, %v4348_v9  ;;  %v4694_v49 = vrot.slane %v16340_v62, %v11673_v10  ;;  %v16352_v62 = vld [vmem:[#allocation89_spill] sm:$0xff] }
 0x4f5   :  { %v4690_v11 = vrot.slane %v16341_v18, %v11676_v8  ;;  %v4686_v3 = vsel %vm2000_vm9, %v4685_v5, %v4681_v57  ;;  %v4758_v34 = vsel %vm2000_vm9, %v4757_v58, %v4753_v22  ;;  %v4294_v26 = vsel %vm2000_vm9, %v4293_v61, %v4289_v16  ;;  %v16346_v5 = vld [vmem:[#allocation82_spill] sm:$0xff] }
 0x4f6   :  { %2895 = vrot.lane.b32.xlu1 %v12698_v25, %s9106_s0  ;;  %v4366_v46 = vsel %vm2000_vm9, %v4365_v7, %v4361_v60  ;;  %v4766_v2 = vrot.slane %v16342_v1, %v11673_v10  ;;  %v4762_v33 = vrot.slane %v16343_v48, %v11676_v8  ;;  %v4302_v12 = vrot.slane %v16344_v20, %v11673_v10  ;;  %v16350_v7 = vld [vmem:[#allocation198_spill] sm:$0xff]  ;;  %v16351_v60 = vld [vmem:[#allocation199_spill] sm:$0xff] }
 0x4f7   :  { %v4298_v47 = vrot.slane %v16345_v42, %v11676_v8  ;;  %v4374_v57 = vrot.slane %v16346_v5, %v11673_v10  ;;  %v4370_v58 = vrot.slane %v16347_v17, %v11676_v8  ;;  %v4703_v22 = vrot.slane %v16348_v32, %v11673_v10  ;;  %v16353_v1 = vld [vmem:[#allocation115_spill] sm:$0xff] }
 0x4f8   :  { %v4775_v61 = vrot.slane %v16349_v44, %v11673_v10  ;;  %v4819_v16 = vsel %vm2283_vm2, %v4686_v3, %v4818_v0  ;;  %v4695_v30 = vsel %vm2000_vm9, %v4694_v49, %v4690_v11  ;;  %v4311_v29 = vrot.slane %v16350_v7, %v11673_v10 }
 0x4f9   :  { %v4307_v54 = vrot.slane %v16351_v60, %v11676_v8  ;;  %v4826_v52 = vsel %vm2283_vm2, %v4758_v34, %v4825_v51  ;;  %v4427_v9 = vsel %vm2283_vm2, %v4294_v26, %v4426_v63  ;;  %v4699_v18 = vrot.slane %v16352_v62, %v11676_v8 }
 0x4fa   :  { %v4771_v0 = vrot.slane %v16353_v1, %v11676_v8  ;;  %v4434_v49 = vsel %vm2283_vm2, %v4366_v46, %v4433_v35  ;;  %v4767_v11 = vsel %vm2000_vm9, %v4766_v2, %v4762_v33  ;;  %v4303_v3 = vsel %vm2000_vm9, %v4302_v12, %v4298_v47  ;;  %v16354_v35 = vld [vmem:[#allocation117_spill] sm:$0xff]  ;;  %v16355_v2 = vld [vmem:[#allocation118_spill] sm:$0xff] }
 0x4fb   :  { %v4712_v48 = vrot.slane %v13361_v41, %v11673_v10  ;;  %v4820_v20 = vsel %vm2285_vm3, %v4695_v30, %v4819_v16  ;;  %v4375_v51 = vsel %vm2000_vm9, %v4374_v57, %v4370_v58  ;;  %v4704_v63 = vsel %vm2000_vm9, %v4703_v22, %v4699_v18 }
 0x4fc   :  { %v4776_v34 = vsel %vm2000_vm9, %v4775_v61, %v4771_v0  ;;  %v4312_v42 = vsel %vm2000_vm9, %v4311_v29, %v4307_v54  ;;  %v4383_v46 = vrot.slane %v16354_v35, %v11673_v10  ;;  %v4379_v33 = vrot.slane %v16355_v2, %v11676_v8 }
 0x4fd   :  { %v4708_v41 = vrot.slane %v13332_v4, %v11676_v8  ;;  %v4827_v47 = vsel %vm2285_vm3, %v4767_v11, %v4826_v52  ;;  %v4428_v5 = vsel %vm2285_vm3, %v4303_v3, %v4427_v9  ;;  %v4320_v57 = vrot.slane %v13376_v13, %v11673_v10 }
 0x4fe   :  { %v4316_v17 = vrot.slane %v13380_v50, %v11676_v8  ;;  %v4435_v58 = vsel %vm2285_vm3, %v4375_v51, %v4434_v49  ;;  %v4821_v32 = vsel %vm2287_vm4, %v4704_v63, %v4820_v20  ;;  %v4828_v44 = vsel %vm2287_vm4, %v4776_v34, %v4827_v47 }
 0x4ff   :  { %v4713_v22 = vsel %vm2000_vm9, %v4712_v48, %v4708_v41  ;;  %v4429_v61 = vsel %vm2287_vm4, %v4312_v42, %v4428_v5  ;;  %v4384_v50 = vsel %vm2000_vm9, %v4383_v46, %v4379_v33  ;;  %v4780_v54 = vrot.slane %v13350_v45, %v11676_v8 }
 0x500   :  { %v4822_v52 = vsel %vm2289_vm5, %v4713_v22, %v4821_v32  ;;  %v4784_v9 = vrot.slane %v13367_v6, %v11673_v10  ;;  %v4321_v62 = vsel %vm2000_vm9, %v4320_v57, %v4316_v17  ;;  %vm2945_vm1 = vcmask 121856  }
 0x501   :  { %v4430_v63 = vsel %vm2289_vm5, %v4321_v62, %v4429_v61  ;;  %v16360_v62 = vld [vmem:[#allocation121_spill] sm:$0xff]  ;;  %vm5008_vm2 = vcmask 392456   ;;  %vm2962_vm3 = vcmask 253056  }
 0x502   :  { %v4785_v48 = vsel %vm2000_vm9, %v4784_v9, %v4780_v54 }
 0x503   :  { %v4829_v2 = vsel %vm2289_vm5, %v4785_v48, %v4828_v44 }
 0x504   :  { %v13494_v55 = vpop.xlane.xlu0 %3165 }
 0x505   :  { %v4717_v7 = vrot.slane %v13494_v55, %v11676_v8  ;;  %v4392_v55 = vrot.slane %v13384_v15, %v11673_v10 }
 0x508   :  { %v13512_v59 = vpop.xlane.xlu0 %3213 }
 0x509   :  { %v4789_v45 = vrot.slane %v13512_v59, %v11676_v8  ;;  %v4436_v59 = vsel %vm2287_vm4, %v4384_v50, %v4435_v58  ;;  %vm5029_vm4 = vcmask 523656  }
 0x50c   :  { %v13534_v31 = vpop.xlane.xlu1 %3168  ;;  %v13544_v24 = vpop.xlane.xlu0 %3216 }
 0x50d   :  { %v4721_v4 = vrot.slane %v13534_v31, %v11673_v10 }
 0x50f   :  { %v4722_v18 = vsel %vm2000_vm9, %v4721_v4, %v4717_v7  ;;  %v16356_v7 = vld [vmem:[#allocation148_spill] sm:$0xff] }
 0x510   :  { %v13560_v53 = vpop.xlane.xlu1 %3648  ;;  %v13568_v56 = vpop.xlane.xlu0 %3645  ;;  %v4823_v20 = vsel %vm2291_vm7, %v4722_v18, %v4822_v52  ;;  %v16359_v52 = vld [vmem:[#allocation69_spill] sm:$0xff] }
 0x511   :  { %v4329_v29 = vrot.slane %v13560_v53, %v11673_v10  ;;  %v4325_v31 = vrot.slane %v13568_v56, %v11676_v8  ;;  %v4388_v53 = vrot.slane %v13392_v43, %v11676_v8  ;;  %v4793_v56 = vrot.slane %v13544_v24, %v11673_v10 }
 0x513   :  { %v4330_v15 = vsel %vm2000_vm9, %v4329_v29, %v4325_v31  ;;  %v4794_v34 = vsel %vm2000_vm9, %v4793_v56, %v4789_v45  ;;  %v16358_v31 = vld [vmem:[#allocation60_spill] sm:$0xff]  ;;  %v16362_v45 = vmov 0.0|0.0  }
 0x514   :  { %v13590_v14 = vpop.xlane.xlu1 %3696  ;;  %v13598_v39 = vpop.xlane.xlu0 %3693  ;;  %v4830_v5 = vsel %vm2291_vm7, %v4794_v34, %v4829_v2  ;;  %v8501_v34 = vld [vmem:[%s16366_s1 + $0x8] sm:$0xff] }
 0x515   :  { %v4401_v43 = vrot.slane %v13590_v14, %v11673_v10  ;;  %v4397_v11 = vrot.slane %v13598_v39, %v11676_v8  ;;  %v4393_v39 = vsel %vm2000_vm9, %v4392_v55, %v4388_v53 }
 0x516   :  { %v4437_v32 = vsel %vm2289_vm5, %v4393_v39, %v4436_v59  ;;  %vm5113_vm5 = vcmask 261120  }
 0x517   :  { %v4402_v33 = vsel %vm2000_vm9, %v4401_v43, %v4397_v11 }
 0x518   :  { %v3175_v26 = vpop.xlane.xlu1 %3174  ;;  %v3172_v12 = vpop.xlane.xlu0 %3171  ;;  %v4438_v4 = vsel %vm2291_vm7, %v4402_v33, %v4437_v32 }
 0x519   :  { %v4730_v16 = vrot.slane %v3175_v26, %v11673_v10  ;;  %v4726_v13 = vrot.slane %v3172_v12, %v11676_v8  ;;  %v4431_v26 = vsel %vm2291_vm7, %v4330_v15, %v4430_v63  ;;  %vm5097_vm7 = vcmask 515456  }
 0x51b   :  { %v4731_v1 = vsel %vm2000_vm9, %v4730_v16, %v4726_v13 }
 0x51c   :  { %v3223_v30 = vpop.xlane.xlu1 %3222  ;;  %v3220_v60 = vpop.xlane.xlu0 %3219  ;;  %v4824_v14 = vsel %vm2293_vm8, %v4731_v1, %v4823_v20  ;;  %v16364_v1 = vld [vmem:[#allocation213_spill] sm:$0xff] }
 0x51d   :  { %v4802_v6 = vrot.slane %v3223_v30, %v11673_v10  ;;  %v4798_v0 = vrot.slane %v3220_v60, %v11676_v8  ;;  %v4838_v58 = vmul.f32 %v4824_v14, %v13207_v38 }
 0x51f   :  { %v4803_v42 = vsel %vm2000_vm9, %v4802_v6, %v4798_v0  ;;  %v16365_v6 = vmov 0.0  }
 0x520   :  { %v3655_v49 = vpop.xlane.xlu1 %3654  ;;  %v3652_v3 = vpop.xlane.xlu0 %3651  ;;  %v4831_v22 = vsel %vm2293_vm8, %v4803_v42, %v4830_v5  ;;  %8735 = vmatprep.mubr.msk.f32.mxu0 %vm9113_vm14, %v16365_v6  ;;  %8746 = vmatprep.mubr.msk.f32.mxu1 %vm9113_vm14, %v16365_v6 }
 0x521   :  { %v4338_v24 = vrot.slane %v3655_v49, %v11673_v10  ;;  %v4334_v51 = vrot.slane %v3652_v3, %v11676_v8  ;;  %v4839_v38 = vmul.f32 %v4831_v22, %v13231_v27  ;;  %v16357_v27 = vld [vmem:[#allocation70_spill] sm:$0xff]  ;;  %v9114_v49 = vmov 0  }
 0x522   :  { %8861 = vset.pattern.permute.xlu0 %v9114_v49  ;;  %8862 = vset.pattern.permute.xlu1 %v9114_v49 }
 0x523   :  { %v4339_v35 = vsel %vm2000_vm9, %v4338_v24, %v4334_v51 }
 0x524   :  { %v3703_v46 = vpop.xlane.xlu1 %3702  ;;  %v4432_v41 = vsel %vm2293_vm8, %v4339_v35, %v4431_v26  ;;  %v3700_v47 = vpop.xlane.xlu0 %3699 }
 0x525   :  { %v4410_v12 = vrot.slane %v3703_v46, %v11673_v10  ;;  %v4406_v57 = vrot.slane %v3700_v47, %v11676_v8  ;;  %v4446_v17 = vmul.f32 %v4432_v41, %v13191_v28 }
 0x527   :  { %v4411_v44 = vsel %vm2000_vm9, %v4410_v12, %v4406_v57  ;;  %v13691_v16 = vadd.f32 %v4838_v58, %v4446_v17 }
 0x528   :  { %v2918_v61 = vpop.permute.xlu1 %2917  ;;  %v4439_v10 = vsel %vm2293_vm8, %v4411_v44, %v4438_v4  ;;  %v2916_v8 = vpop.permute.xlu0 %2915  ;;  %vm5460_vm8 = vcmask 64512  }
 0x529   :  { %2929 = vst.msk [vmem:[#allocation2 + $0x28] sm:$0xff] %vm2927_vm10, %v2918_v61  ;;  %2928 = vst.msk [vmem:[#allocation2 + $0x20] sm:$0xff] %vm2927_vm10, %v2916_v8  ;;  %5055 = vrot.lane.b32.xlu0 %v13691_v16, %s9103_s30  ;;  %v4447_v28 = vmul.f32 %v4439_v10, %v13212_v23 }
 0x52b   :  { %v13700_v30 = vadd.f32 %v4839_v38, %v4447_v28 }
 0x52c   :  { %v5035_v13 = vpop.permute.xlu1 %5034  ;;  %v5052_v50 = vpop.permute.xlu0 %5051 }
 0x52d   :  { %5047 = vst.msk [vmem:[#allocation2 + $0x20] sm:$0xff] %vm5046_vm11, %v5035_v13  ;;  %2932 = vrot.lane.b32.xlu0 %v16356_v7, %s9107_s25  ;;  %5057 = vrot.lane.b32.xlu1 %v13700_v30, %s9103_s30  ;;  %s9109_s30 = smov 15  }
 0x52e   :  { %5064 = vst.msk [vmem:[#allocation2 + $0x20] sm:$0xff] %vm5063_vm12, %v5052_v50 }
 0x530   :  { %v5037_v29 = vpop.permute.xlu1 %5036  ;;  %v2920_v23 = vpop.permute.xlu0 %2919 }
 0x531   :  { %5048 = vst.msk [vmem:[#allocation2 + $0x28] sm:$0xff] %vm5046_vm11, %v5037_v29  ;;  %4996 = vrot.lane.b32.xlu0 %v16357_v27, %s9108_s2  ;;  %2934 = vrot.lane.b32.xlu1 %v16358_v31, %s9107_s25  ;;  %v5102_v31 = vld [vmem:[%s16366_s1] sm:$0xff] }
 0x532   :  { %2930 = vst.msk [vmem:[#allocation2 + $0x30] sm:$0xff] %vm2927_vm10, %v2920_v23 }
 0x534   :  { %v5054_v60 = vpop.permute.xlu1 %5053  ;;  %v2873_v54 = vpop.permute.xlu0 %2872 }
 0x535   :  { %5065 = vst.msk [vmem:[#allocation2 + $0x28] sm:$0xff] %vm5063_vm12, %v5054_v60  ;;  %2950 = vrot.lane.b32.xlu0 %v16281_v19, %s9109_s30  ;;  %4998 = vrot.lane.b32.xlu1 %v16359_v52, %s9108_s2  ;;  %v5109_v53 = vld [vmem:[#allocation2 + $0x20] sm:$0xff]  ;;  %v16361_v19 = vld [vmem:[#allocation122_spill] sm:$0xff] }
 0x536   :  { %2885 = vst.msk [vmem:[#allocation2] sm:$0xff] %vm2884_vm13, %v2873_v54 }
 0x538   :  { %v2922_v9 = vpop.permute.xlu1 %2921 }
 0x539   :  { %2931 = vst.msk [vmem:[#allocation2 + $0x38] sm:$0xff] %vm2927_vm10, %v2922_v9  ;;  %5017 = vrot.lane.b32.xlu0 %v16360_v62, %s9110_s28  ;;  %2952 = vrot.lane.b32.xlu1 %v12698_v25, %s9109_s30  ;;  %v16363_v25 = vld [vmem:[#allocation123_spill] sm:$0xff] }
 0x53a   :  { %v8504_v9 = vld [vmem:[%s16366_s1 + $0x10] sm:$0xff]  ;;  %s8509_s1 = sld [smem:[#allocation5 + $0x2]] }
 0x53c   :  { %v2875_v55 = vpop.permute.xlu1 %2874  ;;  %v5110_v18 = vld [vmem:[#allocation2 + $0x28] sm:$0xff] }
 0x53d   :  { %2886 = vst.msk [vmem:[#allocation2 + $0x8] sm:$0xff] %vm2884_vm13, %v2875_v55  ;;  %v8817_v56 = vpack.c.bf16 %v5110_v18, %v5109_v53  ;;  %2876 = vrot.lane.b32.xlu0 %v13461_v36, %s9104_s29  ;;  %5019 = vrot.lane.b32.xlu1 %v16361_v19, %s9110_s28 }
 0x53f   :  { %8818 = vmatpush3.bf16.msra.mxu0 %v8817_v56 }
 0x540   :  { %8819 = vmatprep.subr.bf16.mxu0 %v16362_v45 }
 0x541   :  { %5068 = vrot.lane.b32.xlu0 %v16357_v27, %s9111_s5  ;;  %2878 = vrot.lane.b32.xlu1 %v13486_v40, %s9104_s29 }
 0x545   :  { %2897 = vrot.lane.b32.xlu0 %v16363_v25, %s9106_s0  ;;  %5070 = vrot.lane.b32.xlu1 %v16359_v52, %s9111_s5 }
 0x549   :  { %5085 = vrot.lane.b32.xlu0 %v16360_v62, %s9112_s24  ;;  %2899 = vrot.lane.b32.xlu1 %v16364_v1, %s9106_s0 }
 0x54d   :  { %2936 = vrot.lane.b32.xlu0 %v13461_v36, %s9107_s25  ;;  %5087 = vrot.lane.b32.xlu1 %v16361_v19, %s9112_s24 }
 0x551   :  { %5000 = vrot.lane.b32.xlu0 %v13456_v21, %s9108_s2  ;;  %2938 = vrot.lane.b32.xlu1 %v13486_v40, %s9107_s25 }
 0x555   :  { %2954 = vrot.lane.b32.xlu0 %v16363_v25, %s9109_s30  ;;  %5002 = vrot.lane.b32.xlu1 %v13484_v37, %s9108_s2 }
 0x559   :  { %5021 = vrot.lane.b32.xlu0 %v13691_v16, %s9110_s28  ;;  %2956 = vrot.lane.b32.xlu1 %v16364_v1, %s9109_s30 }
 0x55c   :  { %v5039_v36 = vpop.permute.xlu0 %5038 }
 0x55d   :  { %5049 = vst.msk [vmem:[#allocation2 + $0x30] sm:$0xff] %vm5046_vm11, %v5039_v36  ;;  %5072 = vrot.lane.b32.xlu0 %v13456_v21, %s9111_s5  ;;  %5023 = vrot.lane.b32.xlu1 %v13700_v30, %s9110_s28  ;;  %v5340_v21 = vld [vmem:[%s15311_s8] sm:$0xff] }
 0x560   :  { %v2894_v40 = vpop.permute.xlu0 %2893 }
 0x561   :  { %2906 = vst.msk [vmem:[#allocation2] sm:$0xff] %vm2905_vm15, %v2894_v40  ;;  %5089 = vrot.lane.b32.xlu0 %v13691_v16, %s9112_s24  ;;  %5074 = vrot.lane.b32.xlu1 %v13484_v37, %s9111_s5 }
 0x564   :  { %v5041_v0 = vpop.permute.xlu1 %5040 }
 0x565   :  { %5050 = vst.msk [vmem:[#allocation2 + $0x38] sm:$0xff] %vm5046_vm11, %v5041_v0  ;;  %5091 = vrot.lane.b32.xlu1 %v13700_v30, %s9112_s24  ;;  %5343 = vperm.xlu0 %8861, %v5340_v21   ;;  %s9116_s24 = smov 112  }
 0x568   :  { %v2896_v15 = vpop.permute.xlu1 %2895 }
 0x569   :  { %2907 = vst.msk [vmem:[#allocation2 + $0x8] sm:$0xff] %vm2905_vm15, %v2896_v15  ;;  %v5393_v15 = vld [vmem:[%s15313_s10] sm:$0xff] }
 0x59b   :  { %v5056_v43 = vpop.permute.xlu0 %5055 }
 0x59c   :  { %5066 = vst.msk [vmem:[#allocation2 + $0x30] sm:$0xff] %vm5063_vm12, %v5056_v43  ;;  %v13835_v43 = vld [vmem:[%s15319_s16] sm:$0xff] }
 0x59f   :  { %v5058_v37 = vpop.permute.xlu1 %5057  ;;  %v2933_v11 = vpop.permute.xlu0 %2932 }
 0x5a0   :  { %5067 = vst.msk [vmem:[#allocation2 + $0x38] sm:$0xff] %vm5063_vm12, %v5058_v37  ;;  %v13841_v37 = vld [vmem:[%s15319_s16 + $0x8] sm:$0xff] }
 0x5a1   :  { %2946 = vst.msk [vmem:[#allocation2 + $0x40] sm:$0xff] %vm2945_vm1, %v2933_v11  ;;  %v5394_v11 = vld [vmem:[%s15316_s13] sm:$0xff] }
 0x5a3   :  { %v2935_v24 = vpop.permute.xlu1 %2934  ;;  %v4997_v3 = vpop.permute.xlu0 %4996  ;;  %v5111_v20 = vld [vmem:[#allocation2 + $0x30] sm:$0xff] }
 0x5a4   :  { %2947 = vst.msk [vmem:[#allocation2 + $0x48] sm:$0xff] %vm2945_vm1, %v2935_v24  ;;  %v13849_v24 = vld [vmem:[%s15317_s14] sm:$0xff] }
 0x5a5   :  { %5009 = vst.msk [vmem:[#allocation2] sm:$0xff] %vm5008_vm2, %v4997_v3  ;;  %v5628_v3 = vsub.f32 %v5394_v11, %v13849_v24 }
 0x5a7   :  { %v4999_v59 = vpop.permute.xlu1 %4998  ;;  %v2951_v48 = vpop.permute.xlu0 %2950  ;;  %v5112_v51 = vld [vmem:[#allocation2 + $0x38] sm:$0xff] }
 0x5a8   :  { %5010 = vst.msk [vmem:[#allocation2 + $0x8] sm:$0xff] %vm5008_vm2, %v4999_v59  ;;  %v8820_v63 = vpack.c.bf16 %v5112_v51, %v5111_v20 }
 0x5a9   :  { %2963 = vst.msk [vmem:[#allocation2 + $0x40] sm:$0xff] %vm2962_vm3, %v2951_v48 }
 0x5aa   :  { %8821 = vmatpush3.bf16.msra.mxu0 %v8820_v63  ;;  %v5392_v63 = vld [vmem:[%s15312_s9] sm:$0xff]  ;;  %s13871_s9 = sld [smem:[#allocation5 + $0x1]] }
 0x5ab   :  { %v2953_v14 = vpop.permute.xlu1 %2952  ;;  %v5018_v39 = vpop.permute.xlu0 %5017  ;;  %8828 = vmatprep.subr.bf16.mxu0 %v16362_v45 }
 0x5ac   :  { %2964 = vst.msk [vmem:[#allocation2 + $0x48] sm:$0xff] %vm2962_vm3, %v2953_v14 }
 0x5ad   :  { %5030 = vst.msk [vmem:[#allocation2] sm:$0xff] %vm5029_vm4, %v5018_v39  ;;  %8736 = vmatmul.mubr.msk.f32.vlgmr.msra.gmra.mrb[0].mxu0 %vm5113_vm5, %v8501_v34  ;;  %v13861_v34 = vld [vmem:[%s15318_s15] sm:$0xff] }
 0x5ae   :  { %8757 = vmatprep.mubr.msk.f32.mxu0 %vm9113_vm14, %v16365_v6 }
 0x5af   :  { %v5020_v26 = vpop.permute.xlu1 %5019  ;;  %v2877_v42 = vpop.permute.xlu0 %2876 }
 0x5b0   :  { %5031 = vst.msk [vmem:[#allocation2 + $0x8] sm:$0xff] %vm5029_vm4, %v5020_v26 }
 0x5b1   :  { %2887 = vst.msk [vmem:[#allocation2 + $0x10] sm:$0xff] %vm2884_vm13, %v2877_v42 }
 0x5b3   :  { %v2879_v35 = vpop.permute.xlu1 %2878  ;;  %v5069_v46 = vpop.permute.xlu0 %5068 }
 0x5b4   :  { %2888 = vst.msk [vmem:[#allocation2 + $0x18] sm:$0xff] %vm2884_vm13, %v2879_v35  ;;  %v5103_v41 = vld [vmem:[#allocation2] sm:$0xff] }
 0x5b5   :  { %5081 = vst.msk [vmem:[#allocation2 + $0x40] sm:$0xff] %vm5080_vm6, %v5069_v46 }
 0x5b7   :  { %v5071_v2 = vpop.permute.xlu1 %5070  ;;  %v2898_v33 = vpop.permute.xlu0 %2897  ;;  %v5104_v12 = vld [vmem:[#allocation2 + $0x8] sm:$0xff] }
 0x5b8   :  { %5082 = vst.msk [vmem:[#allocation2 + $0x48] sm:$0xff] %vm5080_vm6, %v5071_v2  ;;  %v8823_v47 = vpack.c.bf16 %v5104_v12, %v5103_v41 }
 0x5b9   :  { %2908 = vst.msk [vmem:[#allocation2 + $0x10] sm:$0xff] %vm2905_vm15, %v2898_v33 }
 0x5ba   :  { %8824 = vmatpush3.bf16.msra.mxu1 %v8823_v47 }
 0x5bb   :  { %v2900_v5 = vpop.permute.xlu1 %2899  ;;  %v5086_v57 = vpop.permute.xlu0 %5085  ;;  %8825 = vmatprep.subr.bf16.mxu1 %v16362_v45 }
 0x5bc   :  { %2909 = vst.msk [vmem:[#allocation2 + $0x18] sm:$0xff] %vm2905_vm15, %v2900_v5 }
 0x5bd   :  { %5098 = vst.msk [vmem:[#allocation2 + $0x40] sm:$0xff] %vm5097_vm7, %v5086_v57 }
 0x5bf   :  { %v5088_v17 = vpop.permute.xlu1 %5087  ;;  %v2937_v58 = vpop.permute.xlu0 %2936 }
 0x5c0   :  { %5099 = vst.msk [vmem:[#allocation2 + $0x48] sm:$0xff] %vm5097_vm7, %v5088_v17 }
 0x5c1   :  { %2948 = vst.msk [vmem:[#allocation2 + $0x50] sm:$0xff] %vm2945_vm1, %v2937_v58 }
 0x5c3   :  { %v2939_v32 = vpop.permute.xlu1 %2938  ;;  %v5001_v22 = vpop.permute.xlu0 %5000 }
 0x5c4   :  { %2949 = vst.msk [vmem:[#allocation2 + $0x58] sm:$0xff] %vm2945_vm1, %v2939_v32  ;;  %v5262_v61 = vld [vmem:[#allocation2 + $0x40] sm:$0xff] }
 0x5c5   :  { %5011 = vst.msk [vmem:[#allocation2 + $0x10] sm:$0xff] %vm5008_vm2, %v5001_v22 }
 0x5c7   :  { %v5003_v4 = vpop.permute.xlu1 %5002  ;;  %v2955_v44 = vpop.permute.xlu0 %2954  ;;  %v5263_v16 = vld [vmem:[#allocation2 + $0x48] sm:$0xff] }
 0x5c8   :  { %5012 = vst.msk [vmem:[#allocation2 + $0x18] sm:$0xff] %vm5008_vm2, %v5003_v4  ;;  %v8829_v10 = vpack.c.bf16 %v5263_v16, %v5262_v61 }
 0x5c9   :  { %2965 = vst.msk [vmem:[#allocation2 + $0x50] sm:$0xff] %vm2962_vm3, %v2955_v44 }
 0x5ca   :  { %8830 = vmatpush3.bf16.msra.mxu0 %v8829_v10 }
 0x5cb   :  { %v2957_v8 = vpop.permute.xlu1 %2956  ;;  %v5022_v28 = vpop.permute.xlu0 %5021  ;;  %8831 = vmatprep.subr.bf16.mxu0 %v16362_v45 }
 0x5cc   :  { %2966 = vst.msk [vmem:[#allocation2 + $0x58] sm:$0xff] %vm2962_vm3, %v2957_v8 }
 0x5cd   :  { %5032 = vst.msk [vmem:[#allocation2 + $0x10] sm:$0xff] %vm5029_vm4, %v5022_v28 }
 0x5cf   :  { %v5024_v38 = vpop.permute.xlu1 %5023  ;;  %v5073_v13 = vpop.permute.xlu0 %5072 }
 0x5d0   :  { %5033 = vst.msk [vmem:[#allocation2 + $0x18] sm:$0xff] %vm5029_vm4, %v5024_v38 }
 0x5d1   :  { %5083 = vst.msk [vmem:[#allocation2 + $0x50] sm:$0xff] %vm5080_vm6, %v5073_v13 }
 0x5d3   :  { %v5075_v30 = vpop.permute.xlu1 %5074  ;;  %v5090_v50 = vpop.permute.xlu0 %5089 }
 0x5d4   :  { %5084 = vst.msk [vmem:[#allocation2 + $0x58] sm:$0xff] %vm5080_vm6, %v5075_v30  ;;  %v5105_v29 = vld [vmem:[#allocation2 + $0x10] sm:$0xff] }
 0x5d5   :  { %5100 = vst.msk [vmem:[#allocation2 + $0x50] sm:$0xff] %vm5097_vm7, %v5090_v50 }
 0x5d7   :  { %v5092_v7 = vpop.permute.xlu1 %5091  ;;  %v5106_v23 = vld [vmem:[#allocation2 + $0x18] sm:$0xff] }
 0x5d8   :  { %5101 = vst.msk [vmem:[#allocation2 + $0x58] sm:$0xff] %vm5097_vm7, %v5092_v7  ;;  %v8826_v27 = vpack.c.bf16 %v5106_v23, %v5105_v29 }
 0x5da   :  { %8827 = vmatpush3.bf16.msra.mxu1 %v8826_v27 }
 0x5dc   :  { %v5264_v60 = vld [vmem:[#allocation2 + $0x50] sm:$0xff] }
 0x5dd   :  { %8747 = vmatmul.mubr.msk.f32.vlgmr.msra.gmra.mrb[0].mxu1 %vm5113_vm5, %v5102_v31 }
 0x5de   :  { %8762 = vmatprep.mubr.msk.f32.mxu1 %vm5460_vm8, %v13861_v34 }
 0x5df   :  { %v5265_v54 = vld [vmem:[#allocation2 + $0x58] sm:$0xff] }
 0x5e0   :  { %v8832_v52 = vpack.c.bf16 %v5265_v54, %v5264_v60  ;;  %v5423_v60 = vstv %s13871_s9 }
 0x5e2   :  { %8833 = vmatpush3.bf16.msra.mxu0 %v8832_v52 }
 0x5e4   :  { %v5344_v25 = vpop.permute.xlu0 %5343 }
 0x5e5   :  { %8758 = vmatmul.mubr.msk.f32.vlgmr.msra.gmra.mrb[2].mxu0 %vm5113_vm5, %v8504_v9 }
 0x680   :  { %v5183_v62 = vpop.f32.mrb[0].mxu0 }
 0x681   :  { %v8737_v55 = vpop.f32.mrb[1].mxu0 }
 0x6b0   :  { %v5256_v53 = vpop.f32.mrb[0].mxu1 }
 0x6b1   :  { %v5257_v18 = vadd.f32 %v5256_v53, %v5183_v62  ;;  %v8748_v56 = vpop.f32.mrb[1].mxu1  ;;  %v5421_v62 = vstv %s13873_s27 }
 0x6b8   :  { %v5335_v19 = vpop.f32.mrb[2].mxu0 }
 0x6b9   :  { %v5339_v1 = vadd.f32 %v5335_v19, %v5257_v18  ;;  %v8759_v36 = vpop.f32.mrb[3].mxu0 }
 0x6bb   :  { %v13819_v40 = vadd.f32 %v5344_v25, %v5339_v1 }
 0x6bd   :  { %5360 = vrot.lane.b32.xlu1 %v13819_v40, %s9115_s12  ;;  %v5347_v0 = vsel %vm5113_vm5, %v13819_v40, 0.0  ;;  %v5352_v21 = vmul.f32 %v13819_v40, %v13819_v40 }
 0x6be   :  { %5348 = vadd.xlane.f32.xlu0 %v5347_v0 }
 0x6bf   :  { %v5353_v49 = vsel %vm5113_vm5, %v5352_v21, 0.0 }
 0x6c1   :  { %5368 = vrot.lane.b32.xlu1 %v5352_v21, %s9115_s12  ;;  %v5426_v21 = vstv %s8509_s1 }
 0x6e5   :  { %5354 = vadd.xlane.f32.xlu1 %v5353_v49 }
 0x6f6   :  { %5442 = vperm.xlu1 %8862, %v5393_v15  }
 0x6fa   :  { %5452 = vperm.xlu1 %8862, %v13835_v43  }
 0x6fe   :  { %5457 = vperm.xlu1 %8862, %v13841_v37  }
 0x702   :  { %5631 = vperm.xlu1 %8862, %v5628_v3  }
 0x72f   :  { %v5361_v59 = vpop.permute.xlu1 %5360 }
 0x730   :  { %v5363_v48 = vsel %vm5113_vm5, %v5361_v59, 0.0  ;;  %v5413_v59 = vstv %s13876_s26 }
 0x731   :  { %5364 = vadd.xlane.f32.xlu0 %v5363_v48  ;;  %v5415_v48 = vstv %s13878_s6 }
 0x733   :  { %v5369_v20 = vpop.permute.xlu1 %5368 }
 0x734   :  { %v5371_v51 = vsel %vm5113_vm5, %v5369_v20, 0.0  ;;  %v5418_v20 = vstv %s8507_s4 }
 0x735   :  { %5372 = vadd.xlane.f32.xlu0 %v5371_v51 }
 0x74b   :  { %5436 = vperm.xlu0 %8861, %v5392_v63   ;;  %v5349_v14 = vpop.xlane.xlu0 %5348 }
 0x74c   :  { %v13865_v26 = vmul.f32 0.03125, %v5349_v14 }
 0x74e   :  { %v5357_v35 = vmul.f32 %v13865_v26, %v13865_v26  ;;  %v5396_v33 = vrot.slane %v13865_v26, 4 }
 0x750   :  { %v5397_v12 = vadd.f32 %v5396_v33, %v13865_v26 }
 0x752   :  { %v5398_v5 = vrot.slane %v5397_v12, 2 }
 0x754   :  { %v5399_v17 = vadd.f32 %v5398_v5, %v5397_v12 }
 0x756   :  { %v5400_v32 = vrot.slane %v5399_v17, 1 }
 0x758   :  { %v5401_v4 = vadd.f32 %v5400_v32, %v5399_v17  ;;  %v5414_v32 = vmul.f32 %v5413_v59, %v13865_v26 }
 0x75a   :  { %v5403_v10 = vmul.f32 0.125, %v5401_v4 }
 0x75c   :  { %v5411_v29 = vmul.f32 %v5403_v10, %v5403_v10  ;;  %v5416_v17 = vmul.f32 %v5415_v48, %v5403_v10 }
 0x772   :  { %v5355_v39 = vpop.xlane.xlu1 %5354 }
 0x773   :  { %v5356_v42 = vmul.f32 0.03125, %v5355_v39 }
 0x775   :  { %v5358_v46 = vsub.f32 %v5356_v42, %v5357_v35 }
 0x776   :  { %v5443_v10 = vpop.permute.xlu1 %5442 }
 0x777   :  { %v5377_v2 = vadd.f32 %v5358_v46, %v5357_v35  ;;  %v5422_v0 = vmul.f32 %v5421_v62, %v5358_v46 }
 0x779   :  { %v5404_v41 = vrot.slane %v5377_v2, 4 }
 0x77b   :  { %v5405_v47 = vadd.f32 %v5404_v41, %v5377_v2 }
 0x77d   :  { %v5406_v57 = vrot.slane %v5405_v47, 2 }
 0x77f   :  { %v5407_v58 = vadd.f32 %v5406_v57, %v5405_v47 }
 0x781   :  { %v5408_v22 = vrot.slane %v5407_v58, 1 }
 0x783   :  { %v5409_v44 = vadd.f32 %v5408_v22, %v5407_v58 }
 0x785   :  { %v5410_v28 = vmul.f32 0.125, %v5409_v44  ;;  %v5417_v44 = vadd.f32 %v5416_v17, %v5414_v32 }
 0x787   :  { %v5412_v31 = vsub.f32 %v5410_v28, %v5411_v29 }
 0x789   :  { %v5424_v56 = vmul.f32 %v5423_v60, %v5412_v31 }
 0x78b   :  { %v5425_v3 = vadd.f32 %v5424_v56, %v5422_v0  ;;  %v13900_v56 = vld [vmem:[%s15320_s17] sm:$0xff] }
 0x7be   :  { %v5365_v61 = vpop.xlane.xlu0 %5364 }
 0x7bf   :  { %v5366_v16 = vmul.f32 0.03125, %v5365_v61 }
 0x7c1   :  { %v6925_v8 = vrot.slane %v5366_v16, 4  ;;  %v5379_v13 = vadd.f32 %v5366_v16, %v13865_v26  ;;  %v5375_v50 = vmul.f32 %v5366_v16, %v5366_v16  ;;  %v6941_v14 = vmul.f32 %v5413_v59, %v5366_v16  ;;  %v13889_v26 = vld [vmem:[%s15318_s15 + $0x8] sm:$0xff] }
 0x7c2   :  { %v5373_v38 = vpop.xlane.xlu0 %5372 }
 0x7c3   :  { %v6926_v30 = vadd.f32 %v6925_v8, %v5366_v16  ;;  %v5374_v7 = vmul.f32 0.03125, %v5373_v38  ;;  %v5381_v54 = vmul.f32 0.5, %v5379_v13 }
 0x7c5   :  { %v6927_v23 = vrot.slane %v6926_v30, 2  ;;  %v5376_v27 = vsub.f32 %v5374_v7, %v5375_v50  ;;  %v5384_v19 = vmul.f32 %v5381_v54, %v5381_v54 }
 0x7c7   :  { %v6928_v52 = vadd.f32 %v6927_v23, %v6926_v30  ;;  %v5378_v9 = vadd.f32 %v5376_v27, %v5375_v50  ;;  %v6945_v22 = vmul.f32 %v5421_v62, %v5376_v27 }
 0x7c9   :  { %v6929_v55 = vrot.slane %v6928_v52, 1  ;;  %v5382_v53 = vadd.f32 %v5378_v9, %v5377_v2  ;;  %v6932_v18 = vrot.slane %v5378_v9, 4  ;;  %v5419_v2 = vmul.f32 %v5418_v20, %v5381_v54  ;;  %v5453_v54 = vpop.permute.xlu1 %5452  ;;  %v5655_v20 = vld [vmem:[%s15324_s21] sm:$0xff] }
 0x7ca   :  { %v5437_v7 = vpop.permute.xlu0 %5436  ;;  %8774 = vmatprep.mubr.msk.f32.mxu0 %vm5460_vm8, %v5655_v20 }
 0x7cb   :  { %v6930_v25 = vadd.f32 %v6929_v55, %v6928_v52  ;;  %v5383_v1 = vmul.f32 0.5, %v5382_v53  ;;  %v6933_v36 = vadd.f32 %v6932_v18, %v5378_v9  ;;  %v5420_v16 = vadd.f32 %v5419_v2, %v5417_v44 }
 0x7cd   :  { %v6931_v49 = vmul.f32 0.125, %v6930_v25  ;;  %v5385_v15 = vsub.f32 %v5383_v1, %v5384_v19  ;;  %v6934_v11 = vrot.slane %v6933_v36, 2  ;;  %v5430_v38 = vsub.f32 %v13819_v40, %v5420_v16  ;;  %v5458_v52 = vpop.permute.xlu1 %5457  ;;  %v13908_v1 = vld [vmem:[%s15321_s18] sm:$0xff] }
 0x7cf   :  { %v5427_v51 = vmul.f32 %v5426_v21, %v5385_v15  ;;  %v6935_v63 = vadd.f32 %v6934_v11, %v6933_v36  ;;  %v6942_v39 = vmul.f32 %v6931_v49, %v5415_v48  ;;  %v6939_v46 = vmul.f32 %v6931_v49, %v6931_v49 }
 0x7d1   :  { %v5428_v42 = vadd.f32 %v5427_v51, %v5425_v3  ;;  %v6936_v35 = vrot.slane %v6935_v63, 1  ;;  %v6943_v33 = vadd.f32 %v6942_v39, %v6941_v14 }
 0x7d3   :  { %v5429_v41 = vmax.f32 %v5428_v42, 0.0  ;;  %v6937_v12 = vadd.f32 %v6936_v35, %v6935_v63  ;;  %v6944_v47 = vadd.f32 %v6943_v33, %v5419_v2 }
 0x7d5   :  { %v5431_v5 = vadd.f32 1e-05, %v5429_v41  ;;  %v6938_v57 = vmul.f32 0.125, %v6937_v12  ;;  %v6950_v27 = vsub.f32 %v13819_v40, %v6944_v47  ;;  %v13931_v12 = vld [vmem:[%s15324_s21 + $0x8] sm:$0xff]  ;;  %v13936_v47 = vld [vmem:[%s15324_s21 + $0x10] sm:$0xff] }
 0x7d7   :  { %8867 = vrsqrt.f32 %v5431_v5  ;;  %v6940_v58 = vsub.f32 %v6938_v57, %v6939_v46  ;;  %v13945_v5 = vld [vmem:[%s15324_s21 + $0x18] sm:$0xff]  ;;  %v5804_v57 = vld [vmem:[%s15322_s19] sm:$0xff] }
 0x7d9   :  { %v6946_v4 = vmul.f32 %v6940_v58, %v5423_v60 }
 0x7db   :  { %v6947_v61 = vadd.f32 %v6946_v4, %v6945_v22  ;;  %v13961_v22 = vld [vmem:[%s15322_s19 + $0x8] sm:$0xff]  ;;  %v13976_v4 = vld [vmem:[%s15322_s19 + $0x18] sm:$0xff] }
 0x7dd   :  { %v6948_v8 = vadd.f32 %v6947_v61, %v5427_v51  ;;  %v13922_v51 = vpop.permute.xlu1 %5631 }
 0x7df   :  { %v6949_v28 = vmax.f32 %v6948_v8, 0.0 }
 0x7e1   :  { %v8868_v13 = vpop.eup %8867  ;;  %v6951_v30 = vadd.f32 1e-05, %v6949_v28 }
 0x7e2   :  { %v5433_v50 = vmul.f32 %v8868_v13, %v5430_v38 }
 0x7e3   :  { %8869 = vrsqrt.f32 %v6951_v30 }
 0x7e4   :  { %v5439_v29 = vmul.f32 %v5437_v7, %v5433_v50 }
 0x7e6   :  { %v5445_v23 = vadd.f32 %v5443_v10, %v5439_v29 }
 0x7e8   :  { %8760 = vmatprep.subr.mxu1 %v5445_v23  ;;  %v5634_v63 = vmul.f32 %v13922_v51, %v5445_v23 }
 0x7e9   :  { %8761 = vmatpush3.msra.mxu1 %v5445_v23 }
 0x7ea   :  { %8763 = vmatmul.mubr.msk.f32.vlgmr.msra.gmra.mrb[2].mxu1 %vm5460_vm8, %v13889_v26  ;;  %8834 = vmatprep.subr.bf16.mxu1 %v16362_v45 }
 0x7eb   :  { %8769 = vmatprep.mubr.msk.f32.mxu1 %vm9113_vm14, %v16365_v6 }
 0x7ed   :  { %v8870_v31 = vpop.eup %8869 }
 0x7ee   :  { %v6953_v60 = vmul.f32 %v8870_v31, %v6950_v27 }
 0x7f0   :  { %v6954_v59 = vmul.f32 %v6953_v60, %v5437_v7 }
 0x7f2   :  { %v13912_v48 = vadd.f32 %v6954_v59, %v5443_v10 }
 0x8bd   :  { %v8764_v9 = vpop.f32.mrb[2].mxu1 }
 0x8be   :  { %v5539_v62 = vadd.f32 %v8764_v9, %v5458_v52  ;;  %v5533_v55 = vpop.f32.mrb[3].mxu1 }
 0x8bf   :  { %v5534_v53 = vadd.f32 %v5533_v55, %v5453_v54  ;;  %v5808_v55 = vld [vmem:[%s15323_s20] sm:$0xff] }
 0x8c1   :  { %v8835_v18 = vpack.c.bf16 %v5539_v62, %v5534_v53  ;;  %v5809_v53 = vld [vmem:[%s15323_s20 + $0x8] sm:$0xff] }
 0x8c3   :  { %8836 = vmatpush3.bf16.msra.mxu1 %v8835_v18  ;;  %v5810_v18 = vld [vmem:[%s15323_s20 + $0x10] sm:$0xff] }
 0x8c6   :  { %8770 = vmatmul.mubr.msk.f32.vlgmr.msra.gmra.mrb[4].mxu1 %vm184_vm0, %v13900_v56 }
 0x8c7   :  { %8782 = vmatprep.mubr.msk.f32.mxu1 %vm5460_vm8, %v5804_v57 }
 0x999   :  { %v5612_v19 = vpop.f32.mrb[4].mxu1 }
 0x99a   :  { %v5616_v40 = vsel %vm5113_vm5, %v5612_v19, 0.0  ;;  %v8771_v25 = vpop.f32.mrb[5].mxu1  ;;  %v5659_v19 = vld [vmem:[%s15325_s22] sm:$0xff] }
 0x99b   :  { %5617 = vadd.xlane.f32.xlu0 %v5616_v40  ;;  %v5661_v40 = vld [vmem:[%s15325_s22 + $0x10] sm:$0xff]  ;;  %v7141_v25 = vmul.f32 %v13912_v48, %v13922_v51 }
 0xa28   :  { %v5618_v36 = vpop.xlane.xlu0 %5617 }
 0xa29   :  { %v5619_v0 = vmul.f32 0.03125, %v5618_v36 }
 0xa2b   :  { %v5621_v21 = vadd.f32 %v13908_v1, %v5619_v0 }
 0xa2d   :  { %v8513_v49 = vmul.f32 -1.442695, %v5621_v21 }
 0xa2f   :  { %8871 = vpow2.f32 %v8513_v49 }
 0xa39   :  { %v8872_v15 = vpop.eup %8871 }
 0xa3a   :  { %v5625_v11 = vadd.f32 1.0, %v8872_v15 }
 0xa3c   :  { %8873 = vrcp.f32 %v5625_v11 }
 0xa46   :  { %v8874_v3 = vpop.eup %8873 }
 0xa47   :  { %5637 = vperm.xlu1 %8862, %v8874_v3  }
 0xa4b   :  { %5650 = vperm.xlu1 %8862, %v13849_v24  }
 0xa4f   :  { %6971 = vrot.lane.b32.xlu1 %v13912_v48, %s9115_s12 }
 0xa53   :  { %6962 = vperm.xlu1 %8862, %v13835_v43  }
 0xa57   :  { %6967 = vperm.xlu1 %8862, %v13841_v37  }
 0xac6   :  { %v5638_v24 = vpop.permute.xlu1 %5637 }
 0xac7   :  { %v5640_v14 = vmul.f32 %v5638_v24, %v5634_v63 }
 0xac9   :  { %v8514_v39 = vmul.f32 -1.442695, %v5640_v14 }
 0xaca   :  { %v13925_v43 = vpop.permute.xlu1 %5650 }
 0xacb   :  { %8875 = vpow2.f32 %v8514_v39  ;;  %v5653_v33 = vmul.f32 %v13925_v43, %v5445_v23  ;;  %v7155_v24 = vmul.f32 %v13912_v48, %v13925_v43  ;;  %v5660_v48 = vld [vmem:[%s15325_s22 + $0x8] sm:$0xff] }
 0xacc   :  { %v16368_v43 = vld [vmem:[#allocation14_spill] sm:$0xff] }
 0xace   :  { %v6972_v46 = vpop.permute.xlu1 %6971 }
 0xad2   :  { %v6963_v17 = vpop.permute.xlu1 %6962 }
 0xad5   :  { %v8876_v42 = vpop.eup %8875 }
 0xad6   :  { %v5644_v35 = vadd.f32 1.0, %v8876_v42  ;;  %v6968_v58 = vpop.permute.xlu1 %6967 }
 0xad8   :  { %8877 = vrcp.f32 %v5644_v35 }
 0xae2   :  { %v8878_v37 = vpop.eup %8877 }
 0xae3   :  { %v5647_v2 = vmul.f32 %v8878_v37, %v5634_v63 }
 0xae5   :  { %v5654_v41 = vadd.f32 %v5653_v33, %v5647_v2  ;;  %v16367_v2 = vld [vmem:[#allocation11_spill] sm:$0xff] }
 0xae7   :  { %5833 = vrot.lane.b32.xlu1 %v5654_v41, %s9116_s24  ;;  %8772 = vmatprep.subr.mxu0 %v5654_v41 }
 0xae8   :  { %8773 = vmatpush3.msra.mxu0 %v5654_v41 }
 0xae9   :  { %8775 = vmatmul.mubr.msk.f32.vlgmr.msra.gmra.mrb[4].mxu0 %vm5460_vm8, %v13931_v12  ;;  %8788 = vmatprep.subr.mxu0 %v6972_v46 }
 0xaea   :  { %8789 = vmatpush3.msra.mxu0 %v6972_v46  ;;  %8777 = vmatprep.mubr.msk.f32.mxu0 %vm5460_vm8, %v13936_v47  ;;  %v5662_v46 = vld [vmem:[%s15325_s22 + $0x18] sm:$0xff] }
 0xaed   :  { %8778 = vmatmul.mubr.msk.f32.gmra.mrb[6].mxu0 %vm5460_vm8, %v13945_v5 }
 0xaee   :  { %8790 = vmatprep.mubr.msk.f32.mxu0 %vm5460_vm8, %v13861_v34  ;;  %v13966_v34 = vld [vmem:[%s15322_s19 + $0x10] sm:$0xff] }
 0xaf1   :  { %8791 = vmatmul.mubr.msk.f32.vlgmr.msra.gmra.mrb[8].mxu0 %vm5460_vm8, %v13889_v26 }
 0xaf2   :  { %8802 = vmatprep.mubr.msk.f32.mxu0 %vm5460_vm8, %v5655_v20 }
 0xb59   :  { %v5834_v32 = vpop.permute.xlu1 %5833 }
 0xb5a   :  { %8780 = vmatprep.subr.mxu1 %v5834_v32 }
 0xb5b   :  { %8781 = vmatpush3.msra.mxu1 %v5834_v32  ;;  %v16370_v32 = vld [vmem:[#allocation16_spill] sm:$0xff] }
 0xb5c   :  { %8783 = vmatmul.mubr.msk.f32.vlgmr.msra.gmra.mrb[6].mxu1 %vm5460_vm8, %v13961_v22  ;;  %8837 = vmatprep.subr.bf16.mxu1 %v16362_v45 }
 0xb5d   :  { %8785 = vmatprep.mubr.msk.f32.mxu1 %vm5460_vm8, %v13966_v34 }
 0xb60   :  { %8786 = vmatmul.mubr.msk.f32.gmra.mrb[8].mxu1 %vm5460_vm8, %v13976_v4 }
 0xb61   :  { %8797 = vmatprep.mubr.msk.f32.mxu1 %vm9113_vm14, %v16365_v6 }
 0xbbc   :  { %v13982_v44 = vpop.f32.mrb[4].mxu0 }
 0xbbd   :  { %v13984_v61 = vpop.f32.mrb[5].mxu0 }
 0xbc0   :  { %v13986_v16 = vpop.f32.mrb[6].mxu0 }
 0xbc1   :  { %v13988_v45 = vpop.f32.mrb[7].mxu0 }
 0xbc4   :  { %v8792_v8 = vpop.f32.mrb[8].mxu0 }
 0xbc5   :  { %v7052_v28 = vadd.f32 %v8792_v8, %v6968_v58  ;;  %v7046_v38 = vpop.f32.mrb[9].mxu0 }
 0xbc6   :  { %v7047_v13 = vadd.f32 %v7046_v38, %v6963_v17  ;;  %v16371_v38 = vld [vmem:[#allocation63_spill] sm:$0xff] }
 0xbc8   :  { %v8838_v30 = vpack.c.bf16 %v7052_v28, %v7047_v13 }
 0xbca   :  { %8839 = vmatpush3.bf16.msra.mxu1 %v8838_v30  ;;  %v16372_v30 = vld [vmem:[#allocation110_spill] sm:$0xff] }
 0xbcd   :  { %8798 = vmatmul.mubr.msk.f32.vlgmr.msra.gmra.mrb[10].mxu1 %vm184_vm0, %v13900_v56  ;;  %v5811_v56 = vld [vmem:[%s15323_s20 + $0x18] sm:$0xff]  ;;  %s9117_s20 = smov 80  }
 0xbce   :  { %8810 = vmatprep.mubr.msk.f32.mxu1 %vm5460_vm8, %v5804_v57  ;;  %v16369_v57 = vld [vmem:[#allocation15_spill] sm:$0xff] }
 0xc2f   :  { %v8784_v6 = vpop.f32.mrb[6].mxu1 }
 0xc30   :  { %v5914_v50 = vpop.f32.mrb[7].mxu1 }
 0xc33   :  { %v13993_v7 = vpop.f32.mrb[8].mxu1 }
 0xc34   :  { %v13995_v29 = vpop.f32.mrb[9].mxu1 }
 0xca0   :  { %v7125_v10 = vpop.f32.mrb[10].mxu1 }
 0xca1   :  { %v7129_v23 = vsel %vm5113_vm5, %v7125_v10, 0.0  ;;  %v8799_v26 = vpop.f32.mrb[11].mxu1  ;;  %v16373_v10 = vld [vmem:[#allocation166_spill] sm:$0xff] }
 0xca2   :  { %7130 = vadd.xlane.f32.xlu0 %v7129_v23 }
 0xd2f   :  { %v7131_v27 = vpop.xlane.xlu0 %7130 }
 0xd30   :  { %v7132_v31 = vmul.f32 0.03125, %v7131_v27  ;;  %v16374_v27 = vld [vmem:[#allocation229_spill] sm:$0xff] }
 0xd32   :  { %v7134_v60 = vadd.f32 %v7132_v31, %v13908_v1 }
 0xd34   :  { %v8534_v54 = vmul.f32 -1.442695, %v7134_v60 }
 0xd36   :  { %8879 = vpow2.f32 %v8534_v54 }
 0xd40   :  { %v8880_v52 = vpop.eup %8879 }
 0xd41   :  { %v7138_v9 = vadd.f32 1.0, %v8880_v52 }
 0xd43   :  { %8881 = vrcp.f32 %v7138_v9 }
 0xd4d   :  { %v8882_v62 = vpop.eup %8881 }
 0xd4e   :  { %7144 = vperm.xlu1 %8862, %v8882_v62  }
 0xd52   :  { %5814 = vperm.xlu1 %8862, %v5808_v55  }
 0xd56   :  { %5819 = vperm.xlu1 %8862, %v5809_v53  }
 0xd5a   :  { %5824 = vperm.xlu1 %8862, %v5810_v18  }
 0xd5e   :  { %5829 = vperm.xlu1 %8862, %v5811_v56  }
 0xd62   :  { %7320 = vperm.xlu1 %8862, %v5808_v55  }
 0xd66   :  { %7330 = vperm.xlu1 %8862, %v5810_v18  }
 0xd6a   :  { %5665 = vperm.xlu1 %8862, %v5659_v19  }
 0xd6e   :  { %5675 = vperm.xlu1 %8862, %v5661_v40  }
 0xd72   :  { %7167 = vperm.xlu1 %8862, %v5659_v19  }
 0xdcd   :  { %v7145_v1 = vpop.permute.xlu1 %7144 }
 0xdce   :  { %v7147_v36 = vmul.f32 %v7145_v1, %v7141_v25 }
 0xdd0   :  { %v8535_v0 = vmul.f32 -1.442695, %v7147_v36 }
 0xdd1   :  { %v5815_v21 = vpop.permute.xlu1 %5814 }
 0xdd2   :  { %8883 = vpow2.f32 %v8535_v0  ;;  %v5915_v49 = vadd.f32 %v5914_v50, %v5815_v21 }
 0xdd4   :  { %v8527_v15 = vmul.f32 -1.442695, %v5915_v49 }
 0xdd5   :  { %v5820_v51 = vpop.permute.xlu1 %5819 }
 0xdd6   :  { %8885 = vpow2.f32 %v8527_v15  ;;  %v5920_v42 = vadd.f32 %v8784_v6, %v5820_v51 }
 0xdd8   :  { %v8528_v37 = vmul.f32 -1.442695, %v5920_v42 }
 0xdd9   :  { %v5825_v50 = vpop.permute.xlu1 %5824 }
 0xdda   :  { %v5925_v26 = vadd.f32 %v13995_v29, %v5825_v50  ;;  %v16375_v50 = vld [vmem:[#allocation10_spill] sm:$0xff] }
 0xddc   :  { %v8884_v11 = vpop.eup %8883  ;;  %v8529_v54 = vmul.f32 -1.442695, %v5925_v26 }
 0xddd   :  { %v7151_v3 = vadd.f32 1.0, %v8884_v11  ;;  %v5830_v19 = vpop.permute.xlu1 %5829 }
 0xddf   :  { %8887 = vrcp.f32 %v7151_v3 }
 0xde0   :  { %v8886_v59 = vpop.eup %8885 }
 0xde1   :  { %v5945_v20 = vadd.f32 1.0, %v8886_v59  ;;  %v14048_v15 = vpop.permute.xlu1 %7320 }
 0xde3   :  { %8889 = vrcp.f32 %v5945_v20 }
 0xde4   :  { %8891 = vpow2.f32 %v8528_v37 }
 0xde5   :  { %v14051_v11 = vpop.permute.xlu1 %7330 }
 0xde9   :  { %v8888_v63 = vpop.eup %8887 }
 0xdea   :  { %v7154_v14 = vmul.f32 %v8888_v63, %v7141_v25  ;;  %v5930_v25 = vadd.f32 %v13993_v7, %v5830_v19 }
 0xdec   :  { %v7156_v39 = vadd.f32 %v7155_v24, %v7154_v14  ;;  %v8530_v0 = vmul.f32 -1.442695, %v5930_v25  ;;  %v5666_v24 = vpop.permute.xlu1 %5665 }
 0xded   :  { %v8890_v35 = vpop.eup %8889  ;;  %v5762_v14 = vadd.f32 %v13984_v61, %v5666_v24  ;;  %v5963_v24 = vld [vmem:[%s15552_s7 + $0x30] sm:$0xff] }
 0xdee   :  { %7186 = vrot.lane.b32.xlu1 %v7156_v39, %s9115_s12  ;;  %7338 = vrot.lane.b32.xlu0 %v7156_v39, %s9117_s20  ;;  %v6024_v33 = vrot.slane %v8890_v35, %v16367_v2  ;;  %v6035_v41 = vrot.slane %v8890_v35, %v16368_v43  ;;  %v6046_v17 = vrot.slane %v8890_v35, %v16369_v57  ;;  %v8892_v58 = vpop.eup %8891 }
 0xdef   :  { %v6057_v8 = vrot.slane %v8890_v35, %v16370_v32  ;;  %v5946_v28 = vadd.f32 1.0, %v8892_v58  ;;  %v6068_v13 = vrot.slane %v8890_v35, %v16371_v38  ;;  %v6079_v6 = vrot.slane %v8890_v35, %v16372_v30 }
 0xdf0   :  { %v6090_v23 = vrot.slane %v8890_v35, %v16373_v10  ;;  %v6101_v31 = vrot.slane %v8890_v35, %v16374_v27  ;;  %v8519_v39 = vmul.f32 -1.442695, %v5762_v14 }
 0xdf1   :  { %8893 = vrcp.f32 %v5946_v28 }
 0xdf2   :  { %7177 = vperm.xlu1 %8862, %v5661_v40   ;;  %7325 = vperm.xlu0 %8861, %v5809_v53   ;;  %8895 = vpow2.f32 %v8529_v54 }
 0xdf6   :  { %7335 = vperm.xlu0 %8861, %v5811_v56   ;;  %6026 = vbcast.lane.b32.xlu1 %v6024_v33, 256 }
 0xdfa   :  { %5670 = vperm.xlu0 %8861, %v5660_v48   ;;  %6037 = vbcast.lane.b32.xlu1 %v6035_v41, 256 }
 0xdfb   :  { %v8894_v60 = vpop.eup %8893 }
 0xdfc   :  { %v6112_v52 = vrot.slane %v8894_v60, %v16367_v2  ;;  %v6123_v9 = vrot.slane %v8894_v60, %v16368_v43  ;;  %v6134_v62 = vrot.slane %v8894_v60, %v16369_v57  ;;  %v8896_v29 = vpop.eup %8895  ;;  %v6145_v55 = vrot.slane %v8894_v60, %v16370_v32 }
 0xdfd   :  { %v5947_v53 = vadd.f32 1.0, %v8896_v29  ;;  %v6156_v18 = vrot.slane %v8894_v60, %v16371_v38  ;;  %v6167_v56 = vrot.slane %v8894_v60, %v16372_v30  ;;  %v6178_v40 = vrot.slane %v8894_v60, %v16373_v10 }
 0xdfe   :  { %5680 = vperm.xlu0 %8861, %v5662_v46   ;;  %6048 = vbcast.lane.b32.xlu1 %v6046_v17, 256  ;;  %v6189_v1 = vrot.slane %v8894_v60, %v16374_v27  ;;  %v5957_v60 = vld [vmem:[%s15552_s7] sm:$0xff] }
 0xdff   :  { %8897 = vrcp.f32 %v5947_v53 }
 0xe00   :  { %8899 = vpow2.f32 %v8530_v0  ;;  %v5961_v0 = vld [vmem:[%s15552_s7 + $0x20] sm:$0xff] }
 0xe02   :  { %7172 = vperm.xlu0 %8861, %v5660_v48   ;;  %6059 = vbcast.lane.b32.xlu1 %v6057_v8, 256  ;;  %v14060_v48 = vpop.permute.xlu1 %5675 }
 0xe06   :  { %7182 = vperm.xlu0 %8861, %v5662_v46   ;;  %6070 = vbcast.lane.b32.xlu1 %v6068_v13, 256  ;;  %v14063_v46 = vpop.permute.xlu1 %7167 }
 0xe09   :  { %v8898_v36 = vpop.eup %8897 }
 0xe0a   :  { %6030 = vbcast.lane.b32.xlu0 %v6024_v33, 264  ;;  %6081 = vbcast.lane.b32.xlu1 %v6079_v6, 256  ;;  %v6200_v21 = vrot.slane %v8898_v36, %v16367_v2  ;;  %v6211_v49 = vrot.slane %v8898_v36, %v16368_v43  ;;  %v6222_v7 = vrot.slane %v8898_v36, %v16369_v57  ;;  %v8900_v3 = vpop.eup %8899 }
 0xe0b   :  { %v6233_v59 = vrot.slane %v8898_v36, %v16370_v32  ;;  %v5948_v20 = vadd.f32 1.0, %v8900_v3  ;;  %v6244_v63 = vrot.slane %v8898_v36, %v16371_v38  ;;  %v6255_v51 = vrot.slane %v8898_v36, %v16372_v30 }
 0xe0c   :  { %v6266_v42 = vrot.slane %v8898_v36, %v16373_v10  ;;  %v6277_v35 = vrot.slane %v8898_v36, %v16374_v27 }
 0xe0d   :  { %8901 = vrcp.f32 %v5948_v20 }
 0xe0e   :  { %6041 = vbcast.lane.b32.xlu0 %v6035_v41, 264  ;;  %6092 = vbcast.lane.b32.xlu1 %v6090_v23, 256  ;;  %8903 = vpow2.f32 %v8519_v39 }
 0xe12   :  { %6052 = vbcast.lane.b32.xlu0 %v6046_v17, 264  ;;  %6103 = vbcast.lane.b32.xlu1 %v6101_v31, 256 }
 0xe16   :  { %6063 = vbcast.lane.b32.xlu0 %v6057_v8, 264  ;;  %6114 = vbcast.lane.b32.xlu1 %v6112_v52, 256 }
 0xe17   :  { %v8902_v37 = vpop.eup %8901 }
 0xe18   :  { %v6288_v33 = vrot.slane %v8902_v37, %v16367_v2  ;;  %v6299_v61 = vrot.slane %v8902_v37, %v16368_v43  ;;  %v8904_v41 = vpop.eup %8903  ;;  %v6310_v17 = vrot.slane %v8902_v37, %v16369_v57 }
 0xe19   :  { %v5792_v58 = vadd.f32 1.0, %v8904_v41 }
 0xe1a   :  { %6074 = vbcast.lane.b32.xlu0 %v6068_v13, 264  ;;  %6125 = vbcast.lane.b32.xlu1 %v6123_v9, 256  ;;  %v6321_v13 = vrot.slane %v8902_v37, %v16370_v32 }
 0xe1b   :  { %8905 = vrcp.f32 %v5792_v58 }
 0xe1e   :  { %6085 = vbcast.lane.b32.xlu0 %v6079_v6, 264  ;;  %6136 = vbcast.lane.b32.xlu1 %v6134_v62, 256  ;;  %v6332_v6 = vrot.slane %v8902_v37, %v16371_v38 }
 0xe22   :  { %6096 = vbcast.lane.b32.xlu0 %v6090_v23, 264  ;;  %6147 = vbcast.lane.b32.xlu1 %v6145_v55, 256 }
 0xe26   :  { %6107 = vbcast.lane.b32.xlu0 %v6101_v31, 264  ;;  %6158 = vbcast.lane.b32.xlu1 %v6156_v18, 256 }
 0xe2a   :  { %6118 = vbcast.lane.b32.xlu0 %v6112_v52, 264  ;;  %6169 = vbcast.lane.b32.xlu1 %v6167_v56, 256 }
 0xe2e   :  { %6129 = vbcast.lane.b32.xlu0 %v6123_v9, 264  ;;  %6180 = vbcast.lane.b32.xlu1 %v6178_v40, 256 }
 0xe32   :  { %6140 = vbcast.lane.b32.xlu0 %v6134_v62, 264  ;;  %6191 = vbcast.lane.b32.xlu1 %v6189_v1, 256 }
 0xe36   :  { %6151 = vbcast.lane.b32.xlu0 %v6145_v55, 264  ;;  %6202 = vbcast.lane.b32.xlu1 %v6200_v21, 256  ;;  %v5959_v55 = vld [vmem:[%s15552_s7 + $0x10] sm:$0xff] }
 0xe3a   :  { %6162 = vbcast.lane.b32.xlu0 %v6156_v18, 264  ;;  %6213 = vbcast.lane.b32.xlu1 %v6211_v49, 256 }
 0xe3e   :  { %6173 = vbcast.lane.b32.xlu0 %v6167_v56, 264  ;;  %6224 = vbcast.lane.b32.xlu1 %v6222_v7, 256 }
 0xe42   :  { %6184 = vbcast.lane.b32.xlu0 %v6178_v40, 264  ;;  %6235 = vbcast.lane.b32.xlu1 %v6233_v59, 256 }
 0xe46   :  { %6195 = vbcast.lane.b32.xlu0 %v6189_v1, 264  ;;  %6246 = vbcast.lane.b32.xlu1 %v6244_v63, 256 }
 0xe4a   :  { %6206 = vbcast.lane.b32.xlu0 %v6200_v21, 264  ;;  %6257 = vbcast.lane.b32.xlu1 %v6255_v51, 256 }
 0xe4e   :  { %6217 = vbcast.lane.b32.xlu0 %v6211_v49, 264  ;;  %6268 = vbcast.lane.b32.xlu1 %v6266_v42, 256 }
 0xe52   :  { %6228 = vbcast.lane.b32.xlu0 %v6222_v7, 264  ;;  %6279 = vbcast.lane.b32.xlu1 %v6277_v35, 256 }
 0xe56   :  { %6239 = vbcast.lane.b32.xlu0 %v6233_v59, 264  ;;  %6290 = vbcast.lane.b32.xlu1 %v6288_v33, 256 }
 0xe5a   :  { %6250 = vbcast.lane.b32.xlu0 %v6244_v63, 264  ;;  %6301 = vbcast.lane.b32.xlu1 %v6299_v61, 256 }
 0xe5e   :  { %6261 = vbcast.lane.b32.xlu0 %v6255_v51, 264  ;;  %6312 = vbcast.lane.b32.xlu1 %v6310_v17, 256 }
 0xe60   :  { %v7339_v8 = vpop.permute.xlu0 %7338  ;;  %v7187_v28 = vpop.permute.xlu1 %7186 }
 0xe61   :  { %8800 = vmatprep.subr.mxu0 %v7187_v28  ;;  %8808 = vmatprep.subr.mxu1 %v7339_v8 }
 0xe62   :  { %8809 = vmatpush3.msra.mxu1 %v7339_v8  ;;  %6272 = vbcast.lane.b32.xlu0 %v6266_v42, 264 }
 0xe63   :  { %6323 = vbcast.lane.b32.xlu1 %v6321_v13, 256  ;;  %8801 = vmatpush3.msra.mxu0 %v7187_v28 }
 0xe64   :  { %8803 = vmatmul.mubr.msk.f32.vlgmr.msra.gmra.mrb[10].mxu0 %vm5460_vm8, %v13931_v12  ;;  %8811 = vmatmul.mubr.msk.f32.vlgmr.msra.gmra.mrb[12].mxu1 %vm5460_vm8, %v13961_v22  ;;  %v6343_v12 = vrot.slane %v8902_v37, %v16372_v30  ;;  %v8906_v22 = vpop.eup %8905 }
 0xe65   :  { %8813 = vmatprep.mubr.msk.f32.mxu1 %vm5460_vm8, %v13966_v34  ;;  %8805 = vmatprep.mubr.msk.f32.mxu0 %vm5460_vm8, %v13936_v47  ;;  %v6354_v34 = vrot.slane %v8902_v37, %v16373_v10  ;;  %v6448_v23 = vrot.slane %v8906_v22, %v16375_v50  ;;  %v6441_v19 = vcombine.high %v8906_v22, %v8906_v22 }
 0xe66   :  { %6283 = vbcast.lane.b32.xlu0 %v6277_v35, 264 }
 0xe67   :  { %6334 = vbcast.lane.b32.xlu1 %v6332_v6, 256  ;;  %v6456_v31 = vcombine.high %v6448_v23, %v6448_v23  ;;  %v6455_v59 = vrot.slane %v6441_v19, %v16375_v50 }
 0xe68   :  { %8806 = vmatmul.mubr.msk.f32.gmra.mrb[12].mxu0 %vm5460_vm8, %v13945_v5  ;;  %8814 = vmatmul.mubr.msk.f32.gmra.mrb[14].mxu1 %vm5460_vm8, %v13976_v4  ;;  %v6365_v5 = vrot.slane %v8902_v37, %v16374_v27  ;;  %v6464_v4 = vrot.slane %v6448_v23, %v16375_v50 }
 0xe69   :  { %v6478_v29 = vrot.slane %v6456_v31, %v16375_v50  ;;  %v6471_v37 = vrot.slane %v6455_v59, %v16375_v50 }
 0xe6a   :  { %6294 = vbcast.lane.b32.xlu0 %v6288_v33, 264  ;;  %v14095_v9 = vrot.slane %v6464_v4, %v16367_v2  ;;  %v6486_v36 = vcombine.high %v6464_v4, %v6464_v4  ;;  %v6457_v33 = vcombine.high %v6455_v59, %v6455_v59 }
 0xe6b   :  { %6345 = vbcast.lane.b32.xlu1 %v6343_v12, 256  ;;  %v14108_v25 = vrot.slane %v6478_v29, %v16367_v2  ;;  %v6488_v63 = vcombine.high %v6478_v29, %v6478_v29  ;;  %v14151_v28 = vrot.slane %v6471_v37, %v16367_v2  ;;  %v5960_v29 = vld [vmem:[%s15552_s7 + $0x18] sm:$0xff] }
 0xe6d   :  { %v14135_v42 = vrot.slane %v6488_v63, %v16367_v2 }
 0xe6e   :  { %6305 = vbcast.lane.b32.xlu0 %v6299_v61, 264  ;;  %v5965_v61 = vld [vmem:[%s15552_s7 + $0x40] sm:$0xff] }
 0xe6f   :  { %6356 = vbcast.lane.b32.xlu1 %v6354_v34, 256 }
 0xe71   :  { %v14083_v47 = vpop.permute.xlu0 %7325  ;;  %v14085_v26 = vpop.permute.xlu1 %7177 }
 0xe72   :  { %6316 = vbcast.lane.b32.xlu0 %v6310_v17, 264  ;;  %v5772_v17 = vadd.f32 %v13988_v45, %v14060_v48  ;;  %v5967_v45 = vld [vmem:[%s15552_s7 + $0x50] sm:$0xff] }
 0xe73   :  { %6367 = vbcast.lane.b32.xlu1 %v6365_v5, 256 }
 0xe75   :  { %v14092_v54 = vpop.permute.xlu0 %7335  ;;  %v6027_v52 = vpop.permute.xlu1 %6026 }
 0xe76   :  { %v6373_v62 = vmul.f32 %v6027_v52, %v5957_v60  ;;  %6327 = vbcast.lane.b32.xlu0 %v6321_v13, 264 }
 0xe78   :  { %v6797_v53 = vmul.f32 %v14095_v9, %v6373_v62  ;;  %v6487_v62 = vcombine.high %v6471_v37, %v6471_v37 }
 0xe79   :  { %v5671_v18 = vpop.permute.xlu0 %5670  ;;  %v6038_v56 = vpop.permute.xlu1 %6037 }
 0xe7a   :  { %6861 = vst.msk [vmem:[%s15326_s23] sm:$0xff] %vm184_vm0, %v6797_v53  ;;  %v5767_v40 = vadd.f32 %v13982_v44, %v5671_v18  ;;  %v6375_v1 = vmul.f32 %v6038_v56, %v5959_v55  ;;  %6338 = vbcast.lane.b32.xlu0 %v6332_v6, 264  ;;  %v14122_v44 = vrot.slane %v6486_v36, %v16367_v2  ;;  %v5969_v55 = vld [vmem:[%s15552_s7 + $0x60] sm:$0xff] }
 0xe7b   :  { %v6485_v6 = vrot.slane %v6457_v33, %v16375_v50 }
 0xe7c   :  { %v8520_v21 = vmul.f32 -1.442695, %v5767_v40  ;;  %v6799_v49 = vmul.f32 %v14108_v25, %v6375_v1  ;;  %v14185_v1 = vrot.slane %v6487_v62, %v16367_v2  ;;  %v5968_v62 = vld [vmem:[%s15552_s7 + $0x58] sm:$0xff] }
 0xe7d   :  { %v14114_v7 = vpop.permute.xlu0 %5680  ;;  %v6049_v3 = vpop.permute.xlu1 %6048  ;;  %v14166_v60 = vrot.slane %v6485_v6, %v16367_v2  ;;  %v6489_v36 = vcombine.high %v6485_v6, %v6485_v6 }
 0xe7e   :  { %8907 = vpow2.f32 %v8520_v21  ;;  %6863 = vst.msk [vmem:[%s15326_s23 + $0x10] sm:$0xff] %vm184_vm0, %v6799_v49  ;;  %v6377_v20 = vmul.f32 %v6049_v3, %v5961_v0  ;;  %6349 = vbcast.lane.b32.xlu0 %v6343_v12, 264  ;;  %v5958_v12 = vld [vmem:[%s15552_s7 + $0x8] sm:$0xff]  ;;  %v5971_v21 = vld [vmem:[%s15552_s7 + $0x70] sm:$0xff] }
 0xe7f   :  { %v5962_v0 = vld [vmem:[%s15552_s7 + $0x28] sm:$0xff] }
 0xe80   :  { %v6801_v14 = vmul.f32 %v14122_v44, %v6377_v20 }
 0xe81   :  { %v14128_v51 = vpop.permute.xlu0 %7172  ;;  %v6060_v39 = vpop.permute.xlu1 %6059 }
 0xe82   :  { %6865 = vst.msk [vmem:[%s15326_s23 + $0x20] sm:$0xff] %vm184_vm0, %v6801_v14  ;;  %v6379_v35 = vmul.f32 %v6060_v39, %v5963_v24  ;;  %6360 = vbcast.lane.b32.xlu0 %v6354_v34, 264  ;;  %v8521_v34 = vmul.f32 -1.442695, %v5772_v17  ;;  %v14204_v24 = vrot.slane %v6489_v36, %v16367_v2 }
 0xe84   :  { %v6803_v41 = vmul.f32 %v14135_v42, %v6379_v35 }
 0xe85   :  { %v14144_v58 = vpop.permute.xlu0 %7182  ;;  %v6071_v8 = vpop.permute.xlu1 %6070 }
 0xe86   :  { %6867 = vst.msk [vmem:[%s15326_s23 + $0x30] sm:$0xff] %vm184_vm0, %v6803_v41  ;;  %v6381_v13 = vmul.f32 %v6071_v8, %v5965_v61  ;;  %6371 = vbcast.lane.b32.xlu0 %v6365_v5, 264 }
 0xe88   :  { %v8908_v48 = vpop.eup %8907  ;;  %v6805_v22 = vmul.f32 %v14151_v28, %v6381_v13  ;;  %v5966_v13 = vld [vmem:[%s15552_s7 + $0x48] sm:$0xff] }
 0xe89   :  { %v5793_v23 = vadd.f32 1.0, %v8908_v48  ;;  %v6031_v4 = vpop.permute.xlu0 %6030  ;;  %v6082_v31 = vpop.permute.xlu1 %6081 }
 0xe8a   :  { %6869 = vst.msk [vmem:[%s15326_s23 + $0x40] sm:$0xff] %vm184_vm0, %v6805_v22  ;;  %v6374_v5 = vmul.f32 %v6031_v4, %v5958_v12  ;;  %v6383_v52 = vmul.f32 %v6082_v31, %v5967_v45  ;;  %v5975_v22 = vld [vmem:[%s15552_s7 + $0x90] sm:$0xff] }
 0xe8b   :  { %8909 = vrcp.f32 %v5793_v23 }
 0xe8c   :  { %v6798_v53 = vmul.f32 %v14095_v9, %v6374_v5  ;;  %v6807_v18 = vmul.f32 %v14166_v60, %v6383_v52  ;;  %8911 = vpow2.f32 %v8521_v34 }
 0xe8d   :  { %v6042_v56 = vpop.permute.xlu0 %6041  ;;  %v6093_v19 = vpop.permute.xlu1 %6092 }
 0xe8e   :  { %6862 = vst.msk [vmem:[%s15326_s23 + $0x8] sm:$0xff] %vm184_vm0, %v6798_v53  ;;  %6871 = vst.msk [vmem:[%s15326_s23 + $0x50] sm:$0xff] %vm184_vm0, %v6807_v18  ;;  %v6376_v40 = vmul.f32 %v6042_v56, %v5960_v29  ;;  %v6385_v9 = vmul.f32 %v6093_v19, %v5969_v55  ;;  %v5977_v29 = vld [vmem:[%s15552_s7 + $0xa0] sm:$0xff] }
 0xe90   :  { %v6800_v49 = vmul.f32 %v14108_v25, %v6376_v40  ;;  %v6809_v3 = vmul.f32 %v14185_v1, %v6385_v9  ;;  %v5964_v25 = vld [vmem:[%s15552_s7 + $0x38] sm:$0xff] }
 0xe91   :  { %v6053_v59 = vpop.permute.xlu0 %6052  ;;  %v6104_v20 = vpop.permute.xlu1 %6103 }
 0xe92   :  { %6864 = vst.msk [vmem:[%s15326_s23 + $0x18] sm:$0xff] %vm184_vm0, %v6800_v49  ;;  %6873 = vst.msk [vmem:[%s15326_s23 + $0x60] sm:$0xff] %vm184_vm0, %v6809_v3  ;;  %v6378_v63 = vmul.f32 %v6053_v59, %v5962_v0  ;;  %v6387_v14 = vmul.f32 %v6104_v20, %v5971_v21  ;;  %v5970_v59 = vld [vmem:[%s15552_s7 + $0x68] sm:$0xff]  ;;  %v5979_v20 = vld [vmem:[%s15552_s7 + $0xb0] sm:$0xff] }
 0xe94   :  { %v6802_v39 = vmul.f32 %v14122_v44, %v6378_v63  ;;  %v6811_v35 = vmul.f32 %v14204_v24, %v6387_v14  ;;  %v5973_v44 = vld [vmem:[%s15552_s7 + $0x80] sm:$0xff] }
 0xe95   :  { %v8910_v37 = vpop.eup %8909  ;;  %v6064_v33 = vpop.permute.xlu0 %6063 }
 0xe96   :  { %v6115_v61 = vpop.permute.xlu1 %6114  ;;  %6866 = vst.msk [vmem:[%s15326_s23 + $0x28] sm:$0xff] %vm184_vm0, %v6802_v39  ;;  %6875 = vst.msk [vmem:[%s15326_s23 + $0x70] sm:$0xff] %vm184_vm0, %v6811_v35  ;;  %v6380_v41 = vmul.f32 %v6064_v33, %v5964_v25  ;;  %v6497_v17 = vrot.slane %v8910_v37, %v16375_v50  ;;  %v8912_v8 = vpop.eup %8911  ;;  %v6490_v23 = vcombine.high %v8910_v37, %v8910_v37 }
 0xe97   :  { %v6389_v31 = vmul.f32 %v6115_v61, %v5973_v44  ;;  %v5794_v52 = vadd.f32 1.0, %v8912_v8 }
 0xe98   :  { %v6804_v6 = vmul.f32 %v14135_v42, %v6380_v41  ;;  %v6513_v12 = vrot.slane %v6497_v17, %v16375_v50  ;;  %v6505_v45 = vcombine.high %v6497_v17, %v6497_v17  ;;  %v6504_v0 = vrot.slane %v6490_v23, %v16375_v50  ;;  %v5972_v41 = vld [vmem:[%s15552_s7 + $0x78] sm:$0xff]  ;;  %v5981_v17 = vld [vmem:[%s15552_s7 + $0xc0] sm:$0xff] }
 0xe99   :  { %v6075_v48 = vpop.permute.xlu0 %6074  ;;  %8913 = vrcp.f32 %v5794_v52  ;;  %v5777_v23 = vadd.f32 %v13986_v16, %v14114_v7 }
 0xe9a   :  { %v6126_v34 = vpop.permute.xlu1 %6125  ;;  %6868 = vst.msk [vmem:[%s15326_s23 + $0x38] sm:$0xff] %vm184_vm0, %v6804_v6  ;;  %v14236_v4 = vrot.slane %v6513_v12, %v16367_v2  ;;  %v6382_v42 = vmul.f32 %v6075_v48, %v5966_v13  ;;  %v6527_v5 = vrot.slane %v6505_v45, %v16375_v50  ;;  %v6535_v55 = vcombine.high %v6513_v12, %v6513_v12 }
 0xe9b   :  { %v6391_v19 = vmul.f32 %v6126_v34, %v5975_v22  ;;  %v6520_v35 = vrot.slane %v6504_v0, %v16375_v50  ;;  %v6506_v61 = vcombine.high %v6504_v0, %v6504_v0  ;;  %v5974_v22 = vld [vmem:[%s15552_s7 + $0x88] sm:$0xff]  ;;  %v5983_v34 = vld [vmem:[%s15552_s7 + $0xd0] sm:$0xff] }
 0xe9c   :  { %v6813_v53 = vmul.f32 %v14236_v4, %v6389_v31  ;;  %v6806_v18 = vmul.f32 %v14151_v28, %v6382_v42  ;;  %v14248_v56 = vrot.slane %v6527_v5, %v16367_v2  ;;  %v6537_v36 = vcombine.high %v6527_v5, %v6527_v5 }
 0xe9d   :  { %v6086_v40 = vpop.permute.xlu0 %6085  ;;  %v14261_v49 = vrot.slane %v6535_v55, %v16367_v2  ;;  %v14304_v45 = vrot.slane %v6520_v35, %v16367_v2  ;;  %v5976_v55 = vld [vmem:[%s15552_s7 + $0x98] sm:$0xff] }
 0xe9e   :  { %v6137_v9 = vpop.permute.xlu1 %6136  ;;  %6877 = vst.msk [vmem:[%s15326_s23 + $0x80] sm:$0xff] %vm184_vm0, %v6813_v53  ;;  %6870 = vst.msk [vmem:[%s15326_s23 + $0x48] sm:$0xff] %vm184_vm0, %v6806_v18  ;;  %v6815_v28 = vmul.f32 %v14248_v56, %v6391_v19  ;;  %v6384_v21 = vmul.f32 %v6086_v40, %v5968_v62  ;;  %v14285_v33 = vrot.slane %v6537_v36, %v16367_v2  ;;  %v5985_v53 = vld [vmem:[%s15552_s7 + $0xe0] sm:$0xff]  ;;  %v8522_v18 = vmul.f32 -1.442695, %v5777_v23 }
 0xe9f   :  { %v6393_v3 = vmul.f32 %v6137_v9, %v5977_v29 }
 0xea0   :  { %6879 = vst.msk [vmem:[%s15326_s23 + $0x90] sm:$0xff] %vm184_vm0, %v6815_v28  ;;  %v6808_v63 = vmul.f32 %v14166_v60, %v6384_v21  ;;  %8915 = vpow2.f32 %v8522_v18 }
 0xea1   :  { %v6817_v14 = vmul.f32 %v14261_v49, %v6393_v3  ;;  %v6097_v25 = vpop.permute.xlu0 %6096 }
 0xea2   :  { %v6148_v39 = vpop.permute.xlu1 %6147  ;;  %6872 = vst.msk [vmem:[%s15326_s23 + $0x58] sm:$0xff] %vm184_vm0, %v6808_v63  ;;  %v6386_v37 = vmul.f32 %v6097_v25, %v5970_v59  ;;  %v5978_v59 = vld [vmem:[%s15552_s7 + $0xa8] sm:$0xff] }
 0xea3   :  { %6881 = vst.msk [vmem:[%s15326_s23 + $0xa0] sm:$0xff] %vm184_vm0, %v6817_v14  ;;  %v6395_v60 = vmul.f32 %v6148_v39, %v5979_v20  ;;  %v14317_v62 = vpop.eup %8913  ;;  %v5987_v20 = vld [vmem:[%s15552_s7 + $0xf0] sm:$0xff] }
 0xea4   :  { %v6810_v8 = vmul.f32 %v14185_v1, %v6386_v37  ;;  %v6534_v1 = vrot.slane %v6506_v61, %v16375_v50  ;;  %v6546_v0 = vrot.slane %v14317_v62, %v16375_v50 }
 0xea5   :  { %v6819_v44 = vmul.f32 %v14285_v33, %v6395_v60  ;;  %v6108_v13 = vpop.permute.xlu0 %6107 }
 0xea6   :  { %v6159_v6 = vpop.permute.xlu1 %6158  ;;  %6874 = vst.msk [vmem:[%s15326_s23 + $0x68] sm:$0xff] %vm184_vm0, %v6810_v8  ;;  %v6388_v12 = vmul.f32 %v6108_v13, %v5972_v41  ;;  %v14328_v16 = vrot.slane %v6534_v1, %v16367_v2  ;;  %v6538_v3 = vcombine.high %v6534_v1, %v6534_v1  ;;  %v6554_v61 = vcombine.high %v6546_v0, %v6546_v0  ;;  %v5980_v41 = vld [vmem:[%s15552_s7 + $0xb8] sm:$0xff] }
 0xea7   :  { %6883 = vst.msk [vmem:[%s15326_s23 + $0xb0] sm:$0xff] %vm184_vm0, %v6819_v44  ;;  %v6397_v48 = vmul.f32 %v6159_v6, %v5981_v17  ;;  %v5989_v17 = vld [vmem:[%s15552_s7 + $0x100] sm:$0xff] }
 0xea8   :  { %v6812_v31 = vmul.f32 %v14204_v24, %v6388_v12  ;;  %v6536_v24 = vcombine.high %v6520_v35, %v6520_v35  ;;  %v6562_v35 = vrot.slane %v6546_v0, %v16375_v50  ;;  %v14369_v60 = vrot.slane %v6538_v3, %v16367_v2 }
 0xea9   :  { %v6821_v42 = vmul.f32 %v14304_v45, %v6397_v48  ;;  %v6119_v5 = vpop.permute.xlu0 %6118 }
 0xeaa   :  { %v6170_v52 = vpop.permute.xlu1 %6169  ;;  %6876 = vst.msk [vmem:[%s15326_s23 + $0x78] sm:$0xff] %vm184_vm0, %v6812_v31  ;;  %v6390_v29 = vmul.f32 %v6119_v5, %v5974_v22  ;;  %v14388_v48 = vrot.slane %v6562_v35, %v16367_v2  ;;  %v5982_v22 = vld [vmem:[%s15552_s7 + $0xc8] sm:$0xff] }
 0xeab   :  { %6885 = vst.msk [vmem:[%s15326_s23 + $0xc0] sm:$0xff] %vm184_vm0, %v6821_v42  ;;  %v6399_v7 = vmul.f32 %v6170_v52, %v5983_v34  ;;  %v5991_v34 = vld [vmem:[%s15552_s7 + $0x110] sm:$0xff]  ;;  %v6539_v52 = vcombine.high %v14317_v62, %v14317_v62  ;;  %v5984_v62 = vld [vmem:[%s15552_s7 + $0xd8] sm:$0xff] }
 0xeac   :  { %v6814_v19 = vmul.f32 %v14236_v4, %v6390_v29  ;;  %v14349_v4 = vrot.slane %v6536_v24, %v16367_v2  ;;  %v8916_v29 = vpop.eup %8915 }
 0xead   :  { %v6823_v40 = vmul.f32 %v14328_v16, %v6399_v7  ;;  %v6130_v9 = vpop.permute.xlu0 %6129  ;;  %v6553_v0 = vrot.slane %v6539_v52, %v16375_v50 }
 0xeae   :  { %v6181_v36 = vpop.permute.xlu1 %6180  ;;  %6878 = vst.msk [vmem:[%s15326_s23 + $0x88] sm:$0xff] %vm184_vm0, %v6814_v19  ;;  %v6392_v28 = vmul.f32 %v6130_v9, %v5976_v55  ;;  %v6584_v55 = vcombine.high %v6562_v35, %v6562_v35 }
 0xeaf   :  { %6887 = vst.msk [vmem:[%s15326_s23 + $0xd0] sm:$0xff] %vm184_vm0, %v6823_v40  ;;  %v6401_v21 = vmul.f32 %v6181_v36, %v5985_v53  ;;  %v5993_v53 = vld [vmem:[%s15552_s7 + $0x120] sm:$0xff]  ;;  %v5795_v40 = vadd.f32 1.0, %v8916_v29  ;;  %v6569_v35 = vrot.slane %v6553_v0, %v16375_v50 }
 0xeb0   :  { %v6816_v63 = vmul.f32 %v14248_v56, %v6392_v28 }
 0xeb1   :  { %v6825_v14 = vmul.f32 %v14349_v4, %v6401_v21  ;;  %v6141_v25 = vpop.permute.xlu0 %6140  ;;  %8917 = vrcp.f32 %v5795_v40 }
 0xeb2   :  { %v6192_v39 = vpop.permute.xlu1 %6191  ;;  %6880 = vst.msk [vmem:[%s15326_s23 + $0x98] sm:$0xff] %vm184_vm0, %v6816_v63  ;;  %v6394_v37 = vmul.f32 %v6141_v25, %v5978_v59  ;;  %v5986_v59 = vld [vmem:[%s15552_s7 + $0xe8] sm:$0xff] }
 0xeb3   :  { %6889 = vst.msk [vmem:[%s15326_s23 + $0xe0] sm:$0xff] %vm184_vm0, %v6825_v14  ;;  %v6403_v56 = vmul.f32 %v6192_v39, %v5987_v20  ;;  %v5995_v20 = vld [vmem:[%s15552_s7 + $0x130] sm:$0xff] }
 0xeb4   :  { %v6818_v8 = vmul.f32 %v14261_v49, %v6394_v37  ;;  %v6576_v49 = vrot.slane %v6554_v61, %v16375_v50  ;;  %v6555_v61 = vcombine.high %v6553_v0, %v6553_v0 }
 0xeb5   :  { %v6827_v44 = vmul.f32 %v14369_v60, %v6403_v56  ;;  %v6152_v13 = vpop.permute.xlu0 %6151 }
 0xeb6   :  { %v6203_v6 = vpop.permute.xlu1 %6202  ;;  %6882 = vst.msk [vmem:[%s15326_s23 + $0xa8] sm:$0xff] %vm184_vm0, %v6818_v8  ;;  %v6396_v12 = vmul.f32 %v6152_v13, %v5980_v41  ;;  %v6586_v3 = vcombine.high %v6576_v49, %v6576_v49  ;;  %v5988_v41 = vld [vmem:[%s15552_s7 + $0xf8] sm:$0xff] }
 0xeb7   :  { %6891 = vst.msk [vmem:[%s15326_s23 + $0xf0] sm:$0xff] %vm184_vm0, %v6827_v44  ;;  %v6405_v1 = vmul.f32 %v6203_v6, %v5989_v17  ;;  %v5997_v17 = vld [vmem:[%s15552_s7 + $0x140] sm:$0xff] }
 0xeb8   :  { %v6820_v23 = vmul.f32 %v14285_v33, %v6396_v12  ;;  %v14410_v33 = vrot.slane %v6576_v49, %v16367_v2 }
 0xeb9   :  { %v6829_v31 = vmul.f32 %v14388_v48, %v6405_v1  ;;  %v6163_v42 = vpop.permute.xlu0 %6162  ;;  %v14469_v1 = vrot.slane %v6569_v35, %v16367_v2 }
 0xeba   :  { %v6214_v5 = vpop.permute.xlu1 %6213  ;;  %6884 = vst.msk [vmem:[%s15326_s23 + $0xb8] sm:$0xff] %vm184_vm0, %v6820_v23  ;;  %v6398_v7 = vmul.f32 %v6163_v42, %v5982_v22  ;;  %v5990_v22 = vld [vmem:[%s15552_s7 + $0x108] sm:$0xff] }
 0xebb   :  { %6893 = vst.msk [vmem:[%s15326_s23 + $0x100] sm:$0xff] %vm184_vm0, %v6829_v31  ;;  %v6407_v24 = vmul.f32 %v6214_v5, %v5991_v34  ;;  %v5999_v34 = vld [vmem:[%s15552_s7 + $0x150] sm:$0xff] }
 0xebc   :  { %v6822_v18 = vmul.f32 %v14304_v45, %v6398_v7  ;;  %v14430_v45 = vrot.slane %v6584_v55, %v16367_v2  ;;  %v5992_v55 = vld [vmem:[%s15552_s7 + $0x118] sm:$0xff] }
 0xebd   :  { %v6831_v19 = vmul.f32 %v14410_v33, %v6407_v24  ;;  %v6174_v9 = vpop.permute.xlu0 %6173  ;;  %v8918_v24 = vpop.eup %8917 }
 0xebe   :  { %v6225_v36 = vpop.permute.xlu1 %6224  ;;  %6886 = vst.msk [vmem:[%s15326_s23 + $0xc8] sm:$0xff] %vm184_vm0, %v6822_v18  ;;  %v6400_v28 = vmul.f32 %v6174_v9, %v5984_v62  ;;  %v6001_v62 = vld [vmem:[%s15552_s7 + $0x160] sm:$0xff] }
 0xebf   :  { %6895 = vst.msk [vmem:[%s15326_s23 + $0x110] sm:$0xff] %vm184_vm0, %v6831_v19  ;;  %v6409_v21 = vmul.f32 %v6225_v36, %v5993_v53 }
 0xec0   :  { %v6824_v63 = vmul.f32 %v14328_v16, %v6400_v28  ;;  %v14450_v16 = vrot.slane %v6586_v3, %v16367_v2  ;;  %v6595_v28 = vrot.slane %v8918_v24, %v16375_v50  ;;  %v6003_v3 = vld [vmem:[%s15552_s7 + $0x170] sm:$0xff] }
 0xec1   :  { %v6833_v14 = vmul.f32 %v14430_v45, %v6409_v21  ;;  %v6185_v25 = vpop.permute.xlu0 %6184  ;;  %v5994_v21 = vld [vmem:[%s15552_s7 + $0x128] sm:$0xff] }
 0xec2   :  { %v6236_v39 = vpop.permute.xlu1 %6235  ;;  %6888 = vst.msk [vmem:[%s15326_s23 + $0xd8] sm:$0xff] %vm184_vm0, %v6824_v63  ;;  %v6402_v37 = vmul.f32 %v6185_v25, %v5986_v59 }
 0xec3   :  { %6897 = vst.msk [vmem:[%s15326_s23 + $0x120] sm:$0xff] %vm184_vm0, %v6833_v14  ;;  %v6411_v56 = vmul.f32 %v6236_v39, %v5995_v20 }
 0xec4   :  { %v6826_v8 = vmul.f32 %v14349_v4, %v6402_v37  ;;  %v6583_v4 = vrot.slane %v6555_v61, %v16375_v50  ;;  %v6603_v37 = vcombine.high %v6595_v28, %v6595_v28  ;;  %v6005_v61 = vld [vmem:[%s15552_s7 + $0x180] sm:$0xff] }
 0xec5   :  { %v6835_v44 = vmul.f32 %v14450_v16, %v6411_v56  ;;  %v6196_v13 = vpop.permute.xlu0 %6195  ;;  %v5996_v56 = vld [vmem:[%s15552_s7 + $0x138] sm:$0xff] }
 0xec6   :  { %v6247_v6 = vpop.permute.xlu1 %6246  ;;  %6890 = vst.msk [vmem:[%s15326_s23 + $0xe8] sm:$0xff] %vm184_vm0, %v6826_v8  ;;  %v6404_v12 = vmul.f32 %v6196_v13, %v5988_v41  ;;  %v14489_v29 = vrot.slane %v6583_v4, %v16367_v2  ;;  %v6587_v9 = vcombine.high %v6583_v4, %v6583_v4  ;;  %v6007_v4 = vld [vmem:[%s15552_s7 + $0x190] sm:$0xff] }
 0xec7   :  { %6899 = vst.msk [vmem:[%s15326_s23 + $0x130] sm:$0xff] %vm184_vm0, %v6835_v44  ;;  %v6413_v49 = vmul.f32 %v6247_v6, %v5997_v17 }
 0xec8   :  { %v6828_v23 = vmul.f32 %v14369_v60, %v6404_v12  ;;  %v6585_v60 = vcombine.high %v6569_v35, %v6569_v35  ;;  %v14520_v14 = vrot.slane %v6587_v9, %v16367_v2 }
 0xec9   :  { %v6837_v31 = vmul.f32 %v14469_v1, %v6413_v49  ;;  %v6207_v42 = vpop.permute.xlu0 %6206  ;;  %v5998_v49 = vld [vmem:[%s15552_s7 + $0x148] sm:$0xff] }
 0xeca   :  { %v6258_v5 = vpop.permute.xlu1 %6257  ;;  %6892 = vst.msk [vmem:[%s15326_s23 + $0xf8] sm:$0xff] %vm184_vm0, %v6828_v23  ;;  %v6406_v52 = vmul.f32 %v6207_v42, %v5990_v22  ;;  %v14508_v0 = vrot.slane %v6585_v60, %v16367_v2  ;;  %v6588_v42 = vcombine.high %v8918_v24, %v8918_v24  ;;  %v6000_v60 = vld [vmem:[%s15552_s7 + $0x158] sm:$0xff]  ;;  %v6009_v24 = vld [vmem:[%s15552_s7 + $0x1a0] sm:$0xff] }
 0xecb   :  { %6901 = vst.msk [vmem:[%s15326_s23 + $0x140] sm:$0xff] %vm184_vm0, %v6837_v31  ;;  %v6415_v7 = vmul.f32 %v6258_v5, %v5999_v34 }
 0xecc   :  { %v6830_v53 = vmul.f32 %v14388_v48, %v6406_v52 }
 0xecd   :  { %v6839_v18 = vmul.f32 %v14489_v29, %v6415_v7  ;;  %v6218_v19 = vpop.permute.xlu0 %6217 }
 0xece   :  { %v6269_v40 = vpop.permute.xlu1 %6268  ;;  %6894 = vst.msk [vmem:[%s15326_s23 + $0x108] sm:$0xff] %vm184_vm0, %v6830_v53  ;;  %v6408_v36 = vmul.f32 %v6218_v19, %v5992_v55  ;;  %v6602_v19 = vrot.slane %v6588_v42, %v16375_v50 }
 0xecf   :  { %6903 = vst.msk [vmem:[%s15326_s23 + $0x150] sm:$0xff] %vm184_vm0, %v6839_v18  ;;  %v6417_v48 = vmul.f32 %v6269_v40, %v6001_v62 }
 0xed0   :  { %v6832_v59 = vmul.f32 %v14410_v33, %v6408_v36  ;;  %v6611_v33 = vrot.slane %v6595_v28, %v16375_v50  ;;  %v6011_v28 = vld [vmem:[%s15552_s7 + $0x1b0] sm:$0xff] }
 0xed1   :  { %v6841_v20 = vmul.f32 %v14508_v0, %v6417_v48  ;;  %v6229_v63 = vpop.permute.xlu0 %6228  ;;  %v6002_v48 = vld [vmem:[%s15552_s7 + $0x168] sm:$0xff] }
 0xed2   :  { %v6280_v25 = vpop.permute.xlu1 %6279  ;;  %6896 = vst.msk [vmem:[%s15326_s23 + $0x118] sm:$0xff] %vm184_vm0, %v6832_v59  ;;  %v6410_v39 = vmul.f32 %v6229_v63, %v5994_v21  ;;  %v14548_v6 = vrot.slane %v6611_v33, %v16367_v2  ;;  %v6633_v7 = vcombine.high %v6611_v33, %v6611_v33  ;;  %v6618_v63 = vrot.slane %v6602_v19, %v16375_v50  ;;  %v6004_v33 = vld [vmem:[%s15552_s7 + $0x178] sm:$0xff] }
 0xed3   :  { %6905 = vst.msk [vmem:[%s15326_s23 + $0x160] sm:$0xff] %vm184_vm0, %v6841_v20  ;;  %v6419_v35 = vmul.f32 %v6280_v25, %v6003_v3 }
 0xed4   :  { %v6834_v41 = vmul.f32 %v14430_v45, %v6410_v39  ;;  %v6625_v45 = vrot.slane %v6603_v37, %v16375_v50  ;;  %v14588_v9 = vrot.slane %v6633_v7, %v16367_v2  ;;  %v6013_v37 = vld [vmem:[%s15552_s7 + $0x1c0] sm:$0xff] }
 0xed5   :  { %v6843_v17 = vmul.f32 %v14520_v14, %v6419_v35  ;;  %v6240_v8 = vpop.permute.xlu0 %6239  ;;  %v6604_v35 = vcombine.high %v6602_v19, %v6602_v19 }
 0xed6   :  { %v6291_v44 = vpop.permute.xlu1 %6290  ;;  %6898 = vst.msk [vmem:[%s15326_s23 + $0x128] sm:$0xff] %vm184_vm0, %v6834_v41  ;;  %v6412_v13 = vmul.f32 %v6240_v8, %v5996_v56  ;;  %v14568_v52 = vrot.slane %v6625_v45, %v16367_v2  ;;  %v6635_v36 = vcombine.high %v6625_v45, %v6625_v45  ;;  %v6015_v45 = vld [vmem:[%s15552_s7 + $0x1d0] sm:$0xff] }
 0xed7   :  { %6907 = vst.msk [vmem:[%s15326_s23 + $0x170] sm:$0xff] %vm184_vm0, %v6843_v17  ;;  %v6421_v12 = vmul.f32 %v6291_v44, %v6005_v61  ;;  %v6752_v44 = vrot.slane %v6618_v63, %v16367_v2 }
 0xed8   :  { %v6836_v22 = vmul.f32 %v14450_v16, %v6412_v13  ;;  %v6748_v39 = vrot.slane %v6635_v36, %v16367_v2 }
 0xed9   :  { %v6845_v34 = vmul.f32 %v14548_v6, %v6421_v12  ;;  %v6251_v23 = vpop.permute.xlu0 %6250  ;;  %v6632_v12 = vrot.slane %v6604_v35, %v16375_v50  ;;  %v6014_v35 = vld [vmem:[%s15552_s7 + $0x1c8] sm:$0xff] }
 0xeda   :  { %v6302_v31 = vpop.permute.xlu1 %6301  ;;  %6900 = vst.msk [vmem:[%s15326_s23 + $0x138] sm:$0xff] %vm184_vm0, %v6836_v22  ;;  %v6414_v5 = vmul.f32 %v6251_v23, %v5998_v49 }
 0xedb   :  { %6909 = vst.msk [vmem:[%s15326_s23 + $0x180] sm:$0xff] %vm184_vm0, %v6845_v34  ;;  %v6423_v16 = vmul.f32 %v6302_v31, %v6007_v4  ;;  %v6756_v31 = vrot.slane %v6632_v12, %v16367_v2  ;;  %v6636_v19 = vcombine.high %v6632_v12, %v6632_v12 }
 0xedc   :  { %v6838_v55 = vmul.f32 %v14469_v1, %v6414_v5  ;;  %v6634_v5 = vcombine.high %v6618_v63, %v6618_v63 }
 0xedd   :  { %v6847_v62 = vmul.f32 %v14568_v52, %v6423_v16  ;;  %v6262_v53 = vpop.permute.xlu0 %6261  ;;  %v6017_v16 = vld [vmem:[%s15552_s7 + $0x1e0] sm:$0xff] }
 0xede   :  { %v6313_v18 = vpop.permute.xlu1 %6312  ;;  %6902 = vst.msk [vmem:[%s15326_s23 + $0x148] sm:$0xff] %vm184_vm0, %v6838_v55  ;;  %v6416_v40 = vmul.f32 %v6262_v53, %v6000_v60  ;;  %v6760_v53 = vrot.slane %v6634_v5, %v16367_v2 }
 0xedf   :  { %6911 = vst.msk [vmem:[%s15326_s23 + $0x190] sm:$0xff] %vm184_vm0, %v6847_v62  ;;  %v6425_v1 = vmul.f32 %v6313_v18, %v6009_v24 }
 0xee0   :  { %v6840_v21 = vmul.f32 %v14489_v29, %v6416_v40  ;;  %v6019_v40 = vld [vmem:[%s15552_s7 + $0x1f0] sm:$0xff] }
 0xee1   :  { %v6849_v3 = vmul.f32 %v14588_v9, %v6425_v1  ;;  %v6273_v59 = vpop.permute.xlu0 %6272 }
 0xee2   :  { %v6324_v20 = vpop.permute.xlu1 %6323  ;;  %6904 = vst.msk [vmem:[%s15326_s23 + $0x158] sm:$0xff] %vm184_vm0, %v6840_v21  ;;  %v6418_v25 = vmul.f32 %v6273_v59, %v6002_v48 }
 0xee3   :  { %6913 = vst.msk [vmem:[%s15326_s23 + $0x1a0] sm:$0xff] %vm184_vm0, %v6849_v3  ;;  %v6427_v29 = vmul.f32 %v6324_v20, %v6011_v28  ;;  %v6764_v3 = vrot.slane %v6636_v19, %v16367_v2 }
 0xee4   :  { %v6842_v56 = vmul.f32 %v14508_v0, %v6418_v25  ;;  %v6006_v0 = vld [vmem:[%s15552_s7 + $0x188] sm:$0xff] }
 0xee5   :  { %v6851_v61 = vmul.f32 %v6748_v39, %v6427_v29  ;;  %v6284_v41 = vpop.permute.xlu0 %6283 }
 0xee6   :  { %v6335_v17 = vpop.permute.xlu1 %6334  ;;  %6906 = vst.msk [vmem:[%s15326_s23 + $0x168] sm:$0xff] %vm184_vm0, %v6842_v56  ;;  %v6420_v8 = vmul.f32 %v6284_v41, %v6004_v33  ;;  %v6016_v56 = vld [vmem:[%s15552_s7 + $0x1d8] sm:$0xff] }
 0xee7   :  { %6915 = vst.msk [vmem:[%s15326_s23 + $0x1b0] sm:$0xff] %vm184_vm0, %v6851_v61  ;;  %v6429_v13 = vmul.f32 %v6335_v17, %v6013_v37 }
 0xee8   :  { %v6844_v49 = vmul.f32 %v14520_v14, %v6420_v8  ;;  %v6008_v14 = vld [vmem:[%s15552_s7 + $0x198] sm:$0xff] }
 0xee9   :  { %v6853_v4 = vmul.f32 %v6752_v44, %v6429_v13  ;;  %v6295_v22 = vpop.permute.xlu0 %6294 }
 0xeea   :  { %v6346_v34 = vpop.permute.xlu1 %6345  ;;  %6908 = vst.msk [vmem:[%s15326_s23 + $0x178] sm:$0xff] %vm184_vm0, %v6844_v49  ;;  %v6422_v23 = vmul.f32 %v6295_v22, %v6006_v0 }
 0xeeb   :  { %6917 = vst.msk [vmem:[%s15326_s23 + $0x1c0] sm:$0xff] %vm184_vm0, %v6853_v4  ;;  %v6431_v42 = vmul.f32 %v6346_v34, %v6015_v45 }
 0xeec   :  { %v6846_v7 = vmul.f32 %v14548_v6, %v6422_v23  ;;  %v6010_v6 = vld [vmem:[%s15552_s7 + $0x1a8] sm:$0xff] }
 0xeed   :  { %v6855_v60 = vmul.f32 %v6756_v31, %v6431_v42  ;;  %v6306_v24 = vpop.permute.xlu0 %6305 }
 0xeee   :  { %v6357_v55 = vpop.permute.xlu1 %6356  ;;  %6910 = vst.msk [vmem:[%s15326_s23 + $0x188] sm:$0xff] %vm184_vm0, %v6846_v7  ;;  %v6424_v62 = vmul.f32 %v6306_v24, %v6008_v14 }
 0xeef   :  { %6919 = vst.msk [vmem:[%s15326_s23 + $0x1d0] sm:$0xff] %vm184_vm0, %v6855_v60  ;;  %v6433_v18 = vmul.f32 %v6357_v55, %v6017_v16 }
 0xef0   :  { %v6848_v1 = vmul.f32 %v14568_v52, %v6424_v62  ;;  %v6012_v52 = vld [vmem:[%s15552_s7 + $0x1b8] sm:$0xff] }
 0xef1   :  { %v6857_v36 = vmul.f32 %v6760_v53, %v6433_v18  ;;  %v6317_v48 = vpop.permute.xlu0 %6316 }
 0xef2   :  { %v6368_v28 = vpop.permute.xlu1 %6367  ;;  %6912 = vst.msk [vmem:[%s15326_s23 + $0x198] sm:$0xff] %vm184_vm0, %v6848_v1  ;;  %v6426_v21 = vmul.f32 %v6317_v48, %v6010_v6 }
 0xef3   :  { %6921 = vst.msk [vmem:[%s15326_s23 + $0x1e0] sm:$0xff] %vm184_vm0, %v6857_v36  ;;  %v6435_v59 = vmul.f32 %v6368_v28, %v6019_v40 }
 0xef4   :  { %v6850_v20 = vmul.f32 %v14588_v9, %v6426_v21 }
 0xef5   :  { %v6859_v63 = vmul.f32 %v6764_v3, %v6435_v59  ;;  %v6328_v25 = vpop.permute.xlu0 %6327 }
 0xef6   :  { %6914 = vst.msk [vmem:[%s15326_s23 + $0x1a8] sm:$0xff] %vm184_vm0, %v6850_v20  ;;  %v6428_v29 = vmul.f32 %v6328_v25, %v6012_v52 }
 0xef7   :  { %6923 = vst.msk [vmem:[%s15326_s23 + $0x1f0] sm:$0xff] %vm184_vm0, %v6859_v63 }
 0xef8   :  { %v6852_v33 = vmul.f32 %v6748_v39, %v6428_v29  ;;  %v6018_v39 = vld [vmem:[%s15552_s7 + $0x1e8] sm:$0xff] }
 0xef9   :  { %v6339_v37 = vpop.permute.xlu0 %6338 }
 0xefa   :  { %6916 = vst.msk [vmem:[%s15326_s23 + $0x1b8] sm:$0xff] %vm184_vm0, %v6852_v33  ;;  %v6430_v9 = vmul.f32 %v6339_v37, %v6014_v35 }
 0xefc   :  { %v6854_v61 = vmul.f32 %v6752_v44, %v6430_v9  ;;  %v6020_v44 = vld [vmem:[%s15552_s7 + $0x1f8] sm:$0xff] }
 0xefd   :  { %v6350_v41 = vpop.permute.xlu0 %6349 }
 0xefe   :  { %6918 = vst.msk [vmem:[%s15326_s23 + $0x1c8] sm:$0xff] %vm184_vm0, %v6854_v61  ;;  %v6432_v17 = vmul.f32 %v6350_v41, %v6016_v56 }
 0xf00   :  { %v6856_v8 = vmul.f32 %v6756_v31, %v6432_v17 }
 0xf01   :  { %v6361_v13 = vpop.permute.xlu0 %6360 }
 0xf02   :  { %6920 = vst.msk [vmem:[%s15326_s23 + $0x1d8] sm:$0xff] %vm184_vm0, %v6856_v8  ;;  %v6434_v12 = vmul.f32 %v6361_v13, %v6018_v39 }
 0xf04   :  { %v6858_v0 = vmul.f32 %v6760_v53, %v6434_v12 }
 0xf05   :  { %v6372_v45 = vpop.permute.xlu0 %6371 }
 0xf06   :  { %6922 = vst.msk [vmem:[%s15326_s23 + $0x1e8] sm:$0xff] %vm184_vm0, %v6858_v0  ;;  %v6436_v49 = vmul.f32 %v6372_v45, %v6020_v44 }
 0xf08   :  { %v6860_v4 = vmul.f32 %v6764_v3, %v6436_v49 }
 0xf0a   :  { %6924 = vst.msk [vmem:[%s15326_s23 + $0x1f8] sm:$0xff] %vm184_vm0, %v6860_v4 }
 0xf37   :  { %v14717_v22 = vpop.f32.mrb[10].mxu0  ;;  %v8812_v34 = vpop.f32.mrb[12].mxu1 }
 0xf38   :  { %v7425_v23 = vadd.f32 %v8812_v34, %v14083_v47  ;;  %v14720_v31 = vpop.f32.mrb[11].mxu0  ;;  %v7419_v42 = vpop.f32.mrb[13].mxu1  ;;  %v7273_v8 = vadd.f32 %v14717_v22, %v14128_v51 }
 0xf39   :  { %v7420_v62 = vadd.f32 %v7419_v42, %v14048_v15 }
 0xf3a   :  { %v8549_v5 = vmul.f32 -1.442695, %v7425_v23  ;;  %v8541_v44 = vmul.f32 -1.442695, %v7273_v8 }
 0xf3b   :  { %v14722_v14 = vpop.f32.mrb[12].mxu0  ;;  %v8815_v16 = vpop.f32.mrb[14].mxu1  ;;  %v8548_v53 = vmul.f32 -1.442695, %v7420_v62 }
 0xf3c   :  { %v14724_v7 = vpop.f32.mrb[13].mxu0  ;;  %v7429_v60 = vpop.f32.mrb[15].mxu1  ;;  %8919 = vpow2.f32 %v8549_v5  ;;  %v7435_v21 = vadd.f32 %v8815_v16, %v14092_v54 }
 0xf3d   :  { %v7430_v9 = vadd.f32 %v7429_v60, %v14051_v11  ;;  %v7268_v60 = vadd.f32 %v14720_v31, %v14063_v46 }
 0xf3e   :  { %v8551_v52 = vmul.f32 -1.442695, %v7435_v21 }
 0xf3f   :  { %v8550_v61 = vmul.f32 -1.442695, %v7430_v9  ;;  %v8540_v62 = vmul.f32 -1.442695, %v7268_v60 }
 0xf46   :  { %v8920_v24 = vpop.eup %8919 }
 0xf47   :  { %v7451_v55 = vadd.f32 1.0, %v8920_v24 }
 0xf49   :  { %8921 = vrcp.f32 %v7451_v55 }
 0xf4a   :  { %8923 = vpow2.f32 %v8548_v53 }
 0xf53   :  { %v8922_v18 = vpop.eup %8921 }
 0xf54   :  { %v7617_v47 = vrot.slane %v8922_v18, %v16367_v2  ;;  %v7628_v19 = vrot.slane %v8922_v18, %v16368_v43  ;;  %v7639_v6 = vrot.slane %v8922_v18, %v16369_v57  ;;  %v8924_v40 = vpop.eup %8923  ;;  %v7650_v1 = vrot.slane %v8922_v18, %v16370_v32 }
 0xf55   :  { %v7450_v15 = vadd.f32 1.0, %v8924_v40  ;;  %v7661_v36 = vrot.slane %v8922_v18, %v16371_v38  ;;  %v7672_v48 = vrot.slane %v8922_v18, %v16372_v30  ;;  %v7683_v28 = vrot.slane %v8922_v18, %v16373_v10 }
 0xf56   :  { %7623 = vbcast.lane.b32.xlu0 %v7617_v47, 264  ;;  %7619 = vbcast.lane.b32.xlu1 %v7617_v47, 256  ;;  %v7694_v3 = vrot.slane %v8922_v18, %v16374_v27 }
 0xf57   :  { %8925 = vrcp.f32 %v7450_v15  ;;  %v8571_v15 = vld [vmem:[%s15552_s7 + $0x298] sm:$0xff] }
 0xf58   :  { %8927 = vpow2.f32 %v8551_v52 }
 0xf5a   :  { %7634 = vbcast.lane.b32.xlu0 %v7628_v19, 264  ;;  %7630 = vbcast.lane.b32.xlu1 %v7628_v19, 256 }
 0xf5e   :  { %7645 = vbcast.lane.b32.xlu0 %v7639_v6, 264  ;;  %7641 = vbcast.lane.b32.xlu1 %v7639_v6, 256 }
 0xf61   :  { %v8926_v59 = vpop.eup %8925 }
 0xf62   :  { %7656 = vbcast.lane.b32.xlu0 %v7650_v1, 264  ;;  %7652 = vbcast.lane.b32.xlu1 %v7650_v1, 256  ;;  %v7529_v20 = vrot.slane %v8926_v59, %v16367_v2  ;;  %v7540_v63 = vrot.slane %v8926_v59, %v16368_v43  ;;  %v7551_v25 = vrot.slane %v8926_v59, %v16369_v57  ;;  %v8928_v54 = vpop.eup %8927 }
 0xf63   :  { %v7562_v29 = vrot.slane %v8926_v59, %v16370_v32  ;;  %v7453_v35 = vadd.f32 1.0, %v8928_v54  ;;  %v7573_v33 = vrot.slane %v8926_v59, %v16371_v38  ;;  %v7584_v37 = vrot.slane %v8926_v59, %v16372_v30 }
 0xf64   :  { %v7595_v56 = vrot.slane %v8926_v59, %v16373_v10  ;;  %v7606_v41 = vrot.slane %v8926_v59, %v16374_v27 }
 0xf65   :  { %8929 = vrcp.f32 %v7453_v35  ;;  %v8572_v35 = vld [vmem:[%s15552_s7 + $0x2a0] sm:$0xff] }
 0xf66   :  { %7667 = vbcast.lane.b32.xlu0 %v7661_v36, 264  ;;  %7663 = vbcast.lane.b32.xlu1 %v7661_v36, 256  ;;  %8931 = vpow2.f32 %v8550_v61  ;;  %v8570_v36 = vld [vmem:[%s15552_s7 + $0x290] sm:$0xff] }
 0xf67   :  { %8933 = vpow2.f32 %v8541_v44 }
 0xf6a   :  { %7678 = vbcast.lane.b32.xlu0 %v7672_v48, 264  ;;  %7674 = vbcast.lane.b32.xlu1 %v7672_v48, 256 }
 0xf6e   :  { %7689 = vbcast.lane.b32.xlu0 %v7683_v28, 264  ;;  %7685 = vbcast.lane.b32.xlu1 %v7683_v28, 256 }
 0xf6f   :  { %v14745_v17 = vpop.eup %8929 }
 0xf70   :  { %v7793_v39 = vrot.slane %v14745_v17, %v16367_v2  ;;  %v7804_v11 = vrot.slane %v14745_v17, %v16368_v43  ;;  %v8932_v13 = vpop.eup %8931  ;;  %v7815_v12 = vrot.slane %v14745_v17, %v16369_v57  ;;  %v7826_v45 = vrot.slane %v14745_v17, %v16370_v32 }
 0xf71   :  { %v7452_v0 = vadd.f32 1.0, %v8932_v13  ;;  %v7837_v51 = vrot.slane %v14745_v17, %v16371_v38  ;;  %v7848_v49 = vrot.slane %v14745_v17, %v16372_v30  ;;  %v8934_v4 = vpop.eup %8933  ;;  %v7859_v22 = vrot.slane %v14745_v17, %v16373_v10 }
 0xf72   :  { %7700 = vbcast.lane.b32.xlu0 %v7694_v3, 264  ;;  %7696 = vbcast.lane.b32.xlu1 %v7694_v3, 256  ;;  %v7299_v23 = vadd.f32 1.0, %v8934_v4 }
 0xf73   :  { %8935 = vrcp.f32 %v7452_v0 }
 0xf74   :  { %8937 = vrcp.f32 %v7299_v23 }
 0xf75   :  { %8939 = vpow2.f32 %v8540_v62 }
 0xf76   :  { %7535 = vbcast.lane.b32.xlu0 %v7529_v20, 264  ;;  %7531 = vbcast.lane.b32.xlu1 %v7529_v20, 256 }
 0xf7a   :  { %7546 = vbcast.lane.b32.xlu0 %v7540_v63, 264  ;;  %7542 = vbcast.lane.b32.xlu1 %v7540_v63, 256 }
 0xf7d   :  { %v8936_v34 = vpop.eup %8935 }
 0xf7e   :  { %7557 = vbcast.lane.b32.xlu0 %v7551_v25, 264  ;;  %7553 = vbcast.lane.b32.xlu1 %v7551_v25, 256  ;;  %v7705_v42 = vrot.slane %v8936_v34, %v16367_v2  ;;  %v7716_v5 = vrot.slane %v8936_v34, %v16368_v43  ;;  %v7727_v16 = vrot.slane %v8936_v34, %v16369_v57  ;;  %v8938_v55 = vpop.eup %8937 }
 0xf7f   :  { %v7738_v24 = vrot.slane %v8936_v34, %v16370_v32  ;;  %v7749_v53 = vrot.slane %v8936_v34, %v16371_v38  ;;  %v8002_v18 = vrot.slane %v8938_v55, %v16375_v50  ;;  %v7760_v43 = vrot.slane %v8936_v34, %v16372_v30  ;;  %v8569_v32 = vld [vmem:[%s15552_s7 + $0x288] sm:$0xff]  ;;  %v8568_v38 = vld [vmem:[%s15552_s7 + $0x280] sm:$0xff]  ;;  %v8940_v21 = vpop.eup %8939 }
 0xf80   :  { %v7771_v19 = vrot.slane %v8936_v34, %v16373_v10  ;;  %v7782_v59 = vrot.slane %v8936_v34, %v16374_v27  ;;  %v7995_v52 = vcombine.high %v8938_v55, %v8938_v55 }
 0xf81   :  { %v8018_v57 = vrot.slane %v8002_v18, %v16375_v50  ;;  %v8010_v46 = vcombine.high %v8002_v18, %v8002_v18 }
 0xf82   :  { %7568 = vbcast.lane.b32.xlu0 %v7562_v29, 264  ;;  %7564 = vbcast.lane.b32.xlu1 %v7562_v29, 256  ;;  %v8573_v29 = vld [vmem:[%s15552_s7 + $0x2a8] sm:$0xff] }
 0xf83   :  { %v8177_v6 = vrot.slane %v8018_v57, %v16367_v2  ;;  %v8032_v1 = vrot.slane %v8010_v46, %v16375_v50  ;;  %v8040_v54 = vcombine.high %v8018_v57, %v8018_v57  ;;  %v7283_v57 = vadd.f32 %v14722_v14, %v14144_v58  ;;  %v8579_v46 = vld [vmem:[%s15552_s7 + $0x2d8] sm:$0xff] }
 0xf85   :  { %v8181_v20 = vrot.slane %v8032_v1, %v16367_v2 }
 0xf86   :  { %7579 = vbcast.lane.b32.xlu0 %v7573_v33, 264  ;;  %7575 = vbcast.lane.b32.xlu1 %v7573_v33, 256  ;;  %v7298_v33 = vadd.f32 1.0, %v8940_v21 }
 0xf88   :  { %8941 = vrcp.f32 %v7298_v33 }
 0xf8a   :  { %7590 = vbcast.lane.b32.xlu0 %v7584_v37, 264  ;;  %7586 = vbcast.lane.b32.xlu1 %v7584_v37, 256 }
 0xf8e   :  { %7601 = vbcast.lane.b32.xlu0 %v7595_v56, 264  ;;  %7597 = vbcast.lane.b32.xlu1 %v7595_v56, 256 }
 0xf92   :  { %7612 = vbcast.lane.b32.xlu0 %v7606_v41, 264  ;;  %7608 = vbcast.lane.b32.xlu1 %v7606_v41, 256  ;;  %v7870_v41 = vrot.slane %v14745_v17, %v16374_v27  ;;  %v8575_v27 = vld [vmem:[%s15552_s7 + $0x2b8] sm:$0xff]  ;;  %v8574_v17 = vld [vmem:[%s15552_s7 + $0x2b0] sm:$0xff] }
 0xf96   :  { %7799 = vbcast.lane.b32.xlu0 %v7793_v39, 264  ;;  %7795 = vbcast.lane.b32.xlu1 %v7793_v39, 256  ;;  %v8009_v39 = vrot.slane %v7995_v52, %v16375_v50 }
 0xf98   :  { %v8011_v23 = vcombine.high %v8009_v39, %v8009_v39 }
 0xf9a   :  { %7810 = vbcast.lane.b32.xlu0 %v7804_v11, 264  ;;  %7806 = vbcast.lane.b32.xlu1 %v7804_v11, 256  ;;  %v8185_v11 = vrot.slane %v8040_v54, %v16367_v2  ;;  %v8582_v54 = vld [vmem:[%s15552_s7 + $0x2f0] sm:$0xff] }
 0xf9e   :  { %7821 = vbcast.lane.b32.xlu0 %v7815_v12, 264  ;;  %7817 = vbcast.lane.b32.xlu1 %v7815_v12, 256  ;;  %v8042_v12 = vcombine.high %v8032_v1, %v8032_v1  ;;  %v8543_v1 = vmul.f32 -1.442695, %v7283_v57 }
 0xfa0   :  { %v8189_v4 = vrot.slane %v8042_v12, %v16367_v2  ;;  %8943 = vpow2.f32 %v8543_v1 }
 0xfa2   :  { %7832 = vbcast.lane.b32.xlu0 %v7826_v45, 264  ;;  %7828 = vbcast.lane.b32.xlu1 %v7826_v45, 256 }
 0xfa6   :  { %7843 = vbcast.lane.b32.xlu0 %v7837_v51, 264  ;;  %7839 = vbcast.lane.b32.xlu1 %v7837_v51, 256 }
 0xfaa   :  { %7854 = vbcast.lane.b32.xlu0 %v7848_v49, 264  ;;  %7850 = vbcast.lane.b32.xlu1 %v7848_v49, 256  ;;  %v8025_v49 = vrot.slane %v8009_v39, %v16375_v50 }
 0xfac   :  { %v8193_v62 = vrot.slane %v8025_v49, %v16367_v2 }
 0xfae   :  { %7865 = vbcast.lane.b32.xlu0 %v7859_v22, 264  ;;  %7861 = vbcast.lane.b32.xlu1 %v7859_v22, 256 }
 0xfb2   :  { %7711 = vbcast.lane.b32.xlu0 %v7705_v42, 264  ;;  %7707 = vbcast.lane.b32.xlu1 %v7705_v42, 256  ;;  %v8577_v42 = vld [vmem:[%s15552_s7 + $0x2c8] sm:$0xff] }
 0xfb6   :  { %7722 = vbcast.lane.b32.xlu0 %v7716_v5, 264  ;;  %7718 = vbcast.lane.b32.xlu1 %v7716_v5, 256  ;;  %v8576_v5 = vld [vmem:[%s15552_s7 + $0x2c0] sm:$0xff] }
 0xfba   :  { %7733 = vbcast.lane.b32.xlu0 %v7727_v16, 264  ;;  %7729 = vbcast.lane.b32.xlu1 %v7727_v16, 256 }
 0xfbe   :  { %7744 = vbcast.lane.b32.xlu0 %v7738_v24, 264  ;;  %7740 = vbcast.lane.b32.xlu1 %v7738_v24, 256 }
 0xfc2   :  { %7755 = vbcast.lane.b32.xlu0 %v7749_v53, 264  ;;  %7751 = vbcast.lane.b32.xlu1 %v7749_v53, 256 }
 0xfc6   :  { %7766 = vbcast.lane.b32.xlu0 %v7760_v43, 264  ;;  %7762 = vbcast.lane.b32.xlu1 %v7760_v43, 256  ;;  %v8039_v43 = vrot.slane %v8011_v23, %v16375_v50 }
 0xfc8   :  { %v7624_v31 = vpop.permute.xlu0 %7623  ;;  %v7620_v47 = vpop.permute.xlu1 %7619  ;;  %v8197_v58 = vrot.slane %v8039_v43, %v16367_v2 }
 0xfc9   :  { %v7895_v30 = vmul.f32 %v8569_v32, %v7624_v31  ;;  %v7894_v40 = vmul.f32 %v8568_v38, %v7620_v47  ;;  %v8578_v32 = vld [vmem:[%s15552_s7 + $0x2d0] sm:$0xff] }
 0xfca   :  { %7777 = vbcast.lane.b32.xlu0 %v7771_v19, 264  ;;  %7773 = vbcast.lane.b32.xlu1 %v7771_v19, 256 }
 0xfcb   :  { %v8319_v48 = vmul.f32 %v8177_v6, %v7895_v30  ;;  %v8318_v28 = vmul.f32 %v8177_v6, %v7894_v40  ;;  %v14856_v6 = vpop.eup %8941  ;;  %v8041_v40 = vcombine.high %v8025_v49, %v8025_v49  ;;  %v8555_v49 = vld [vmem:[%s15552_s7 + $0x218] sm:$0xff] }
 0xfcc   :  { %v7635_v10 = vpop.permute.xlu0 %7634  ;;  %v7631_v3 = vpop.permute.xlu1 %7630 }
 0xfcd   :  { %8633 = vst.msk [vmem:[%s15326_s23 + $0x288] sm:$0xff] %vm184_vm0, %v8319_v48  ;;  %8632 = vst.msk [vmem:[%s15326_s23 + $0x280] sm:$0xff] %vm184_vm0, %v8318_v28  ;;  %v7897_v63 = vmul.f32 %v8571_v15, %v7635_v10  ;;  %v7896_v25 = vmul.f32 %v8570_v36, %v7631_v3  ;;  %v8581_v15 = vld [vmem:[%s15552_s7 + $0x2e8] sm:$0xff]  ;;  %v8580_v36 = vld [vmem:[%s15552_s7 + $0x2e0] sm:$0xff]  ;;  %v7953_v3 = vrot.slane %v14856_v6, %v16375_v50  ;;  %v8944_v23 = vpop.eup %8943 }
 0xfce   :  { %7788 = vbcast.lane.b32.xlu0 %v7782_v59, 264  ;;  %7784 = vbcast.lane.b32.xlu1 %v7782_v59, 256  ;;  %v8201_v59 = vrot.slane %v8041_v40, %v16367_v2 }
 0xfcf   :  { %v8321_v37 = vmul.f32 %v8181_v20, %v7897_v63  ;;  %v8320_v9 = vmul.f32 %v8181_v20, %v7896_v25  ;;  %v8043_v63 = vcombine.high %v8039_v43, %v8039_v43  ;;  %v8583_v25 = vld [vmem:[%s15552_s7 + $0x2f8] sm:$0xff]  ;;  %v7961_v39 = vcombine.high %v7953_v3, %v7953_v3 }
 0xfd0   :  { %v7646_v56 = vpop.permute.xlu0 %7645  ;;  %v7642_v61 = vpop.permute.xlu1 %7641  ;;  %v7301_v43 = vadd.f32 1.0, %v8944_v23 }
 0xfd1   :  { %8635 = vst.msk [vmem:[%s15326_s23 + $0x298] sm:$0xff] %vm184_vm0, %v8321_v37  ;;  %8634 = vst.msk [vmem:[%s15326_s23 + $0x290] sm:$0xff] %vm184_vm0, %v8320_v9  ;;  %v7899_v8 = vmul.f32 %v8573_v29, %v7646_v56  ;;  %v7898_v13 = vmul.f32 %v8572_v35, %v7642_v61  ;;  %v7969_v9 = vrot.slane %v7953_v3, %v16375_v50 }
 0xfd2   :  { %7876 = vbcast.lane.b32.xlu0 %v7870_v41, 264  ;;  %7872 = vbcast.lane.b32.xlu1 %v7870_v41, 256  ;;  %v8205_v56 = vrot.slane %v8043_v63, %v16367_v2  ;;  %8945 = vrcp.f32 %v7301_v43 }
 0xfd3   :  { %v8323_v44 = vmul.f32 %v8185_v11, %v7899_v8  ;;  %v8322_v0 = vmul.f32 %v8185_v11, %v7898_v13  ;;  %v8553_v11 = vld [vmem:[%s15552_s7 + $0x208] sm:$0xff]  ;;  %v8552_v8 = vld [vmem:[%s15552_s7 + $0x200] sm:$0xff] }
 0xfd4   :  { %v7657_v45 = vpop.permute.xlu0 %7656  ;;  %v7653_v51 = vpop.permute.xlu1 %7652 }
 0xfd5   :  { %8637 = vst.msk [vmem:[%s15326_s23 + $0x2a8] sm:$0xff] %vm184_vm0, %v8323_v44  ;;  %8636 = vst.msk [vmem:[%s15326_s23 + $0x2a0] sm:$0xff] %vm184_vm0, %v8322_v0  ;;  %v7901_v22 = vmul.f32 %v8575_v27, %v7657_v45  ;;  %v7900_v34 = vmul.f32 %v8574_v17, %v7653_v51  ;;  %v8145_v44 = vrot.slane %v7969_v9, %v16367_v2 }
 0xfd6   :  { %v7983_v51 = vrot.slane %v7961_v39, %v16375_v50 }
 0xfd7   :  { %v8325_v16 = vmul.f32 %v8189_v4, %v7901_v22  ;;  %v8324_v60 = vmul.f32 %v8189_v4, %v7900_v34  ;;  %v8554_v4 = vld [vmem:[%s15552_s7 + $0x210] sm:$0xff] }
 0xfd8   :  { %v7668_v24 = vpop.permute.xlu0 %7667  ;;  %v7664_v55 = vpop.permute.xlu1 %7663 }
 0xfd9   :  { %8639 = vst.msk [vmem:[%s15326_s23 + $0x2b8] sm:$0xff] %vm184_vm0, %v8325_v16  ;;  %8638 = vst.msk [vmem:[%s15326_s23 + $0x2b0] sm:$0xff] %vm184_vm0, %v8324_v60  ;;  %v7903_v53 = vmul.f32 %v8577_v42, %v7668_v24  ;;  %v7902_v18 = vmul.f32 %v8576_v5, %v7664_v55  ;;  %v7946_v16 = vcombine.high %v14856_v6, %v14856_v6 }
 0xfda   :  { %v8149_v60 = vrot.slane %v7983_v51, %v16367_v2 }
 0xfdb   :  { %v8327_v38 = vmul.f32 %v8193_v62, %v7903_v53  ;;  %v8326_v31 = vmul.f32 %v8193_v62, %v7902_v18  ;;  %v7991_v62 = vcombine.high %v7969_v9, %v7969_v9  ;;  %v8557_v53 = vld [vmem:[%s15552_s7 + $0x228] sm:$0xff]  ;;  %v8556_v18 = vld [vmem:[%s15552_s7 + $0x220] sm:$0xff]  ;;  %v8563_v9 = vld [vmem:[%s15552_s7 + $0x258] sm:$0xff] }
 0xfdc   :  { %v7679_v47 = vpop.permute.xlu0 %7678  ;;  %v7675_v19 = vpop.permute.xlu1 %7674 }
 0xfdd   :  { %8641 = vst.msk [vmem:[%s15326_s23 + $0x2c8] sm:$0xff] %vm184_vm0, %v8327_v38  ;;  %8640 = vst.msk [vmem:[%s15326_s23 + $0x2c0] sm:$0xff] %vm184_vm0, %v8326_v31  ;;  %v7905_v14 = vmul.f32 %v8579_v46, %v7679_v47  ;;  %v7904_v30 = vmul.f32 %v8578_v32, %v7675_v19  ;;  %v7960_v31 = vrot.slane %v7946_v16, %v16375_v50  ;;  %v8567_v16 = vld [vmem:[%s15552_s7 + $0x278] sm:$0xff] }
 0xfde   :  { %v8153_v47 = vrot.slane %v7991_v62, %v16367_v2 }
 0xfdf   :  { %v8329_v48 = vmul.f32 %v8197_v58, %v7905_v14  ;;  %v8328_v28 = vmul.f32 %v8197_v58, %v7904_v30  ;;  %v7993_v58 = vcombine.high %v7983_v51, %v7983_v51  ;;  %v8559_v14 = vld [vmem:[%s15552_s7 + $0x238] sm:$0xff]  ;;  %v8558_v30 = vld [vmem:[%s15552_s7 + $0x230] sm:$0xff]  ;;  %v7962_v3 = vcombine.high %v7960_v31, %v7960_v31 }
 0xfe0   :  { %v7690_v21 = vpop.permute.xlu0 %7689  ;;  %v7686_v10 = vpop.permute.xlu1 %7685 }
 0xfe1   :  { %8643 = vst.msk [vmem:[%s15326_s23 + $0x2d8] sm:$0xff] %vm184_vm0, %v8329_v48  ;;  %8642 = vst.msk [vmem:[%s15326_s23 + $0x2d0] sm:$0xff] %vm184_vm0, %v8328_v28  ;;  %v7907_v52 = vmul.f32 %v8581_v15, %v7690_v21  ;;  %v7906_v20 = vmul.f32 %v8580_v36, %v7686_v10  ;;  %v7976_v48 = vrot.slane %v7960_v31, %v16375_v50  ;;  %v8600_v31 = vld [vmem:[%s15552_s7 + $0x380] sm:$0xff] }
 0xfe2   :  { %v8157_v28 = vrot.slane %v7993_v58, %v16367_v2 }
 0xfe3   :  { %v8331_v29 = vmul.f32 %v8201_v59, %v7907_v52  ;;  %v8330_v35 = vmul.f32 %v8201_v59, %v7906_v20  ;;  %v7278_v59 = vadd.f32 %v14724_v7, %v14085_v26  ;;  %v8561_v52 = vld [vmem:[%s15552_s7 + $0x248] sm:$0xff]  ;;  %v8560_v20 = vld [vmem:[%s15552_s7 + $0x240] sm:$0xff]  ;;  %v8161_v26 = vrot.slane %v7976_v48, %v16367_v2 }
 0xfe4   :  { %v7701_v33 = vpop.permute.xlu0 %7700  ;;  %v7697_v37 = vpop.permute.xlu1 %7696 }
 0xfe5   :  { %8645 = vst.msk [vmem:[%s15326_s23 + $0x2e8] sm:$0xff] %vm184_vm0, %v8331_v29  ;;  %8644 = vst.msk [vmem:[%s15326_s23 + $0x2e0] sm:$0xff] %vm184_vm0, %v8330_v35  ;;  %v7909_v61 = vmul.f32 %v8583_v25, %v7701_v33  ;;  %v7908_v41 = vmul.f32 %v8582_v54, %v7697_v37  ;;  %v7990_v33 = vrot.slane %v7962_v3, %v16375_v50  ;;  %v8542_v37 = vmul.f32 -1.442695, %v7278_v59 }
 0xfe7   :  { %v8333_v13 = vmul.f32 %v8205_v56, %v7909_v61  ;;  %v8332_v12 = vmul.f32 %v8205_v56, %v7908_v41  ;;  %v8562_v56 = vld [vmem:[%s15552_s7 + $0x250] sm:$0xff]  ;;  %8947 = vpow2.f32 %v8542_v37 }
 0xfe8   :  { %v7536_v27 = vpop.permute.xlu0 %7535  ;;  %v7532_v17 = vpop.permute.xlu1 %7531 }
 0xfe9   :  { %8647 = vst.msk [vmem:[%s15326_s23 + $0x2f8] sm:$0xff] %vm184_vm0, %v8333_v13  ;;  %8646 = vst.msk [vmem:[%s15326_s23 + $0x2f0] sm:$0xff] %vm184_vm0, %v8332_v12  ;;  %v7879_v0 = vmul.f32 %v8553_v11, %v7536_v27  ;;  %v7878_v45 = vmul.f32 %v8552_v8, %v7532_v17  ;;  %v14989_v8 = vpop.eup %8945  ;;  %v8165_v13 = vrot.slane %v7990_v33, %v16367_v2 }
 0xfea   :  { %v7992_v17 = vcombine.high %v7976_v48, %v7976_v48  ;;  %v8602_v48 = vld [vmem:[%s15552_s7 + $0x390] sm:$0xff] }
 0xfeb   :  { %v8303_v22 = vmul.f32 %v8145_v44, %v7879_v0  ;;  %v8302_v34 = vmul.f32 %v8145_v44, %v7878_v45  ;;  %v8565_v44 = vld [vmem:[%s15552_s7 + $0x268] sm:$0xff]  ;;  %v8564_v0 = vld [vmem:[%s15552_s7 + $0x260] sm:$0xff] }
 0xfec   :  { %v7547_v42 = vpop.permute.xlu0 %7546  ;;  %v7543_v5 = vpop.permute.xlu1 %7542 }
 0xfed   :  { %8617 = vst.msk [vmem:[%s15326_s23 + $0x208] sm:$0xff] %vm184_vm0, %v8303_v22  ;;  %8616 = vst.msk [vmem:[%s15326_s23 + $0x200] sm:$0xff] %vm184_vm0, %v8302_v34  ;;  %v7881_v24 = vmul.f32 %v8555_v49, %v7547_v42  ;;  %v7880_v55 = vmul.f32 %v8554_v4, %v7543_v5  ;;  %v8100_v22 = vrot.slane %v14989_v8, %v16375_v50 }
 0xfee   :  { %v8169_v34 = vrot.slane %v7992_v17, %v16367_v2  ;;  %v7994_v5 = vcombine.high %v7990_v33, %v7990_v33 }
 0xfef   :  { %v8305_v57 = vmul.f32 %v8149_v60, %v7881_v24  ;;  %v8304_v46 = vmul.f32 %v8149_v60, %v7880_v55  ;;  %v8566_v60 = vld [vmem:[%s15552_s7 + $0x270] sm:$0xff] }
 0xff0   :  { %v7558_v32 = vpop.permute.xlu0 %7557  ;;  %v7554_v38 = vpop.permute.xlu1 %7553  ;;  %v8173_v43 = vrot.slane %v7994_v5, %v16367_v2 }
 0xff1   :  { %8619 = vst.msk [vmem:[%s15326_s23 + $0x218] sm:$0xff] %vm184_vm0, %v8305_v57  ;;  %8618 = vst.msk [vmem:[%s15326_s23 + $0x210] sm:$0xff] %vm184_vm0, %v8304_v46  ;;  %v7883_v19 = vmul.f32 %v8557_v53, %v7558_v32  ;;  %v7882_v6 = vmul.f32 %v8556_v18, %v7554_v38  ;;  %v8116_v18 = vrot.slane %v8100_v22, %v16375_v50  ;;  %v8601_v38 = vld [vmem:[%s15552_s7 + $0x388] sm:$0xff] }
 0xff2   :  { %v8108_v32 = vcombine.high %v8100_v22, %v8100_v22  ;;  %v8608_v22 = vld [vmem:[%s15552_s7 + $0x3c0] sm:$0xff] }
 0xff3   :  { %v8307_v40 = vmul.f32 %v8153_v47, %v7883_v19  ;;  %v8306_v1 = vmul.f32 %v8153_v47, %v7882_v6  ;;  %v8948_v6 = vpop.eup %8947 }
 0xff4   :  { %v7569_v15 = vpop.permute.xlu0 %7568  ;;  %v7565_v36 = vpop.permute.xlu1 %7564 }
 0xff5   :  { %8621 = vst.msk [vmem:[%s15326_s23 + $0x228] sm:$0xff] %vm184_vm0, %v8307_v40  ;;  %8620 = vst.msk [vmem:[%s15326_s23 + $0x220] sm:$0xff] %vm184_vm0, %v8306_v1  ;;  %v7885_v21 = vmul.f32 %v8559_v14, %v7569_v15  ;;  %v7884_v10 = vmul.f32 %v8558_v30, %v7565_v36  ;;  %v8241_v30 = vrot.slane %v8116_v18, %v16367_v2  ;;  %v8603_v36 = vld [vmem:[%s15552_s7 + $0x398] sm:$0xff] }
 0xff6   :  { %v8130_v15 = vrot.slane %v8108_v32, %v16375_v50 }
 0xff7   :  { %v8309_v63 = vmul.f32 %v8157_v28, %v7885_v21  ;;  %v8308_v25 = vmul.f32 %v8157_v28, %v7884_v10  ;;  %v7300_v28 = vadd.f32 1.0, %v8948_v6 }
 0xff8   :  { %v7580_v54 = vpop.permute.xlu0 %7579  ;;  %v7576_v29 = vpop.permute.xlu1 %7575 }
 0xff9   :  { %8623 = vst.msk [vmem:[%s15326_s23 + $0x238] sm:$0xff] %vm184_vm0, %v8309_v63  ;;  %8622 = vst.msk [vmem:[%s15326_s23 + $0x230] sm:$0xff] %vm184_vm0, %v8308_v25  ;;  %v7887_v7 = vmul.f32 %v8561_v52, %v7580_v54  ;;  %v7886_v35 = vmul.f32 %v8560_v20, %v7576_v29  ;;  %v8093_v52 = vcombine.high %v14989_v8, %v14989_v8  ;;  %v8605_v29 = vld [vmem:[%s15552_s7 + $0x3a8] sm:$0xff]  ;;  %8949 = vrcp.f32 %v7300_v28  ;;  %v8606_v8 = vld [vmem:[%s15552_s7 + $0x3b0] sm:$0xff] }
 0xffa   :  { %v8245_v20 = vrot.slane %v8130_v15, %v16367_v2  ;;  %v8138_v54 = vcombine.high %v8116_v18, %v8116_v18  ;;  %v8610_v18 = vld [vmem:[%s15552_s7 + $0x3d0] sm:$0xff] }
 0xffb   :  { %v8311_v61 = vmul.f32 %v8161_v26, %v7887_v7  ;;  %v8310_v41 = vmul.f32 %v8161_v26, %v7886_v35  ;;  %v8604_v26 = vld [vmem:[%s15552_s7 + $0x3a0] sm:$0xff] }
 0xffc   :  { %v7591_v39 = vpop.permute.xlu0 %7590  ;;  %v7587_v11 = vpop.permute.xlu1 %7586 }
 0xffd   :  { %8625 = vst.msk [vmem:[%s15326_s23 + $0x248] sm:$0xff] %vm184_vm0, %v8311_v61  ;;  %8624 = vst.msk [vmem:[%s15326_s23 + $0x240] sm:$0xff] %vm184_vm0, %v8310_v41  ;;  %v7889_v12 = vmul.f32 %v8563_v9, %v7591_v39  ;;  %v7888_v27 = vmul.f32 %v8562_v56, %v7587_v11  ;;  %v8107_v9 = vrot.slane %v8093_v52, %v16375_v50  ;;  %v8607_v11 = vld [vmem:[%s15552_s7 + $0x3b8] sm:$0xff] }
 0xffe   :  { %v8249_v56 = vrot.slane %v8138_v54, %v16367_v2  ;;  %v8140_v39 = vcombine.high %v8130_v15, %v8130_v15 }
 0xfff   :  { %v8313_v45 = vmul.f32 %v8165_v13, %v7889_v12  ;;  %v8312_v51 = vmul.f32 %v8165_v13, %v7888_v27 }
0x1000   :  { %v7602_v49 = vpop.permute.xlu0 %7601  ;;  %v7598_v4 = vpop.permute.xlu1 %7597 }
0x1001   :  { %8627 = vst.msk [vmem:[%s15326_s23 + $0x258] sm:$0xff] %vm184_vm0, %v8313_v45  ;;  %8626 = vst.msk [vmem:[%s15326_s23 + $0x250] sm:$0xff] %vm184_vm0, %v8312_v51  ;;  %v7891_v23 = vmul.f32 %v8565_v44, %v7602_v49  ;;  %v7890_v42 = vmul.f32 %v8564_v0, %v7598_v4  ;;  %v8123_v44 = vrot.slane %v8107_v9, %v16375_v50  ;;  %v8609_v4 = vld [vmem:[%s15552_s7 + $0x3c8] sm:$0xff] }
0x1002   :  { %v8253_v0 = vrot.slane %v8140_v39, %v16367_v2  ;;  %v8109_v49 = vcombine.high %v8107_v9, %v8107_v9 }
0x1003   :  { %v8315_v24 = vmul.f32 %v8169_v34, %v7891_v23  ;;  %v8314_v55 = vmul.f32 %v8169_v34, %v7890_v42  ;;  %v8139_v6 = vcombine.high %v8123_v44, %v8123_v44 }
0x1004   :  { %v7613_v62 = vpop.permute.xlu0 %7612  ;;  %v7609_v53 = vpop.permute.xlu1 %7608 }
0x1005   :  { %8629 = vst.msk [vmem:[%s15326_s23 + $0x268] sm:$0xff] %vm184_vm0, %v8315_v24  ;;  %8628 = vst.msk [vmem:[%s15326_s23 + $0x260] sm:$0xff] %vm184_vm0, %v8314_v55  ;;  %v7893_v57 = vmul.f32 %v8567_v16, %v7613_v62  ;;  %v7892_v46 = vmul.f32 %v8566_v60, %v7609_v53  ;;  %v15104_v16 = vpop.eup %8949  ;;  %v8257_v60 = vrot.slane %v8123_v44, %v16367_v2  ;;  %v8611_v53 = vld [vmem:[%s15552_s7 + $0x3d8] sm:$0xff] }
0x1006   :  { %v15116_v62 = vrot.slane %v8109_v49, %v16375_v50 }
0x1007   :  { %v8317_v47 = vmul.f32 %v8173_v43, %v7893_v57  ;;  %v8316_v19 = vmul.f32 %v8173_v43, %v7892_v46 }
0x1008   :  { %v7800_v58 = vpop.permute.xlu0 %7799  ;;  %v7796_v14 = vpop.permute.xlu1 %7795 }
0x1009   :  { %8631 = vst.msk [vmem:[%s15326_s23 + $0x278] sm:$0xff] %vm184_vm0, %v8317_v47  ;;  %8630 = vst.msk [vmem:[%s15326_s23 + $0x270] sm:$0xff] %vm184_vm0, %v8316_v19  ;;  %v7927_v40 = vmul.f32 %v8601_v38, %v7800_v58  ;;  %v7926_v1 = vmul.f32 %v8600_v31, %v7796_v14  ;;  %v8051_v38 = vrot.slane %v15104_v16, %v16375_v50  ;;  %v8613_v58 = vld [vmem:[%s15552_s7 + $0x3e8] sm:$0xff]  ;;  %v8612_v14 = vld [vmem:[%s15552_s7 + $0x3e0] sm:$0xff] }
0x100a   :  { %v8261_v31 = vrot.slane %v15116_v62, %v16367_v2 }
0x100b   :  { %v8351_v21 = vmul.f32 %v8241_v30, %v7927_v40  ;;  %v8350_v10 = vmul.f32 %v8241_v30, %v7926_v1 }
0x100c   :  { %v7811_v3 = vpop.permute.xlu0 %7810  ;;  %v7807_v59 = vpop.permute.xlu1 %7806 }
0x100d   :  { %8665 = vst.msk [vmem:[%s15326_s23 + $0x388] sm:$0xff] %vm184_vm0, %v8351_v21  ;;  %8664 = vst.msk [vmem:[%s15326_s23 + $0x380] sm:$0xff] %vm184_vm0, %v8350_v10  ;;  %v7929_v63 = vmul.f32 %v8603_v36, %v7811_v3  ;;  %v7928_v25 = vmul.f32 %v8602_v48, %v7807_v59  ;;  %v8067_v36 = vrot.slane %v8051_v38, %v16375_v50  ;;  %v8585_v3 = vld [vmem:[%s15552_s7 + $0x308] sm:$0xff]  ;;  %v8584_v59 = vld [vmem:[%s15552_s7 + $0x300] sm:$0xff] }
0x100e   :  { %v8265_v48 = vrot.slane %v8139_v6, %v16367_v2  ;;  %v8059_v10 = vcombine.high %v8051_v38, %v8051_v38 }
0x100f   :  { %v8353_v7 = vmul.f32 %v8245_v20, %v7929_v63  ;;  %v8352_v35 = vmul.f32 %v8245_v20, %v7928_v25  ;;  %v8209_v54 = vrot.slane %v8067_v36, %v16367_v2 }
0x1010   :  { %v7822_v33 = vpop.permute.xlu0 %7821  ;;  %v7818_v37 = vpop.permute.xlu1 %7817 }
0x1011   :  { %8667 = vst.msk [vmem:[%s15326_s23 + $0x398] sm:$0xff] %vm184_vm0, %v8353_v7  ;;  %8666 = vst.msk [vmem:[%s15326_s23 + $0x390] sm:$0xff] %vm184_vm0, %v8352_v35  ;;  %v7931_v61 = vmul.f32 %v8605_v29, %v7822_v33  ;;  %v7930_v41 = vmul.f32 %v8604_v26, %v7818_v37  ;;  %v8081_v7 = vrot.slane %v8059_v10, %v16375_v50  ;;  %v8587_v35 = vld [vmem:[%s15552_s7 + $0x318] sm:$0xff]  ;;  %v8586_v33 = vld [vmem:[%s15552_s7 + $0x310] sm:$0xff] }
0x1013   :  { %v8355_v13 = vmul.f32 %v8249_v56, %v7931_v61  ;;  %v8354_v12 = vmul.f32 %v8249_v56, %v7930_v41  ;;  %v8044_v41 = vcombine.high %v15104_v16, %v15104_v16  ;;  %v8213_v39 = vrot.slane %v8081_v7, %v16367_v2 }
0x1014   :  { %v7833_v27 = vpop.permute.xlu0 %7832  ;;  %v7829_v17 = vpop.permute.xlu1 %7828 }
0x1015   :  { %8669 = vst.msk [vmem:[%s15326_s23 + $0x3a8] sm:$0xff] %vm184_vm0, %v8355_v13  ;;  %8668 = vst.msk [vmem:[%s15326_s23 + $0x3a0] sm:$0xff] %vm184_vm0, %v8354_v12  ;;  %v7933_v45 = vmul.f32 %v8607_v11, %v7833_v27  ;;  %v7932_v51 = vmul.f32 %v8606_v8, %v7829_v17  ;;  %v8089_v13 = vcombine.high %v8067_v36, %v8067_v36  ;;  %v8589_v12 = vld [vmem:[%s15552_s7 + $0x328] sm:$0xff]  ;;  %v8588_v27 = vld [vmem:[%s15552_s7 + $0x320] sm:$0xff] }
0x1017   :  { %v8357_v34 = vmul.f32 %v8253_v0, %v7933_v45  ;;  %v8356_v23 = vmul.f32 %v8253_v0, %v7932_v51  ;;  %v8058_v51 = vrot.slane %v8044_v41, %v16375_v50  ;;  %v8217_v49 = vrot.slane %v8089_v13, %v16367_v2 }
0x1018   :  { %v7844_v42 = vpop.permute.xlu0 %7843  ;;  %v7840_v5 = vpop.permute.xlu1 %7839  ;;  %v8141_v13 = vcombine.high %v15116_v62, %v15116_v62 }
0x1019   :  { %8671 = vst.msk [vmem:[%s15326_s23 + $0x3b8] sm:$0xff] %vm184_vm0, %v8357_v34  ;;  %8670 = vst.msk [vmem:[%s15326_s23 + $0x3b0] sm:$0xff] %vm184_vm0, %v8356_v23  ;;  %v7935_v24 = vmul.f32 %v8609_v4, %v7844_v42  ;;  %v7934_v55 = vmul.f32 %v8608_v22, %v7840_v5  ;;  %v8091_v34 = vcombine.high %v8081_v7, %v8081_v7  ;;  %v8591_v23 = vld [vmem:[%s15552_s7 + $0x338] sm:$0xff]  ;;  %v8590_v42 = vld [vmem:[%s15552_s7 + $0x330] sm:$0xff] }
0x101a   :  { %v8269_v62 = vrot.slane %v8141_v13, %v16367_v2 }
0x101b   :  { %v8359_v43 = vmul.f32 %v8257_v60, %v7935_v24  ;;  %v8358_v57 = vmul.f32 %v8257_v60, %v7934_v55  ;;  %v8074_v55 = vrot.slane %v8058_v51, %v16375_v50 }
0x101c   :  { %v7855_v46 = vpop.permute.xlu0 %7854  ;;  %v7851_v32 = vpop.permute.xlu1 %7850 }
0x101d   :  { %8673 = vst.msk [vmem:[%s15326_s23 + $0x3c8] sm:$0xff] %vm184_vm0, %v8359_v43  ;;  %8672 = vst.msk [vmem:[%s15326_s23 + $0x3c0] sm:$0xff] %vm184_vm0, %v8358_v57  ;;  %v7937_v47 = vmul.f32 %v8611_v53, %v7855_v46  ;;  %v7936_v19 = vmul.f32 %v8610_v18, %v7851_v32  ;;  %v8221_v53 = vrot.slane %v8091_v34, %v16367_v2  ;;  %v8593_v46 = vld [vmem:[%s15552_s7 + $0x348] sm:$0xff]  ;;  %v8592_v32 = vld [vmem:[%s15552_s7 + $0x340] sm:$0xff] }
0x101e   :  { %v8060_v57 = vcombine.high %v8058_v51, %v8058_v51  ;;  %v8225_v6 = vrot.slane %v8074_v55, %v16367_v2 }
0x101f   :  { %v8361_v30 = vmul.f32 %v8261_v31, %v7937_v47  ;;  %v8360_v40 = vmul.f32 %v8261_v31, %v7936_v19 }
0x1020   :  { %v7866_v1 = vpop.permute.xlu0 %7865  ;;  %v7862_v15 = vpop.permute.xlu1 %7861 }
0x1021   :  { %8675 = vst.msk [vmem:[%s15326_s23 + $0x3d8] sm:$0xff] %vm184_vm0, %v8361_v30  ;;  %8674 = vst.msk [vmem:[%s15326_s23 + $0x3d0] sm:$0xff] %vm184_vm0, %v8360_v40  ;;  %v7939_v28 = vmul.f32 %v8613_v58, %v7866_v1  ;;  %v7938_v21 = vmul.f32 %v8612_v14, %v7862_v15  ;;  %v8088_v30 = vrot.slane %v8060_v57, %v16375_v50  ;;  %v8595_v40 = vld [vmem:[%s15552_s7 + $0x358] sm:$0xff]  ;;  %v8594_v1 = vld [vmem:[%s15552_s7 + $0x350] sm:$0xff] }
0x1023   :  { %v8363_v52 = vmul.f32 %v8265_v48, %v7939_v28  ;;  %v8362_v20 = vmul.f32 %v8265_v48, %v7938_v21  ;;  %v8229_v50 = vrot.slane %v8088_v30, %v16367_v2 }
0x1024   :  { %v7712_v63 = vpop.permute.xlu0 %7711  ;;  %v7708_v25 = vpop.permute.xlu1 %7707 }
0x1025   :  { %8677 = vst.msk [vmem:[%s15326_s23 + $0x3e8] sm:$0xff] %vm184_vm0, %v8363_v52  ;;  %8676 = vst.msk [vmem:[%s15326_s23 + $0x3e0] sm:$0xff] %vm184_vm0, %v8362_v20  ;;  %v7911_v29 = vmul.f32 %v8585_v3, %v7712_v63  ;;  %v7910_v26 = vmul.f32 %v8584_v59, %v7708_v25  ;;  %v8090_v3 = vcombine.high %v8074_v55, %v8074_v55  ;;  %v8597_v59 = vld [vmem:[%s15552_s7 + $0x368] sm:$0xff]  ;;  %v8596_v52 = vld [vmem:[%s15552_s7 + $0x360] sm:$0xff] }
0x1027   :  { %v8335_v37 = vmul.f32 %v8209_v54, %v7911_v29  ;;  %v8334_v9 = vmul.f32 %v8209_v54, %v7910_v26  ;;  %v8233_v29 = vrot.slane %v8090_v3, %v16367_v2 }
0x1028   :  { %v7723_v56 = vpop.permute.xlu0 %7722  ;;  %v7719_v61 = vpop.permute.xlu1 %7718 }
0x1029   :  { %8649 = vst.msk [vmem:[%s15326_s23 + $0x308] sm:$0xff] %vm184_vm0, %v8335_v37  ;;  %8648 = vst.msk [vmem:[%s15326_s23 + $0x300] sm:$0xff] %vm184_vm0, %v8334_v9  ;;  %v7913_v11 = vmul.f32 %v8587_v35, %v7723_v56  ;;  %v7912_v8 = vmul.f32 %v8586_v33, %v7719_v61  ;;  %v8092_v35 = vcombine.high %v8088_v30, %v8088_v30  ;;  %v8599_v33 = vld [vmem:[%s15552_s7 + $0x378] sm:$0xff]  ;;  %v8598_v37 = vld [vmem:[%s15552_s7 + $0x370] sm:$0xff] }
0x102b   :  { %v8337_v17 = vmul.f32 %v8213_v39, %v7913_v11  ;;  %v8336_v44 = vmul.f32 %v8213_v39, %v7912_v8  ;;  %v8237_v39 = vrot.slane %v8092_v35, %v16367_v2 }
0x102c   :  { %v7734_v0 = vpop.permute.xlu0 %7733  ;;  %v7730_v45 = vpop.permute.xlu1 %7729 }
0x102d   :  { %8651 = vst.msk [vmem:[%s15326_s23 + $0x318] sm:$0xff] %vm184_vm0, %v8337_v17  ;;  %8650 = vst.msk [vmem:[%s15326_s23 + $0x310] sm:$0xff] %vm184_vm0, %v8336_v44  ;;  %v7915_v4 = vmul.f32 %v8589_v12, %v7734_v0  ;;  %v7914_v22 = vmul.f32 %v8588_v27, %v7730_v45  ;;  %v8615_v12 = vld [vmem:[%s15552_s7 + $0x3f8] sm:$0xff]  ;;  %v8614_v27 = vld [vmem:[%s15552_s7 + $0x3f0] sm:$0xff] }
0x102f   :  { %v8339_v5 = vmul.f32 %v8217_v49, %v7915_v4  ;;  %v8338_v16 = vmul.f32 %v8217_v49, %v7914_v22 }
0x1030   :  { %v7745_v60 = vpop.permute.xlu0 %7744  ;;  %v7741_v24 = vpop.permute.xlu1 %7740 }
0x1031   :  { %8653 = vst.msk [vmem:[%s15326_s23 + $0x328] sm:$0xff] %vm184_vm0, %v8339_v5  ;;  %8652 = vst.msk [vmem:[%s15326_s23 + $0x320] sm:$0xff] %vm184_vm0, %v8338_v16  ;;  %v7917_v18 = vmul.f32 %v8591_v23, %v7745_v60  ;;  %v7916_v43 = vmul.f32 %v8590_v42, %v7741_v24 }
0x1033   :  { %v8341_v38 = vmul.f32 %v8221_v53, %v7917_v18  ;;  %v8340_v31 = vmul.f32 %v8221_v53, %v7916_v43 }
0x1034   :  { %v7756_v47 = vpop.permute.xlu0 %7755  ;;  %v7752_v19 = vpop.permute.xlu1 %7751 }
0x1035   :  { %8655 = vst.msk [vmem:[%s15326_s23 + $0x338] sm:$0xff] %vm184_vm0, %v8341_v38  ;;  %8654 = vst.msk [vmem:[%s15326_s23 + $0x330] sm:$0xff] %vm184_vm0, %v8340_v31  ;;  %v7919_v58 = vmul.f32 %v8593_v46, %v7756_v47  ;;  %v7918_v14 = vmul.f32 %v8592_v32, %v7752_v19 }
0x1037   :  { %v8343_v15 = vmul.f32 %v8225_v6, %v7919_v58  ;;  %v8342_v36 = vmul.f32 %v8225_v6, %v7918_v14 }
0x1038   :  { %v7767_v48 = vpop.permute.xlu0 %7766  ;;  %v7763_v28 = vpop.permute.xlu1 %7762 }
0x1039   :  { %8657 = vst.msk [vmem:[%s15326_s23 + $0x348] sm:$0xff] %vm184_vm0, %v8343_v15  ;;  %8656 = vst.msk [vmem:[%s15326_s23 + $0x340] sm:$0xff] %vm184_vm0, %v8342_v36  ;;  %v7921_v21 = vmul.f32 %v8595_v40, %v7767_v48  ;;  %v7920_v10 = vmul.f32 %v8594_v1, %v7763_v28 }
0x103b   :  { %v8345_v20 = vmul.f32 %v8229_v50, %v7921_v21  ;;  %v8344_v63 = vmul.f32 %v8229_v50, %v7920_v10 }
0x103c   :  { %v7778_v25 = vpop.permute.xlu0 %7777  ;;  %v7774_v54 = vpop.permute.xlu1 %7773 }
0x103d   :  { %8659 = vst.msk [vmem:[%s15326_s23 + $0x358] sm:$0xff] %vm184_vm0, %v8345_v20  ;;  %8658 = vst.msk [vmem:[%s15326_s23 + $0x350] sm:$0xff] %vm184_vm0, %v8344_v63  ;;  %v7923_v26 = vmul.f32 %v8597_v59, %v7778_v25  ;;  %v7922_v7 = vmul.f32 %v8596_v52, %v7774_v54 }
0x103f   :  { %v8347_v9 = vmul.f32 %v8233_v29, %v7923_v26  ;;  %v8346_v56 = vmul.f32 %v8233_v29, %v7922_v7 }
0x1040   :  { %v7789_v61 = vpop.permute.xlu0 %7788  ;;  %v7785_v41 = vpop.permute.xlu1 %7784 }
0x1041   :  { %8661 = vst.msk [vmem:[%s15326_s23 + $0x368] sm:$0xff] %vm184_vm0, %v8347_v9  ;;  %8660 = vst.msk [vmem:[%s15326_s23 + $0x360] sm:$0xff] %vm184_vm0, %v8346_v56  ;;  %v7925_v11 = vmul.f32 %v8599_v33, %v7789_v61  ;;  %v7924_v8 = vmul.f32 %v8598_v37, %v7785_v41 }
0x1043   :  { %v8349_v17 = vmul.f32 %v8237_v39, %v7925_v11  ;;  %v8348_v44 = vmul.f32 %v8237_v39, %v7924_v8 }
0x1044   :  { %v7877_v0 = vpop.permute.xlu0 %7876  ;;  %v7873_v45 = vpop.permute.xlu1 %7872 }
0x1045   :  { %8663 = vst.msk [vmem:[%s15326_s23 + $0x378] sm:$0xff] %vm184_vm0, %v8349_v17  ;;  %8662 = vst.msk [vmem:[%s15326_s23 + $0x370] sm:$0xff] %vm184_vm0, %v8348_v44  ;;  %v7941_v51 = vmul.f32 %v8615_v12, %v7877_v0  ;;  %v7940_v49 = vmul.f32 %v8614_v27, %v7873_v45 }
0x1047   :  { %v8365_v4 = vmul.f32 %v8269_v62, %v7941_v51  ;;  %v8364_v22 = vmul.f32 %v8269_v62, %v7940_v49 }
0x1049   :  { %8679 = vst.msk [vmem:[%s15326_s23 + $0x3f8] sm:$0xff] %vm184_vm0, %v8365_v4  ;;  %8678 = vst.msk [vmem:[%s15326_s23 + $0x3f0] sm:$0xff] %vm184_vm0, %v8364_v22 }
0x104a   :  { %8435 = vsyncpa [#allocation4], 1 }
0x104b   :  { %8436 = vsyncpa [#allocation6], 1 }

</bundles_post_ra>
